<compile_context>
chip_gen: v7x
topology: tpu7x:2x2x1
jax: 0.10.0
libtpu: 0.0.40
codegen_flags: <defaults>
</compile_context>

<pallas_src>
import functools

import numpy as np
import jax
import jax.numpy as jnp
from jax.experimental import pallas as pl
from jax.experimental.pallas import tpu as pltpu

HID_CH = 32
KSIZE = 4
HIDDEN = 256
STRIDE = 2
PAD = 1
BATCH_BLOCK = 8          # batch elements per grid step; must be a multiple of 8 (sublanes)


# ------------------------ host-side weight preparation ----------------------
def _build_phase_mats(wt, b, w_in):
    """Banded matrices for ConvTranspose2d(k=4, s=2, p=1), one per output-row parity.

    wt: (Cin, Cout, 4, 4)  PyTorch ConvTranspose2d layout.   Returns
    (B0, B1, bias_row) with B_ry of shape (2*w_in*Cin, 2*w_in*Cout):
       rows [0 : w_in*Cin]      multiply padded input row (my + ry)      (kh = 3 - ry)
       rows [w_in*Cin : 2*...]  multiply padded input row (my + ry + 1)  (kh = 1 - ry)
    and output column ox*Cout+co gets kernel tap kw = ox + 1 - 2*ix (W-boundary folded in).
    """
    wt = np.asarray(wt, np.float32)
    b = np.asarray(b, np.float32)
    cin, cout, K, _ = wt.shape
    w_out = 2 * w_in
    mats = []
    for ry in (0, 1):
        M = np.zeros((2 * w_in * cin, w_out * cout), np.float32)
        for dy in (0, 1):
            kh = 3 - 2 * dy - ry
            for ix in range(w_in):
                for ox in range(w_out):
                    kw = ox + 1 - 2 * ix
                    if 0 <= kw < K:
                        r0 = (dy * w_in + ix) * cin
                        c0 = ox * cout
                        M[r0:r0 + cin, c0:c0 + cout] = wt[:, :, kh, kw]
        mats.append(M)
    bias_row = np.tile(b, w_out)[None, :].astype(np.float32)
    return mats[0], mats[1], bias_row


def prepare_params(params, img_size):
    """One-time preprocessing: permute lin3 to NHWC order, build banded conv matrices."""
    use64 = img_size[1] == img_size[2] == 64

    # lin3 column permutation: old (NCHW-flat) index -> new (NHWC-flat) index.
    reshape_dim = HID_CH * KSIZE * KSIZE
    new = np.arange(reshape_dim)
    hh = new // (KSIZE * HID_CH)
    ww = (new // HID_CH) % KSIZE
    cc = new % HID_CH
    old = cc * (KSIZE * KSIZE) + hh * KSIZE + ww
    w3p = params["w3"][:, old]
    b3p = params["b3"][old][None, :]

    layer_names = []
    if use64:
        layer_names.append(("wt64", "bt64"))
    layer_names += [("wt1", "bt1"), ("wt2", "bt2"), ("wt3", "bt3")]

    cfgs = []
    conv_arrays = []
    h_in, w_in = KSIZE, KSIZE
    for li, (wn, bn) in enumerate(layer_names):
        wt = params[wn]
        bb = params[bn]
        cin, cout = wt.shape[0], wt.shape[1]
        B0, B1, brow = _build_phase_mats(wt, bb, w_in)
        conv_arrays += [jnp.asarray(B0), jnp.asarray(B1), jnp.asarray(brow)]
        act = "sigmoid" if li == len(layer_names) - 1 else "relu"
        cfgs.append((h_in, w_in, cin, cout, act))
        h_in, w_in = 2 * h_in, 2 * w_in

    weights = (params["w1"], params["b1"][None, :],
               params["w2"], params["b2"][None, :],
               w3p, b3p) + tuple(conv_arrays)
    return tuple(cfgs), weights


# ------------------------------ fused kernel --------------------------------
def _make_kernel(cfgs, bb):
    n_layers = len(cfgs)

    def kernel(*refs):
        wz_ref, w1_ref, b1_ref, w2_ref, b2_ref, w3_ref, b3_ref = refs[:7]
        conv_refs = refs[7:7 + 3 * n_layers]
        o_ref = refs[7 + 3 * n_layers]
        act_refs = refs[8 + 3 * n_layers:]

        # ---- zero the two pad rows of every activation scratch (full-tile stores) ----
        for li in range(n_layers):
            H_in, W_in, Cin = cfgs[li][0], cfgs[li][1], cfgs[li][2]
            zrow = jnp.zeros((bb, W_in * Cin), jnp.float32)
            act_refs[li][0, :, :] = zrow
            act_refs[li][H_in + 1, :, :] = zrow

        # ---- fused MLP (lin1/lin2/lin3 + ReLU), M = bb ----
        wz = wz_ref[...]                                                 # (bb, Din)
        h = jnp.dot(wz, w1_ref[...], preferred_element_type=jnp.float32) + b1_ref[...]
        h = jnp.maximum(h, 0.0)
        h = jnp.dot(h, w2_ref[...], preferred_element_type=jnp.float32) + b2_ref[...]
        h = jnp.maximum(h, 0.0)
        h = jnp.dot(h, w3_ref[...], preferred_element_type=jnp.float32) + b3_ref[...]
        h = jnp.maximum(h, 0.0)                                          # (bb, H0*W0*C0) NHWC-flat

        # ---- scatter MLP output into first activation scratch (rows 1..H0) ----
        H0, W0, C0 = cfgs[0][0], cfgs[0][1], cfgs[0][2]
        WC0 = W0 * C0
        a0 = act_refs[0]
        for r in range(H0):                                              # H0 full-tile stores
            a0[r + 1, :, :] = h[:, r * WC0:(r + 1) * WC0]

        # ---- conv-transpose layers: parity-decomposed banded matmuls, M = H_in*bb ----
        for li in range(n_layers):
            H_in, W_in, Cin, Cout, act = cfgs[li]
            WC = W_in * Cin
            Nout = 2 * W_in * Cout                                       # = W_out * Cout
            m0_ref, m1_ref, brow_ref = conv_refs[3 * li:3 * li + 3]
            a_in = act_refs[li]
            last = li == n_layers - 1

            for ry in (0, 1):
                wmat = m0_ref if ry == 0 else m1_ref
                x_top = a_in[ry:ry + H_in, :, :].reshape(H_in * bb, WC)
                x_bot = a_in[ry + 1:ry + 1 + H_in, :, :].reshape(H_in * bb, WC)
                acc = jnp.dot(x_top, wmat[0:WC, :],
                              preferred_element_type=jnp.float32)
                acc = acc + jnp.dot(x_bot, wmat[WC:2 * WC, :],
                                    preferred_element_type=jnp.float32)
                acc = acc + brow_ref[...]
                if act == "relu":
                    acc = jnp.maximum(acc, 0.0)
                else:
                    acc = jax.nn.sigmoid(acc)

                acc3 = acc.reshape(H_in, bb, Nout)                       # rows = (my, batch)
                if last:
                    # parity-blocked output slab: rows [ry*H_in : (ry+1)*H_in]
                    o_ref[0, ry * H_in:(ry + 1) * H_in, :, :] = acc3
                else:
                    # interleave rows into the next activation — one full-tile store per row
                    a_out = act_refs[li + 1]
                    for my in range(H_in):
                        a_out[2 * my + ry + 1, :, :] = acc3[my]

    return kernel


def _pallas_decoder(wz, weights, cfgs, bb):
    Bpad, Din = wz.shape
    nblocks = Bpad // bb
    H_last, W_last, _, Cout_last, _ = cfgs[-1]
    N_last = 2 * W_last * Cout_last
    kernel = _make_kernel(cfgs, bb)

    in_specs = [pl.BlockSpec((bb, Din), lambda i: (i, 0))]
    in_specs += [pl.BlockSpec(tuple(a.shape), lambda i: (0, 0)) for a in weights]
    out_spec = pl.BlockSpec((1, 2 * H_last, bb, N_last), lambda i: (i, 0, 0, 0))
    scratch = [pltpu.VMEM((c[0] + 2, bb, c[1] * c[2]), jnp.float32) for c in cfgs]

    return pl.pallas_call(
        kernel,
        out_shape=jax.ShapeDtypeStruct((nblocks, 2 * H_last, bb, N_last), jnp.float32),
        grid=(nblocks,),
        in_specs=in_specs,
        out_specs=out_spec,
        scratch_shapes=scratch,
        compiler_params=pltpu.CompilerParams(
            dimension_semantics=("parallel",),
            vmem_limit_bytes=64 * 1024 * 1024),
    )(wz, *weights)


@functools.partial(jax.jit, static_argnames=("cfgs", "img_size", "block_b"))
def decoder_csvaex_forward(z, w, weights, cfgs, img_size, block_b=BATCH_BLOCK):
    """forward(z, w) of DecoderCsvaeX; returns NCHW images."""
    assert block_b % 8 == 0
    n_chan, H_img, W_img = img_size
    B = z.shape[0]
    wz = jnp.concatenate([w, z], axis=-1)                   # torch.cat([w, z], dim=-1)
    Bpad = ((B + block_b - 1) // block_b) * block_b
    if Bpad != B:
        wz = jnp.pad(wz, ((0, Bpad - B), (0, 0)))
    out = _pallas_decoder(wz, weights, cfgs, block_b)       # (nb, 2*Hh, bb, W_img*n_chan)
    nb = Bpad // block_b
    Hh = H_img // 2
    # de-interleave parities / pull batch out of the sublane dim (tiny XLA relayout)
    y = out.reshape(nb, 2, Hh, block_b, W_img, n_chan)      # (blk, ry, my, b, ox, c)
    y = y.transpose(0, 3, 5, 2, 1, 4).reshape(Bpad, n_chan, H_img, W_img)
    return y[:B]


# --------------------------- pure-JAX reference ------------------------------
def _convt_ref(x_nchw, wt, b, act):
    K = wt.shape[2]
    w_oihw = jnp.flip(wt, axis=(2, 3)).transpose(1, 0, 2, 3)
    y = jax.lax.conv_general_dilated(
        x_nchw, w_oihw, window_strides=(1, 1),
        padding=[(K - 1 - PAD, K - 1 - PAD)] * 2,
        lhs_dilation=(STRIDE, STRIDE),
        dimension_numbers=("NCHW", "OIHW", "NCHW"))
    y = y + b.reshape(1, -1, 1, 1)
    return jax.nn.relu(y) if act == "relu" else jax.nn.sigmoid(y)


def decoder_csvaex_ref(z, w, params, img_size):
    wz = jnp.concatenate([w, z], axis=-1)
    x = jax.nn.relu(wz @ params["w1"] + params["b1"])
    x = jax.nn.relu(x @ params["w2"] + params["b2"])
    x = jax.nn.relu(x @ params["w3"] + params["b3"])
    x = x.reshape(z.shape[0], HID_CH, KSIZE, KSIZE)
    if img_size[1] == img_size[2] == 64:
        x = _convt_ref(x, params["wt64"], params["bt64"], "relu")
    x = _convt_ref(x, params["wt1"], params["bt1"], "relu")
    x = _convt_ref(x, params["wt2"], params["bt2"], "relu")
    x = _convt_ref(x, params["wt3"], params["bt3"], "sigmoid")
    return x


# ----------------------------------- main ------------------------------------
def make_params(key, img_size, latent_dim):
    n_chan = img_size[0]
    reshape_dim = HID_CH * KSIZE * KSIZE
    ks = jax.random.split(key, 16)
    p = {
        "w1": jax.random.normal(ks[0], (latent_dim, HIDDEN), jnp.float32) * 0.1,
        "b1": jax.random.normal(ks[1], (HIDDEN,), jnp.float32) * 0.01,
        "w2": jax.random.normal(ks[2], (HIDDEN, HIDDEN), jnp.float32) * 0.1,
        "b2": jax.random.normal(ks[3], (HIDDEN,), jnp.float32) * 0.01,
        "w3": jax.random.normal(ks[4], (HIDDEN, reshape_dim), jnp.float32) * 0.1,
        "b3": jax.random.normal(ks[5], (reshape_dim,), jnp.float32) * 0.01,
        # ConvTranspose2d weights in PyTorch layout: (Cin, Cout, K, K)
        "wt1": jax.random.normal(ks[6], (HID_CH, HID_CH, KSIZE, KSIZE), jnp.float32) * 0.05,
        "bt1": jax.random.normal(ks[7], (HID_CH,), jnp.float32) * 0.01,
        "wt2": jax.random.normal(ks[8], (HID_CH, HID_CH, KSIZE, KSIZE), jnp.float32) * 0.05,
        "bt2": jax.random.normal(ks[9], (HID_CH,), jnp.float32) * 0.01,
        "wt3": jax.random.normal(ks[10], (HID_CH, n_chan, KSIZE, KSIZE), jnp.float32) * 0.05,
        "bt3": jax.random.normal(ks[11], (n_chan,), jnp.float32) * 0.01,
    }
    if img_size[1] == img_size[2] == 64:
        p["wt64"] = jax.random.normal(ks[12], (HID_CH, HID_CH, KSIZE, KSIZE), jnp.float32) * 0.05
        p["bt64"] = jax.random.normal(ks[13], (HID_CH,), jnp.float32) * 0.01
    return p


if __name__ == "__main__":
    img_size = (1, 32, 32)      # 32x32 -> the convT_64 branch is skipped, as in torch
    latent_dim_z = 10
    num_prop = 2
    batch = 2

    key = jax.random.PRNGKey(0)
    kz, kw, kp = jax.random.split(key, 3)
    z = jax.random.normal(kz, (batch, latent_dim_z), jnp.float32)
    w = jax.random.normal(kw, (batch, num_prop), jnp.float32)
    params = make_params(kp, img_size, latent_dim_z + num_prop)

    cfgs, weights = prepare_params(params, img_size)     # one-time weight prep (hoisted)

    out = decoder_csvaex_forward(z, w, weights, cfgs=cfgs, img_size=img_size)
    out = jax.block_until_ready(out)
    assert out.shape == (batch, img_size[0], img_size[1], img_size[2]), out.shape

    ref = jax.block_until_ready(decoder_csvaex_ref(z, w, params, img_size))
    err = float(jnp.max(jnp.abs(out - ref)))
    assert err < 2e-3, err

    print("KERNEL_OK")
</pallas_src>

<mosaic_0001>
module attributes {stable_mosaic.version = 11 : i64} {
  func.func @kernel(%arg0: i32, %arg1: memref<8x12xf32, #tpu.memory_space<vmem>>, %arg2: memref<12x256xf32, #tpu.memory_space<vmem>>, %arg3: memref<1x256xf32, #tpu.memory_space<vmem>>, %arg4: memref<256x256xf32, #tpu.memory_space<vmem>>, %arg5: memref<1x256xf32, #tpu.memory_space<vmem>>, %arg6: memref<256x512xf32, #tpu.memory_space<vmem>>, %arg7: memref<1x512xf32, #tpu.memory_space<vmem>>, %arg8: memref<256x256xf32, #tpu.memory_space<vmem>>, %arg9: memref<256x256xf32, #tpu.memory_space<vmem>>, %arg10: memref<1x256xf32, #tpu.memory_space<vmem>>, %arg11: memref<512x512xf32, #tpu.memory_space<vmem>>, %arg12: memref<512x512xf32, #tpu.memory_space<vmem>>, %arg13: memref<1x512xf32, #tpu.memory_space<vmem>>, %arg14: memref<1024x32xf32, #tpu.memory_space<vmem>>, %arg15: memref<1024x32xf32, #tpu.memory_space<vmem>>, %arg16: memref<1x32xf32, #tpu.memory_space<vmem>>, %arg17: memref<1x32x8x32xf32, #tpu.memory_space<vmem>>, %arg18: memref<6x8x128xf32, #tpu.memory_space<vmem>>, %arg19: memref<10x8x256xf32, #tpu.memory_space<vmem>>, %arg20: memref<18x8x512xf32, #tpu.memory_space<vmem>>) attributes {dimension_semantics = [#tpu.dimension_semantics<parallel>], iteration_bounds = array<i64: 1>, scalar_prefetch = 0 : i64, scratch_operands = 3 : i64, tpu.core_type = #tpu.core_type<tc>, window_params = [{transform_indices = @transform_0, window_bounds = array<i64: 8, 12>}, {pipeline_mode = #tpu.pipeline_mode<synchronous>, transform_indices = @transform_1, window_bounds = array<i64: 12, 256>}, {pipeline_mode = #tpu.pipeline_mode<synchronous>, transform_indices = @transform_2, window_bounds = array<i64: 1, 256>}, {pipeline_mode = #tpu.pipeline_mode<synchronous>, transform_indices = @transform_3, window_bounds = array<i64: 256, 256>}, {pipeline_mode = #tpu.pipeline_mode<synchronous>, transform_indices = @transform_4, window_bounds = array<i64: 1, 256>}, {pipeline_mode = #tpu.pipeline_mode<synchronous>, transform_indices = @transform_5, window_bounds = array<i64: 256, 512>}, {pipeline_mode = #tpu.pipeline_mode<synchronous>, transform_indices = @transform_6, window_bounds = array<i64: 1, 512>}, {pipeline_mode = #tpu.pipeline_mode<synchronous>, transform_indices = @transform_7, window_bounds = array<i64: 256, 256>}, {pipeline_mode = #tpu.pipeline_mode<synchronous>, transform_indices = @transform_8, window_bounds = array<i64: 256, 256>}, {pipeline_mode = #tpu.pipeline_mode<synchronous>, transform_indices = @transform_9, window_bounds = array<i64: 1, 256>}, {pipeline_mode = #tpu.pipeline_mode<synchronous>, transform_indices = @transform_10, window_bounds = array<i64: 512, 512>}, {pipeline_mode = #tpu.pipeline_mode<synchronous>, transform_indices = @transform_11, window_bounds = array<i64: 512, 512>}, {pipeline_mode = #tpu.pipeline_mode<synchronous>, transform_indices = @transform_12, window_bounds = array<i64: 1, 512>}, {pipeline_mode = #tpu.pipeline_mode<synchronous>, transform_indices = @transform_13, window_bounds = array<i64: 1024, 32>}, {pipeline_mode = #tpu.pipeline_mode<synchronous>, transform_indices = @transform_14, window_bounds = array<i64: 1024, 32>}, {pipeline_mode = #tpu.pipeline_mode<synchronous>, transform_indices = @transform_15, window_bounds = array<i64: 1, 32>}, {transform_indices = @transform_16, window_bounds = array<i64: 1, 32, 8, 32>}]} {
    %cst = arith.constant 0.000000e+00 : f32
    %0 = vector.broadcast %cst : f32 to vector<8x128xf32>
    %c0 = arith.constant 0 : index
    %c0_0 = arith.constant 0 : index
    %c0_1 = arith.constant 0 : index
    %1 = vector.load %arg18[%c0, %c0_0, %c0_1] : memref<6x8x128xf32, #tpu.memory_space<vmem>>, vector<1x8x128xf32>
    %2 = vector.shape_cast %1 : vector<1x8x128xf32> to vector<8x128xf32>
    %3 = vector.shape_cast %0 : vector<8x128xf32> to vector<1x8x128xf32>
    tpu.vector_store %arg18[%c0, %c0_0, %c0_1], %3 {strides = array<i32>} : memref<6x8x128xf32, #tpu.memory_space<vmem>>, vector<1x8x128xf32>,
    %c5 = arith.constant 5 : index
    %c0_2 = arith.constant 0 : index
    %c0_3 = arith.constant 0 : index
    %4 = vector.load %arg18[%c5, %c0_2, %c0_3] : memref<6x8x128xf32, #tpu.memory_space<vmem>>, vector<1x8x128xf32>
    %5 = vector.shape_cast %4 : vector<1x8x128xf32> to vector<8x128xf32>
    %6 = vector.shape_cast %0 : vector<8x128xf32> to vector<1x8x128xf32>
    tpu.vector_store %arg18[%c5, %c0_2, %c0_3], %6 {strides = array<i32>} : memref<6x8x128xf32, #tpu.memory_space<vmem>>, vector<1x8x128xf32>,
    %cst_4 = arith.constant 0.000000e+00 : f32
    %7 = vector.broadcast %cst_4 : f32 to vector<8x256xf32>
    %c0_5 = arith.constant 0 : index
    %c0_6 = arith.constant 0 : index
    %c0_7 = arith.constant 0 : index
    %8 = vector.load %arg19[%c0_5, %c0_6, %c0_7] : memref<10x8x256xf32, #tpu.memory_space<vmem>>, vector<1x8x256xf32>
    %9 = vector.shape_cast %8 : vector<1x8x256xf32> to vector<8x256xf32>
    %10 = vector.shape_cast %7 : vector<8x256xf32> to vector<1x8x256xf32>
    tpu.vector_store %arg19[%c0_5, %c0_6, %c0_7], %10 {strides = array<i32>} : memref<10x8x256xf32, #tpu.memory_space<vmem>>, vector<1x8x256xf32>,
    %c9 = arith.constant 9 : index
    %c0_8 = arith.constant 0 : index
    %c0_9 = arith.constant 0 : index
    %11 = vector.load %arg19[%c9, %c0_8, %c0_9] : memref<10x8x256xf32, #tpu.memory_space<vmem>>, vector<1x8x256xf32>
    %12 = vector.shape_cast %11 : vector<1x8x256xf32> to vector<8x256xf32>
    %13 = vector.shape_cast %7 : vector<8x256xf32> to vector<1x8x256xf32>
    tpu.vector_store %arg19[%c9, %c0_8, %c0_9], %13 {strides = array<i32>} : memref<10x8x256xf32, #tpu.memory_space<vmem>>, vector<1x8x256xf32>,
    %cst_10 = arith.constant 0.000000e+00 : f32
    %14 = vector.broadcast %cst_10 : f32 to vector<8x512xf32>
    %c0_11 = arith.constant 0 : index
    %c0_12 = arith.constant 0 : index
    %c0_13 = arith.constant 0 : index
    %15 = vector.load %arg20[%c0_11, %c0_12, %c0_13] : memref<18x8x512xf32, #tpu.memory_space<vmem>>, vector<1x8x512xf32>
    %16 = vector.shape_cast %15 : vector<1x8x512xf32> to vector<8x512xf32>
    %17 = vector.shape_cast %14 : vector<8x512xf32> to vector<1x8x512xf32>
    tpu.vector_store %arg20[%c0_11, %c0_12, %c0_13], %17 {strides = array<i32>} : memref<18x8x512xf32, #tpu.memory_space<vmem>>, vector<1x8x512xf32>,
    %c17 = arith.constant 17 : index
    %c0_14 = arith.constant 0 : index
    %c0_15 = arith.constant 0 : index
    %18 = vector.load %arg20[%c17, %c0_14, %c0_15] : memref<18x8x512xf32, #tpu.memory_space<vmem>>, vector<1x8x512xf32>
    %19 = vector.shape_cast %18 : vector<1x8x512xf32> to vector<8x512xf32>
    %20 = vector.shape_cast %14 : vector<8x512xf32> to vector<1x8x512xf32>
    tpu.vector_store %arg20[%c17, %c0_14, %c0_15], %20 {strides = array<i32>} : memref<18x8x512xf32, #tpu.memory_space<vmem>>, vector<1x8x512xf32>,
    %c0_16 = arith.constant 0 : index
    %c0_17 = arith.constant 0 : index
    %21 = vector.load %arg1[%c0_16, %c0_17] : memref<8x12xf32, #tpu.memory_space<vmem>>, vector<8x12xf32>
    %c0_18 = arith.constant 0 : index
    %c0_19 = arith.constant 0 : index
    %22 = vector.load %arg2[%c0_18, %c0_19] : memref<12x256xf32, #tpu.memory_space<vmem>>, vector<12x256xf32>
    %cst_20 = arith.constant dense<0.000000e+00> : vector<8x256xf32>
    %23 = tpu.matmul %21, %22, %cst_20 {dimension_numbers = #tpu.dot_dimension_numbers<[1], [0], [0], [1], [0, 0, 1, 1], [], []>} : vector<8x12xf32>, vector<12x256xf32>, vector<8x256xf32> -> vector<8x256xf32>
    %c0_21 = arith.constant 0 : index
    %c0_22 = arith.constant 0 : index
    %24 = vector.load %arg3[%c0_21, %c0_22] : memref<1x256xf32, #tpu.memory_space<vmem>>, vector<1x256xf32>
    %25 = vector.broadcast %24 : vector<1x256xf32> to vector<8x256xf32>
    %26 = arith.addf %23, %25 : vector<8x256xf32>
    %cst_23 = arith.constant 0.000000e+00 : f32
    %27 = vector.broadcast %cst_23 : f32 to vector<8x256xf32>
    %28 = arith.maximumf %26, %27 : vector<8x256xf32>
    %c0_24 = arith.constant 0 : index
    %c0_25 = arith.constant 0 : index
    %29 = vector.load %arg4[%c0_24, %c0_25] : memref<256x256xf32, #tpu.memory_space<vmem>>, vector<256x256xf32>
    %cst_26 = arith.constant dense<0.000000e+00> : vector<8x256xf32>
    %30 = tpu.matmul %28, %29, %cst_26 {dimension_numbers = #tpu.dot_dimension_numbers<[1], [0], [0], [1], [0, 0, 1, 1], [], []>} : vector<8x256xf32>, vector<256x256xf32>, vector<8x256xf32> -> vector<8x256xf32>
    %c0_27 = arith.constant 0 : index
    %c0_28 = arith.constant 0 : index
    %31 = vector.load %arg5[%c0_27, %c0_28] : memref<1x256xf32, #tpu.memory_space<vmem>>, vector<1x256xf32>
    %32 = vector.broadcast %31 : vector<1x256xf32> to vector<8x256xf32>
    %33 = arith.addf %30, %32 : vector<8x256xf32>
    %cst_29 = arith.constant 0.000000e+00 : f32
    %34 = vector.broadcast %cst_29 : f32 to vector<8x256xf32>
    %35 = arith.maximumf %33, %34 : vector<8x256xf32>
    %c0_30 = arith.constant 0 : index
    %c0_31 = arith.constant 0 : index
    %36 = vector.load %arg6[%c0_30, %c0_31] : memref<256x512xf32, #tpu.memory_space<vmem>>, vector<256x512xf32>
    %cst_32 = arith.constant dense<0.000000e+00> : vector<8x512xf32>
    %37 = tpu.matmul %35, %36, %cst_32 {dimension_numbers = #tpu.dot_dimension_numbers<[1], [0], [0], [1], [0, 0, 1, 1], [], []>} : vector<8x256xf32>, vector<256x512xf32>, vector<8x512xf32> -> vector<8x512xf32>
    %c0_33 = arith.constant 0 : index
    %c0_34 = arith.constant 0 : index
    %38 = vector.load %arg7[%c0_33, %c0_34] : memref<1x512xf32, #tpu.memory_space<vmem>>, vector<1x512xf32>
    %39 = vector.broadcast %38 : vector<1x512xf32> to vector<8x512xf32>
    %40 = arith.addf %37, %39 : vector<8x512xf32>
    %cst_35 = arith.constant 0.000000e+00 : f32
    %41 = vector.broadcast %cst_35 : f32 to vector<8x512xf32>
    %42 = arith.maximumf %40, %41 : vector<8x512xf32>
    %43 = vector.extract_strided_slice %42 {offsets = [0, 0], sizes = [8, 128], strides = [1, 1]} : vector<8x512xf32> to vector<8x128xf32>
    %c1 = arith.constant 1 : index
    %c0_36 = arith.constant 0 : index
    %c0_37 = arith.constant 0 : index
    %44 = vector.load %arg18[%c1, %c0_36, %c0_37] : memref<6x8x128xf32, #tpu.memory_space<vmem>>, vector<1x8x128xf32>
    %45 = vector.shape_cast %44 : vector<1x8x128xf32> to vector<8x128xf32>
    %46 = vector.shape_cast %43 : vector<8x128xf32> to vector<1x8x128xf32>
    tpu.vector_store %arg18[%c1, %c0_36, %c0_37], %46 {strides = array<i32>} : memref<6x8x128xf32, #tpu.memory_space<vmem>>, vector<1x8x128xf32>,
    %47 = vector.extract_strided_slice %42 {offsets = [0, 128], sizes = [8, 128], strides = [1, 1]} : vector<8x512xf32> to vector<8x128xf32>
    %c2 = arith.constant 2 : index
    %c0_38 = arith.constant 0 : index
    %c0_39 = arith.constant 0 : index
    %48 = vector.load %arg18[%c2, %c0_38, %c0_39] : memref<6x8x128xf32, #tpu.memory_space<vmem>>, vector<1x8x128xf32>
    %49 = vector.shape_cast %48 : vector<1x8x128xf32> to vector<8x128xf32>
    %50 = vector.shape_cast %47 : vector<8x128xf32> to vector<1x8x128xf32>
    tpu.vector_store %arg18[%c2, %c0_38, %c0_39], %50 {strides = array<i32>} : memref<6x8x128xf32, #tpu.memory_space<vmem>>, vector<1x8x128xf32>,
    %51 = vector.extract_strided_slice %42 {offsets = [0, 256], sizes = [8, 128], strides = [1, 1]} : vector<8x512xf32> to vector<8x128xf32>
    %c3 = arith.constant 3 : index
    %c0_40 = arith.constant 0 : index
    %c0_41 = arith.constant 0 : index
    %52 = vector.load %arg18[%c3, %c0_40, %c0_41] : memref<6x8x128xf32, #tpu.memory_space<vmem>>, vector<1x8x128xf32>
    %53 = vector.shape_cast %52 : vector<1x8x128xf32> to vector<8x128xf32>
    %54 = vector.shape_cast %51 : vector<8x128xf32> to vector<1x8x128xf32>
    tpu.vector_store %arg18[%c3, %c0_40, %c0_41], %54 {strides = array<i32>} : memref<6x8x128xf32, #tpu.memory_space<vmem>>, vector<1x8x128xf32>,
    %55 = vector.extract_strided_slice %42 {offsets = [0, 384], sizes = [8, 128], strides = [1, 1]} : vector<8x512xf32> to vector<8x128xf32>
    %c4 = arith.constant 4 : index
    %c0_42 = arith.constant 0 : index
    %c0_43 = arith.constant 0 : index
    %56 = vector.load %arg18[%c4, %c0_42, %c0_43] : memref<6x8x128xf32, #tpu.memory_space<vmem>>, vector<1x8x128xf32>
    %57 = vector.shape_cast %56 : vector<1x8x128xf32> to vector<8x128xf32>
    %58 = vector.shape_cast %55 : vector<8x128xf32> to vector<1x8x128xf32>
    tpu.vector_store %arg18[%c4, %c0_42, %c0_43], %58 {strides = array<i32>} : memref<6x8x128xf32, #tpu.memory_space<vmem>>, vector<1x8x128xf32>,
    %c0_44 = arith.constant 0 : index
    %c0_45 = arith.constant 0 : index
    %c0_46 = arith.constant 0 : index
    %59 = vector.load %arg18[%c0_44, %c0_45, %c0_46] : memref<6x8x128xf32, #tpu.memory_space<vmem>>, vector<4x8x128xf32>
    %60 = vector.shape_cast %59 : vector<4x8x128xf32> to vector<32x128xf32>
    %c1_47 = arith.constant 1 : index
    %c0_48 = arith.constant 0 : index
    %c0_49 = arith.constant 0 : index
    %61 = vector.load %arg18[%c1_47, %c0_48, %c0_49] : memref<6x8x128xf32, #tpu.memory_space<vmem>>, vector<4x8x128xf32>
    %62 = vector.shape_cast %61 : vector<4x8x128xf32> to vector<32x128xf32>
    %c0_50 = arith.constant 0 : index
    %c0_51 = arith.constant 0 : index
    %63 = vector.load %arg8[%c0_50, %c0_51] : memref<256x256xf32, #tpu.memory_space<vmem>>, vector<128x256xf32>
    %cst_52 = arith.constant dense<0.000000e+00> : vector<32x256xf32>
    %64 = tpu.matmul %60, %63, %cst_52 {dimension_numbers = #tpu.dot_dimension_numbers<[1], [0], [0], [1], [0, 0, 1, 1], [], []>} : vector<32x128xf32>, vector<128x256xf32>, vector<32x256xf32> -> vector<32x256xf32>
    %c128 = arith.constant 128 : index
    %c0_53 = arith.constant 0 : index
    %65 = vector.load %arg8[%c128, %c0_53] : memref<256x256xf32, #tpu.memory_space<vmem>>, vector<128x256xf32>
    %cst_54 = arith.constant dense<0.000000e+00> : vector<32x256xf32>
    %66 = tpu.matmul %62, %65, %cst_54 {dimension_numbers = #tpu.dot_dimension_numbers<[1], [0], [0], [1], [0, 0, 1, 1], [], []>} : vector<32x128xf32>, vector<128x256xf32>, vector<32x256xf32> -> vector<32x256xf32>
    %67 = arith.addf %64, %66 : vector<32x256xf32>
    %c0_55 = arith.constant 0 : index
    %c0_56 = arith.constant 0 : index
    %68 = vector.load %arg10[%c0_55, %c0_56] : memref<1x256xf32, #tpu.memory_space<vmem>>, vector<1x256xf32>
    %69 = vector.broadcast %68 : vector<1x256xf32> to vector<32x256xf32>
    %70 = arith.addf %67, %69 : vector<32x256xf32>
    %cst_57 = arith.constant 0.000000e+00 : f32
    %71 = vector.broadcast %cst_57 : f32 to vector<32x256xf32>
    %72 = arith.maximumf %70, %71 : vector<32x256xf32>
    %73 = vector.shape_cast %72 : vector<32x256xf32> to vector<4x8x256xf32>
    %74 = vector.extract_strided_slice %73 {offsets = [0, 0, 0], sizes = [1, 8, 256], strides = [1, 1, 1]} : vector<4x8x256xf32> to vector<1x8x256xf32>
    %75 = vector.shape_cast %74 : vector<1x8x256xf32> to vector<8x256xf32>
    %c1_58 = arith.constant 1 : index
    %c0_59 = arith.constant 0 : index
    %c0_60 = arith.constant 0 : index
    %76 = vector.load %arg19[%c1_58, %c0_59, %c0_60] : memref<10x8x256xf32, #tpu.memory_space<vmem>>, vector<1x8x256xf32>
    %77 = vector.shape_cast %76 : vector<1x8x256xf32> to vector<8x256xf32>
    %78 = vector.shape_cast %75 : vector<8x256xf32> to vector<1x8x256xf32>
    tpu.vector_store %arg19[%c1_58, %c0_59, %c0_60], %78 {strides = array<i32>} : memref<10x8x256xf32, #tpu.memory_space<vmem>>, vector<1x8x256xf32>,
    %79 = vector.extract_strided_slice %73 {offsets = [1, 0, 0], sizes = [1, 8, 256], strides = [1, 1, 1]} : vector<4x8x256xf32> to vector<1x8x256xf32>
    %80 = vector.shape_cast %79 : vector<1x8x256xf32> to vector<8x256xf32>
    %c3_61 = arith.constant 3 : index
    %c0_62 = arith.constant 0 : index
    %c0_63 = arith.constant 0 : index
    %81 = vector.load %arg19[%c3_61, %c0_62, %c0_63] : memref<10x8x256xf32, #tpu.memory_space<vmem>>, vector<1x8x256xf32>
    %82 = vector.shape_cast %81 : vector<1x8x256xf32> to vector<8x256xf32>
    %83 = vector.shape_cast %80 : vector<8x256xf32> to vector<1x8x256xf32>
    tpu.vector_store %arg19[%c3_61, %c0_62, %c0_63], %83 {strides = array<i32>} : memref<10x8x256xf32, #tpu.memory_space<vmem>>, vector<1x8x256xf32>,
    %84 = vector.extract_strided_slice %73 {offsets = [2, 0, 0], sizes = [1, 8, 256], strides = [1, 1, 1]} : vector<4x8x256xf32> to vector<1x8x256xf32>
    %85 = vector.shape_cast %84 : vector<1x8x256xf32> to vector<8x256xf32>
    %c5_64 = arith.constant 5 : index
    %c0_65 = arith.constant 0 : index
    %c0_66 = arith.constant 0 : index
    %86 = vector.load %arg19[%c5_64, %c0_65, %c0_66] : memref<10x8x256xf32, #tpu.memory_space<vmem>>, vector<1x8x256xf32>
    %87 = vector.shape_cast %86 : vector<1x8x256xf32> to vector<8x256xf32>
    %88 = vector.shape_cast %85 : vector<8x256xf32> to vector<1x8x256xf32>
    tpu.vector_store %arg19[%c5_64, %c0_65, %c0_66], %88 {strides = array<i32>} : memref<10x8x256xf32, #tpu.memory_space<vmem>>, vector<1x8x256xf32>,
    %89 = vector.extract_strided_slice %73 {offsets = [3, 0, 0], sizes = [1, 8, 256], strides = [1, 1, 1]} : vector<4x8x256xf32> to vector<1x8x256xf32>
    %90 = vector.shape_cast %89 : vector<1x8x256xf32> to vector<8x256xf32>
    %c7 = arith.constant 7 : index
    %c0_67 = arith.constant 0 : index
    %c0_68 = arith.constant 0 : index
    %91 = vector.load %arg19[%c7, %c0_67, %c0_68] : memref<10x8x256xf32, #tpu.memory_space<vmem>>, vector<1x8x256xf32>
    %92 = vector.shape_cast %91 : vector<1x8x256xf32> to vector<8x256xf32>
    %93 = vector.shape_cast %90 : vector<8x256xf32> to vector<1x8x256xf32>
    tpu.vector_store %arg19[%c7, %c0_67, %c0_68], %93 {strides = array<i32>} : memref<10x8x256xf32, #tpu.memory_space<vmem>>, vector<1x8x256xf32>,
    %c1_69 = arith.constant 1 : index
    %c0_70 = arith.constant 0 : index
    %c0_71 = arith.constant 0 : index
    %94 = vector.load %arg18[%c1_69, %c0_70, %c0_71] : memref<6x8x128xf32, #tpu.memory_space<vmem>>, vector<4x8x128xf32>
    %95 = vector.shape_cast %94 : vector<4x8x128xf32> to vector<32x128xf32>
    %c2_72 = arith.constant 2 : index
    %c0_73 = arith.constant 0 : index
    %c0_74 = arith.constant 0 : index
    %96 = vector.load %arg18[%c2_72, %c0_73, %c0_74] : memref<6x8x128xf32, #tpu.memory_space<vmem>>, vector<4x8x128xf32>
    %97 = vector.shape_cast %96 : vector<4x8x128xf32> to vector<32x128xf32>
    %c0_75 = arith.constant 0 : index
    %c0_76 = arith.constant 0 : index
    %98 = vector.load %arg9[%c0_75, %c0_76] : memref<256x256xf32, #tpu.memory_space<vmem>>, vector<128x256xf32>
    %cst_77 = arith.constant dense<0.000000e+00> : vector<32x256xf32>
    %99 = tpu.matmul %95, %98, %cst_77 {dimension_numbers = #tpu.dot_dimension_numbers<[1], [0], [0], [1], [0, 0, 1, 1], [], []>} : vector<32x128xf32>, vector<128x256xf32>, vector<32x256xf32> -> vector<32x256xf32>
    %c128_78 = arith.constant 128 : index
    %c0_79 = arith.constant 0 : index
    %100 = vector.load %arg9[%c128_78, %c0_79] : memref<256x256xf32, #tpu.memory_space<vmem>>, vector<128x256xf32>
    %cst_80 = arith.constant dense<0.000000e+00> : vector<32x256xf32>
    %101 = tpu.matmul %97, %100, %cst_80 {dimension_numbers = #tpu.dot_dimension_numbers<[1], [0], [0], [1], [0, 0, 1, 1], [], []>} : vector<32x128xf32>, vector<128x256xf32>, vector<32x256xf32> -> vector<32x256xf32>
    %102 = arith.addf %99, %101 : vector<32x256xf32>
    %c0_81 = arith.constant 0 : index
    %c0_82 = arith.constant 0 : index
    %103 = vector.load %arg10[%c0_81, %c0_82] : memref<1x256xf32, #tpu.memory_space<vmem>>, vector<1x256xf32>
    %104 = vector.broadcast %103 : vector<1x256xf32> to vector<32x256xf32>
    %105 = arith.addf %102, %104 : vector<32x256xf32>
    %cst_83 = arith.constant 0.000000e+00 : f32
    %106 = vector.broadcast %cst_83 : f32 to vector<32x256xf32>
    %107 = arith.maximumf %105, %106 : vector<32x256xf32>
    %108 = vector.shape_cast %107 : vector<32x256xf32> to vector<4x8x256xf32>
    %109 = vector.extract_strided_slice %108 {offsets = [0, 0, 0], sizes = [1, 8, 256], strides = [1, 1, 1]} : vector<4x8x256xf32> to vector<1x8x256xf32>
    %110 = vector.shape_cast %109 : vector<1x8x256xf32> to vector<8x256xf32>
    %c2_84 = arith.constant 2 : index
    %c0_85 = arith.constant 0 : index
    %c0_86 = arith.constant 0 : index
    %111 = vector.load %arg19[%c2_84, %c0_85, %c0_86] : memref<10x8x256xf32, #tpu.memory_space<vmem>>, vector<1x8x256xf32>
    %112 = vector.shape_cast %111 : vector<1x8x256xf32> to vector<8x256xf32>
    %113 = vector.shape_cast %110 : vector<8x256xf32> to vector<1x8x256xf32>
    tpu.vector_store %arg19[%c2_84, %c0_85, %c0_86], %113 {strides = array<i32>} : memref<10x8x256xf32, #tpu.memory_space<vmem>>, vector<1x8x256xf32>,
    %114 = vector.extract_strided_slice %108 {offsets = [1, 0, 0], sizes = [1, 8, 256], strides = [1, 1, 1]} : vector<4x8x256xf32> to vector<1x8x256xf32>
    %115 = vector.shape_cast %114 : vector<1x8x256xf32> to vector<8x256xf32>
    %c4_87 = arith.constant 4 : index
    %c0_88 = arith.constant 0 : index
    %c0_89 = arith.constant 0 : index
    %116 = vector.load %arg19[%c4_87, %c0_88, %c0_89] : memref<10x8x256xf32, #tpu.memory_space<vmem>>, vector<1x8x256xf32>
    %117 = vector.shape_cast %116 : vector<1x8x256xf32> to vector<8x256xf32>
    %118 = vector.shape_cast %115 : vector<8x256xf32> to vector<1x8x256xf32>
    tpu.vector_store %arg19[%c4_87, %c0_88, %c0_89], %118 {strides = array<i32>} : memref<10x8x256xf32, #tpu.memory_space<vmem>>, vector<1x8x256xf32>,
    %119 = vector.extract_strided_slice %108 {offsets = [2, 0, 0], sizes = [1, 8, 256], strides = [1, 1, 1]} : vector<4x8x256xf32> to vector<1x8x256xf32>
    %120 = vector.shape_cast %119 : vector<1x8x256xf32> to vector<8x256xf32>
    %c6 = arith.constant 6 : index
    %c0_90 = arith.constant 0 : index
    %c0_91 = arith.constant 0 : index
    %121 = vector.load %arg19[%c6, %c0_90, %c0_91] : memref<10x8x256xf32, #tpu.memory_space<vmem>>, vector<1x8x256xf32>
    %122 = vector.shape_cast %121 : vector<1x8x256xf32> to vector<8x256xf32>
    %123 = vector.shape_cast %120 : vector<8x256xf32> to vector<1x8x256xf32>
    tpu.vector_store %arg19[%c6, %c0_90, %c0_91], %123 {strides = array<i32>} : memref<10x8x256xf32, #tpu.memory_space<vmem>>, vector<1x8x256xf32>,
    %124 = vector.extract_strided_slice %108 {offsets = [3, 0, 0], sizes = [1, 8, 256], strides = [1, 1, 1]} : vector<4x8x256xf32> to vector<1x8x256xf32>
    %125 = vector.shape_cast %124 : vector<1x8x256xf32> to vector<8x256xf32>
    %c8 = arith.constant 8 : index
    %c0_92 = arith.constant 0 : index
    %c0_93 = arith.constant 0 : index
    %126 = vector.load %arg19[%c8, %c0_92, %c0_93] : memref<10x8x256xf32, #tpu.memory_space<vmem>>, vector<1x8x256xf32>
    %127 = vector.shape_cast %126 : vector<1x8x256xf32> to vector<8x256xf32>
    %128 = vector.shape_cast %125 : vector<8x256xf32> to vector<1x8x256xf32>
    tpu.vector_store %arg19[%c8, %c0_92, %c0_93], %128 {strides = array<i32>} : memref<10x8x256xf32, #tpu.memory_space<vmem>>, vector<1x8x256xf32>,
    %c0_94 = arith.constant 0 : index
    %c0_95 = arith.constant 0 : index
    %c0_96 = arith.constant 0 : index
    %129 = vector.load %arg19[%c0_94, %c0_95, %c0_96] : memref<10x8x256xf32, #tpu.memory_space<vmem>>, vector<8x8x256xf32>
    %130 = vector.shape_cast %129 : vector<8x8x256xf32> to vector<64x256xf32>
    %c1_97 = arith.constant 1 : index
    %c0_98 = arith.constant 0 : index
    %c0_99 = arith.constant 0 : index
    %131 = vector.load %arg19[%c1_97, %c0_98, %c0_99] : memref<10x8x256xf32, #tpu.memory_space<vmem>>, vector<8x8x256xf32>
    %132 = vector.shape_cast %131 : vector<8x8x256xf32> to vector<64x256xf32>
    %c0_100 = arith.constant 0 : index
    %c0_101 = arith.constant 0 : index
    %133 = vector.load %arg11[%c0_100, %c0_101] : memref<512x512xf32, #tpu.memory_space<vmem>>, vector<256x512xf32>
    %cst_102 = arith.constant dense<0.000000e+00> : vector<64x512xf32>
    %134 = tpu.matmul %130, %133, %cst_102 {dimension_numbers = #tpu.dot_dimension_numbers<[1], [0], [0], [1], [0, 0, 1, 1], [], []>} : vector<64x256xf32>, vector<256x512xf32>, vector<64x512xf32> -> vector<64x512xf32>
    %c256 = arith.constant 256 : index
    %c0_103 = arith.constant 0 : index
    %135 = vector.load %arg11[%c256, %c0_103] : memref<512x512xf32, #tpu.memory_space<vmem>>, vector<256x512xf32>
    %cst_104 = arith.constant dense<0.000000e+00> : vector<64x512xf32>
    %136 = tpu.matmul %132, %135, %cst_104 {dimension_numbers = #tpu.dot_dimension_numbers<[1], [0], [0], [1], [0, 0, 1, 1], [], []>} : vector<64x256xf32>, vector<256x512xf32>, vector<64x512xf32> -> vector<64x512xf32>
    %137 = arith.addf %134, %136 : vector<64x512xf32>
    %c0_105 = arith.constant 0 : index
    %c0_106 = arith.constant 0 : index
    %138 = vector.load %arg13[%c0_105, %c0_106] : memref<1x512xf32, #tpu.memory_space<vmem>>, vector<1x512xf32>
    %139 = vector.broadcast %138 : vector<1x512xf32> to vector<64x512xf32>
    %140 = arith.addf %137, %139 : vector<64x512xf32>
    %cst_107 = arith.constant 0.000000e+00 : f32
    %141 = vector.broadcast %cst_107 : f32 to vector<64x512xf32>
    %142 = arith.maximumf %140, %141 : vector<64x512xf32>
    %143 = vector.shape_cast %142 : vector<64x512xf32> to vector<8x8x512xf32>
    %144 = vector.extract_strided_slice %143 {offsets = [0, 0, 0], sizes = [1, 8, 512], strides = [1, 1, 1]} : vector<8x8x512xf32> to vector<1x8x512xf32>
    %145 = vector.shape_cast %144 : vector<1x8x512xf32> to vector<8x512xf32>
    %c1_108 = arith.constant 1 : index
    %c0_109 = arith.constant 0 : index
    %c0_110 = arith.constant 0 : index
    %146 = vector.load %arg20[%c1_108, %c0_109, %c0_110] : memref<18x8x512xf32, #tpu.memory_space<vmem>>, vector<1x8x512xf32>
    %147 = vector.shape_cast %146 : vector<1x8x512xf32> to vector<8x512xf32>
    %148 = vector.shape_cast %145 : vector<8x512xf32> to vector<1x8x512xf32>
    tpu.vector_store %arg20[%c1_108, %c0_109, %c0_110], %148 {strides = array<i32>} : memref<18x8x512xf32, #tpu.memory_space<vmem>>, vector<1x8x512xf32>,
    %149 = vector.extract_strided_slice %143 {offsets = [1, 0, 0], sizes = [1, 8, 512], strides = [1, 1, 1]} : vector<8x8x512xf32> to vector<1x8x512xf32>
    %150 = vector.shape_cast %149 : vector<1x8x512xf32> to vector<8x512xf32>
    %c3_111 = arith.constant 3 : index
    %c0_112 = arith.constant 0 : index
    %c0_113 = arith.constant 0 : index
    %151 = vector.load %arg20[%c3_111, %c0_112, %c0_113] : memref<18x8x512xf32, #tpu.memory_space<vmem>>, vector<1x8x512xf32>
    %152 = vector.shape_cast %151 : vector<1x8x512xf32> to vector<8x512xf32>
    %153 = vector.shape_cast %150 : vector<8x512xf32> to vector<1x8x512xf32>
    tpu.vector_store %arg20[%c3_111, %c0_112, %c0_113], %153 {strides = array<i32>} : memref<18x8x512xf32, #tpu.memory_space<vmem>>, vector<1x8x512xf32>,
    %154 = vector.extract_strided_slice %143 {offsets = [2, 0, 0], sizes = [1, 8, 512], strides = [1, 1, 1]} : vector<8x8x512xf32> to vector<1x8x512xf32>
    %155 = vector.shape_cast %154 : vector<1x8x512xf32> to vector<8x512xf32>
    %c5_114 = arith.constant 5 : index
    %c0_115 = arith.constant 0 : index
    %c0_116 = arith.constant 0 : index
    %156 = vector.load %arg20[%c5_114, %c0_115, %c0_116] : memref<18x8x512xf32, #tpu.memory_space<vmem>>, vector<1x8x512xf32>
    %157 = vector.shape_cast %156 : vector<1x8x512xf32> to vector<8x512xf32>
    %158 = vector.shape_cast %155 : vector<8x512xf32> to vector<1x8x512xf32>
    tpu.vector_store %arg20[%c5_114, %c0_115, %c0_116], %158 {strides = array<i32>} : memref<18x8x512xf32, #tpu.memory_space<vmem>>, vector<1x8x512xf32>,
    %159 = vector.extract_strided_slice %143 {offsets = [3, 0, 0], sizes = [1, 8, 512], strides = [1, 1, 1]} : vector<8x8x512xf32> to vector<1x8x512xf32>
    %160 = vector.shape_cast %159 : vector<1x8x512xf32> to vector<8x512xf32>
    %c7_117 = arith.constant 7 : index
    %c0_118 = arith.constant 0 : index
    %c0_119 = arith.constant 0 : index
    %161 = vector.load %arg20[%c7_117, %c0_118, %c0_119] : memref<18x8x512xf32, #tpu.memory_space<vmem>>, vector<1x8x512xf32>
    %162 = vector.shape_cast %161 : vector<1x8x512xf32> to vector<8x512xf32>
    %163 = vector.shape_cast %160 : vector<8x512xf32> to vector<1x8x512xf32>
    tpu.vector_store %arg20[%c7_117, %c0_118, %c0_119], %163 {strides = array<i32>} : memref<18x8x512xf32, #tpu.memory_space<vmem>>, vector<1x8x512xf32>,
    %164 = vector.extract_strided_slice %143 {offsets = [4, 0, 0], sizes = [1, 8, 512], strides = [1, 1, 1]} : vector<8x8x512xf32> to vector<1x8x512xf32>
    %165 = vector.shape_cast %164 : vector<1x8x512xf32> to vector<8x512xf32>
    %c9_120 = arith.constant 9 : index
    %c0_121 = arith.constant 0 : index
    %c0_122 = arith.constant 0 : index
    %166 = vector.load %arg20[%c9_120, %c0_121, %c0_122] : memref<18x8x512xf32, #tpu.memory_space<vmem>>, vector<1x8x512xf32>
    %167 = vector.shape_cast %166 : vector<1x8x512xf32> to vector<8x512xf32>
    %168 = vector.shape_cast %165 : vector<8x512xf32> to vector<1x8x512xf32>
    tpu.vector_store %arg20[%c9_120, %c0_121, %c0_122], %168 {strides = array<i32>} : memref<18x8x512xf32, #tpu.memory_space<vmem>>, vector<1x8x512xf32>,
    %169 = vector.extract_strided_slice %143 {offsets = [5, 0, 0], sizes = [1, 8, 512], strides = [1, 1, 1]} : vector<8x8x512xf32> to vector<1x8x512xf32>
    %170 = vector.shape_cast %169 : vector<1x8x512xf32> to vector<8x512xf32>
    %c11 = arith.constant 11 : index
    %c0_123 = arith.constant 0 : index
    %c0_124 = arith.constant 0 : index
    %171 = vector.load %arg20[%c11, %c0_123, %c0_124] : memref<18x8x512xf32, #tpu.memory_space<vmem>>, vector<1x8x512xf32>
    %172 = vector.shape_cast %171 : vector<1x8x512xf32> to vector<8x512xf32>
    %173 = vector.shape_cast %170 : vector<8x512xf32> to vector<1x8x512xf32>
    tpu.vector_store %arg20[%c11, %c0_123, %c0_124], %173 {strides = array<i32>} : memref<18x8x512xf32, #tpu.memory_space<vmem>>, vector<1x8x512xf32>,
    %174 = vector.extract_strided_slice %143 {offsets = [6, 0, 0], sizes = [1, 8, 512], strides = [1, 1, 1]} : vector<8x8x512xf32> to vector<1x8x512xf32>
    %175 = vector.shape_cast %174 : vector<1x8x512xf32> to vector<8x512xf32>
    %c13 = arith.constant 13 : index
    %c0_125 = arith.constant 0 : index
    %c0_126 = arith.constant 0 : index
    %176 = vector.load %arg20[%c13, %c0_125, %c0_126] : memref<18x8x512xf32, #tpu.memory_space<vmem>>, vector<1x8x512xf32>
    %177 = vector.shape_cast %176 : vector<1x8x512xf32> to vector<8x512xf32>
    %178 = vector.shape_cast %175 : vector<8x512xf32> to vector<1x8x512xf32>
    tpu.vector_store %arg20[%c13, %c0_125, %c0_126], %178 {strides = array<i32>} : memref<18x8x512xf32, #tpu.memory_space<vmem>>, vector<1x8x512xf32>,
    %179 = vector.extract_strided_slice %143 {offsets = [7, 0, 0], sizes = [1, 8, 512], strides = [1, 1, 1]} : vector<8x8x512xf32> to vector<1x8x512xf32>
    %180 = vector.shape_cast %179 : vector<1x8x512xf32> to vector<8x512xf32>
    %c15 = arith.constant 15 : index
    %c0_127 = arith.constant 0 : index
    %c0_128 = arith.constant 0 : index
    %181 = vector.load %arg20[%c15, %c0_127, %c0_128] : memref<18x8x512xf32, #tpu.memory_space<vmem>>, vector<1x8x512xf32>
    %182 = vector.shape_cast %181 : vector<1x8x512xf32> to vector<8x512xf32>
    %183 = vector.shape_cast %180 : vector<8x512xf32> to vector<1x8x512xf32>
    tpu.vector_store %arg20[%c15, %c0_127, %c0_128], %183 {strides = array<i32>} : memref<18x8x512xf32, #tpu.memory_space<vmem>>, vector<1x8x512xf32>,
    %c1_129 = arith.constant 1 : index
    %c0_130 = arith.constant 0 : index
    %c0_131 = arith.constant 0 : index
    %184 = vector.load %arg19[%c1_129, %c0_130, %c0_131] : memref<10x8x256xf32, #tpu.memory_space<vmem>>, vector<8x8x256xf32>
    %185 = vector.shape_cast %184 : vector<8x8x256xf32> to vector<64x256xf32>
    %c2_132 = arith.constant 2 : index
    %c0_133 = arith.constant 0 : index
    %c0_134 = arith.constant 0 : index
    %186 = vector.load %arg19[%c2_132, %c0_133, %c0_134] : memref<10x8x256xf32, #tpu.memory_space<vmem>>, vector<8x8x256xf32>
    %187 = vector.shape_cast %186 : vector<8x8x256xf32> to vector<64x256xf32>
    %c0_135 = arith.constant 0 : index
    %c0_136 = arith.constant 0 : index
    %188 = vector.load %arg12[%c0_135, %c0_136] : memref<512x512xf32, #tpu.memory_space<vmem>>, vector<256x512xf32>
    %cst_137 = arith.constant dense<0.000000e+00> : vector<64x512xf32>
    %189 = tpu.matmul %185, %188, %cst_137 {dimension_numbers = #tpu.dot_dimension_numbers<[1], [0], [0], [1], [0, 0, 1, 1], [], []>} : vector<64x256xf32>, vector<256x512xf32>, vector<64x512xf32> -> vector<64x512xf32>
    %c256_138 = arith.constant 256 : index
    %c0_139 = arith.constant 0 : index
    %190 = vector.load %arg12[%c256_138, %c0_139] : memref<512x512xf32, #tpu.memory_space<vmem>>, vector<256x512xf32>
    %cst_140 = arith.constant dense<0.000000e+00> : vector<64x512xf32>
    %191 = tpu.matmul %187, %190, %cst_140 {dimension_numbers = #tpu.dot_dimension_numbers<[1], [0], [0], [1], [0, 0, 1, 1], [], []>} : vector<64x256xf32>, vector<256x512xf32>, vector<64x512xf32> -> vector<64x512xf32>
    %192 = arith.addf %189, %191 : vector<64x512xf32>
    %c0_141 = arith.constant 0 : index
    %c0_142 = arith.constant 0 : index
    %193 = vector.load %arg13[%c0_141, %c0_142] : memref<1x512xf32, #tpu.memory_space<vmem>>, vector<1x512xf32>
    %194 = vector.broadcast %193 : vector<1x512xf32> to vector<64x512xf32>
    %195 = arith.addf %192, %194 : vector<64x512xf32>
    %cst_143 = arith.constant 0.000000e+00 : f32
    %196 = vector.broadcast %cst_143 : f32 to vector<64x512xf32>
    %197 = arith.maximumf %195, %196 : vector<64x512xf32>
    %198 = vector.shape_cast %197 : vector<64x512xf32> to vector<8x8x512xf32>
    %199 = vector.extract_strided_slice %198 {offsets = [0, 0, 0], sizes = [1, 8, 512], strides = [1, 1, 1]} : vector<8x8x512xf32> to vector<1x8x512xf32>
    %200 = vector.shape_cast %199 : vector<1x8x512xf32> to vector<8x512xf32>
    %c2_144 = arith.constant 2 : index
    %c0_145 = arith.constant 0 : index
    %c0_146 = arith.constant 0 : index
    %201 = vector.load %arg20[%c2_144, %c0_145, %c0_146] : memref<18x8x512xf32, #tpu.memory_space<vmem>>, vector<1x8x512xf32>
    %202 = vector.shape_cast %201 : vector<1x8x512xf32> to vector<8x512xf32>
    %203 = vector.shape_cast %200 : vector<8x512xf32> to vector<1x8x512xf32>
    tpu.vector_store %arg20[%c2_144, %c0_145, %c0_146], %203 {strides = array<i32>} : memref<18x8x512xf32, #tpu.memory_space<vmem>>, vector<1x8x512xf32>,
    %204 = vector.extract_strided_slice %198 {offsets = [1, 0, 0], sizes = [1, 8, 512], strides = [1, 1, 1]} : vector<8x8x512xf32> to vector<1x8x512xf32>
    %205 = vector.shape_cast %204 : vector<1x8x512xf32> to vector<8x512xf32>
    %c4_147 = arith.constant 4 : index
    %c0_148 = arith.constant 0 : index
    %c0_149 = arith.constant 0 : index
    %206 = vector.load %arg20[%c4_147, %c0_148, %c0_149] : memref<18x8x512xf32, #tpu.memory_space<vmem>>, vector<1x8x512xf32>
    %207 = vector.shape_cast %206 : vector<1x8x512xf32> to vector<8x512xf32>
    %208 = vector.shape_cast %205 : vector<8x512xf32> to vector<1x8x512xf32>
    tpu.vector_store %arg20[%c4_147, %c0_148, %c0_149], %208 {strides = array<i32>} : memref<18x8x512xf32, #tpu.memory_space<vmem>>, vector<1x8x512xf32>,
    %209 = vector.extract_strided_slice %198 {offsets = [2, 0, 0], sizes = [1, 8, 512], strides = [1, 1, 1]} : vector<8x8x512xf32> to vector<1x8x512xf32>
    %210 = vector.shape_cast %209 : vector<1x8x512xf32> to vector<8x512xf32>
    %c6_150 = arith.constant 6 : index
    %c0_151 = arith.constant 0 : index
    %c0_152 = arith.constant 0 : index
    %211 = vector.load %arg20[%c6_150, %c0_151, %c0_152] : memref<18x8x512xf32, #tpu.memory_space<vmem>>, vector<1x8x512xf32>
    %212 = vector.shape_cast %211 : vector<1x8x512xf32> to vector<8x512xf32>
    %213 = vector.shape_cast %210 : vector<8x512xf32> to vector<1x8x512xf32>
    tpu.vector_store %arg20[%c6_150, %c0_151, %c0_152], %213 {strides = array<i32>} : memref<18x8x512xf32, #tpu.memory_space<vmem>>, vector<1x8x512xf32>,
    %214 = vector.extract_strided_slice %198 {offsets = [3, 0, 0], sizes = [1, 8, 512], strides = [1, 1, 1]} : vector<8x8x512xf32> to vector<1x8x512xf32>
    %215 = vector.shape_cast %214 : vector<1x8x512xf32> to vector<8x512xf32>
    %c8_153 = arith.constant 8 : index
    %c0_154 = arith.constant 0 : index
    %c0_155 = arith.constant 0 : index
    %216 = vector.load %arg20[%c8_153, %c0_154, %c0_155] : memref<18x8x512xf32, #tpu.memory_space<vmem>>, vector<1x8x512xf32>
    %217 = vector.shape_cast %216 : vector<1x8x512xf32> to vector<8x512xf32>
    %218 = vector.shape_cast %215 : vector<8x512xf32> to vector<1x8x512xf32>
    tpu.vector_store %arg20[%c8_153, %c0_154, %c0_155], %218 {strides = array<i32>} : memref<18x8x512xf32, #tpu.memory_space<vmem>>, vector<1x8x512xf32>,
    %219 = vector.extract_strided_slice %198 {offsets = [4, 0, 0], sizes = [1, 8, 512], strides = [1, 1, 1]} : vector<8x8x512xf32> to vector<1x8x512xf32>
    %220 = vector.shape_cast %219 : vector<1x8x512xf32> to vector<8x512xf32>
    %c10 = arith.constant 10 : index
    %c0_156 = arith.constant 0 : index
    %c0_157 = arith.constant 0 : index
    %221 = vector.load %arg20[%c10, %c0_156, %c0_157] : memref<18x8x512xf32, #tpu.memory_space<vmem>>, vector<1x8x512xf32>
    %222 = vector.shape_cast %221 : vector<1x8x512xf32> to vector<8x512xf32>
    %223 = vector.shape_cast %220 : vector<8x512xf32> to vector<1x8x512xf32>
    tpu.vector_store %arg20[%c10, %c0_156, %c0_157], %223 {strides = array<i32>} : memref<18x8x512xf32, #tpu.memory_space<vmem>>, vector<1x8x512xf32>,
    %224 = vector.extract_strided_slice %198 {offsets = [5, 0, 0], sizes = [1, 8, 512], strides = [1, 1, 1]} : vector<8x8x512xf32> to vector<1x8x512xf32>
    %225 = vector.shape_cast %224 : vector<1x8x512xf32> to vector<8x512xf32>
    %c12 = arith.constant 12 : index
    %c0_158 = arith.constant 0 : index
    %c0_159 = arith.constant 0 : index
    %226 = vector.load %arg20[%c12, %c0_158, %c0_159] : memref<18x8x512xf32, #tpu.memory_space<vmem>>, vector<1x8x512xf32>
    %227 = vector.shape_cast %226 : vector<1x8x512xf32> to vector<8x512xf32>
    %228 = vector.shape_cast %225 : vector<8x512xf32> to vector<1x8x512xf32>
    tpu.vector_store %arg20[%c12, %c0_158, %c0_159], %228 {strides = array<i32>} : memref<18x8x512xf32, #tpu.memory_space<vmem>>, vector<1x8x512xf32>,
    %229 = vector.extract_strided_slice %198 {offsets = [6, 0, 0], sizes = [1, 8, 512], strides = [1, 1, 1]} : vector<8x8x512xf32> to vector<1x8x512xf32>
    %230 = vector.shape_cast %229 : vector<1x8x512xf32> to vector<8x512xf32>
    %c14 = arith.constant 14 : index
    %c0_160 = arith.constant 0 : index
    %c0_161 = arith.constant 0 : index
    %231 = vector.load %arg20[%c14, %c0_160, %c0_161] : memref<18x8x512xf32, #tpu.memory_space<vmem>>, vector<1x8x512xf32>
    %232 = vector.shape_cast %231 : vector<1x8x512xf32> to vector<8x512xf32>
    %233 = vector.shape_cast %230 : vector<8x512xf32> to vector<1x8x512xf32>
    tpu.vector_store %arg20[%c14, %c0_160, %c0_161], %233 {strides = array<i32>} : memref<18x8x512xf32, #tpu.memory_space<vmem>>, vector<1x8x512xf32>,
    %234 = vector.extract_strided_slice %198 {offsets = [7, 0, 0], sizes = [1, 8, 512], strides = [1, 1, 1]} : vector<8x8x512xf32> to vector<1x8x512xf32>
    %235 = vector.shape_cast %234 : vector<1x8x512xf32> to vector<8x512xf32>
    %c16 = arith.constant 16 : index
    %c0_162 = arith.constant 0 : index
    %c0_163 = arith.constant 0 : index
    %236 = vector.load %arg20[%c16, %c0_162, %c0_163] : memref<18x8x512xf32, #tpu.memory_space<vmem>>, vector<1x8x512xf32>
    %237 = vector.shape_cast %236 : vector<1x8x512xf32> to vector<8x512xf32>
    %238 = vector.shape_cast %235 : vector<8x512xf32> to vector<1x8x512xf32>
    tpu.vector_store %arg20[%c16, %c0_162, %c0_163], %238 {strides = array<i32>} : memref<18x8x512xf32, #tpu.memory_space<vmem>>, vector<1x8x512xf32>,
    %c0_164 = arith.constant 0 : index
    %c0_165 = arith.constant 0 : index
    %c0_166 = arith.constant 0 : index
    %239 = vector.load %arg20[%c0_164, %c0_165, %c0_166] : memref<18x8x512xf32, #tpu.memory_space<vmem>>, vector<16x8x512xf32>
    %240 = vector.shape_cast %239 : vector<16x8x512xf32> to vector<128x512xf32>
    %c1_167 = arith.constant 1 : index
    %c0_168 = arith.constant 0 : index
    %c0_169 = arith.constant 0 : index
    %241 = vector.load %arg20[%c1_167, %c0_168, %c0_169] : memref<18x8x512xf32, #tpu.memory_space<vmem>>, vector<16x8x512xf32>
    %242 = vector.shape_cast %241 : vector<16x8x512xf32> to vector<128x512xf32>
    %c0_170 = arith.constant 0 : index
    %c0_171 = arith.constant 0 : index
    %243 = vector.load %arg14[%c0_170, %c0_171] : memref<1024x32xf32, #tpu.memory_space<vmem>>, vector<512x32xf32>
    %cst_172 = arith.constant dense<0.000000e+00> : vector<128x32xf32>
    %244 = tpu.matmul %240, %243, %cst_172 {dimension_numbers = #tpu.dot_dimension_numbers<[1], [0], [0], [1], [0, 0, 1, 1], [], []>} : vector<128x512xf32>, vector<512x32xf32>, vector<128x32xf32> -> vector<128x32xf32>
    %c512 = arith.constant 512 : index
    %c0_173 = arith.constant 0 : index
    %245 = vector.load %arg14[%c512, %c0_173] : memref<1024x32xf32, #tpu.memory_space<vmem>>, vector<512x32xf32>
    %cst_174 = arith.constant dense<0.000000e+00> : vector<128x32xf32>
    %246 = tpu.matmul %242, %245, %cst_174 {dimension_numbers = #tpu.dot_dimension_numbers<[1], [0], [0], [1], [0, 0, 1, 1], [], []>} : vector<128x512xf32>, vector<512x32xf32>, vector<128x32xf32> -> vector<128x32xf32>
    %247 = arith.addf %244, %246 : vector<128x32xf32>
    %c0_175 = arith.constant 0 : index
    %c0_176 = arith.constant 0 : index
    %248 = vector.load %arg16[%c0_175, %c0_176] : memref<1x32xf32, #tpu.memory_space<vmem>>, vector<1x32xf32>
    %249 = vector.broadcast %248 : vector<1x32xf32> to vector<128x32xf32>
    %250 = arith.addf %247, %249 : vector<128x32xf32>
    %251 = arith.negf %250 : vector<128x32xf32>
    %252 = math.exp %251 : vector<128x32xf32>
    %cst_177 = arith.constant 1.000000e+00 : f32
    %253 = vector.broadcast %cst_177 : f32 to vector<128x32xf32>
    %254 = arith.addf %253, %252 : vector<128x32xf32>
    %255 = arith.divf %253, %254 : vector<128x32xf32>
    %256 = vector.shape_cast %255 : vector<128x32xf32> to vector<16x8x32xf32>
    %c0_178 = arith.constant 0 : index
    %c0_179 = arith.constant 0 : index
    %c0_180 = arith.constant 0 : index
    %c0_181 = arith.constant 0 : index
    %257 = vector.load %arg17[%c0_178, %c0_179, %c0_180, %c0_181] : memref<1x32x8x32xf32, #tpu.memory_space<vmem>>, vector<1x16x8x32xf32>
    %258 = vector.shape_cast %257 : vector<1x16x8x32xf32> to vector<16x8x32xf32>
    %259 = vector.shape_cast %256 : vector<16x8x32xf32> to vector<1x16x8x32xf32>
    tpu.vector_store %arg17[%c0_178, %c0_179, %c0_180, %c0_181], %259 {strides = array<i32>} : memref<1x32x8x32xf32, #tpu.memory_space<vmem>>, vector<1x16x8x32xf32>,
    %c1_182 = arith.constant 1 : index
    %c0_183 = arith.constant 0 : index
    %c0_184 = arith.constant 0 : index
    %260 = vector.load %arg20[%c1_182, %c0_183, %c0_184] : memref<18x8x512xf32, #tpu.memory_space<vmem>>, vector<16x8x512xf32>
    %261 = vector.shape_cast %260 : vector<16x8x512xf32> to vector<128x512xf32>
    %c2_185 = arith.constant 2 : index
    %c0_186 = arith.constant 0 : index
    %c0_187 = arith.constant 0 : index
    %262 = vector.load %arg20[%c2_185, %c0_186, %c0_187] : memref<18x8x512xf32, #tpu.memory_space<vmem>>, vector<16x8x512xf32>
    %263 = vector.shape_cast %262 : vector<16x8x512xf32> to vector<128x512xf32>
    %c0_188 = arith.constant 0 : index
    %c0_189 = arith.constant 0 : index
    %264 = vector.load %arg15[%c0_188, %c0_189] : memref<1024x32xf32, #tpu.memory_space<vmem>>, vector<512x32xf32>
    %cst_190 = arith.constant dense<0.000000e+00> : vector<128x32xf32>
    %265 = tpu.matmul %261, %264, %cst_190 {dimension_numbers = #tpu.dot_dimension_numbers<[1], [0], [0], [1], [0, 0, 1, 1], [], []>} : vector<128x512xf32>, vector<512x32xf32>, vector<128x32xf32> -> vector<128x32xf32>
    %c512_191 = arith.constant 512 : index
    %c0_192 = arith.constant 0 : index
    %266 = vector.load %arg15[%c512_191, %c0_192] : memref<1024x32xf32, #tpu.memory_space<vmem>>, vector<512x32xf32>
    %cst_193 = arith.constant dense<0.000000e+00> : vector<128x32xf32>
    %267 = tpu.matmul %263, %266, %cst_193 {dimension_numbers = #tpu.dot_dimension_numbers<[1], [0], [0], [1], [0, 0, 1, 1], [], []>} : vector<128x512xf32>, vector<512x32xf32>, vector<128x32xf32> -> vector<128x32xf32>
    %268 = arith.addf %265, %267 : vector<128x32xf32>
    %c0_194 = arith.constant 0 : index
    %c0_195 = arith.constant 0 : index
    %269 = vector.load %arg16[%c0_194, %c0_195] : memref<1x32xf32, #tpu.memory_space<vmem>>, vector<1x32xf32>
    %270 = vector.broadcast %269 : vector<1x32xf32> to vector<128x32xf32>
    %271 = arith.addf %268, %270 : vector<128x32xf32>
    %272 = arith.negf %271 : vector<128x32xf32>
    %273 = math.exp %272 : vector<128x32xf32>
    %cst_196 = arith.constant 1.000000e+00 : f32
    %274 = vector.broadcast %cst_196 : f32 to vector<128x32xf32>
    %275 = arith.addf %274, %273 : vector<128x32xf32>
    %276 = arith.divf %274, %275 : vector<128x32xf32>
    %277 = vector.shape_cast %276 : vector<128x32xf32> to vector<16x8x32xf32>
    %c0_197 = arith.constant 0 : index
    %c16_198 = arith.constant 16 : index
    %c0_199 = arith.constant 0 : index
    %c0_200 = arith.constant 0 : index
    %278 = vector.load %arg17[%c0_197, %c16_198, %c0_199, %c0_200] : memref<1x32x8x32xf32, #tpu.memory_space<vmem>>, vector<1x16x8x32xf32>
    %279 = vector.shape_cast %278 : vector<1x16x8x32xf32> to vector<16x8x32xf32>
    %280 = vector.shape_cast %277 : vector<16x8x32xf32> to vector<1x16x8x32xf32>
    tpu.vector_store %arg17[%c0_197, %c16_198, %c0_199, %c0_200], %280 {strides = array<i32>} : memref<1x32x8x32xf32, #tpu.memory_space<vmem>>, vector<1x16x8x32xf32>,
    return
  }
  func.func @transform_0(%arg0: i32) -> (i32, i32) {
    %c0_i32 = arith.constant 0 : i32
    %c0_i32_0 = arith.constant 0 : i32
    return %arg0, %c0_i32 : i32, i32
  }
  func.func @transform_1(%arg0: i32) -> (i32, i32) {
    %c0_i32 = arith.constant 0 : i32
    %c0_i32_0 = arith.constant 0 : i32
    %c0_i32_1 = arith.constant 0 : i32
    return %c0_i32, %c0_i32_0 : i32, i32
  }
  func.func @transform_2(%arg0: i32) -> (i32, i32) {
    %c0_i32 = arith.constant 0 : i32
    %c0_i32_0 = arith.constant 0 : i32
    %c0_i32_1 = arith.constant 0 : i32
    return %c0_i32, %c0_i32_0 : i32, i32
  }
  func.func @transform_3(%arg0: i32) -> (i32, i32) {
    %c0_i32 = arith.constant 0 : i32
    %c0_i32_0 = arith.constant 0 : i32
    %c0_i32_1 = arith.constant 0 : i32
    return %c0_i32, %c0_i32_0 : i32, i32
  }
  func.func @transform_4(%arg0: i32) -> (i32, i32) {
    %c0_i32 = arith.constant 0 : i32
    %c0_i32_0 = arith.constant 0 : i32
    %c0_i32_1 = arith.constant 0 : i32
    return %c0_i32, %c0_i32_0 : i32, i32
  }
  func.func @transform_5(%arg0: i32) -> (i32, i32) {
    %c0_i32 = arith.constant 0 : i32
    %c0_i32_0 = arith.constant 0 : i32
    %c0_i32_1 = arith.constant 0 : i32
    return %c0_i32, %c0_i32_0 : i32, i32
  }
  func.func @transform_6(%arg0: i32) -> (i32, i32) {
    %c0_i32 = arith.constant 0 : i32
    %c0_i32_0 = arith.constant 0 : i32
    %c0_i32_1 = arith.constant 0 : i32
    return %c0_i32, %c0_i32_0 : i32, i32
  }
  func.func @transform_7(%arg0: i32) -> (i32, i32) {
    %c0_i32 = arith.constant 0 : i32
    %c0_i32_0 = arith.constant 0 : i32
    %c0_i32_1 = arith.constant 0 : i32
    return %c0_i32, %c0_i32_0 : i32, i32
  }
  func.func @transform_8(%arg0: i32) -> (i32, i32) {
    %c0_i32 = arith.constant 0 : i32
    %c0_i32_0 = arith.constant 0 : i32
    %c0_i32_1 = arith.constant 0 : i32
    return %c0_i32, %c0_i32_0 : i32, i32
  }
  func.func @transform_9(%arg0: i32) -> (i32, i32) {
    %c0_i32 = arith.constant 0 : i32
    %c0_i32_0 = arith.constant 0 : i32
    %c0_i32_1 = arith.constant 0 : i32
    return %c0_i32, %c0_i32_0 : i32, i32
  }
  func.func @transform_10(%arg0: i32) -> (i32, i32) {
    %c0_i32 = arith.constant 0 : i32
    %c0_i32_0 = arith.constant 0 : i32
    %c0_i32_1 = arith.constant 0 : i32
    return %c0_i32, %c0_i32_0 : i32, i32
  }
  func.func @transform_11(%arg0: i32) -> (i32, i32) {
    %c0_i32 = arith.constant 0 : i32
    %c0_i32_0 = arith.constant 0 : i32
    %c0_i32_1 = arith.constant 0 : i32
    return %c0_i32, %c0_i32_0 : i32, i32
  }
  func.func @transform_12(%arg0: i32) -> (i32, i32) {
    %c0_i32 = arith.constant 0 : i32
    %c0_i32_0 = arith.constant 0 : i32
    %c0_i32_1 = arith.constant 0 : i32
    return %c0_i32, %c0_i32_0 : i32, i32
  }
  func.func @transform_13(%arg0: i32) -> (i32, i32) {
    %c0_i32 = arith.constant 0 : i32
    %c0_i32_0 = arith.constant 0 : i32
    %c0_i32_1 = arith.constant 0 : i32
    return %c0_i32, %c0_i32_0 : i32, i32
  }
  func.func @transform_14(%arg0: i32) -> (i32, i32) {
    %c0_i32 = arith.constant 0 : i32
    %c0_i32_0 = arith.constant 0 : i32
    %c0_i32_1 = arith.constant 0 : i32
    return %c0_i32, %c0_i32_0 : i32, i32
  }
  func.func @transform_15(%arg0: i32) -> (i32, i32) {
    %c0_i32 = arith.constant 0 : i32
    %c0_i32_0 = arith.constant 0 : i32
    %c0_i32_1 = arith.constant 0 : i32
    return %c0_i32, %c0_i32_0 : i32, i32
  }
  func.func @transform_16(%arg0: i32) -> (i32, i32, i32, i32) {
    %c0_i32 = arith.constant 0 : i32
    %c0_i32_0 = arith.constant 0 : i32
    %c0_i32_1 = arith.constant 0 : i32
    %c0_i32_2 = arith.constant 0 : i32
    return %arg0, %c0_i32, %c0_i32_0, %c0_i32_1 : i32, i32, i32, i32
  }
}

</mosaic_0001>

<bundles_post_ra>
// kernel: decoder_csvaex_forward.1
= control target key start
LH: loop header
LB: loop body
LE: loop exit
PB: predicated region body
PF: predicated region fallthrough
CT: control target
= control target key end

     0   :  { %s8906_s0 = inlined_call_operand.hbm [shape: f32[8,12], index: 0, kind: input, shape index: {}]   ;;  %s8907_s1 = inlined_call_operand.hbm [shape: f32[12,256], index: 1, kind: input, shape index: {}]   ;;  %s8908_s2 = inlined_call_operand.hbm [shape: f32[1,256], index: 2, kind: input, shape index: {}]   ;;  %s8909_s3 = inlined_call_operand.hbm [shape: f32[256,256], index: 3, kind: input, shape index: {}]   ;;  %s8910_s4 = inlined_call_operand.hbm [shape: f32[1,256], index: 4, kind: input, shape index: {}]   ;;  %s8911_s5 = inlined_call_operand.hbm [shape: f32[256,512], index: 5, kind: input, shape index: {}]   ;;  %s8912_s6 = inlined_call_operand.hbm [shape: f32[1,512], index: 6, kind: input, shape index: {}]   ;;  %s8913_s7 = inlined_call_operand.hbm [shape: f32[256,256], index: 7, kind: input, shape index: {}]   ;;  %s8914_s8 = inlined_call_operand.hbm [shape: f32[256,256], index: 8, kind: input, shape index: {}]   ;;  %s8915_s9 = inlined_call_operand.hbm [shape: f32[1,256], index: 9, kind: input, shape index: {}]   ;;  %s8916_s10 = inlined_call_operand.hbm [shape: f32[512,512], index: 10, kind: input, shape index: {}]   ;;  %s8917_s11 = inlined_call_operand.hbm [shape: f32[512,512], index: 11, kind: input, shape index: {}]   ;;  %s8918_s12 = inlined_call_operand.hbm [shape: f32[1,512], index: 12, kind: input, shape index: {}]   ;;  %s8919_s13 = inlined_call_operand.hbm [shape: f32[1024,32], index: 13, kind: input, shape index: {}]   ;;  %s8920_s14 = inlined_call_operand.hbm [shape: f32[1024,32], index: 14, kind: input, shape index: {}]   ;;  %s8921_s15 = inlined_call_operand.hbm [shape: f32[1,32], index: 15, kind: input, shape index: {}]   ;;  %s8922_s16 = inlined_call_operand.hbm [shape: f32[1,32,8,32], index: 16, kind: output, shape index: {}]  }
   0x1   :  { %8990 = sst [smem:[#allocation78_spill]] %s8906_s0 }
   0x2   :  { %8991 = sst [smem:[#allocation79_spill]] %s8922_s16 }
   0x3   :  { %21 = vsyncpa [#allocation6], 0 }
   0x4   :  { %22 = vsyncpa [#allocation9], 0 }
   0x5   :  { %23 = vsyncpa [#allocation12], 0 }
   0x6   :  { %24 = vsyncpa [#allocation15], 0 }
   0x7   :  { %25 = vsyncpa [#allocation18], 0 }
   0x8   :  { %26 = vsyncpa [#allocation21], 0 }
   0x9   :  { %27 = vsyncpa [#allocation24], 0 }
   0xa   :  { %28 = vsyncpa [#allocation27], 0 }
   0xb   :  { %29 = vsyncpa [#allocation30], 0 }
   0xc   :  { %30 = vsyncpa [#allocation7], 0  ;;  %s7508_s21 = smov [#allocation8]   ;;  %s7114_s25 = scalar_lea.hbm %s8907_s1, 512 }
   0xd   :  { %s46_s22 = sshll.u32 %s7508_s21, 4  ;;  %p7115_p0 = scmp.ne.s32.totalorder %s8907_s1, %s7114_s25  ;;  %s47_s22 = int_to_ptr.vmem [resolvable:$true] %s46_s22 }
   0xe   :  { %p7118_p1 = scmp.lt.u32.totalorder %s7114_s25, %s8907_s1 }
  0x10   :  { %p7120_p2 = pnand %p7118_p1, %p7115_p0 }
  0x12   :  { %7123 = shalt.err (!%p7120_p2)
}
  0x13   :  { %s7124_s30 = scalar_lea.vmem %s47_s22, 512  ;;  %p7129_p4 = scmp.lt.s32.totalorder %s47_s22, %s47_s22 }
  0x14   :  { %p7125_p3 = scmp.ne.s32.totalorder %s47_s22, %s7124_s30  ;;  %p7130_p5 = scmp.lt.s32.totalorder %s7124_s30, %s7124_s30 }
  0x16   :  { %p7131_p6 = por %p7130_p5, %p7129_p4 }
  0x18   :  { %p7132_p7 = pnand %p7131_p6, %p7125_p3 }
  0x1a   :  { %7135 = shalt.err (!%p7132_p7)
}
  0x1b   :  { %s7509_s0 = smov 256   ;;  %s7510_s17 = smov 16  }
  0x1c   :  { %52 = dma.hbm_to_vmem [thread:$0]  %s8907_s1, 512, %s47_s22, [#allocation9], %s7509_s0, %s7509_s0, %s7510_s17  }
  0x1d   :  { %s7511_s20 = smov [#allocation11]   ;;  %s7512_s23 = smov [#allocation14]  }
  0x1e   :  { %s68_s21 = sshll.u32 %s7511_s20, 4  ;;  %s90_s24 = sshll.u32 %s7512_s23, 4  ;;  %s69_s21 = int_to_ptr.vmem [resolvable:$true] %s68_s21  ;;  %s91_s24 = int_to_ptr.vmem [resolvable:$true] %s90_s24 }
  0x1f   :  { %s7136_s27 = scalar_lea.hbm %s8909_s3, 8192 }
  0x20   :  { %p7137_p8 = scmp.ne.s32.totalorder %s8909_s3, %s7136_s27  ;;  %p7140_p9 = scmp.lt.u32.totalorder %s7136_s27, %s8909_s3 }
  0x22   :  { %p7142_p10 = pnand %p7140_p9, %p7137_p8 }
  0x24   :  { %7145 = shalt.err (!%p7142_p10)
}
  0x25   :  { %s7146_s1 = scalar_lea.vmem %s69_s21, 8192  ;;  %p7151_p12 = scmp.lt.s32.totalorder %s69_s21, %s69_s21 }
  0x26   :  { %p7147_p11 = scmp.ne.s32.totalorder %s69_s21, %s7146_s1  ;;  %p7152_p13 = scmp.lt.s32.totalorder %s7146_s1, %s7146_s1 }
  0x28   :  { %p7153_p0 = por %p7152_p13, %p7151_p12 }
  0x2a   :  { %p7154_p1 = pnand %p7153_p0, %p7147_p11 }
  0x2c   :  { %7157 = shalt.err (!%p7154_p1)
}
  0x2d   :  { %74 = dma.hbm_to_vmem [thread:$0]  %s8909_s3, 8192, %s69_s21, [#allocation12], %s7509_s0, %s7509_s0, %s7510_s17  }
  0x2e   :  { %s7158_s20 = scalar_lea.hbm %s8911_s5, 16384 }
  0x2f   :  { %p7159_p2 = scmp.ne.s32.totalorder %s8911_s5, %s7158_s20  ;;  %p7162_p3 = scmp.lt.u32.totalorder %s7158_s20, %s8911_s5 }
  0x31   :  { %p7164_p4 = pnand %p7162_p3, %p7159_p2 }
  0x33   :  { %7167 = shalt.err (!%p7164_p4)
}
  0x34   :  { %s7168_s28 = scalar_lea.vmem %s91_s24, 16384  ;;  %p7173_p6 = scmp.lt.s32.totalorder %s91_s24, %s91_s24 }
  0x35   :  { %p7169_p5 = scmp.ne.s32.totalorder %s91_s24, %s7168_s28  ;;  %p7174_p7 = scmp.lt.s32.totalorder %s7168_s28, %s7168_s28 }
  0x37   :  { %p7175_p8 = por %p7174_p7, %p7173_p6 }
  0x39   :  { %p7176_p9 = pnand %p7175_p8, %p7169_p5 }
  0x3b   :  { %7179 = shalt.err (!%p7176_p9)
}
  0x3c   :  { %s7513_s3 = smov 512   ;;  %s7514_s21 = smov 32  }
  0x3d   :  { %96 = dma.hbm_to_vmem [thread:$0]  %s8911_s5, 16384, %s91_s24, [#allocation15], %s7513_s3, %s7513_s3, %s7514_s21  }
  0x3e   :  { %s7515_s1 = smov [#allocation17]   ;;  %s7516_s18 = smov [#allocation20]  }
  0x3f   :  { %s112_s22 = sshll.u32 %s7515_s1, 4  ;;  %s137_s19 = sshll.u32 %s7516_s18, 4  ;;  %s113_s22 = int_to_ptr.vmem [resolvable:$true] %s112_s22  ;;  %s138_s19 = int_to_ptr.vmem [resolvable:$true] %s137_s19 }
  0x40   :  { %s7180_s23 = scalar_lea.hbm %s8913_s7, 8192 }
  0x41   :  { %p7181_p10 = scmp.ne.s32.totalorder %s8913_s7, %s7180_s23  ;;  %p7184_p11 = scmp.lt.u32.totalorder %s7180_s23, %s8913_s7 }
  0x43   :  { %p7186_p12 = pnand %p7184_p11, %p7181_p10 }
  0x45   :  { %7189 = shalt.err (!%p7186_p12)
}
  0x46   :  { %s7190_s5 = scalar_lea.vmem %s113_s22, 8192  ;;  %p7195_p0 = scmp.lt.s32.totalorder %s113_s22, %s113_s22 }
  0x47   :  { %p7191_p13 = scmp.ne.s32.totalorder %s113_s22, %s7190_s5  ;;  %p7196_p1 = scmp.lt.s32.totalorder %s7190_s5, %s7190_s5 }
  0x49   :  { %p7197_p2 = por %p7196_p1, %p7195_p0 }
  0x4b   :  { %p7198_p3 = pnand %p7197_p2, %p7191_p13 }
  0x4d   :  { %7201 = shalt.err (!%p7198_p3)
}
  0x4e   :  { %118 = dma.hbm_to_vmem [thread:$0]  %s8913_s7, 8192, %s113_s22, [#allocation18], %s7509_s0, %s7509_s0, %s7510_s17  }
  0x4f   :  { %s7202_s18 = scalar_lea.hbm %s8915_s9, 32 }
  0x50   :  { %p7203_p4 = scmp.ne.s32.totalorder %s8915_s9, %s7202_s18  ;;  %p7206_p5 = scmp.lt.u32.totalorder %s7202_s18, %s8915_s9 }
  0x52   :  { %p7208_p6 = pnand %p7206_p5, %p7203_p4 }
  0x54   :  { %7211 = shalt.err (!%p7208_p6)
}
  0x55   :  { %s7212_s26 = scalar_lea.vmem %s138_s19, 32  ;;  %p7217_p8 = scmp.lt.s32.totalorder %s138_s19, %s138_s19 }
  0x56   :  { %p7213_p7 = scmp.ne.s32.totalorder %s138_s19, %s7212_s26  ;;  %p7218_p9 = scmp.lt.s32.totalorder %s7212_s26, %s7212_s26 }
  0x58   :  { %p7219_p10 = por %p7218_p9, %p7217_p8 }
  0x5a   :  { %p7220_p11 = pnand %p7219_p10, %p7213_p7 }
  0x5c   :  { %7223 = shalt.err (!%p7220_p11)
}
  0x5d   :  { %140 = dma.hbm_to_vmem [thread:$0]  %s8915_s9, 32, %s138_s19, [#allocation21]  }
  0x5e   :  { %s7517_s27 = smov [#allocation23]   ;;  %s7518_s5 = smov [#allocation26]  }
  0x5f   :  { %s158_s28 = sshll.u32 %s7517_s27, 4  ;;  %s180_s24 = sshll.u32 %s7518_s5, 4  ;;  %s159_s28 = int_to_ptr.vmem [resolvable:$true] %s158_s28  ;;  %s181_s24 = int_to_ptr.vmem [resolvable:$true] %s180_s24 }
  0x60   :  { %s7224_s1 = scalar_lea.hbm %s8917_s11, 32768 }
  0x61   :  { %p7225_p12 = scmp.ne.s32.totalorder %s8917_s11, %s7224_s1  ;;  %p7228_p13 = scmp.lt.u32.totalorder %s7224_s1, %s8917_s11 }
  0x63   :  { %p7230_p0 = pnand %p7228_p13, %p7225_p12 }
  0x65   :  { %7233 = shalt.err (!%p7230_p0)
}
  0x66   :  { %s7234_s9 = scalar_lea.vmem %s159_s28, 32768  ;;  %p7239_p2 = scmp.lt.s32.totalorder %s159_s28, %s159_s28 }
  0x67   :  { %p7235_p1 = scmp.ne.s32.totalorder %s159_s28, %s7234_s9  ;;  %p7240_p3 = scmp.lt.s32.totalorder %s7234_s9, %s7234_s9 }
  0x69   :  { %p7241_p4 = por %p7240_p3, %p7239_p2 }
  0x6b   :  { %p7242_p5 = pnand %p7241_p4, %p7235_p1 }
  0x6d   :  { %7245 = shalt.err (!%p7242_p5)
}
  0x6e   :  { %164 = dma.hbm_to_vmem [thread:$0]  %s8917_s11, 32768, %s159_s28, [#allocation24], %s7513_s3, %s7513_s3, %s7514_s21  }
  0x6f   :  { %s7246_s22 = scalar_lea.hbm %s8919_s13, 16384 }
  0x70   :  { %p7247_p6 = scmp.ne.s32.totalorder %s8919_s13, %s7246_s22  ;;  %p7250_p7 = scmp.lt.u32.totalorder %s7246_s22, %s8919_s13 }
  0x72   :  { %p7252_p8 = pnand %p7250_p7, %p7247_p6 }
  0x74   :  { %7255 = shalt.err (!%p7252_p8)
}
  0x75   :  { %s7256_s1 = scalar_lea.vmem %s181_s24, 16384  ;;  %p7261_p10 = scmp.lt.s32.totalorder %s181_s24, %s181_s24 }
  0x76   :  { %p7257_p9 = scmp.ne.s32.totalorder %s181_s24, %s7256_s1  ;;  %p7262_p11 = scmp.lt.s32.totalorder %s7256_s1, %s7256_s1 }
  0x78   :  { %p7263_p12 = por %p7262_p11, %p7261_p10 }
  0x7a   :  { %p7264_p13 = pnand %p7263_p12, %p7257_p9 }
  0x7c   :  { %7267 = shalt.err (!%p7264_p13)
}
  0x7d   :  { %s7519_s11 = smov 128   ;;  %s7520_s28 = smov 8  }
  0x7e   :  { %186 = dma.hbm_to_vmem [thread:$0]  %s8919_s13, 16384, %s181_s24, [#allocation27], %s7519_s11, %s7519_s11, %s7520_s28  }
  0x7f   :  { %s7521_s20 = smov [#allocation5]   ;;  %s7522_s9 = smov [#allocation10]  }
  0x80   :  { %s37_s23 = sshll.u32 %s7521_s20, 4  ;;  %s59_s19 = sshll.u32 %s7522_s9, 4  ;;  %s38_s23 = int_to_ptr.vmem [resolvable:$true] %s37_s23  ;;  %s60_s19 = int_to_ptr.vmem [resolvable:$true] %s59_s19 }
  0x81   :  { %s8992_s7 = sld [smem:[#allocation78_spill]] }
  0x87   :  { %s7268_s22 = scalar_lea.hbm %s8992_s7, 128 }
  0x88   :  { %p7269_p0 = scmp.ne.s32.totalorder %s8992_s7, %s7268_s22  ;;  %p7272_p1 = scmp.lt.u32.totalorder %s7268_s22, %s8992_s7 }
  0x8a   :  { %p7274_p2 = pnand %p7272_p1, %p7269_p0 }
  0x8c   :  { %7277 = shalt.err (!%p7274_p2)
}
  0x8d   :  { %s7278_s13 = scalar_lea.vmem %s38_s23, 128  ;;  %p7283_p4 = scmp.lt.s32.totalorder %s38_s23, %s38_s23 }
  0x8e   :  { %p7279_p3 = scmp.ne.s32.totalorder %s38_s23, %s7278_s13  ;;  %p7284_p5 = scmp.lt.s32.totalorder %s7278_s13, %s7278_s13 }
  0x90   :  { %p7285_p6 = por %p7284_p5, %p7283_p4 }
  0x92   :  { %p7286_p7 = pnand %p7285_p6, %p7279_p3 }
  0x94   :  { %7289 = shalt.err (!%p7286_p7)
}
  0x95   :  { %40 = dma.hbm_to_vmem [thread:$0]  %s8992_s7, 128, %s38_s23, [#allocation6]  }
  0x96   :  { %s7290_s20 = scalar_lea.hbm %s8908_s2, 32 }
  0x97   :  { %p7291_p8 = scmp.ne.s32.totalorder %s8908_s2, %s7290_s20  ;;  %p7294_p9 = scmp.lt.u32.totalorder %s7290_s20, %s8908_s2 }
  0x99   :  { %p7296_p10 = pnand %p7294_p9, %p7291_p8 }
  0x9b   :  { %7299 = shalt.err (!%p7296_p10)
}
  0x9c   :  { %s7300_s27 = scalar_lea.vmem %s60_s19, 32  ;;  %p7305_p12 = scmp.lt.s32.totalorder %s60_s19, %s60_s19 }
  0x9d   :  { %p7301_p11 = scmp.ne.s32.totalorder %s60_s19, %s7300_s27  ;;  %p7306_p13 = scmp.lt.s32.totalorder %s7300_s27, %s7300_s27 }
  0x9f   :  { %p7307_p0 = por %p7306_p13, %p7305_p12 }
  0xa1   :  { %p7308_p1 = pnand %p7307_p0, %p7301_p11 }
  0xa3   :  { %7311 = shalt.err (!%p7308_p1)
}
  0xa4   :  { %62 = dma.hbm_to_vmem [thread:$0]  %s8908_s2, 32, %s60_s19, [#allocation9]  }
  0xa5   :  { %s7523_s5 = smov [#allocation13]   ;;  %s7524_s30 = smov [#allocation16]  }
  0xa6   :  { %s81_s29 = sshll.u32 %s7523_s5, 4  ;;  %s103_s13 = sshll.u32 %s7524_s30, 4  ;;  %s82_s29 = int_to_ptr.vmem [resolvable:$true] %s81_s29  ;;  %s104_s13 = int_to_ptr.vmem [resolvable:$true] %s103_s13 }
  0xa7   :  { %s7312_s18 = scalar_lea.hbm %s8910_s4, 32 }
  0xa8   :  { %p7313_p2 = scmp.ne.s32.totalorder %s8910_s4, %s7312_s18  ;;  %p7316_p3 = scmp.lt.u32.totalorder %s7312_s18, %s8910_s4 }
  0xaa   :  { %p7318_p4 = pnand %p7316_p3, %p7313_p2 }
  0xac   :  { %7321 = shalt.err (!%p7318_p4)
}
  0xad   :  { %s7322_s2 = scalar_lea.vmem %s82_s29, 32  ;;  %p7327_p6 = scmp.lt.s32.totalorder %s82_s29, %s82_s29 }
  0xae   :  { %p7323_p5 = scmp.ne.s32.totalorder %s82_s29, %s7322_s2  ;;  %p7328_p7 = scmp.lt.s32.totalorder %s7322_s2, %s7322_s2 }
  0xb0   :  { %p7329_p8 = por %p7328_p7, %p7327_p6 }
  0xb2   :  { %p7330_p9 = pnand %p7329_p8, %p7323_p5 }
  0xb4   :  { %7333 = shalt.err (!%p7330_p9)
}
  0xb5   :  { %84 = dma.hbm_to_vmem [thread:$0]  %s8910_s4, 32, %s82_s29, [#allocation12]  }
  0xb6   :  { %s7334_s23 = scalar_lea.hbm %s8912_s6, 64 }
  0xb7   :  { %p7335_p10 = scmp.ne.s32.totalorder %s8912_s6, %s7334_s23  ;;  %p7338_p11 = scmp.lt.u32.totalorder %s7334_s23, %s8912_s6 }
  0xb9   :  { %p7340_p12 = pnand %p7338_p11, %p7335_p10 }
  0xbb   :  { %7343 = shalt.err (!%p7340_p12)
}
  0xbc   :  { %s7344_s1 = scalar_lea.vmem %s104_s13, 64  ;;  %p7349_p0 = scmp.lt.s32.totalorder %s104_s13, %s104_s13 }
  0xbd   :  { %p7345_p13 = scmp.ne.s32.totalorder %s104_s13, %s7344_s1  ;;  %p7350_p1 = scmp.lt.s32.totalorder %s7344_s1, %s7344_s1 }
  0xbf   :  { %p7351_p2 = por %p7350_p1, %p7349_p0 }
  0xc1   :  { %p7352_p3 = pnand %p7351_p2, %p7345_p13 }
  0xc3   :  { %7355 = shalt.err (!%p7352_p3)
}
  0xc4   :  { %106 = dma.hbm_to_vmem [thread:$0]  %s8912_s6, 64, %s104_s13, [#allocation15]  }
  0xc5   :  { %s7525_s18 = smov [#allocation19]   ;;  %s7526_s20 = smov [#allocation22]  }
  0xc6   :  { %s124_s16 = sshll.u32 %s7525_s18, 4  ;;  %s146_s9 = sshll.u32 %s7526_s20, 4  ;;  %s125_s16 = int_to_ptr.vmem [resolvable:$true] %s124_s16  ;;  %s147_s9 = int_to_ptr.vmem [resolvable:$true] %s146_s9 }
  0xc7   :  { %s7356_s19 = scalar_lea.hbm %s8914_s8, 8192 }
  0xc8   :  { %p7357_p4 = scmp.ne.s32.totalorder %s8914_s8, %s7356_s19  ;;  %p7360_p5 = scmp.lt.u32.totalorder %s7356_s19, %s8914_s8 }
  0xca   :  { %p7362_p6 = pnand %p7360_p5, %p7357_p4 }
  0xcc   :  { %7365 = shalt.err (!%p7362_p6)
}
  0xcd   :  { %s7366_s6 = scalar_lea.vmem %s125_s16, 8192  ;;  %p7371_p8 = scmp.lt.s32.totalorder %s125_s16, %s125_s16 }
  0xce   :  { %p7367_p7 = scmp.ne.s32.totalorder %s125_s16, %s7366_s6  ;;  %p7372_p9 = scmp.lt.s32.totalorder %s7366_s6, %s7366_s6 }
  0xd0   :  { %p7373_p10 = por %p7372_p9, %p7371_p8 }
  0xd2   :  { %p7374_p11 = pnand %p7373_p10, %p7367_p7 }
  0xd4   :  { %7377 = shalt.err (!%p7374_p11)
}
  0xd5   :  { %130 = dma.hbm_to_vmem [thread:$0]  %s8914_s8, 8192, %s125_s16, [#allocation18], %s7509_s0, %s7509_s0, %s7510_s17  }
  0xd6   :  { %s7378_s24 = scalar_lea.hbm %s8916_s10, 32768 }
  0xd7   :  { %p7379_p12 = scmp.ne.s32.totalorder %s8916_s10, %s7378_s24  ;;  %p7382_p13 = scmp.lt.u32.totalorder %s7378_s24, %s8916_s10 }
  0xd9   :  { %p7384_p0 = pnand %p7382_p13, %p7379_p12 }
  0xdb   :  { %7387 = shalt.err (!%p7384_p0)
}
  0xdc   :  { %s7388_s20 = scalar_lea.vmem %s147_s9, 32768  ;;  %p7393_p2 = scmp.lt.s32.totalorder %s147_s9, %s147_s9 }
  0xdd   :  { %p7389_p1 = scmp.ne.s32.totalorder %s147_s9, %s7388_s20  ;;  %p7394_p3 = scmp.lt.s32.totalorder %s7388_s20, %s7388_s20 }
  0xdf   :  { %p7395_p4 = por %p7394_p3, %p7393_p2 }
  0xe1   :  { %p7396_p5 = pnand %p7395_p4, %p7389_p1 }
  0xe3   :  { %7399 = shalt.err (!%p7396_p5)
}
  0xe4   :  { %152 = dma.hbm_to_vmem [thread:$0]  %s8916_s10, 32768, %s147_s9, [#allocation21], %s7513_s3, %s7513_s3, %s7514_s21  }
  0xe5   :  { %s7527_s17 = smov [#allocation25]   ;;  %s7528_s25 = smov [#allocation28]  }
  0xe6   :  { %s171_s16 = sshll.u32 %s7527_s17, 4  ;;  %s192_s2 = sshll.u32 %s7528_s25, 4  ;;  %s172_s16 = int_to_ptr.vmem [resolvable:$true] %s171_s16  ;;  %s193_s2 = int_to_ptr.vmem [resolvable:$true] %s192_s2 }
  0xe7   :  { %s7400_s22 = scalar_lea.hbm %s8918_s12, 64 }
  0xe8   :  { %p7401_p6 = scmp.ne.s32.totalorder %s8918_s12, %s7400_s22  ;;  %p7404_p7 = scmp.lt.u32.totalorder %s7400_s22, %s8918_s12 }
  0xea   :  { %p7406_p8 = pnand %p7404_p7, %p7401_p6 }
  0xec   :  { %7409 = shalt.err (!%p7406_p8)
}
  0xed   :  { %s7410_s10 = scalar_lea.vmem %s172_s16, 64  ;;  %p7415_p10 = scmp.lt.s32.totalorder %s172_s16, %s172_s16 }
  0xee   :  { %p7411_p9 = scmp.ne.s32.totalorder %s172_s16, %s7410_s10  ;;  %p7416_p11 = scmp.lt.s32.totalorder %s7410_s10, %s7410_s10 }
  0xf0   :  { %p7417_p12 = por %p7416_p11, %p7415_p10 }
  0xf2   :  { %p7418_p13 = pnand %p7417_p12, %p7411_p9 }
  0xf4   :  { %7421 = shalt.err (!%p7418_p13)
}
  0xf5   :  { %174 = dma.hbm_to_vmem [thread:$0]  %s8918_s12, 64, %s172_s16, [#allocation24]  }
  0xf6   :  { %s7422_s5 = scalar_lea.hbm %s8920_s14, 16384 }
  0xf7   :  { %p7423_p0 = scmp.ne.s32.totalorder %s8920_s14, %s7422_s5  ;;  %p7426_p1 = scmp.lt.u32.totalorder %s7422_s5, %s8920_s14 }
  0xf9   :  { %p7428_p2 = pnand %p7426_p1, %p7423_p0 }
  0xfb   :  { %7431 = shalt.err (!%p7428_p2)
}
  0xfc   :  { %s7432_s29 = scalar_lea.vmem %s193_s2, 16384  ;;  %p7437_p4 = scmp.lt.s32.totalorder %s193_s2, %s193_s2 }
  0xfd   :  { %p7433_p3 = scmp.ne.s32.totalorder %s193_s2, %s7432_s29  ;;  %p7438_p5 = scmp.lt.s32.totalorder %s7432_s29, %s7432_s29 }
  0xff   :  { %p7439_p6 = por %p7438_p5, %p7437_p4 }
 0x101   :  { %p7440_p7 = pnand %p7439_p6, %p7433_p3 }
 0x103   :  { %7443 = shalt.err (!%p7440_p7)
}
 0x104   :  { %198 = dma.hbm_to_vmem [thread:$0]  %s8920_s14, 16384, %s193_s2, [#allocation27], %s7519_s11, %s7519_s11, %s7520_s28  }
 0x105   :  { %s7529_s20 = smov [#allocation29]   ;;  %s7444_s16 = scalar_lea.hbm %s8921_s15, 16 }
 0x106   :  { %s205_s8 = sshll.u32 %s7529_s20, 4  ;;  %p7445_p8 = scmp.ne.s32.totalorder %s8921_s15, %s7444_s16  ;;  %s206_s8 = int_to_ptr.vmem [resolvable:$true] %s205_s8 }
 0x107   :  { %p7448_p9 = scmp.lt.u32.totalorder %s7444_s16, %s8921_s15 }
 0x109   :  { %p7450_p10 = pnand %p7448_p9, %p7445_p8 }
 0x10b   :  { %7453 = shalt.err (!%p7450_p10)
}
 0x10c   :  { %s7454_s27 = scalar_lea.vmem %s206_s8, 16  ;;  %s7458_s14 = scalar_lea.vmem %s206_s8, 32 }
 0x10d   :  { %p7455_p11 = scmp.ne.s32.totalorder %s206_s8, %s7454_s27  ;;  %p7459_p12 = scmp.lt.s32.totalorder %s206_s8, %s206_s8 }
 0x10e   :  { %p7460_p13 = scmp.lt.s32.totalorder %s7458_s14, %s7454_s27 }
 0x110   :  { %p7461_p0 = por %p7460_p13, %p7459_p12 }
 0x112   :  { %p7462_p1 = pnand %p7461_p0, %p7455_p11 }
 0x114   :  { %7465 = shalt.err (!%p7462_p1)
}
 0x115   :  { %208 = dma.hbm_to_vmem [thread:$0]  %s8921_s15, 16, %s206_s8, [#allocation30]  }
 0x116   :  { %7488 = dma.done.wait [#allocation6], 128  }
 0x117   :  { %7489 = vsyncadd [#allocation6], 4294967168 }
 0x118   :  { %7490 = dma.done.wait [#allocation9], 544  }
 0x119   :  { %7491 = vsyncadd [#allocation9], 4294966752 }
 0x11a   :  { %7492 = dma.done.wait [#allocation12], 8224  }
 0x11b   :  { %7493 = vsyncadd [#allocation12], 4294959072 }
 0x11c   :  { %7494 = dma.done.wait [#allocation15], 16448  }
 0x11d   :  { %7495 = vsyncadd [#allocation15], 4294950848 }
 0x11e   :  { %7496 = dma.done.wait [#allocation18], 16384  }
 0x11f   :  { %7497 = vsyncadd [#allocation18], 4294950912 }
 0x120   :  { %7498 = dma.done.wait [#allocation21], 32800  }
 0x121   :  { %7499 = vsyncadd [#allocation21], 4294934496 }
 0x122   :  { %7500 = dma.done.wait [#allocation24], 32832  }
 0x123   :  { %7501 = vsyncadd [#allocation24], 4294934464 }
 0x124   :  { %7502 = dma.done.wait [#allocation27], 32768  }
 0x125   :  { %7503 = vsyncadd [#allocation27], 4294934528 }
 0x126   :  { %7504 = dma.done.wait [#allocation30], 16  }
 0x127   :  { %7505 = vsyncadd [#allocation30], 4294967280  ;;  %v8925_v0 = vmov 0.0   ;;  %vm295_vm0 = vcmask 1043456   ;;  %vm7531_vm1 = vmmov 1   ;;  %v276_v2 = vld [vmem:[#allocation8 + $0x8] sm:$0xff] }
 0x128   :  { %366 = vmatprep.mubr.f32.mxu0 %v8925_v0  ;;  %vm7838_vm2 = vmpackc.low %vm295_vm0, %vm7531_vm1  ;;  %v278_v3 = vld [vmem:[#allocation8 + $0x18] sm:$0xf]  ;;  %v275_v4 = vld [vmem:[#allocation8] sm:$0xff]  ;;  %vm291_vm3 = vcmask 97280   ;;  %vm4095_vm4 = vcmask 261120   ;;  %s7532_s15 = smov [#allocation31]  }
 0x129   :  { %v5786_v5 = vpack.c.bf16 %v278_v3, %v276_v2  ;;  %v277_v6 = vld [vmem:[#allocation8 + $0x10] sm:$0xf]  ;;  %v274_v9 = vld [vmem:[#allocation5] sm:$0xff]  ;;  %v375_v11 = vld [vmem:[#allocation11] sm:$0xff]  ;;  %s5089_s6 = sshll.u32 %s7532_s15, 4  ;;  %s5090_s6 = int_to_ptr.vmem [resolvable:$true] %s5089_s6 }
 0x12a   :  { %v376_v7 = vld [vmem:[#allocation11 + $0x8] sm:$0xff]  ;;  %v5789_v8 = vpack.c.bf16 %v277_v6, %v275_v4  ;;  %v378_v10 = vld [vmem:[#allocation11 + $0x18] sm:$0xff]  ;;  %v377_v12 = vld [vmem:[#allocation11 + $0x10] sm:$0xff]  ;;  %s7466_s13 = scalar_lea.vmem %s5090_s6, 4096  ;;  %p7471_p3 = scmp.lt.s32.totalorder %s5090_s6, %s5090_s6 }
 0x12b   :  { %5788 = vmatprep.subr.msk.bf16.mxu0 %vm7838_vm2, %v5786_v5  ;;  %v5792_v13 = vpack.c.bf16 %v378_v10, %v376_v7  ;;  %v5794_v14 = vpack.c.bf16 %v377_v12, %v375_v11  ;;  %v380_v15 = vld [vmem:[#allocation11 + $0x28] sm:$0xff]  ;;  %v382_v16 = vld [vmem:[#allocation11 + $0x38] sm:$0xff]  ;;  %v379_v17 = vld [vmem:[#allocation11 + $0x20] sm:$0xff]  ;;  %p7467_p2 = scmp.ne.s32.totalorder %s5090_s6, %s7466_s13  ;;  %p7472_p4 = scmp.lt.s32.totalorder %s7466_s13, %s7466_s13 }
 0x12c   :  { %5791 = vmatpush1.bf16.msk.msra.mxu0 %vm7838_vm2, %v5789_v8  ;;  %v5796_v18 = vpack.c.bf16 %v382_v16, %v380_v15  ;;  %v381_v19 = vld [vmem:[#allocation11 + $0x30] sm:$0xff]  ;;  %v384_v20 = vld [vmem:[#allocation11 + $0x48] sm:$0xff]  ;;  %v386_v21 = vld [vmem:[#allocation11 + $0x58] sm:$0xff] }
 0x12d   :  { %5793 = vmatprep.subr.bf16.mxu1 %v5792_v13  ;;  %v5798_v22 = vpack.c.bf16 %v381_v19, %v379_v17  ;;  %v5800_v23 = vpack.c.bf16 %v386_v21, %v384_v20  ;;  %v383_v24 = vld [vmem:[#allocation11 + $0x40] sm:$0xff]  ;;  %v385_v25 = vld [vmem:[#allocation11 + $0x50] sm:$0xff]  ;;  %v388_v26 = vld [vmem:[#allocation11 + $0x68] sm:$0xff]  ;;  %p7473_p5 = por %p7472_p4, %p7471_p3 }
 0x12e   :  { %5795 = vmatpush1.bf16.msra.mxu1 %v5794_v14  ;;  %v390_v27 = vld [vmem:[#allocation11 + $0x78] sm:$0xff]  ;;  %v5802_v28 = vpack.c.bf16 %v385_v25, %v383_v24  ;;  %v387_v30 = vld [vmem:[#allocation11 + $0x60] sm:$0xff]  ;;  %v389_v31 = vld [vmem:[#allocation11 + $0x70] sm:$0xff] }
 0x12f   :  { %5111 = vmatmul.mubr.msk.f32.vlgmr.msra.gmra.mrb[0].mxu0 %vm291_vm3, %v274_v9  ;;  %5797 = vmatprep.subr.bf16.mxu1 %v5796_v18  ;;  %v5804_v29 = vpack.c.bf16 %v390_v27, %v388_v26  ;;  %v392_v32 = vld [vmem:[#allocation11 + $0x88] sm:$0xff]  ;;  %v394_v33 = vld [vmem:[#allocation11 + $0x98] sm:$0xff]  ;;  %v5806_v34 = vpack.c.bf16 %v389_v31, %v387_v30  ;;  %v391_v36 = vld [vmem:[#allocation11 + $0x80] sm:$0xff]  ;;  %p7474_p6 = pnand %p7473_p5, %p7467_p2 }
 0x130   :  { %v5808_v35 = vpack.c.bf16 %v394_v33, %v392_v32  ;;  %v393_v37 = vld [vmem:[#allocation11 + $0x90] sm:$0xff]  ;;  %v396_v38 = vld [vmem:[#allocation11 + $0xa8] sm:$0xff]  ;;  %v398_v39 = vld [vmem:[#allocation11 + $0xb8] sm:$0xff] }
 0x131   :  { %v5810_v40 = vpack.c.bf16 %v393_v37, %v391_v36  ;;  %v5812_v41 = vpack.c.bf16 %v398_v39, %v396_v38  ;;  %v395_v42 = vld [vmem:[#allocation11 + $0xa0] sm:$0xff]  ;;  %v397_v43 = vld [vmem:[#allocation11 + $0xb0] sm:$0xff]  ;;  %v400_v44 = vld [vmem:[#allocation11 + $0xc8] sm:$0xff] }
 0x132   :  { %5799 = vmatpush1.bf16.msra.mxu1 %v5798_v22  ;;  %v402_v45 = vld [vmem:[#allocation11 + $0xd8] sm:$0xff]  ;;  %v5814_v46 = vpack.c.bf16 %v397_v43, %v395_v42  ;;  %v399_v48 = vld [vmem:[#allocation11 + $0xc0] sm:$0xff]  ;;  %v401_v49 = vld [vmem:[#allocation11 + $0xd0] sm:$0xff] }
 0x133   :  { %5801 = vmatprep.subr.bf16.mxu1 %v5800_v23  ;;  %v5816_v47 = vpack.c.bf16 %v402_v45, %v400_v44  ;;  %v404_v50 = vld [vmem:[#allocation11 + $0xe8] sm:$0xff]  ;;  %v406_v51 = vld [vmem:[#allocation11 + $0xf8] sm:$0xff]  ;;  %v5818_v52 = vpack.c.bf16 %v401_v49, %v399_v48  ;;  %v403_v54 = vld [vmem:[#allocation11 + $0xe0] sm:$0xff] }
 0x134   :  { %v5820_v53 = vpack.c.bf16 %v406_v51, %v404_v50  ;;  %v405_v55 = vld [vmem:[#allocation11 + $0xf0] sm:$0xff]  ;;  %v408_v56 = vld [vmem:[#allocation11 + $0x108] sm:$0xff]  ;;  %v410_v57 = vld [vmem:[#allocation11 + $0x118] sm:$0xff] }
 0x135   :  { %v5822_v58 = vpack.c.bf16 %v405_v55, %v403_v54  ;;  %v5824_v59 = vpack.c.bf16 %v410_v57, %v408_v56  ;;  %v407_v60 = vld [vmem:[#allocation11 + $0x100] sm:$0xff]  ;;  %v409_v61 = vld [vmem:[#allocation11 + $0x110] sm:$0xff]  ;;  %v412_v62 = vld [vmem:[#allocation11 + $0x128] sm:$0xff] }
 0x136   :  { %5803 = vmatpush1.bf16.msra.mxu1 %v5802_v28  ;;  %v414_v63 = vld [vmem:[#allocation11 + $0x138] sm:$0xff]  ;;  %v5826_v1 = vpack.c.bf16 %v409_v61, %v407_v60  ;;  %v411_v3 = vld [vmem:[#allocation11 + $0x120] sm:$0xff]  ;;  %v413_v4 = vld [vmem:[#allocation11 + $0x130] sm:$0xff] }
 0x137   :  { %5805 = vmatprep.subr.bf16.mxu1 %v5804_v29  ;;  %v5828_v2 = vpack.c.bf16 %v414_v63, %v412_v62  ;;  %v416_v5 = vld [vmem:[#allocation11 + $0x148] sm:$0xff]  ;;  %v418_v6 = vld [vmem:[#allocation11 + $0x158] sm:$0xff]  ;;  %v5830_v7 = vpack.c.bf16 %v413_v4, %v411_v3  ;;  %v415_v9 = vld [vmem:[#allocation11 + $0x140] sm:$0xff] }
 0x138   :  { %v5832_v8 = vpack.c.bf16 %v418_v6, %v416_v5  ;;  %v417_v10 = vld [vmem:[#allocation11 + $0x150] sm:$0xff]  ;;  %v420_v11 = vld [vmem:[#allocation11 + $0x168] sm:$0xff]  ;;  %v422_v12 = vld [vmem:[#allocation11 + $0x178] sm:$0xff] }
 0x139   :  { %v5834_v13 = vpack.c.bf16 %v417_v10, %v415_v9  ;;  %v5836_v14 = vpack.c.bf16 %v422_v12, %v420_v11  ;;  %v419_v15 = vld [vmem:[#allocation11 + $0x160] sm:$0xff]  ;;  %v421_v16 = vld [vmem:[#allocation11 + $0x170] sm:$0xff]  ;;  %v424_v17 = vld [vmem:[#allocation11 + $0x188] sm:$0xff] }
 0x13a   :  { %5807 = vmatpush1.bf16.msra.mxu1 %v5806_v34  ;;  %v426_v18 = vld [vmem:[#allocation11 + $0x198] sm:$0xff]  ;;  %v5838_v19 = vpack.c.bf16 %v421_v16, %v419_v15  ;;  %v423_v21 = vld [vmem:[#allocation11 + $0x180] sm:$0xff]  ;;  %v425_v22 = vld [vmem:[#allocation11 + $0x190] sm:$0xff] }
 0x13b   :  { %5809 = vmatprep.subr.bf16.mxu1 %v5808_v35  ;;  %v5840_v20 = vpack.c.bf16 %v426_v18, %v424_v17  ;;  %v428_v23 = vld [vmem:[#allocation11 + $0x1a8] sm:$0xff]  ;;  %v430_v24 = vld [vmem:[#allocation11 + $0x1b8] sm:$0xff]  ;;  %v5842_v25 = vpack.c.bf16 %v425_v22, %v423_v21  ;;  %v427_v27 = vld [vmem:[#allocation11 + $0x1a0] sm:$0xff] }
 0x13c   :  { %v5844_v26 = vpack.c.bf16 %v430_v24, %v428_v23  ;;  %v429_v28 = vld [vmem:[#allocation11 + $0x1b0] sm:$0xff]  ;;  %v432_v29 = vld [vmem:[#allocation11 + $0x1c8] sm:$0xff]  ;;  %v434_v30 = vld [vmem:[#allocation11 + $0x1d8] sm:$0xff] }
 0x13d   :  { %v5846_v31 = vpack.c.bf16 %v429_v28, %v427_v27  ;;  %v5848_v32 = vpack.c.bf16 %v434_v30, %v432_v29  ;;  %v431_v33 = vld [vmem:[#allocation11 + $0x1c0] sm:$0xff]  ;;  %v433_v34 = vld [vmem:[#allocation11 + $0x1d0] sm:$0xff]  ;;  %v436_v36 = vld [vmem:[#allocation11 + $0x1e8] sm:$0xff] }
 0x13e   :  { %5811 = vmatpush1.bf16.msra.mxu1 %v5810_v40  ;;  %v5850_v35 = vpack.c.bf16 %v433_v34, %v431_v33  ;;  %v438_v37 = vld [vmem:[#allocation11 + $0x1f8] sm:$0xff]  ;;  %v435_v39 = vld [vmem:[#allocation11 + $0x1e0] sm:$0xff]  ;;  %v437_v40 = vld [vmem:[#allocation11 + $0x1f0] sm:$0xff] }
 0x13f   :  { %5813 = vmatprep.subr.bf16.mxu1 %v5812_v41  ;;  %v5852_v38 = vpack.c.bf16 %v438_v37, %v436_v36  ;;  %v5854_v41 = vpack.c.bf16 %v437_v40, %v435_v39  ;;  %v525_v42 = vld [vmem:[#allocation14 + $0x8] sm:$0xff]  ;;  %v527_v44 = vld [vmem:[#allocation14 + $0x18] sm:$0xff]  ;;  %v528_v48 = vld [vmem:[#allocation14 + $0x20] sm:$0xff] }
 0x140   :  { %v529_v43 = vld [vmem:[#allocation14 + $0x28] sm:$0xff]  ;;  %v532_v54 = vld [vmem:[#allocation14 + $0x40] sm:$0xff] }
 0x141   :  { %v5856_v45 = vpack.c.bf16 %v529_v43, %v525_v42  ;;  %v533_v51 = vld [vmem:[#allocation14 + $0x48] sm:$0xff]  ;;  %v536_v55 = vld [vmem:[#allocation14 + $0x60] sm:$0xff] }
 0x142   :  { %5815 = vmatpush1.bf16.msra.mxu1 %v5814_v46  ;;  %v531_v46 = vld [vmem:[#allocation14 + $0x38] sm:$0xff]  ;;  %v5862_v56 = vpack.c.bf16 %v536_v55, %v532_v54  ;;  %v541_v57 = vld [vmem:[#allocation14 + $0x88] sm:$0xff]  ;;  %v540_v60 = vld [vmem:[#allocation14 + $0x80] sm:$0xff] }
 0x143   :  { %5817 = vmatprep.subr.bf16.mxu1 %v5816_v47  ;;  %v524_v47 = vld [vmem:[#allocation14] sm:$0xff]  ;;  %v5920_v49 = vpack.c.bf16 %v531_v46, %v527_v44  ;;  %5857 = vmatprep.subr.bf16.mxu0 %v5856_v45  ;;  %v549_v63 = vld [vmem:[#allocation14 + $0xc8] sm:$0xff] }
 0x144   :  { %v5858_v50 = vpack.c.bf16 %v528_v48, %v524_v47  ;;  %v544_v61 = vld [vmem:[#allocation14 + $0xa0] sm:$0xff]  ;;  %v557_v6 = vld [vmem:[#allocation14 + $0x108] sm:$0xff] }
 0x145   :  { %v5866_v62 = vpack.c.bf16 %v544_v61, %v540_v60  ;;  %v548_v3 = vld [vmem:[#allocation14 + $0xc0] sm:$0xff]  ;;  %v565_v12 = vld [vmem:[#allocation14 + $0x148] sm:$0xff] }
 0x146   :  { %5819 = vmatpush1.bf16.msra.mxu1 %v5818_v52  ;;  %v537_v52 = vld [vmem:[#allocation14 + $0x68] sm:$0xff]  ;;  %5859 = vmatpush1.bf16.msra.mxu0 %v5858_v50  ;;  %v552_v4 = vld [vmem:[#allocation14 + $0xe0] sm:$0xff] }
 0x147   :  { %5821 = vmatprep.subr.bf16.mxu1 %v5820_v53  ;;  %v5860_v53 = vpack.c.bf16 %v537_v52, %v533_v51  ;;  %v5870_v5 = vpack.c.bf16 %v552_v4, %v548_v3  ;;  %v556_v9 = vld [vmem:[#allocation14 + $0x100] sm:$0xff]  ;;  %v573_v18 = vld [vmem:[#allocation14 + $0x188] sm:$0xff] }
 0x148   :  { %v560_v10 = vld [vmem:[#allocation14 + $0x120] sm:$0xff]  ;;  %v581_v24 = vld [vmem:[#allocation14 + $0x1c8] sm:$0xff] }
 0x149   :  { %5861 = vmatprep.subr.bf16.mxu0 %v5860_v53  ;;  %v5874_v11 = vpack.c.bf16 %v560_v10, %v556_v9  ;;  %v564_v15 = vld [vmem:[#allocation14 + $0x140] sm:$0xff]  ;;  %v589_v30 = vld [vmem:[#allocation14 + $0x208] sm:$0xff]  ;;  %v279_v9 = vld [vmem:[#allocation10] sm:$0x3] }
 0x14a   :  { %5823 = vmatpush1.bf16.msra.mxu1 %v5822_v58  ;;  %v545_v58 = vld [vmem:[#allocation14 + $0xa8] sm:$0xff]  ;;  %5863 = vmatpush1.bf16.msra.mxu0 %v5862_v56  ;;  %v568_v16 = vld [vmem:[#allocation14 + $0x160] sm:$0xff] }
 0x14b   :  { %5825 = vmatprep.subr.bf16.mxu1 %v5824_v59  ;;  %v5864_v59 = vpack.c.bf16 %v545_v58, %v541_v57  ;;  %v5878_v17 = vpack.c.bf16 %v568_v16, %v564_v15  ;;  %v572_v21 = vld [vmem:[#allocation14 + $0x180] sm:$0xff]  ;;  %v597_v36 = vld [vmem:[#allocation14 + $0x248] sm:$0xff]  ;;  %v526_v16 = vld [vmem:[#allocation14 + $0x10] sm:$0xff] }
 0x14c   :  { %v576_v22 = vld [vmem:[#allocation14 + $0x1a0] sm:$0xff]  ;;  %v601_v37 = vld [vmem:[#allocation14 + $0x268] sm:$0xff] }
 0x14d   :  { %5865 = vmatprep.subr.bf16.mxu0 %v5864_v59  ;;  %v5882_v23 = vpack.c.bf16 %v576_v22, %v572_v21  ;;  %v580_v27 = vld [vmem:[#allocation14 + $0x1c0] sm:$0xff]  ;;  %v605_v42 = vld [vmem:[#allocation14 + $0x288] sm:$0xff] }
 0x14e   :  { %5827 = vmatpush1.bf16.msra.mxu1 %v5826_v1  ;;  %v553_v1 = vld [vmem:[#allocation14 + $0xe8] sm:$0xff]  ;;  %5867 = vmatpush1.bf16.msra.mxu0 %v5866_v62  ;;  %v584_v28 = vld [vmem:[#allocation14 + $0x1e0] sm:$0xff] }
 0x14f   :  { %5829 = vmatprep.subr.bf16.mxu1 %v5828_v2  ;;  %v5868_v2 = vpack.c.bf16 %v553_v1, %v549_v63  ;;  %v5886_v29 = vpack.c.bf16 %v584_v28, %v580_v27  ;;  %v588_v33 = vld [vmem:[#allocation14 + $0x200] sm:$0xff]  ;;  %v609_v43 = vld [vmem:[#allocation14 + $0x2a8] sm:$0xff]  ;;  %v543_v27 = vld [vmem:[#allocation14 + $0x98] sm:$0xff] }
 0x150   :  { %v592_v34 = vld [vmem:[#allocation14 + $0x220] sm:$0xff]  ;;  %v5896_v44 = vpack.c.bf16 %v609_v43, %v605_v42  ;;  %v613_v48 = vld [vmem:[#allocation14 + $0x2c8] sm:$0xff]  ;;  %v547_v28 = vld [vmem:[#allocation14 + $0xb8] sm:$0xff] }
 0x151   :  { %5869 = vmatprep.subr.bf16.mxu0 %v5868_v2  ;;  %v596_v39 = vld [vmem:[#allocation14 + $0x240] sm:$0xff]  ;;  %v621_v54 = vld [vmem:[#allocation14 + $0x308] sm:$0xff]  ;;  %v558_v43 = vld [vmem:[#allocation14 + $0x110] sm:$0xff] }
 0x152   :  { %5831 = vmatpush1.bf16.msra.mxu1 %v5830_v7  ;;  %v561_v7 = vld [vmem:[#allocation14 + $0x128] sm:$0xff]  ;;  %5871 = vmatpush1.bf16.msra.mxu0 %v5870_v5  ;;  %v600_v40 = vld [vmem:[#allocation14 + $0x260] sm:$0xff] }
 0x153   :  { %5833 = vmatprep.subr.bf16.mxu1 %v5832_v8  ;;  %v5872_v8 = vpack.c.bf16 %v561_v7, %v557_v6  ;;  %v604_v45 = vld [vmem:[#allocation14 + $0x280] sm:$0xff]  ;;  %v625_v55 = vld [vmem:[#allocation14 + $0x328] sm:$0xff]  ;;  %v281_v6 = vlaneseq }
 0x154   :  { %v608_v46 = vld [vmem:[#allocation14 + $0x2a0] sm:$0xff]  ;;  %v5904_v56 = vpack.c.bf16 %v625_v55, %v621_v54  ;;  %v629_v60 = vld [vmem:[#allocation14 + $0x348] sm:$0xff]  ;;  %v574_v55 = vld [vmem:[#allocation14 + $0x190] sm:$0xff] }
 0x155   :  { %5873 = vmatprep.subr.bf16.mxu0 %v5872_v8  ;;  %v5898_v47 = vpack.c.bf16 %v608_v46, %v604_v45  ;;  %v612_v51 = vld [vmem:[#allocation14 + $0x2c0] sm:$0xff]  ;;  %v633_v61 = vld [vmem:[#allocation14 + $0x368] sm:$0xff]  ;;  %v7846_v7 = vshrl.u32 %v281_v6, 7  ;;  %v567_v45 = vld [vmem:[#allocation14 + $0x158] sm:$0xff] }
 0x156   :  { %5835 = vmatpush1.bf16.msra.mxu1 %v5834_v13  ;;  %v569_v13 = vld [vmem:[#allocation14 + $0x168] sm:$0xff]  ;;  %5875 = vmatpush1.bf16.msra.mxu0 %v5874_v11  ;;  %v616_v52 = vld [vmem:[#allocation14 + $0x2e0] sm:$0xff]  ;;  %v5908_v62 = vpack.c.bf16 %v633_v61, %v629_v60  ;;  %v571_v46 = vld [vmem:[#allocation14 + $0x178] sm:$0xff] }
 0x157   :  { %5837 = vmatprep.subr.bf16.mxu1 %v5836_v14  ;;  %v5876_v14 = vpack.c.bf16 %v569_v13, %v565_v12  ;;  %v5902_v53 = vpack.c.bf16 %v616_v52, %v612_v51  ;;  %v620_v57 = vld [vmem:[#allocation14 + $0x300] sm:$0xff]  ;;  %v637_v3 = vld [vmem:[#allocation14 + $0x388] sm:$0xff]  ;;  %v7849_v8 = vsub.s32 0, %v7846_v7  ;;  %v7852_v10 = vsub.s32 1, %v7846_v7  ;;  %v575_v51 = vld [vmem:[#allocation14 + $0x198] sm:$0xff] }
 0x158   :  { %v624_v58 = vld [vmem:[#allocation14 + $0x320] sm:$0xff]  ;;  %v641_v4 = vld [vmem:[#allocation14 + $0x3a8] sm:$0xff]  ;;  %v579_v52 = vld [vmem:[#allocation14 + $0x1b8] sm:$0xff] }
 0x159   :  { %5877 = vmatprep.subr.bf16.mxu0 %v5876_v14  ;;  %v5906_v59 = vpack.c.bf16 %v624_v58, %v620_v57  ;;  %v628_v63 = vld [vmem:[#allocation14 + $0x340] sm:$0xff]  ;;  %v5912_v5 = vpack.c.bf16 %v641_v4, %v637_v3  ;;  %v284_v11 = vrot.slane %v279_v9, %v7849_v8  ;;  %v288_v12 = vrot.slane %v279_v9, %v7852_v10  ;;  %v583_v57 = vld [vmem:[#allocation14 + $0x1d8] sm:$0xff]  ;;  %v582_v61 = vld [vmem:[#allocation14 + $0x1d0] sm:$0xff] }
 0x15a   :  { %5839 = vmatpush1.bf16.msra.mxu1 %v5838_v19  ;;  %v577_v19 = vld [vmem:[#allocation14 + $0x1a8] sm:$0xff]  ;;  %5879 = vmatpush1.bf16.msra.mxu0 %v5878_v17  ;;  %v632_v1 = vld [vmem:[#allocation14 + $0x360] sm:$0xff]  ;;  %v530_v17 = vld [vmem:[#allocation14 + $0x30] sm:$0xff]  ;;  %v5944_v54 = vpack.c.bf16 %v579_v52, %v575_v51 }
 0x15b   :  { %5841 = vmatprep.subr.bf16.mxu1 %v5840_v20  ;;  %v5880_v20 = vpack.c.bf16 %v577_v19, %v573_v18  ;;  %v5910_v2 = vpack.c.bf16 %v632_v1, %v628_v63  ;;  %v535_v19 = vld [vmem:[#allocation14 + $0x58] sm:$0xff]  ;;  %v5922_v22 = vpack.c.bf16 %v530_v17, %v526_v16  ;;  %v590_v4 = vld [vmem:[#allocation14 + $0x210] sm:$0xff] }
 0x15c   :  { %v587_v58 = vld [vmem:[#allocation14 + $0x1f8] sm:$0xff] }
 0x15d   :  { %5881 = vmatprep.subr.bf16.mxu0 %v5880_v20  ;;  %v539_v20 = vld [vmem:[#allocation14 + $0x78] sm:$0xff]  ;;  %v5948_v60 = vpack.c.bf16 %v587_v58, %v583_v57  ;;  %v646_v58 = vld [vmem:[#allocation14 + $0x3d0] sm:$0xff] }
 0x15e   :  { %5843 = vmatpush1.bf16.msra.mxu1 %v5842_v25  ;;  %v585_v25 = vld [vmem:[#allocation14 + $0x1e8] sm:$0xff]  ;;  %5883 = vmatpush1.bf16.msra.mxu0 %v5882_v23  ;;  %v591_v63 = vld [vmem:[#allocation14 + $0x218] sm:$0xff] }
 0x15f   :  { %5845 = vmatprep.subr.bf16.mxu1 %v5844_v26  ;;  %v5884_v26 = vpack.c.bf16 %v585_v25, %v581_v24  ;;  %v5924_v24 = vpack.c.bf16 %v539_v20, %v535_v19  ;;  %v534_v25 = vld [vmem:[#allocation14 + $0x50] sm:$0xff]  ;;  %v595_v1 = vld [vmem:[#allocation14 + $0x238] sm:$0xff] }
 0x160   :  { %v5952_v3 = vpack.c.bf16 %v595_v1, %v591_v63  ;;  %v599_v6 = vld [vmem:[#allocation14 + $0x258] sm:$0xff]  ;;  %v606_v19 = vld [vmem:[#allocation14 + $0x290] sm:$0xff] }
 0x161   :  { %5885 = vmatprep.subr.bf16.mxu0 %v5884_v26  ;;  %v538_v26 = vld [vmem:[#allocation14 + $0x70] sm:$0xff]  ;;  %v603_v9 = vld [vmem:[#allocation14 + $0x278] sm:$0xff] }
 0x162   :  { %5847 = vmatpush1.bf16.msra.mxu1 %v5846_v31  ;;  %v593_v31 = vld [vmem:[#allocation14 + $0x228] sm:$0xff]  ;;  %5887 = vmatpush1.bf16.msra.mxu0 %v5886_v29  ;;  %v5926_v29 = vpack.c.bf16 %v538_v26, %v534_v25  ;;  %v611_v16 = vld [vmem:[#allocation14 + $0x2b8] sm:$0xff]  ;;  %v610_v20 = vld [vmem:[#allocation14 + $0x2b0] sm:$0xff] }
 0x163   :  { %5849 = vmatprep.subr.bf16.mxu1 %v5848_v32  ;;  %v5888_v32 = vpack.c.bf16 %v593_v31, %v589_v30  ;;  %v5928_v30 = vpack.c.bf16 %v547_v28, %v543_v27  ;;  %v542_v31 = vld [vmem:[#allocation14 + $0x90] sm:$0xff]  ;;  %v623_v27 = vld [vmem:[#allocation14 + $0x318] sm:$0xff] }
 0x164   :  { %v614_v25 = vld [vmem:[#allocation14 + $0x2d0] sm:$0xff]  ;;  %v627_v28 = vld [vmem:[#allocation14 + $0x338] sm:$0xff] }
 0x165   :  { %5889 = vmatprep.subr.bf16.mxu0 %v5888_v32  ;;  %v546_v32 = vld [vmem:[#allocation14 + $0xb0] sm:$0xff]  ;;  %v647_v51 = vld [vmem:[#allocation14 + $0x3d8] sm:$0xff] }
 0x166   :  { %5851 = vmatpush1.bf16.msra.mxu1 %v5850_v35  ;;  %v5890_v35 = vpack.c.bf16 %v592_v34, %v588_v33  ;;  %v551_v33 = vld [vmem:[#allocation14 + $0xd8] sm:$0xff]  ;;  %v618_v26 = vld [vmem:[#allocation14 + $0x2f0] sm:$0xff] }
 0x167   :  { %5853 = vmatprep.subr.bf16.mxu1 %v5852_v38  ;;  %v5892_v38 = vpack.c.bf16 %v601_v37, %v597_v36  ;;  %v555_v34 = vld [vmem:[#allocation14 + $0xf8] sm:$0xff]  ;;  %v550_v37 = vld [vmem:[#allocation14 + $0xd0] sm:$0xff] }
 0x168   :  { %5891 = vmatpush1.bf16.msra.mxu0 %v5890_v35  ;;  %v5930_v35 = vpack.c.bf16 %v546_v32, %v542_v31  ;;  %v5932_v36 = vpack.c.bf16 %v555_v34, %v551_v33  ;;  %v622_v31 = vld [vmem:[#allocation14 + $0x310] sm:$0xff]  ;;  %v631_v33 = vld [vmem:[#allocation14 + $0x358] sm:$0xff] }
 0x169   :  { %5893 = vmatprep.subr.bf16.mxu0 %v5892_v38  ;;  %v554_v38 = vld [vmem:[#allocation14 + $0xf0] sm:$0xff]  ;;  %v635_v34 = vld [vmem:[#allocation14 + $0x378] sm:$0xff] }
 0x16a   :  { %5855 = vmatpush1.bf16.msra.mxu1 %v5854_v41  ;;  %v5894_v41 = vpack.c.bf16 %v600_v40, %v596_v39  ;;  %v559_v39 = vld [vmem:[#allocation14 + $0x118] sm:$0xff]  ;;  %v626_v32 = vld [vmem:[#allocation14 + $0x330] sm:$0xff] }
 0x16b   :  { %5921 = vmatprep.subr.bf16.mxu1 %v5920_v49  ;;  %v617_v49 = vld [vmem:[#allocation14 + $0x2e8] sm:$0xff]  ;;  %v563_v40 = vld [vmem:[#allocation14 + $0x138] sm:$0xff] }
 0x16c   :  { %5895 = vmatpush1.bf16.msra.mxu0 %v5894_v41  ;;  %v5900_v50 = vpack.c.bf16 %v617_v49, %v613_v48  ;;  %v5934_v41 = vpack.c.bf16 %v554_v38, %v550_v37  ;;  %v5936_v42 = vpack.c.bf16 %v563_v40, %v559_v39  ;;  %v5940_v48 = vpack.c.bf16 %v571_v46, %v567_v45  ;;  %v566_v49 = vld [vmem:[#allocation14 + $0x150] sm:$0xff]  ;;  %v639_v39 = vld [vmem:[#allocation14 + $0x398] sm:$0xff] }
 0x16d   :  { %5897 = vmatprep.subr.bf16.mxu0 %v5896_v44  ;;  %v562_v44 = vld [vmem:[#allocation14 + $0x130] sm:$0xff]  ;;  %v643_v40 = vld [vmem:[#allocation14 + $0x3b8] sm:$0xff] }
 0x16e   :  { %v630_v37 = vld [vmem:[#allocation14 + $0x350] sm:$0xff] }
 0x16f   :  { %v634_v38 = vld [vmem:[#allocation14 + $0x370] sm:$0xff] }
 0x170   :  { %5899 = vmatpush1.bf16.msra.mxu0 %v5898_v47  ;;  %v5938_v47 = vpack.c.bf16 %v562_v44, %v558_v43  ;;  %v636_v43 = vld [vmem:[#allocation14 + $0x380] sm:$0xff]  ;;  %v638_v45 = vld [vmem:[#allocation14 + $0x390] sm:$0xff] }
 0x171   :  { %5901 = vmatprep.subr.bf16.mxu0 %v5900_v50  ;;  %v570_v50 = vld [vmem:[#allocation14 + $0x170] sm:$0xff]  ;;  %v640_v44 = vld [vmem:[#allocation14 + $0x3a0] sm:$0xff] }
 0x172   :  { %v5914_v46 = vpack.c.bf16 %v640_v44, %v636_v43  ;;  %v1127_v1 = vld [vmem:[#allocation19 + $0x8] sm:$0xff]  ;;  %v1136_v43 = vld [vmem:[#allocation19 + $0x50] sm:$0xff] }
 0x173   :  { %v881_v44 = vld [vmem:[#allocation17 + $0x168] sm:$0xff] }
 0x174   :  { %5903 = vmatpush1.bf16.msra.mxu0 %v5902_v53  ;;  %v5942_v53 = vpack.c.bf16 %v570_v50, %v566_v49  ;;  %v645_v49 = vld [vmem:[#allocation14 + $0x3c8] sm:$0xff] }
 0x175   :  { %5905 = vmatprep.subr.bf16.mxu0 %v5904_v56  ;;  %v578_v56 = vld [vmem:[#allocation14 + $0x1b0] sm:$0xff]  ;;  %v649_v50 = vld [vmem:[#allocation14 + $0x3e8] sm:$0xff] }
 0x176   :  { %v5916_v52 = vpack.c.bf16 %v649_v50, %v645_v49  ;;  %v880_v50 = vld [vmem:[#allocation17 + $0x160] sm:$0xff] }
 0x178   :  { %5907 = vmatpush1.bf16.msra.mxu0 %v5906_v59  ;;  %v5946_v59 = vpack.c.bf16 %v578_v56, %v574_v55  ;;  %v648_v55 = vld [vmem:[#allocation14 + $0x3e0] sm:$0xff] }
 0x179   :  { %5909 = vmatprep.subr.bf16.mxu0 %v5908_v62  ;;  %v586_v62 = vld [vmem:[#allocation14 + $0x1f0] sm:$0xff] }
 0x17c   :  { %5911 = vmatpush1.bf16.msra.mxu0 %v5910_v2  ;;  %v5950_v2 = vpack.c.bf16 %v586_v62, %v582_v61  ;;  %v869_v61 = vld [vmem:[#allocation17 + $0x108] sm:$0xff]  ;;  %v871_v62 = vld [vmem:[#allocation17 + $0x118] sm:$0xff] }
 0x17d   :  { %5913 = vmatprep.subr.bf16.mxu0 %v5912_v5  ;;  %v594_v5 = vld [vmem:[#allocation14 + $0x230] sm:$0xff]  ;;  %v5984_v63 = vpack.c.bf16 %v871_v62, %v869_v61  ;;  %v884_v62 = vld [vmem:[#allocation17 + $0x180] sm:$0xff] }
 0x180   :  { %5915 = vmatpush1.bf16.msra.mxu0 %v5914_v46  ;;  %v1139_v46 = vld [vmem:[#allocation19 + $0x68] sm:$0xff] }
 0x181   :  { %5917 = vmatprep.subr.bf16.mxu0 %v5916_v52 }
 0x202   :  { %v368_v13 = vpop.f32.mrb[0].mxu0 }
 0x203   :  { %v369_v14 = vadd.f32 %v368_v13, %v284_v11  ;;  %v370_v15 = vpop.f32.mrb[1].mxu0  ;;  %v5954_v11 = vpack.c.bf16 %v594_v5, %v590_v4  ;;  %v598_v13 = vld [vmem:[#allocation14 + $0x250] sm:$0xff]  ;;  %v439_v4 = vld [vmem:[#allocation13] sm:$0x3] }
 0x204   :  { %v371_v18 = vadd.f32 %v370_v15, %v288_v12  ;;  %v5956_v12 = vpack.c.bf16 %v603_v9, %v599_v6  ;;  %v607_v15 = vld [vmem:[#allocation14 + $0x298] sm:$0xff]  ;;  %v444_v5 = vrot.slane %v439_v4, %v7849_v8  ;;  %v448_v6 = vrot.slane %v439_v4, %v7852_v10 }
 0x205   :  { %v373_v23 = vmax.f32 %v369_v14, 0.0  ;;  %v602_v14 = vld [vmem:[#allocation14 + $0x270] sm:$0xff] }
 0x206   :  { %v374_v21 = vmax.f32 %v371_v18, 0.0  ;;  %v5958_v17 = vpack.c.bf16 %v602_v14, %v598_v13  ;;  %v5960_v18 = vpack.c.bf16 %v611_v16, %v607_v15  ;;  %v1126_v15 = vld [vmem:[#allocation19] sm:$0xff]  ;;  %v1128_v16 = vld [vmem:[#allocation19 + $0x10] sm:$0xff] }
 0x207   :  { %v1144_v4 = vld [vmem:[#allocation19 + $0x90] sm:$0xff] }
 0x208   :  { %515 = vmatprep.mubr.f32.mxu1 %v374_v21  ;;  %v615_v21 = vld [vmem:[#allocation14 + $0x2d8] sm:$0xff] }
 0x209   :  { %516 = vmatmul.mubr.f32.vlgmr.msra.gmra.mrb[0].mxu1 %v373_v23  ;;  %v5962_v23 = vpack.c.bf16 %v610_v20, %v606_v19  ;;  %v875_v19 = vld [vmem:[#allocation17 + $0x138] sm:$0xff]  ;;  %v1131_v20 = vld [vmem:[#allocation19 + $0x28] sm:$0xff] }
 0x20a   :  { %5923 = vmatpush1.bf16.msra.mxu1 %v5922_v22  ;;  %v619_v22 = vld [vmem:[#allocation14 + $0x2f8] sm:$0xff] }
 0x20b   :  { %5925 = vmatprep.subr.bf16.mxu1 %v5924_v24  ;;  %v5964_v24 = vpack.c.bf16 %v619_v22, %v615_v21  ;;  %v1133_v21 = vld [vmem:[#allocation19 + $0x38] sm:$0xff] }
 0x20e   :  { %5927 = vmatpush1.bf16.msra.mxu1 %v5926_v29  ;;  %v5966_v29 = vpack.c.bf16 %v618_v26, %v614_v25  ;;  %v872_v25 = vld [vmem:[#allocation17 + $0x120] sm:$0xff]  ;;  %v874_v26 = vld [vmem:[#allocation17 + $0x130] sm:$0xff] }
 0x20f   :  { %5929 = vmatprep.subr.bf16.mxu1 %v5928_v30  ;;  %v5968_v30 = vpack.c.bf16 %v627_v28, %v623_v27 }
 0x212   :  { %5931 = vmatpush1.bf16.msra.mxu1 %v5930_v35  ;;  %v5970_v35 = vpack.c.bf16 %v626_v32, %v622_v31  ;;  %v1132_v31 = vld [vmem:[#allocation19 + $0x30] sm:$0xff]  ;;  %v877_v32 = vld [vmem:[#allocation17 + $0x148] sm:$0xff] }
 0x213   :  { %5933 = vmatprep.subr.bf16.mxu1 %v5932_v36  ;;  %v5972_v36 = vpack.c.bf16 %v635_v34, %v631_v33  ;;  %v879_v33 = vld [vmem:[#allocation17 + $0x158] sm:$0xff]  ;;  %v1135_v34 = vld [vmem:[#allocation19 + $0x48] sm:$0xff] }
 0x216   :  { %5935 = vmatpush1.bf16.msra.mxu1 %v5934_v41  ;;  %v5974_v41 = vpack.c.bf16 %v634_v38, %v630_v37  ;;  %v876_v38 = vld [vmem:[#allocation17 + $0x140] sm:$0xff] }
 0x217   :  { %5937 = vmatprep.subr.bf16.mxu1 %v5936_v42  ;;  %v5976_v42 = vpack.c.bf16 %v643_v40, %v639_v39  ;;  %v878_v39 = vld [vmem:[#allocation17 + $0x150] sm:$0xff]  ;;  %v5992_v40 = vpack.c.bf16 %v879_v33, %v877_v32 }
 0x21a   :  { %5939 = vmatpush1.bf16.msra.mxu1 %v5938_v47  ;;  %v642_v47 = vld [vmem:[#allocation14 + $0x3b0] sm:$0xff] }
 0x21b   :  { %5941 = vmatprep.subr.bf16.mxu1 %v5940_v48  ;;  %v5978_v48 = vpack.c.bf16 %v642_v47, %v638_v45  ;;  %v883_v45 = vld [vmem:[#allocation17 + $0x178] sm:$0xff] }
 0x21c   :  { %v1141_v47 = vld [vmem:[#allocation19 + $0x78] sm:$0xff]  ;;  %v5996_v52 = vpack.c.bf16 %v883_v45, %v881_v44 }
 0x21e   :  { %5943 = vmatpush1.bf16.msra.mxu1 %v5942_v53  ;;  %v651_v53 = vld [vmem:[#allocation14 + $0x3f8] sm:$0xff] }
 0x21f   :  { %5945 = vmatprep.subr.bf16.mxu1 %v5944_v54  ;;  %v644_v54 = vld [vmem:[#allocation14 + $0x3c0] sm:$0xff]  ;;  %v5980_v56 = vpack.c.bf16 %v651_v53, %v647_v51  ;;  %v882_v51 = vld [vmem:[#allocation17 + $0x170] sm:$0xff]  ;;  %v6092_v53 = vpack.c.bf16 %v1141_v47, %v1139_v46  ;;  %v837_v46 = vld [vmem:[#allocation17 + $0x8] sm:$0xff] }
 0x220   :  { %v5918_v57 = vpack.c.bf16 %v648_v55, %v644_v54  ;;  %v1138_v54 = vld [vmem:[#allocation19 + $0x60] sm:$0xff]  ;;  %v1140_v55 = vld [vmem:[#allocation19 + $0x70] sm:$0xff]  ;;  %v839_v47 = vld [vmem:[#allocation17 + $0x18] sm:$0xff] }
 0x221   :  { %v6094_v61 = vpack.c.bf16 %v1140_v55, %v1138_v54  ;;  %v7862_v54 = vsub.s32 2, %v7846_v7 }
 0x222   :  { %5947 = vmatpush1.bf16.msra.mxu1 %v5946_v59  ;;  %v650_v59 = vld [vmem:[#allocation14 + $0x3f0] sm:$0xff]  ;;  %5919 = vmatpush1.bf16.msra.mxu0 %v5918_v57  ;;  %v887_v57 = vld [vmem:[#allocation17 + $0x198] sm:$0xff] }
 0x223   :  { %5949 = vmatprep.subr.bf16.mxu1 %v5948_v60  ;;  %v5982_v60 = vpack.c.bf16 %v650_v59, %v646_v58  ;;  %5985 = vmatprep.subr.bf16.mxu0 %v5984_v63  ;;  %v1143_v58 = vld [vmem:[#allocation19 + $0x88] sm:$0xff]  ;;  %v1145_v59 = vld [vmem:[#allocation19 + $0x98] sm:$0xff]  ;;  %v886_v63 = vld [vmem:[#allocation17 + $0x190] sm:$0xff] }
 0x226   :  { %5951 = vmatpush1.bf16.msra.mxu1 %v5950_v2  ;;  %v1129_v2 = vld [vmem:[#allocation19 + $0x18] sm:$0xff] }
 0x227   :  { %5953 = vmatprep.subr.bf16.mxu1 %v5952_v3  ;;  %v6080_v3 = vpack.c.bf16 %v1129_v2, %v1127_v1  ;;  %v6096_v2 = vpack.c.bf16 %v1145_v59, %v1143_v58 }
 0x22a   :  { %5955 = vmatpush1.bf16.msra.mxu1 %v5954_v11  ;;  %v868_v11 = vld [vmem:[#allocation17 + $0x100] sm:$0xff] }
 0x22b   :  { %5957 = vmatprep.subr.bf16.mxu1 %v5956_v12  ;;  %v870_v12 = vld [vmem:[#allocation17 + $0x110] sm:$0xff] }
 0x22e   :  { %5959 = vmatpush1.bf16.msra.mxu1 %v5958_v17  ;;  %v873_v17 = vld [vmem:[#allocation17 + $0x128] sm:$0xff] }
 0x22f   :  { %5961 = vmatprep.subr.bf16.mxu1 %v5960_v18  ;;  %v5988_v28 = vpack.c.bf16 %v875_v19, %v873_v17  ;;  %v1148_v19 = vld [vmem:[#allocation19 + $0xb0] sm:$0xff] }
 0x232   :  { %5963 = vmatpush1.bf16.msra.mxu1 %v5962_v23  ;;  %v5986_v23 = vpack.c.bf16 %v870_v12, %v868_v11  ;;  %v1149_v11 = vld [vmem:[#allocation19 + $0xb8] sm:$0xff]  ;;  %v6002_v12 = vpack.c.bf16 %v886_v63, %v884_v62 }
 0x233   :  { %5965 = vmatprep.subr.bf16.mxu1 %v5964_v24  ;;  %v6082_v24 = vpack.c.bf16 %v1128_v16, %v1126_v15  ;;  %v890_v15 = vld [vmem:[#allocation17 + $0x1b0] sm:$0xff] }
 0x236   :  { %5967 = vmatpush1.bf16.msra.mxu1 %v5966_v29  ;;  %v6084_v29 = vpack.c.bf16 %v1133_v21, %v1131_v20  ;;  %v893_v20 = vld [vmem:[#allocation17 + $0x1c8] sm:$0xff]  ;;  %v895_v21 = vld [vmem:[#allocation17 + $0x1d8] sm:$0xff] }
 0x237   :  { %5969 = vmatprep.subr.bf16.mxu1 %v5968_v30  ;;  %v1130_v30 = vld [vmem:[#allocation19 + $0x20] sm:$0xff] }
 0x238   :  { %v6086_v37 = vpack.c.bf16 %v1132_v31, %v1130_v30  ;;  %v1150_v30 = vld [vmem:[#allocation19 + $0xc0] sm:$0xff]  ;;  %v1152_v31 = vld [vmem:[#allocation19 + $0xd0] sm:$0xff] }
 0x239   :  { %v6106_v33 = vpack.c.bf16 %v1152_v31, %v1150_v30  ;;  %v1582_v30 = vld [vmem:[#allocation22 + $0x470] sm:$0xff] }
 0x23a   :  { %5971 = vmatpush1.bf16.msra.mxu1 %v5970_v35  ;;  %v1137_v35 = vld [vmem:[#allocation19 + $0x58] sm:$0xff] }
 0x23b   :  { %5973 = vmatprep.subr.bf16.mxu1 %v5972_v36  ;;  %v5990_v36 = vpack.c.bf16 %v874_v26, %v872_v25  ;;  %v892_v26 = vld [vmem:[#allocation17 + $0x1c0] sm:$0xff] }
 0x23e   :  { %5975 = vmatpush1.bf16.msra.mxu1 %v5974_v41  ;;  %v6088_v41 = vpack.c.bf16 %v1137_v35, %v1135_v34  ;;  %v897_v34 = vld [vmem:[#allocation17 + $0x1e8] sm:$0xff]  ;;  %v899_v35 = vld [vmem:[#allocation17 + $0x1f8] sm:$0xff] }
 0x23f   :  { %5977 = vmatprep.subr.bf16.mxu1 %v5976_v42  ;;  %v1134_v42 = vld [vmem:[#allocation19 + $0x40] sm:$0xff] }
 0x240   :  { %v6090_v49 = vpack.c.bf16 %v1136_v43, %v1134_v42  ;;  %v1154_v42 = vld [vmem:[#allocation19 + $0xe0] sm:$0xff]  ;;  %v1156_v43 = vld [vmem:[#allocation19 + $0xf0] sm:$0xff] }
 0x241   :  { %v6110_v45 = vpack.c.bf16 %v1156_v43, %v1154_v42  ;;  %v1586_v42 = vld [vmem:[#allocation22 + $0x490] sm:$0xff] }
 0x242   :  { %5979 = vmatpush1.bf16.msra.mxu1 %v5978_v48  ;;  %v5994_v48 = vpack.c.bf16 %v878_v39, %v876_v38  ;;  %v898_v38 = vld [vmem:[#allocation17 + $0x1f0] sm:$0xff]  ;;  %v1155_v39 = vld [vmem:[#allocation19 + $0xe8] sm:$0xff] }
 0x243   :  { %5981 = vmatprep.subr.bf16.mxu1 %v5980_v56  ;;  %v885_v56 = vld [vmem:[#allocation17 + $0x188] sm:$0xff]  ;;  %v1590_v43 = vld [vmem:[#allocation22 + $0x4b0] sm:$0xff] }
 0x244   :  { %v6000_v1 = vpack.c.bf16 %v887_v57, %v885_v56  ;;  %v836_v56 = vld [vmem:[#allocation17] sm:$0xff]  ;;  %v838_v57 = vld [vmem:[#allocation17 + $0x10] sm:$0xff] }
 0x246   :  { %5983 = vmatpush1.bf16.msra.mxu1 %v5982_v60  ;;  %v5998_v60 = vpack.c.bf16 %v882_v51, %v880_v50  ;;  %v1575_v50 = vld [vmem:[#allocation22 + $0x438] sm:$0xff] }
 0x247   :  { %6081 = vmatprep.subr.bf16.mxu1 %v6080_v3  ;;  %v1142_v3 = vld [vmem:[#allocation19 + $0x80] sm:$0xff] }
 0x2dc   :  { %v517_v9 = vpop.f32.mrb[0].mxu1 }
 0x2dd   :  { %v518_v13 = vadd.f32 %v517_v9, %v444_v5  ;;  %v519_v14 = vpop.f32.mrb[1].mxu1  ;;  %v889_v5 = vld [vmem:[#allocation17 + $0x1a8] sm:$0xff] }
 0x2de   :  { %v520_v18 = vadd.f32 %v519_v14, %v448_v6  ;;  %v891_v6 = vld [vmem:[#allocation17 + $0x1b8] sm:$0xff]  ;;  %v1147_v9 = vld [vmem:[#allocation19 + $0xa8] sm:$0xff]  ;;  %v888_v14 = vld [vmem:[#allocation17 + $0x1a0] sm:$0xff] }
 0x2df   :  { %v522_v27 = vmax.f32 %v518_v13, 0.0  ;;  %v6098_v13 = vpack.c.bf16 %v1144_v4, %v1142_v3  ;;  %v6004_v16 = vpack.c.bf16 %v891_v6, %v889_v5  ;;  %v6100_v17 = vpack.c.bf16 %v1149_v11, %v1147_v9  ;;  %v1574_v3 = vld [vmem:[#allocation22 + $0x430] sm:$0xff] }
 0x2e0   :  { %v523_v22 = vmax.f32 %v520_v18, 0.0  ;;  %v1146_v18 = vld [vmem:[#allocation19 + $0xa0] sm:$0xff]  ;;  %v7866_v4 = vsub.s32 3, %v7846_v7  ;;  %v6018_v5 = vpack.c.bf16 %v838_v57, %v836_v56  ;;  %v1594_v57 = vld [vmem:[#allocation22 + $0x4d0] sm:$0xff] }
 0x2e1   :  { %v6102_v25 = vpack.c.bf16 %v1148_v19, %v1146_v18  ;;  %v1579_v18 = vld [vmem:[#allocation22 + $0x458] sm:$0xff] }
 0x2e2   :  { %738 = vmatprep.mubr.f32.mxu0 %v523_v22  ;;  %809 = vmatprep.mubr.f32.mxu1 %v523_v22  ;;  %v1151_v22 = vld [vmem:[#allocation19 + $0xc8] sm:$0xff]  ;;  %v1583_v19 = vld [vmem:[#allocation22 + $0x478] sm:$0xff] }
 0x2e3   :  { %739 = vmatmul.mubr.f32.vlgmr.msra.gmra.mrb[2].mxu0 %v522_v27  ;;  %810 = vmatmul.mubr.f32.vlgmr.msra.gmra.mrb[2].mxu1 %v522_v27  ;;  %v6008_v27 = vpack.c.bf16 %v895_v21, %v893_v20 }
 0x2e4   :  { %5987 = vmatpush1.bf16.msra.mxu0 %v5986_v23  ;;  %6083 = vmatpush1.bf16.msra.mxu1 %v6082_v24  ;;  %v1153_v23 = vld [vmem:[#allocation19 + $0xd8] sm:$0xff]  ;;  %v6006_v24 = vpack.c.bf16 %v890_v15, %v888_v14  ;;  %v842_v14 = vld [vmem:[#allocation17 + $0x30] sm:$0xff]  ;;  %v845_v15 = vld [vmem:[#allocation17 + $0x48] sm:$0xff] }
 0x2e5   :  { %5989 = vmatprep.subr.bf16.mxu0 %v5988_v28  ;;  %6085 = vmatprep.subr.bf16.mxu1 %v6084_v29  ;;  %v894_v28 = vld [vmem:[#allocation17 + $0x1d0] sm:$0xff]  ;;  %v6104_v29 = vpack.c.bf16 %v1153_v23, %v1151_v22 }
 0x2e6   :  { %964 = vmatprep.mubr.f32.mxu0 %v8925_v0  ;;  %1343 = vmatprep.mubr.f32.mxu1 %v8925_v0  ;;  %v6010_v32 = vpack.c.bf16 %v894_v28, %v892_v26  ;;  %v849_v26 = vld [vmem:[#allocation17 + $0x68] sm:$0xff]  ;;  %v6180_v28 = vpack.c.bf16 %v1583_v19, %v1579_v18  ;;  %v862_v18 = vld [vmem:[#allocation17 + $0xd0] sm:$0xff] }
 0x2e7   :  { %v865_v19 = vld [vmem:[#allocation17 + $0xe8] sm:$0xff] }
 0x2e8   :  { %5991 = vmatpush1.bf16.msra.mxu0 %v5990_v36  ;;  %6087 = vmatpush1.bf16.msra.mxu1 %v6086_v37  ;;  %v6012_v36 = vpack.c.bf16 %v899_v35, %v897_v34  ;;  %v896_v37 = vld [vmem:[#allocation17 + $0x1e0] sm:$0xff] }
 0x2e9   :  { %5993 = vmatprep.subr.bf16.mxu0 %v5992_v40  ;;  %6089 = vmatprep.subr.bf16.mxu1 %v6088_v41  ;;  %v6014_v40 = vpack.c.bf16 %v898_v38, %v896_v37  ;;  %v1157_v41 = vld [vmem:[#allocation19 + $0xf8] sm:$0xff]  ;;  %v848_v35 = vld [vmem:[#allocation17 + $0x60] sm:$0xff]  ;;  %v853_v37 = vld [vmem:[#allocation17 + $0x88] sm:$0xff] }
 0x2ea   :  { %v6108_v44 = vpack.c.bf16 %v1157_v41, %v1155_v39  ;;  %v855_v38 = vld [vmem:[#allocation17 + $0x98] sm:$0xff] }
 0x2eb   :  { %v1591_v41 = vld [vmem:[#allocation22 + $0x4b8] sm:$0xff] }
 0x2ec   :  { %5995 = vmatpush1.bf16.msra.mxu0 %v5994_v48  ;;  %6091 = vmatpush1.bf16.msra.mxu1 %v6090_v49  ;;  %v6016_v48 = vpack.c.bf16 %v839_v47, %v837_v46  ;;  %v1571_v49 = vld [vmem:[#allocation22 + $0x418] sm:$0xff] }
 0x2ed   :  { %5997 = vmatprep.subr.bf16.mxu0 %v5996_v52  ;;  %6093 = vmatprep.subr.bf16.mxu1 %v6092_v53  ;;  %v6176_v51 = vpack.c.bf16 %v1575_v50, %v1571_v49  ;;  %v652_v52 = vld [vmem:[#allocation16] sm:$0xf]  ;;  %v852_v49 = vld [vmem:[#allocation17 + $0x80] sm:$0xff]  ;;  %v854_v50 = vld [vmem:[#allocation17 + $0x90] sm:$0xff] }
 0x2ee   :  { %v657_v53 = vrot.slane %v652_v52, %v7849_v8  ;;  %v661_v55 = vrot.slane %v652_v52, %v7852_v10  ;;  %v665_v9 = vrot.slane %v652_v52, %v7862_v54  ;;  %v669_v22 = vrot.slane %v652_v52, %v7866_v4  ;;  %v1599_v46 = vld [vmem:[#allocation22 + $0x4f8] sm:$0xff]  ;;  %v857_v52 = vld [vmem:[#allocation17 + $0xa8] sm:$0xff] }
 0x2f0   :  { %5999 = vmatpush1.bf16.msra.mxu0 %v5998_v60  ;;  %6095 = vmatpush1.bf16.msra.mxu1 %v6094_v61  ;;  %v841_v60 = vld [vmem:[#allocation17 + $0x28] sm:$0xff]  ;;  %v843_v61 = vld [vmem:[#allocation17 + $0x38] sm:$0xff] }
 0x2f1   :  { %6001 = vmatprep.subr.bf16.mxu0 %v6000_v1  ;;  %6097 = vmatprep.subr.bf16.mxu1 %v6096_v2  ;;  %v1570_v2 = vld [vmem:[#allocation22 + $0x410] sm:$0xff] }
 0x2f4   :  { %6003 = vmatpush1.bf16.msra.mxu0 %v6002_v12  ;;  %6099 = vmatpush1.bf16.msra.mxu1 %v6098_v13  ;;  %v6020_v12 = vpack.c.bf16 %v843_v61, %v841_v60  ;;  %v840_v13 = vld [vmem:[#allocation17 + $0x20] sm:$0xff] }
 0x2f5   :  { %6005 = vmatprep.subr.bf16.mxu0 %v6004_v16  ;;  %6101 = vmatprep.subr.bf16.mxu1 %v6100_v17  ;;  %v847_v16 = vld [vmem:[#allocation17 + $0x58] sm:$0xff]  ;;  %v6178_v17 = vpack.c.bf16 %v1574_v3, %v1570_v2  ;;  %v6022_v7 = vpack.c.bf16 %v842_v14, %v840_v13  ;;  %v861_v2 = vld [vmem:[#allocation17 + $0xc8] sm:$0xff] }
 0x2f6   :  { %v6024_v23 = vpack.c.bf16 %v847_v16, %v845_v15  ;;  %v1603_v60 = vld [vmem:[#allocation22 + $0x518] sm:$0xff] }
 0x2f7   :  { %v1607_v61 = vld [vmem:[#allocation22 + $0x538] sm:$0xff] }
 0x2f8   :  { %6007 = vmatpush1.bf16.msra.mxu0 %v6006_v24  ;;  %6103 = vmatpush1.bf16.msra.mxu1 %v6102_v25  ;;  %v844_v24 = vld [vmem:[#allocation17 + $0x40] sm:$0xff]  ;;  %v846_v25 = vld [vmem:[#allocation17 + $0x50] sm:$0xff]  ;;  %v863_v3 = vld [vmem:[#allocation17 + $0xd8] sm:$0xff] }
 0x2f9   :  { %6009 = vmatprep.subr.bf16.mxu0 %v6008_v27  ;;  %6105 = vmatprep.subr.bf16.mxu1 %v6104_v29  ;;  %v851_v27 = vld [vmem:[#allocation17 + $0x78] sm:$0xff]  ;;  %v6026_v31 = vpack.c.bf16 %v846_v25, %v844_v24  ;;  %v6040_v16 = vpack.c.bf16 %v863_v3, %v861_v2 }
 0x2fa   :  { %v1578_v29 = vld [vmem:[#allocation22 + $0x450] sm:$0xff]  ;;  %v6028_v34 = vpack.c.bf16 %v851_v27, %v849_v26  ;;  %v1611_v14 = vld [vmem:[#allocation22 + $0x558] sm:$0xff] }
 0x2fb   :  { %v6182_v39 = vpack.c.bf16 %v1582_v30, %v1578_v29  ;;  %v1615_v15 = vld [vmem:[#allocation22 + $0x578] sm:$0xff]  ;;  %v1614_v24 = vld [vmem:[#allocation22 + $0x570] sm:$0xff] }
 0x2fc   :  { %6011 = vmatpush1.bf16.msra.mxu0 %v6010_v32  ;;  %6107 = vmatpush1.bf16.msra.mxu1 %v6106_v33  ;;  %v1619_v26 = vld [vmem:[#allocation22 + $0x598] sm:$0xff]  ;;  %v866_v30 = vld [vmem:[#allocation17 + $0xf0] sm:$0xff] }
 0x2fd   :  { %6013 = vmatprep.subr.bf16.mxu0 %v6012_v36  ;;  %6109 = vmatprep.subr.bf16.mxu1 %v6108_v44  ;;  %v850_v36 = vld [vmem:[#allocation17 + $0x70] sm:$0xff]  ;;  %v1623_v27 = vld [vmem:[#allocation22 + $0x5b8] sm:$0xff] }
 0x2fe   :  { %v6030_v44 = vpack.c.bf16 %v850_v36, %v848_v35  ;;  %v864_v29 = vld [vmem:[#allocation17 + $0xe0] sm:$0xff]  ;;  %v6200_v35 = vpack.c.bf16 %v1623_v27, %v1619_v26  ;;  %v1618_v36 = vld [vmem:[#allocation22 + $0x590] sm:$0xff] }
 0x2ff   :  { %v1186_v26 = vld [vmem:[#allocation19 + $0x1e0] sm:$0xff]  ;;  %v1188_v27 = vld [vmem:[#allocation19 + $0x1f0] sm:$0xff] }
 0x300   :  { %6015 = vmatpush1.bf16.msra.mxu0 %v6014_v40  ;;  %6111 = vmatpush1.bf16.msra.mxu1 %v6110_v45  ;;  %v1587_v40 = vld [vmem:[#allocation22 + $0x498] sm:$0xff] }
 0x301   :  { %6017 = vmatprep.subr.bf16.mxu0 %v6016_v48  ;;  %6177 = vmatprep.subr.bf16.mxu1 %v6176_v51  ;;  %v1595_v45 = vld [vmem:[#allocation22 + $0x4d8] sm:$0xff]  ;;  %v6032_v48 = vpack.c.bf16 %v855_v38, %v853_v37  ;;  %v6184_v51 = vpack.c.bf16 %v1591_v41, %v1587_v40  ;;  %v1622_v37 = vld [vmem:[#allocation22 + $0x5b0] sm:$0xff]  ;;  %v6046_v38 = vpack.c.bf16 %v866_v30, %v864_v29  ;;  %v1573_v29 = vld [vmem:[#allocation22 + $0x428] sm:$0xff] }
 0x302   :  { %v6188_v56 = vpack.c.bf16 %v1599_v46, %v1595_v45  ;;  %v1158_v40 = vld [vmem:[#allocation19 + $0x100] sm:$0xff]  ;;  %v1160_v41 = vld [vmem:[#allocation19 + $0x110] sm:$0xff]  ;;  %v6078_v30 = vpack.c.bf16 %v1188_v27, %v1186_v26 }
 0x303   :  { %v6050_v45 = vpack.c.bf16 %v1160_v41, %v1158_v40  ;;  %v1580_v40 = vld [vmem:[#allocation22 + $0x460] sm:$0xff]  ;;  %v1585_v41 = vld [vmem:[#allocation22 + $0x488] sm:$0xff]  ;;  %v1639_v26 = vld [vmem:[#allocation22 + $0x638] sm:$0xff] }
 0x3b6   :  { %v740_v58 = vpop.f32.mrb[2].mxu0  ;;  %v811_v59 = vpop.f32.mrb[2].mxu1 }
 0x3b7   :  { %v741_v62 = vadd.f32 %v740_v58, %v657_v53  ;;  %v742_v63 = vpop.f32.mrb[3].mxu0  ;;  %v813_v1 = vpop.f32.mrb[3].mxu1  ;;  %v812_v20 = vadd.f32 %v811_v59, %v665_v9  ;;  %v859_v53 = vld [vmem:[#allocation17 + $0xb8] sm:$0xff]  ;;  %v6034_v59 = vpack.c.bf16 %v854_v50, %v852_v49  ;;  %v6192_v9 = vpack.c.bf16 %v1607_v61, %v1603_v60  ;;  %v1164_v49 = vld [vmem:[#allocation19 + $0x130] sm:$0xff]  ;;  %v1167_v50 = vld [vmem:[#allocation19 + $0x148] sm:$0xff] }
 0x3b8   :  { %v743_v11 = vadd.f32 %v742_v63, %v661_v55  ;;  %v814_v33 = vadd.f32 %v813_v1, %v669_v22  ;;  %v6186_v55 = vpack.c.bf16 %v1590_v43, %v1586_v42  ;;  %v1598_v58 = vld [vmem:[#allocation22 + $0x4f0] sm:$0xff]  ;;  %v856_v63 = vld [vmem:[#allocation17 + $0xa0] sm:$0xff]  ;;  %v6196_v22 = vpack.c.bf16 %v1615_v15, %v1611_v14  ;;  %v1163_v42 = vld [vmem:[#allocation19 + $0x128] sm:$0xff] }
 0x3b9   :  { %v7868_v6 = vmax.f32 %v741_v62, 0.0  ;;  %v7881_v32 = vmax.f32 %v812_v20, 0.0  ;;  %v6036_v62 = vpack.c.bf16 %v859_v53, %v857_v52  ;;  %v858_v1 = vld [vmem:[#allocation17 + $0xb0] sm:$0xff]  ;;  %v1165_v43 = vld [vmem:[#allocation19 + $0x138] sm:$0xff]  ;;  %v1170_v61 = vld [vmem:[#allocation19 + $0x160] sm:$0xff] }
 0x3ba   :  { %v7874_v21 = vmax.f32 %v743_v11, 0.0  ;;  %v7887_v47 = vmax.f32 %v814_v33, 0.0  ;;  %v1602_v11 = vld [vmem:[#allocation22 + $0x510] sm:$0xff]  ;;  %v6038_v13 = vpack.c.bf16 %v858_v1, %v856_v63  ;;  %v6052_v46 = vpack.c.bf16 %v1165_v43, %v1163_v42  ;;  %v1175_v63 = vld [vmem:[#allocation19 + $0x188] sm:$0xff]  ;;  %v1178_v14 = vld [vmem:[#allocation19 + $0x1a0] sm:$0xff] }
 0x3bb   :  { %965 = vmatmul.mubr.f32.vlgmr.msra.gmra.mrb[4].mxu0 %v7868_v6  ;;  %1344 = vmatmul.mubr.f32.vlgmr.msra.gmra.mrb[4].mxu1 %v7868_v6  ;;  %v1161_v33 = vld [vmem:[#allocation19 + $0x118] sm:$0xff]  ;;  %v1180_v15 = vld [vmem:[#allocation19 + $0x1b0] sm:$0xff] }
 0x3bc   :  { %6019 = vmatpush1.bf16.msra.mxu0 %v6018_v5  ;;  %970 = vmatprep.mubr.f32.mxu0 %v8925_v0  ;;  %v6190_v5 = vpack.c.bf16 %v1598_v58, %v1594_v57  ;;  %v1171_v57 = vld [vmem:[#allocation19 + $0x168] sm:$0xff]  ;;  %v1173_v58 = vld [vmem:[#allocation19 + $0x178] sm:$0xff] }
 0x3bd   :  { %6021 = vmatprep.subr.bf16.mxu0 %v6020_v12  ;;  %1349 = vmatprep.mubr.f32.mxu1 %v8925_v0  ;;  %v1606_v12 = vld [vmem:[#allocation22 + $0x530] sm:$0xff]  ;;  %v6060_v60 = vpack.c.bf16 %v1173_v58, %v1171_v57  ;;  %v1589_v42 = vld [vmem:[#allocation22 + $0x4a8] sm:$0xff]  ;;  %v1600_v58 = vld [vmem:[#allocation22 + $0x500] sm:$0xff] }
 0x3be   :  { %6179 = vmatpush1.bf16.msra.mxu1 %v6178_v17  ;;  %v860_v17 = vld [vmem:[#allocation17 + $0xc0] sm:$0xff]  ;;  %v6194_v20 = vpack.c.bf16 %v1606_v12, %v1602_v11  ;;  %v1177_v1 = vld [vmem:[#allocation19 + $0x198] sm:$0xff] }
 0x3bf   :  { %971 = vmatmul.mubr.f32.gmra.mrb[6].mxu0 %v7874_v21  ;;  %1350 = vmatmul.mubr.f32.gmra.mrb[6].mxu1 %v7874_v21  ;;  %v6042_v25 = vpack.c.bf16 %v862_v18, %v860_v17  ;;  %v6064_v3 = vpack.c.bf16 %v1177_v1, %v1175_v63  ;;  %v1181_v11 = vld [vmem:[#allocation19 + $0x1b8] sm:$0xff]  ;;  %v6070_v18 = vpack.c.bf16 %v1180_v15, %v1178_v14  ;;  %v1608_v63 = vld [vmem:[#allocation22 + $0x540] sm:$0xff] }
 0x3c0   :  { %6023 = vmatpush1.bf16.msra.mxu0 %v6022_v7  ;;  %976 = vmatprep.mubr.f32.mxu0 %v8925_v0  ;;  %v867_v7 = vld [vmem:[#allocation17 + $0xf8] sm:$0xff]  ;;  %v1612_v1 = vld [vmem:[#allocation22 + $0x560] sm:$0xff] }
 0x3c1   :  { %6025 = vmatprep.subr.bf16.mxu0 %v6024_v23  ;;  %1355 = vmatprep.mubr.f32.mxu1 %v8925_v0  ;;  %v1610_v23 = vld [vmem:[#allocation22 + $0x550] sm:$0xff]  ;;  %v1631_v14 = vld [vmem:[#allocation22 + $0x5f8] sm:$0xff] }
 0x3c2   :  { %6181 = vmatprep.subr.bf16.mxu1 %v6180_v28  ;;  %v6044_v28 = vpack.c.bf16 %v867_v7, %v865_v19  ;;  %v1185_v17 = vld [vmem:[#allocation19 + $0x1d8] sm:$0xff]  ;;  %v1182_v7 = vld [vmem:[#allocation19 + $0x1c0] sm:$0xff] }
 0x3c3   :  { %977 = vmatmul.mubr.f32.gmra.mrb[8].mxu0 %v7881_v32  ;;  %1356 = vmatmul.mubr.f32.gmra.mrb[8].mxu1 %v7881_v32 }
 0x3c4   :  { %6027 = vmatpush1.bf16.msra.mxu0 %v6026_v31  ;;  %982 = vmatprep.mubr.f32.mxu0 %v8925_v0  ;;  %v1159_v31 = vld [vmem:[#allocation19 + $0x108] sm:$0xff] }
 0x3c5   :  { %6029 = vmatprep.subr.bf16.mxu0 %v6028_v34  ;;  %1361 = vmatprep.mubr.f32.mxu1 %v8925_v0  ;;  %v6198_v34 = vpack.c.bf16 %v1614_v24, %v1610_v23  ;;  %v1189_v23 = vld [vmem:[#allocation19 + $0x1f8] sm:$0xff] }
 0x3c6   :  { %6183 = vmatpush1.bf16.msra.mxu1 %v6182_v39  ;;  %v6048_v39 = vpack.c.bf16 %v1161_v33, %v1159_v31  ;;  %v1568_v33 = vld [vmem:[#allocation22 + $0x400] sm:$0xff] }
 0x3c7   :  { %983 = vmatmul.mubr.f32.gmra.mrb[10].mxu0 %v7887_v47  ;;  %1362 = vmatmul.mubr.f32.gmra.mrb[10].mxu1 %v7887_v47 }
 0x3c8   :  { %6031 = vmatpush1.bf16.msra.mxu0 %v6030_v44  ;;  %1053 = vmatprep.mubr.f32.mxu0 %v8925_v0  ;;  %v6202_v44 = vpack.c.bf16 %v1622_v37, %v1618_v36  ;;  %v1581_v36 = vld [vmem:[#allocation22 + $0x468] sm:$0xff] }
 0x3c9   :  { %6033 = vmatprep.subr.bf16.mxu0 %v6032_v48  ;;  %6185 = vmatprep.subr.bf16.mxu1 %v6184_v51  ;;  %v1162_v48 = vld [vmem:[#allocation19 + $0x120] sm:$0xff]  ;;  %v1169_v51 = vld [vmem:[#allocation19 + $0x158] sm:$0xff] }
 0x3ca   :  { %6187 = vmatpush1.bf16.msra.mxu1 %v6186_v55  ;;  %v6054_v52 = vpack.c.bf16 %v1164_v49, %v1162_v48  ;;  %v6056_v53 = vpack.c.bf16 %v1169_v51, %v1167_v50  ;;  %v1166_v55 = vld [vmem:[#allocation19 + $0x140] sm:$0xff]  ;;  %v1593_v48 = vld [vmem:[#allocation22 + $0x4c8] sm:$0xff] }
 0x3cb   :  { %6189 = vmatprep.subr.bf16.mxu1 %v6188_v56  ;;  %v1168_v56 = vld [vmem:[#allocation19 + $0x150] sm:$0xff] }
 0x3cc   :  { %6035 = vmatpush1.bf16.msra.mxu0 %v6034_v59  ;;  %v6058_v59 = vpack.c.bf16 %v1168_v56, %v1166_v55  ;;  %v1597_v49 = vld [vmem:[#allocation22 + $0x4e8] sm:$0xff] }
 0x3cd   :  { %6037 = vmatprep.subr.bf16.mxu0 %v6036_v62  ;;  %v1172_v62 = vld [vmem:[#allocation19 + $0x170] sm:$0xff]  ;;  %v6124_v51 = vpack.c.bf16 %v1597_v49, %v1593_v48  ;;  %v1644_v48 = vld [vmem:[#allocation22 + $0x660] sm:$0xff]  ;;  %v1651_v49 = vld [vmem:[#allocation22 + $0x698] sm:$0xff] }
 0x3ce   :  { %6191 = vmatpush1.bf16.msra.mxu1 %v6190_v5  ;;  %v6062_v2 = vpack.c.bf16 %v1172_v62, %v1170_v61  ;;  %v1174_v5 = vld [vmem:[#allocation19 + $0x180] sm:$0xff]  ;;  %v1605_v55 = vld [vmem:[#allocation22 + $0x528] sm:$0xff] }
 0x3cf   :  { %6193 = vmatprep.subr.bf16.mxu1 %v6192_v9  ;;  %v1179_v9 = vld [vmem:[#allocation19 + $0x1a8] sm:$0xff] }
 0x3d0   :  { %6039 = vmatpush1.bf16.msra.mxu0 %v6038_v13  ;;  %v6068_v13 = vpack.c.bf16 %v1181_v11, %v1179_v9  ;;  %v1620_v9 = vld [vmem:[#allocation22 + $0x5a0] sm:$0xff]  ;;  %v1627_v11 = vld [vmem:[#allocation22 + $0x5d8] sm:$0xff] }
 0x3d1   :  { %6041 = vmatprep.subr.bf16.mxu0 %v6040_v16  ;;  %v1183_v16 = vld [vmem:[#allocation19 + $0x1c8] sm:$0xff]  ;;  %v6204_v15 = vpack.c.bf16 %v1631_v14, %v1627_v11 }
 0x3d2   :  { %6195 = vmatpush1.bf16.msra.mxu1 %v6194_v20  ;;  %v6072_v19 = vpack.c.bf16 %v1185_v17, %v1183_v16  ;;  %v1184_v20 = vld [vmem:[#allocation19 + $0x1d0] sm:$0xff] }
 0x3d3   :  { %6197 = vmatprep.subr.bf16.mxu1 %v6196_v22  ;;  %v1187_v22 = vld [vmem:[#allocation19 + $0x1e8] sm:$0xff]  ;;  %v6074_v24 = vpack.c.bf16 %v1184_v20, %v1182_v7  ;;  %v1626_v16 = vld [vmem:[#allocation22 + $0x5d0] sm:$0xff] }
 0x3d4   :  { %6043 = vmatpush1.bf16.msra.mxu0 %v6042_v25  ;;  %v6076_v25 = vpack.c.bf16 %v1189_v23, %v1187_v22  ;;  %v1630_v17 = vld [vmem:[#allocation22 + $0x5f0] sm:$0xff]  ;;  %v1624_v20 = vld [vmem:[#allocation22 + $0x5c0] sm:$0xff]  ;;  %v1635_v23 = vld [vmem:[#allocation22 + $0x618] sm:$0xff] }
 0x3d5   :  { %6045 = vmatprep.subr.bf16.mxu0 %v6044_v28  ;;  %v1569_v28 = vld [vmem:[#allocation22 + $0x408] sm:$0xff]  ;;  %v1628_v22 = vld [vmem:[#allocation22 + $0x5e0] sm:$0xff]  ;;  %v6208_v27 = vpack.c.bf16 %v1639_v26, %v1635_v23  ;;  %v1674_v23 = vld [vmem:[#allocation22 + $0x750] sm:$0xff] }
 0x3d6   :  { %6199 = vmatpush1.bf16.msra.mxu1 %v6198_v34  ;;  %v6112_v31 = vpack.c.bf16 %v1573_v29, %v1569_v28  ;;  %v1572_v34 = vld [vmem:[#allocation22 + $0x420] sm:$0xff]  ;;  %v1634_v28 = vld [vmem:[#allocation22 + $0x610] sm:$0xff]  ;;  %v1683_v26 = vld [vmem:[#allocation22 + $0x798] sm:$0xff] }
 0x3d7   :  { %6201 = vmatprep.subr.bf16.mxu1 %v6200_v35  ;;  %v1577_v35 = vld [vmem:[#allocation22 + $0x448] sm:$0xff]  ;;  %v6114_v37 = vpack.c.bf16 %v1572_v34, %v1568_v33  ;;  %v1638_v29 = vld [vmem:[#allocation22 + $0x630] sm:$0xff]  ;;  %v1632_v34 = vld [vmem:[#allocation22 + $0x600] sm:$0xff] }
 0x3d8   :  { %6047 = vmatpush1.bf16.msra.mxu0 %v6046_v38  ;;  %v6116_v38 = vpack.c.bf16 %v1581_v36, %v1577_v35  ;;  %v1636_v35 = vld [vmem:[#allocation22 + $0x620] sm:$0xff]  ;;  %v1643_v36 = vld [vmem:[#allocation22 + $0x658] sm:$0xff] }
 0x3d9   :  { %6049 = vmatprep.subr.bf16.mxu0 %v6048_v39  ;;  %v1576_v39 = vld [vmem:[#allocation22 + $0x440] sm:$0xff] }
 0x3da   :  { %6203 = vmatpush1.bf16.msra.mxu1 %v6202_v44  ;;  %v6118_v43 = vpack.c.bf16 %v1580_v40, %v1576_v39  ;;  %v6120_v44 = vpack.c.bf16 %v1589_v42, %v1585_v41  ;;  %v1647_v39 = vld [vmem:[#allocation22 + $0x678] sm:$0xff]  ;;  %v1642_v41 = vld [vmem:[#allocation22 + $0x650] sm:$0xff] }
 0x3db   :  { %1054 = vmatmul.mubr.f32.vlgmr.msra.gmra.mrb[4].mxu0 %v8925_v0  ;;  %6205 = vmatprep.subr.bf16.mxu1 %v6204_v15  ;;  %v6212_v40 = vpack.c.bf16 %v1647_v39, %v1643_v36  ;;  %v1646_v42 = vld [vmem:[#allocation22 + $0x670] sm:$0xff]  ;;  %v1656_v15 = vld [vmem:[#allocation22 + $0x6c0] sm:$0xff] }
 0x3dc   :  { %6051 = vmatpush1.bf16.msra.mxu0 %v6050_v45  ;;  %1059 = vmatprep.mubr.f32.mxu0 %v8925_v0  ;;  %v1584_v45 = vld [vmem:[#allocation22 + $0x480] sm:$0xff]  ;;  %v1682_v36 = vld [vmem:[#allocation22 + $0x790] sm:$0xff] }
 0x3dd   :  { %6053 = vmatprep.subr.bf16.mxu0 %v6052_v46  ;;  %v1588_v46 = vld [vmem:[#allocation22 + $0x4a0] sm:$0xff] }
 0x3de   :  { %v6122_v50 = vpack.c.bf16 %v1588_v46, %v1584_v45  ;;  %v1640_v46 = vld [vmem:[#allocation22 + $0x640] sm:$0xff] }
 0x3df   :  { %1060 = vmatmul.mubr.f32.gmra.mrb[6].mxu0 %v7868_v6  ;;  %v1176_v6 = vld [vmem:[#allocation19 + $0x190] sm:$0xff] }
 0x3e0   :  { %6055 = vmatpush1.bf16.msra.mxu0 %v6054_v52  ;;  %1065 = vmatprep.mubr.f32.mxu0 %v8925_v0  ;;  %v6066_v12 = vpack.c.bf16 %v1176_v6, %v1174_v5  ;;  %v1592_v52 = vld [vmem:[#allocation22 + $0x4c0] sm:$0xff] }
 0x3e1   :  { %6057 = vmatprep.subr.bf16.mxu0 %v6056_v53  ;;  %v1601_v53 = vld [vmem:[#allocation22 + $0x508] sm:$0xff]  ;;  %v1616_v6 = vld [vmem:[#allocation22 + $0x580] sm:$0xff] }
 0x3e2   :  { %v6128_v57 = vpack.c.bf16 %v1605_v55, %v1601_v53  ;;  %v1650_v53 = vld [vmem:[#allocation22 + $0x690] sm:$0xff] }
 0x3e3   :  { %1066 = vmatmul.mubr.f32.gmra.mrb[8].mxu0 %v7874_v21  ;;  %v1654_v55 = vld [vmem:[#allocation22 + $0x6b0] sm:$0xff] }
 0x3e4   :  { %6059 = vmatpush1.bf16.msra.mxu0 %v6058_v59  ;;  %1071 = vmatprep.mubr.f32.mxu0 %v8925_v0  ;;  %v1609_v59 = vld [vmem:[#allocation22 + $0x548] sm:$0xff] }
 0x3e5   :  { %6061 = vmatprep.subr.bf16.mxu0 %v6060_v60  ;;  %v1613_v60 = vld [vmem:[#allocation22 + $0x568] sm:$0xff] }
 0x3e6   :  { %v6132_v62 = vpack.c.bf16 %v1613_v60, %v1609_v59  ;;  %v1648_v60 = vld [vmem:[#allocation22 + $0x680] sm:$0xff] }
 0x3e7   :  { %1072 = vmatmul.mubr.f32.gmra.mrb[10].mxu0 %v7881_v32 }
 0x3e8   :  { %6063 = vmatpush1.bf16.msra.mxu0 %v6062_v2  ;;  %1254 = vmatprep.mubr.f32.mxu0 %v8925_v0  ;;  %v1617_v2 = vld [vmem:[#allocation22 + $0x588] sm:$0xff] }
 0x3e9   :  { %6065 = vmatprep.subr.bf16.mxu0 %v6064_v3  ;;  %v6134_v3 = vpack.c.bf16 %v1612_v1, %v1608_v63  ;;  %v1658_v63 = vld [vmem:[#allocation22 + $0x6d0] sm:$0xff]  ;;  %v1657_v1 = vld [vmem:[#allocation22 + $0x6c8] sm:$0xff] }
 0x3ec   :  { %6067 = vmatpush1.bf16.msra.mxu0 %v6066_v12  ;;  %v1625_v12 = vld [vmem:[#allocation22 + $0x5c8] sm:$0xff] }
 0x3ed   :  { %6069 = vmatprep.subr.bf16.mxu0 %v6068_v13  ;;  %v1629_v13 = vld [vmem:[#allocation22 + $0x5e8] sm:$0xff] }
 0x3ee   :  { %v6140_v7 = vpack.c.bf16 %v1629_v13, %v1625_v12  ;;  %v1666_v12 = vld [vmem:[#allocation22 + $0x710] sm:$0xff] }
 0x3ef   :  { %v1670_v13 = vld [vmem:[#allocation22 + $0x730] sm:$0xff] }
 0x3f0   :  { %6071 = vmatpush1.bf16.msra.mxu0 %v6070_v18  ;;  %v6138_v18 = vpack.c.bf16 %v1620_v9, %v1616_v6  ;;  %v1671_v6 = vld [vmem:[#allocation22 + $0x738] sm:$0xff] }
 0x3f1   :  { %6073 = vmatprep.subr.bf16.mxu0 %v6072_v19  ;;  %v6206_v19 = vpack.c.bf16 %v1630_v17, %v1626_v16  ;;  %v1660_v16 = vld [vmem:[#allocation22 + $0x6e0] sm:$0xff]  ;;  %v1675_v17 = vld [vmem:[#allocation22 + $0x758] sm:$0xff] }
 0x3f3   :  { %6207 = vmatpush1.bf16.msra.mxu1 %v6206_v19  ;;  %v1669_v19 = vld [vmem:[#allocation22 + $0x728] sm:$0xff] }
 0x3f4   :  { %6075 = vmatpush1.bf16.msra.mxu0 %v6074_v24  ;;  %v1633_v24 = vld [vmem:[#allocation22 + $0x608] sm:$0xff]  ;;  %6209 = vmatprep.subr.bf16.mxu1 %v6208_v27  ;;  %v1687_v27 = vld [vmem:[#allocation22 + $0x7b8] sm:$0xff] }
 0x3f5   :  { %6077 = vmatprep.subr.bf16.mxu0 %v6076_v25  ;;  %v1637_v25 = vld [vmem:[#allocation22 + $0x628] sm:$0xff] }
 0x3f6   :  { %v6144_v33 = vpack.c.bf16 %v1637_v25, %v1633_v24  ;;  %v1678_v24 = vld [vmem:[#allocation22 + $0x770] sm:$0xff]  ;;  %v6158_v25 = vpack.c.bf16 %v1660_v16, %v1656_v15  ;;  %v1078_v16 = vld [vmem:[#allocation20] sm:$0x3] }
 0x3f8   :  { %6079 = vmatpush1.bf16.msra.mxu0 %v6078_v30  ;;  %v6142_v30 = vpack.c.bf16 %v1628_v22, %v1624_v20  ;;  %v1679_v20 = vld [vmem:[#allocation22 + $0x778] sm:$0xff] }
 0x3f9   :  { %6113 = vmatprep.subr.bf16.mxu0 %v6112_v31  ;;  %v6210_v31 = vpack.c.bf16 %v1638_v29, %v1634_v28  ;;  %v6228_v22 = vpack.c.bf16 %v1679_v20, %v1675_v17  ;;  %v1664_v29 = vld [vmem:[#allocation22 + $0x700] sm:$0xff]  ;;  %v7925_v17 = vrot.slane %v1078_v16, %v7849_v8 }
 0x3fa   :  { %v1444_v20 = vld [vmem:[#allocation22 + $0x20] sm:$0xff] }
 0x3fb   :  { %1255 = vmatmul.mubr.f32.vlgmr.msra.gmra.mrb[12].mxu0 %v7874_v21  ;;  %v1596_v21 = vld [vmem:[#allocation22 + $0x4e0] sm:$0xff]  ;;  %6211 = vmatpush1.bf16.msra.mxu1 %v6210_v31  ;;  %v1673_v31 = vld [vmem:[#allocation22 + $0x748] sm:$0xff] }
 0x3fc   :  { %1260 = vmatprep.mubr.f32.mxu0 %v8925_v0  ;;  %6115 = vmatpush1.bf16.msra.mxu0 %v6114_v37  ;;  %v6126_v56 = vpack.c.bf16 %v1596_v21, %v1592_v52  ;;  %v1641_v37 = vld [vmem:[#allocation22 + $0x648] sm:$0xff]  ;;  %v1655_v52 = vld [vmem:[#allocation22 + $0x6b8] sm:$0xff] }
 0x3fd   :  { %6117 = vmatprep.subr.bf16.mxu0 %v6116_v38  ;;  %v1645_v38 = vld [vmem:[#allocation22 + $0x668] sm:$0xff]  ;;  %6213 = vmatprep.subr.bf16.mxu1 %v6212_v40  ;;  %v6216_v21 = vpack.c.bf16 %v1655_v52, %v1651_v49  ;;  %v1672_v40 = vld [vmem:[#allocation22 + $0x740] sm:$0xff] }
 0x3fe   :  { %v6148_v45 = vpack.c.bf16 %v1645_v38, %v1641_v37  ;;  %v1686_v37 = vld [vmem:[#allocation22 + $0x7b0] sm:$0xff]  ;;  %v1684_v49 = vld [vmem:[#allocation22 + $0x7a0] sm:$0xff]  ;;  %v1693_v52 = vld [vmem:[#allocation22 + $0x7e8] sm:$0xff] }
 0x3ff   :  { %1261 = vmatmul.mubr.f32.gmra.mrb[14].mxu0 %v7881_v32  ;;  %v1604_v32 = vld [vmem:[#allocation22 + $0x520] sm:$0xff] }
 0x400   :  { %1266 = vmatprep.mubr.f32.mxu0 %v8925_v0  ;;  %6119 = vmatpush1.bf16.msra.mxu0 %v6118_v43  ;;  %v6130_v61 = vpack.c.bf16 %v1604_v32, %v1600_v58  ;;  %v6146_v43 = vpack.c.bf16 %v1636_v35, %v1632_v34  ;;  %v1659_v58 = vld [vmem:[#allocation22 + $0x6d8] sm:$0xff]  ;;  %v6230_v34 = vpack.c.bf16 %v1678_v24, %v1674_v23  ;;  %v1442_v24 = vld [vmem:[#allocation22 + $0x10] sm:$0xff] }
 0x401   :  { %6121 = vmatprep.subr.bf16.mxu0 %v6120_v44  ;;  %v6214_v44 = vpack.c.bf16 %v1646_v42, %v1642_v41  ;;  %v1663_v32 = vld [vmem:[#allocation22 + $0x6f8] sm:$0xff]  ;;  %v6232_v35 = vpack.c.bf16 %v1687_v27, %v1683_v26  ;;  %v1676_v41 = vld [vmem:[#allocation22 + $0x760] sm:$0xff]  ;;  %v1681_v42 = vld [vmem:[#allocation22 + $0x788] sm:$0xff] }
 0x402   :  { %v1449_v26 = vld [vmem:[#allocation22 + $0x48] sm:$0xff] }
 0x403   :  { %1267 = vmatmul.mubr.f32.gmra.mrb[16].mxu0 %v7887_v47  ;;  %v1621_v47 = vld [vmem:[#allocation22 + $0x5a8] sm:$0xff]  ;;  %6215 = vmatpush1.bf16.msra.mxu1 %v6214_v44  ;;  %v6234_v44 = vpack.c.bf16 %v1686_v37, %v1682_v36  ;;  %v1448_v36 = vld [vmem:[#allocation22 + $0x40] sm:$0xff] }
 0x404   :  { %1272 = vmatprep.mubr.f32.mxu0 %v8925_v0  ;;  %6123 = vmatpush1.bf16.msra.mxu0 %v6122_v50  ;;  %v6136_v5 = vpack.c.bf16 %v1621_v47, %v1617_v2  ;;  %v1649_v50 = vld [vmem:[#allocation22 + $0x688] sm:$0xff]  ;;  %v1662_v47 = vld [vmem:[#allocation22 + $0x6f0] sm:$0xff]  ;;  %v1452_v37 = vld [vmem:[#allocation22 + $0x60] sm:$0xff] }
 0x405   :  { %6125 = vmatprep.subr.bf16.mxu0 %v6124_v51  ;;  %v1653_v51 = vld [vmem:[#allocation22 + $0x6a8] sm:$0xff]  ;;  %6217 = vmatprep.subr.bf16.mxu1 %v6216_v21  ;;  %v1695_v21 = vld [vmem:[#allocation22 + $0x7f8] sm:$0xff] }
 0x406   :  { %v6152_v59 = vpack.c.bf16 %v1653_v51, %v1649_v50  ;;  %v1661_v2 = vld [vmem:[#allocation22 + $0x6e8] sm:$0xff]  ;;  %v1691_v50 = vld [vmem:[#allocation22 + $0x7d8] sm:$0xff] }
 0x407   :  { %1273 = vmatmul.mubr.f32.gmra.mrb[18].mxu0 %v8925_v0  ;;  %v6156_v14 = vpack.c.bf16 %v1661_v2, %v1657_v1  ;;  %v1689_v51 = vld [vmem:[#allocation22 + $0x7c8] sm:$0xff]  ;;  %v1447_v1 = vld [vmem:[#allocation22 + $0x38] sm:$0xff] }
 0x408   :  { %6127 = vmatpush1.bf16.msra.mxu0 %v6126_v56  ;;  %v6150_v56 = vpack.c.bf16 %v1644_v48, %v1640_v46  ;;  %v1680_v48 = vld [vmem:[#allocation22 + $0x780] sm:$0xff] }
 0x409   :  { %6129 = vmatprep.subr.bf16.mxu0 %v6128_v57  ;;  %v6218_v57 = vpack.c.bf16 %v1654_v55, %v1650_v53  ;;  %v6236_v53 = vpack.c.bf16 %v1695_v21, %v1691_v50  ;;  %v1690_v55 = vld [vmem:[#allocation22 + $0x7d0] sm:$0xff]  ;;  %v6246_v50 = vpack.c.bf16 %v1452_v37, %v1448_v36  ;;  %v1460_v21 = vld [vmem:[#allocation22 + $0xa0] sm:$0xff]  ;;  %v1481_v37 = vld [vmem:[#allocation22 + $0x148] sm:$0xff] }
 0x40a   :  { %v1478_v36 = vld [vmem:[#allocation22 + $0x130] sm:$0xff] }
 0x40b   :  { %6219 = vmatpush1.bf16.msra.mxu1 %v6218_v57  ;;  %v6170_v57 = vpack.c.bf16 %v1684_v49, %v1680_v48  ;;  %v1463_v48 = vld [vmem:[#allocation22 + $0xb8] sm:$0xff] }
 0x40c   :  { %6131 = vmatpush1.bf16.msra.mxu0 %v6130_v61  ;;  %v1652_v61 = vld [vmem:[#allocation22 + $0x6a0] sm:$0xff] }
 0x40d   :  { %6133 = vmatprep.subr.bf16.mxu0 %v6132_v62  ;;  %v6220_v62 = vpack.c.bf16 %v1663_v32, %v1659_v58  ;;  %v6154_v9 = vpack.c.bf16 %v1652_v61, %v1648_v60  ;;  %v6172_v32 = vpack.c.bf16 %v1693_v52, %v1689_v51  ;;  %v1692_v60 = vld [vmem:[#allocation22 + $0x7e0] sm:$0xff]  ;;  %v1443_v61 = vld [vmem:[#allocation22 + $0x18] sm:$0xff] }
 0x40e   :  { %v6304_v2 = vpack.c.bf16 %v1447_v1, %v1443_v61  ;;  %v1456_v52 = vld [vmem:[#allocation22 + $0x80] sm:$0xff]  ;;  %v1471_v61 = vld [vmem:[#allocation22 + $0xf8] sm:$0xff] }
 0x40f   :  { %6221 = vmatprep.subr.bf16.mxu1 %v6220_v62  ;;  %v1441_v62 = vld [vmem:[#allocation22 + $0x8] sm:$0xff] }
 0x410   :  { %6135 = vmatpush1.bf16.msra.mxu0 %v6134_v3  ;;  %v6222_v3 = vpack.c.bf16 %v1662_v47, %v1658_v63  ;;  %v1445_v63 = vld [vmem:[#allocation22 + $0x28] sm:$0xff] }
 0x411   :  { %6137 = vmatprep.subr.bf16.mxu0 %v6136_v5  ;;  %v1667_v5 = vld [vmem:[#allocation22 + $0x718] sm:$0xff] }
 0x412   :  { %v6224_v11 = vpack.c.bf16 %v1671_v6, %v1667_v5  ;;  %6223 = vmatpush1.bf16.msra.mxu1 %v6222_v3  ;;  %v6240_v3 = vpack.c.bf16 %v1445_v63, %v1441_v62  ;;  %v6250_v63 = vpack.c.bf16 %v1460_v21, %v1456_v52  ;;  %v1486_v52 = vld [vmem:[#allocation22 + $0x170] sm:$0xff]  ;;  %v1489_v21 = vld [vmem:[#allocation22 + $0x188] sm:$0xff] }
 0x414   :  { %6139 = vmatpush1.bf16.msra.mxu0 %v6138_v18  ;;  %v1665_v18 = vld [vmem:[#allocation22 + $0x708] sm:$0xff]  ;;  %6225 = vmatprep.subr.bf16.mxu1 %v6224_v11 }
 0x415   :  { %6141 = vmatprep.subr.bf16.mxu0 %v6140_v7  ;;  %v6226_v7 = vpack.c.bf16 %v1670_v13, %v1666_v12  ;;  %v6160_v28 = vpack.c.bf16 %v1669_v19, %v1665_v18  ;;  %v7928_v18 = vrot.slane %v1078_v16, %v7852_v10 }
 0x417   :  { %6227 = vmatpush1.bf16.msra.mxu1 %v6226_v7  ;;  %v1440_v7 = vld [vmem:[#allocation22] sm:$0xff] }
 0x418   :  { %6143 = vmatpush1.bf16.msra.mxu0 %v6142_v30  ;;  %v1668_v30 = vld [vmem:[#allocation22 + $0x720] sm:$0xff]  ;;  %6229 = vmatprep.subr.bf16.mxu1 %v6228_v22 }
 0x419   :  { %6145 = vmatprep.subr.bf16.mxu0 %v6144_v33  ;;  %v1677_v33 = vld [vmem:[#allocation22 + $0x768] sm:$0xff]  ;;  %v6162_v38 = vpack.c.bf16 %v1668_v30, %v1664_v29  ;;  %v1451_v29 = vld [vmem:[#allocation22 + $0x58] sm:$0xff] }
 0x41a   :  { %v6164_v39 = vpack.c.bf16 %v1677_v33, %v1673_v31  ;;  %v1455_v30 = vld [vmem:[#allocation22 + $0x78] sm:$0xff] }
 0x41b   :  { %6231 = vmatpush1.bf16.msra.mxu1 %v6230_v34  ;;  %v6242_v34 = vpack.c.bf16 %v1444_v20, %v1440_v7  ;;  %v1466_v7 = vld [vmem:[#allocation22 + $0xd0] sm:$0xff] }
 0x41c   :  { %6147 = vmatpush1.bf16.msra.mxu0 %v6146_v43  ;;  %v1685_v43 = vld [vmem:[#allocation22 + $0x7a8] sm:$0xff]  ;;  %6233 = vmatprep.subr.bf16.mxu1 %v6232_v35  ;;  %v1470_v20 = vld [vmem:[#allocation22 + $0xf0] sm:$0xff] }
 0x41d   :  { %6149 = vmatprep.subr.bf16.mxu0 %v6148_v45  ;;  %v6166_v45 = vpack.c.bf16 %v1676_v41, %v1672_v40  ;;  %v6168_v46 = vpack.c.bf16 %v1685_v43, %v1681_v42  ;;  %v6308_v41 = vpack.c.bf16 %v1455_v30, %v1451_v29  ;;  %v1450_v42 = vld [vmem:[#allocation22 + $0x50] sm:$0xff]  ;;  %v1476_v29 = vld [vmem:[#allocation22 + $0x120] sm:$0xff] }
 0x41e   :  { %v1454_v43 = vld [vmem:[#allocation22 + $0x70] sm:$0xff] }
 0x41f   :  { %6235 = vmatpush1.bf16.msra.mxu1 %v6234_v44  ;;  %v1457_v44 = vld [vmem:[#allocation22 + $0x88] sm:$0xff]  ;;  %v6310_v51 = vpack.c.bf16 %v1454_v43, %v1450_v42  ;;  %v1487_v42 = vld [vmem:[#allocation22 + $0x178] sm:$0xff] }
 0x420   :  { %6151 = vmatpush1.bf16.msra.mxu0 %v6150_v56  ;;  %v1694_v56 = vld [vmem:[#allocation22 + $0x7f0] sm:$0xff]  ;;  %6237 = vmatprep.subr.bf16.mxu1 %v6236_v53 }
 0x421   :  { %6153 = vmatprep.subr.bf16.mxu0 %v6152_v59  ;;  %v6238_v58 = vpack.c.bf16 %v1694_v56, %v1690_v55  ;;  %v1688_v59 = vld [vmem:[#allocation22 + $0x7c0] sm:$0xff] }
 0x422   :  { %v6174_v47 = vpack.c.bf16 %v1692_v60, %v1688_v59  ;;  %v1469_v59 = vld [vmem:[#allocation22 + $0xe8] sm:$0xff]  ;;  %v1467_v60 = vld [vmem:[#allocation22 + $0xd8] sm:$0xff] }
 0x423   :  { %6239 = vmatpush1.bf16.msra.mxu1 %v6238_v58  ;;  %v1462_v58 = vld [vmem:[#allocation22 + $0xb0] sm:$0xff] }
 0x424   :  { %6155 = vmatpush1.bf16.msra.mxu0 %v6154_v9  ;;  %6305 = vmatprep.subr.bf16.mxu1 %v6304_v2  ;;  %v1464_v2 = vld [vmem:[#allocation22 + $0xc0] sm:$0xff] }
 0x425   :  { %6157 = vmatprep.subr.bf16.mxu0 %v6156_v14 }
 0x428   :  { %6159 = vmatpush1.bf16.msra.mxu0 %v6158_v25  ;;  %v1446_v25 = vld [vmem:[#allocation22 + $0x30] sm:$0xff] }
 0x429   :  { %6161 = vmatprep.subr.bf16.mxu0 %v6160_v28  ;;  %v1453_v28 = vld [vmem:[#allocation22 + $0x68] sm:$0xff]  ;;  %v6306_v35 = vpack.c.bf16 %v1446_v25, %v1442_v24  ;;  %v1475_v24 = vld [vmem:[#allocation22 + $0x118] sm:$0xff] }
 0x42a   :  { %v6244_v40 = vpack.c.bf16 %v1453_v28, %v1449_v26  ;;  %v1479_v25 = vld [vmem:[#allocation22 + $0x138] sm:$0xff]  ;;  %v1472_v28 = vld [vmem:[#allocation22 + $0x100] sm:$0xff] }
 0x42b   :  { %v6258_v43 = vpack.c.bf16 %v1476_v29, %v1472_v28  ;;  %v1498_v28 = vld [vmem:[#allocation22 + $0x1d0] sm:$0xff] }
 0x42c   :  { %6163 = vmatpush1.bf16.msra.mxu0 %v6162_v38  ;;  %v1502_v29 = vld [vmem:[#allocation22 + $0x1f0] sm:$0xff] }
 0x42d   :  { %6165 = vmatprep.subr.bf16.mxu0 %v6164_v39 }
 0x430   :  { %6167 = vmatpush1.bf16.msra.mxu0 %v6166_v45  ;;  %v1461_v45 = vld [vmem:[#allocation22 + $0xa8] sm:$0xff] }
 0x431   :  { %6169 = vmatprep.subr.bf16.mxu0 %v6168_v46  ;;  %v1459_v46 = vld [vmem:[#allocation22 + $0x98] sm:$0xff]  ;;  %v6248_v55 = vpack.c.bf16 %v1461_v45, %v1457_v44  ;;  %v1480_v45 = vld [vmem:[#allocation22 + $0x140] sm:$0xff] }
 0x432   :  { %v6312_v56 = vpack.c.bf16 %v1463_v48, %v1459_v46  ;;  %v1484_v46 = vld [vmem:[#allocation22 + $0x160] sm:$0xff] }
 0x434   :  { %6171 = vmatpush1.bf16.msra.mxu0 %v6170_v57  ;;  %v1458_v57 = vld [vmem:[#allocation22 + $0x90] sm:$0xff] }
 0x435   :  { %6173 = vmatprep.subr.bf16.mxu0 %v6172_v32  ;;  %v1465_v32 = vld [vmem:[#allocation22 + $0xc8] sm:$0xff]  ;;  %v6314_v1 = vpack.c.bf16 %v1462_v58, %v1458_v57  ;;  %v1495_v57 = vld [vmem:[#allocation22 + $0x1b8] sm:$0xff]  ;;  %v6262_v58 = vpack.c.bf16 %v1484_v46, %v1480_v45  ;;  %v1508_v45 = vld [vmem:[#allocation22 + $0x220] sm:$0xff] }
 0x436   :  { %v6252_v16 = vpack.c.bf16 %v1469_v59, %v1465_v32  ;;  %v1488_v59 = vld [vmem:[#allocation22 + $0x180] sm:$0xff] }
 0x438   :  { %6175 = vmatpush1.bf16.msra.mxu0 %v6174_v47  ;;  %v1468_v47 = vld [vmem:[#allocation22 + $0xe0] sm:$0xff] }
 0x439   :  { %6241 = vmatprep.subr.bf16.mxu0 %v6240_v3  ;;  %v6254_v26 = vpack.c.bf16 %v1468_v47, %v1464_v2  ;;  %v1494_v2 = vld [vmem:[#allocation22 + $0x1b0] sm:$0xff]  ;;  %v1497_v47 = vld [vmem:[#allocation22 + $0x1c8] sm:$0xff] }
 0x48e   :  { %v7908_v5 = vpop.f32.mrb[4].mxu1 }
 0x48f   :  { %v7910_v6 = vpop.f32.mrb[5].mxu1 }
 0x492   :  { %v7912_v9 = vpop.f32.mrb[6].mxu1 }
 0x493   :  { %v7914_v11 = vpop.f32.mrb[7].mxu1 }
 0x496   :  { %v7916_v12 = vpop.f32.mrb[8].mxu1 }
 0x497   :  { %v7918_v13 = vpop.f32.mrb[9].mxu1 }
 0x49a   :  { %v7920_v14 = vpop.f32.mrb[10].mxu1 }
 0x49b   :  { %v7922_v15 = vpop.f32.mrb[11].mxu1 }
 0x4ae   :  { %v1055_v19 = vpop.f32.mrb[4].mxu0 }
 0x4af   :  { %v1090_v22 = vadd.f32 %v7925_v17, %v1055_v19  ;;  %v1057_v23 = vpop.f32.mrb[5].mxu0  ;;  %v6316_v19 = vpack.c.bf16 %v1471_v61, %v1467_v60  ;;  %v1492_v60 = vld [vmem:[#allocation22 + $0x1a0] sm:$0xff] }
 0x4b0   :  { %v1091_v27 = vadd.f32 %v7928_v18, %v1057_v23  ;;  %v1477_v23 = vld [vmem:[#allocation22 + $0x128] sm:$0xff] }
 0x4b1   :  { %v7936_v38 = vmax.f32 %v1090_v22, 0.0  ;;  %v1473_v22 = vld [vmem:[#allocation22 + $0x108] sm:$0xff] }
 0x4b2   :  { %v7932_v31 = vmax.f32 %v1091_v27, 0.0  ;;  %v7934_v33 = vpop.f32.mrb[6].mxu0  ;;  %v6318_v27 = vpack.c.bf16 %v1470_v20, %v1466_v7  ;;  %v6256_v30 = vpack.c.bf16 %v1477_v23, %v1473_v22  ;;  %v1503_v7 = vld [vmem:[#allocation22 + $0x1f8] sm:$0xff]  ;;  %v6266_v20 = vpack.c.bf16 %v1492_v60, %v1488_v59  ;;  %v1513_v60 = vld [vmem:[#allocation22 + $0x248] sm:$0xff] }
 0x4b3   :  { %v7938_v39 = vpop.f32.mrb[7].mxu0  ;;  %v1368_v23 = vld [vmem:[#allocation20] sm:$0x3] }
 0x4b4   :  { %1760 = vmatprep.mubr.f32.mxu0 %v7932_v31  ;;  %1873 = vmatprep.mubr.f32.mxu1 %v7932_v31 }
 0x4b5   :  { %1761 = vmatmul.mubr.f32.vlgmr.msra.gmra.mrb[20].mxu0 %v7936_v38  ;;  %1874 = vmatmul.mubr.f32.vlgmr.msra.gmra.mrb[12].mxu1 %v7936_v38 }
 0x4b6   :  { %6243 = vmatpush1.bf16.msra.mxu0 %v6242_v34  ;;  %6307 = vmatpush1.bf16.msra.mxu1 %v6306_v35  ;;  %v7944_v49 = vpop.f32.mrb[8].mxu0  ;;  %v6320_v34 = vpack.c.bf16 %v1479_v25, %v1475_v24  ;;  %v1474_v35 = vld [vmem:[#allocation22 + $0x110] sm:$0xff]  ;;  %v1496_v24 = vld [vmem:[#allocation22 + $0x1c0] sm:$0xff] }
 0x4b7   :  { %v7946_v53 = vpop.f32.mrb[9].mxu0  ;;  %6245 = vmatprep.subr.bf16.mxu0 %v6244_v40  ;;  %6309 = vmatprep.subr.bf16.mxu1 %v6308_v41  ;;  %v1485_v40 = vld [vmem:[#allocation22 + $0x168] sm:$0xff]  ;;  %v1483_v41 = vld [vmem:[#allocation22 + $0x158] sm:$0xff]  ;;  %v6322_v44 = vpack.c.bf16 %v1478_v36, %v1474_v35  ;;  %v1500_v25 = vld [vmem:[#allocation22 + $0x1e0] sm:$0xff] }
 0x4b8   :  { %v6260_v48 = vpack.c.bf16 %v1485_v40, %v1481_v37  ;;  %v1507_v35 = vld [vmem:[#allocation22 + $0x218] sm:$0xff]  ;;  %v7953_v37 = vrot.slane %v1368_v23, %v7849_v8 }
 0x4b9   :  { %v1511_v36 = vld [vmem:[#allocation22 + $0x238] sm:$0xff] }
 0x4ba   :  { %6247 = vmatpush1.bf16.msra.mxu0 %v6246_v50  ;;  %6311 = vmatpush1.bf16.msra.mxu1 %v6310_v51  ;;  %v7948_v62 = vpop.f32.mrb[10].mxu0  ;;  %v6324_v50 = vpack.c.bf16 %v1487_v42, %v1483_v41  ;;  %v1482_v51 = vld [vmem:[#allocation22 + $0x150] sm:$0xff]  ;;  %v7956_v41 = vrot.slane %v1368_v23, %v7852_v10  ;;  %v6270_v42 = vpack.c.bf16 %v1500_v25, %v1496_v24 }
 0x4bb   :  { %v7950_v3 = vpop.f32.mrb[11].mxu0  ;;  %6249 = vmatprep.subr.bf16.mxu0 %v6248_v55  ;;  %6313 = vmatprep.subr.bf16.mxu1 %v6312_v56  ;;  %v1493_v55 = vld [vmem:[#allocation22 + $0x1a8] sm:$0xff]  ;;  %v1491_v56 = vld [vmem:[#allocation22 + $0x198] sm:$0xff]  ;;  %v6326_v32 = vpack.c.bf16 %v1486_v52, %v1482_v51  ;;  %v6336_v51 = vpack.c.bf16 %v1511_v36, %v1507_v35  ;;  %v1506_v52 = vld [vmem:[#allocation22 + $0x210] sm:$0xff]  ;;  %v1092_v24 = vadd.f32 %v7925_v17, %v7934_v33 }
 0x4bc   :  { %v6264_v61 = vpack.c.bf16 %v1493_v55, %v1489_v21  ;;  %v1510_v21 = vld [vmem:[#allocation22 + $0x230] sm:$0xff]  ;;  %v1527_v36 = vld [vmem:[#allocation22 + $0x2b8] sm:$0xff] }
 0x4bd   :  { %v6338_v59 = vpack.c.bf16 %v1510_v21, %v1506_v52  ;;  %v1529_v52 = vld [vmem:[#allocation22 + $0x2c8] sm:$0xff] }
 0x4be   :  { %6251 = vmatpush1.bf16.msra.mxu0 %v6250_v63  ;;  %6315 = vmatpush1.bf16.msra.mxu1 %v6314_v1  ;;  %v6328_v63 = vpack.c.bf16 %v1495_v57, %v1491_v56  ;;  %v1490_v1 = vld [vmem:[#allocation22 + $0x190] sm:$0xff]  ;;  %v1533_v21 = vld [vmem:[#allocation22 + $0x2e8] sm:$0xff] }
 0x4bf   :  { %6253 = vmatprep.subr.bf16.mxu0 %v6252_v16  ;;  %6317 = vmatprep.subr.bf16.mxu1 %v6316_v19  ;;  %v1501_v16 = vld [vmem:[#allocation22 + $0x1e8] sm:$0xff]  ;;  %v1499_v19 = vld [vmem:[#allocation22 + $0x1d8] sm:$0xff]  ;;  %v6330_v22 = vpack.c.bf16 %v1494_v2, %v1490_v1 }
 0x4c2   :  { %6255 = vmatpush1.bf16.msra.mxu0 %v6254_v26  ;;  %6319 = vmatpush1.bf16.msra.mxu1 %v6318_v27  ;;  %v6268_v26 = vpack.c.bf16 %v1501_v16, %v1497_v47  ;;  %v6332_v27 = vpack.c.bf16 %v1503_v7, %v1499_v19  ;;  %v1512_v47 = vld [vmem:[#allocation22 + $0x240] sm:$0xff] }
 0x4c3   :  { %6257 = vmatprep.subr.bf16.mxu0 %v6256_v30  ;;  %6321 = vmatprep.subr.bf16.mxu1 %v6320_v34  ;;  %v1505_v30 = vld [vmem:[#allocation22 + $0x208] sm:$0xff]  ;;  %v1516_v16 = vld [vmem:[#allocation22 + $0x260] sm:$0xff] }
 0x4c4   :  { %v1509_v34 = vld [vmem:[#allocation22 + $0x228] sm:$0xff] }
 0x4c6   :  { %6259 = vmatpush1.bf16.msra.mxu0 %v6258_v43  ;;  %6323 = vmatpush1.bf16.msra.mxu1 %v6322_v44  ;;  %v6334_v43 = vpack.c.bf16 %v1502_v29, %v1498_v28  ;;  %v1504_v44 = vld [vmem:[#allocation22 + $0x200] sm:$0xff]  ;;  %v1525_v28 = vld [vmem:[#allocation22 + $0x2a8] sm:$0xff]  ;;  %v1523_v29 = vld [vmem:[#allocation22 + $0x298] sm:$0xff] }
 0x4c7   :  { %6261 = vmatprep.subr.bf16.mxu0 %v6260_v48  ;;  %6325 = vmatprep.subr.bf16.mxu1 %v6324_v50  ;;  %v6272_v50 = vpack.c.bf16 %v1509_v34, %v1505_v30  ;;  %v6274_v56 = vpack.c.bf16 %v1508_v45, %v1504_v44  ;;  %v1522_v44 = vld [vmem:[#allocation22 + $0x290] sm:$0xff] }
 0x4c8   :  { %v1526_v45 = vld [vmem:[#allocation22 + $0x2b0] sm:$0xff] }
 0x4ca   :  { %6263 = vmatpush1.bf16.msra.mxu0 %v6262_v58  ;;  %6327 = vmatpush1.bf16.msra.mxu1 %v6326_v32 }
 0x4cb   :  { %6265 = vmatprep.subr.bf16.mxu0 %v6264_v61  ;;  %6329 = vmatprep.subr.bf16.mxu1 %v6328_v63  ;;  %v1515_v61 = vld [vmem:[#allocation22 + $0x258] sm:$0xff]  ;;  %v1093_v63 = vadd.f32 %v7928_v18, %v7938_v39 }
 0x4cd   :  { %v7972_v30 = vmax.f32 %v1093_v63, 0.0  ;;  %v1530_v63 = vld [vmem:[#allocation22 + $0x2d0] sm:$0xff] }
 0x4ce   :  { %6267 = vmatpush1.bf16.msra.mxu0 %v6266_v20  ;;  %6331 = vmatpush1.bf16.msra.mxu1 %v6330_v22  ;;  %v1256_v40 = vpop.f32.mrb[12].mxu0  ;;  %v1514_v20 = vld [vmem:[#allocation22 + $0x250] sm:$0xff] }
 0x4cf   :  { %v1346_v46 = vadd.f32 %v7908_v5, %v1256_v40  ;;  %v1258_v48 = vpop.f32.mrb[13].mxu0  ;;  %6269 = vmatprep.subr.bf16.mxu0 %v6268_v26  ;;  %6333 = vmatprep.subr.bf16.mxu1 %v6332_v27  ;;  %v1517_v5 = vld [vmem:[#allocation22 + $0x268] sm:$0xff]  ;;  %v1518_v22 = vld [vmem:[#allocation22 + $0x270] sm:$0xff]  ;;  %v6278_v26 = vpack.c.bf16 %v1516_v16, %v1512_v47  ;;  %v1520_v40 = vld [vmem:[#allocation22 + $0x280] sm:$0xff] }
 0x4d0   :  { %v1348_v55 = vadd.f32 %v7910_v6, %v1258_v48  ;;  %v1519_v6 = vld [vmem:[#allocation22 + $0x278] sm:$0xff]  ;;  %v6276_v23 = vpack.c.bf16 %v1517_v5, %v1513_v60  ;;  %v1521_v27 = vld [vmem:[#allocation22 + $0x288] sm:$0xff]  ;;  %v6342_v35 = vpack.c.bf16 %v1518_v22, %v1514_v20  ;;  %v1528_v5 = vld [vmem:[#allocation22 + $0x2c0] sm:$0xff] }
 0x4d1   :  { %v1380_v57 = vadd.f32 %v7953_v37, %v1346_v46  ;;  %v6340_v39 = vpack.c.bf16 %v1519_v6, %v1515_v61  ;;  %v7985_v46 = vmax.f32 %v1092_v24, 0.0  ;;  %v1535_v60 = vld [vmem:[#allocation22 + $0x2f8] sm:$0xff]  ;;  %v1537_v47 = vld [vmem:[#allocation22 + $0x308] sm:$0xff] }
 0x4d2   :  { %v1381_v58 = vadd.f32 %v7956_v41, %v1348_v55  ;;  %6271 = vmatpush1.bf16.msra.mxu0 %v6270_v42  ;;  %6335 = vmatpush1.bf16.msra.mxu1 %v6334_v43  ;;  %v1262_v32 = vpop.f32.mrb[14].mxu0  ;;  %v1524_v42 = vld [vmem:[#allocation22 + $0x2a0] sm:$0xff]  ;;  %v1095_v55 = vadd.f32 %v7928_v18, %v7946_v53  ;;  %v1541_v16 = vld [vmem:[#allocation22 + $0x328] sm:$0xff]  ;;  %v1539_v24 = vld [vmem:[#allocation22 + $0x318] sm:$0xff] }
 0x4d3   :  { %v1352_v1 = vadd.f32 %v7912_v9, %v1262_v32  ;;  %v1264_v2 = vpop.f32.mrb[15].mxu0  ;;  %6273 = vmatprep.subr.bf16.mxu0 %v6272_v50  ;;  %6337 = vmatprep.subr.bf16.mxu1 %v6336_v51  ;;  %v7970_v25 = vmax.f32 %v1380_v57, 0.0  ;;  %v6344_v51 = vpack.c.bf16 %v1527_v36, %v1523_v29  ;;  %v6346_v32 = vpack.c.bf16 %v1526_v45, %v1522_v44  ;;  %v1532_v53 = vld [vmem:[#allocation22 + $0x2e0] sm:$0xff]  ;;  %v1549_v36 = vld [vmem:[#allocation22 + $0x368] sm:$0xff]  ;;  %v1547_v45 = vld [vmem:[#allocation22 + $0x358] sm:$0xff] }
 0x4d4   :  { %v7965_v19 = vmax.f32 %v1381_v58, 0.0  ;;  %v1354_v7 = vadd.f32 %v7914_v11, %v1264_v2  ;;  %v6286_v22 = vpack.c.bf16 %v1532_v53, %v1528_v5  ;;  %v1555_v5 = vld [vmem:[#allocation22 + $0x398] sm:$0xff] }
 0x4d5   :  { %v1382_v48 = vadd.f32 %v7953_v37, %v1352_v1  ;;  %v1534_v1 = vld [vmem:[#allocation22 + $0x2f0] sm:$0xff]  ;;  %v1559_v53 = vld [vmem:[#allocation22 + $0x3b8] sm:$0xff] }
 0x4d6   :  { %6275 = vmatpush1.bf16.msra.mxu0 %v6274_v56  ;;  %6339 = vmatpush1.bf16.msra.mxu1 %v6338_v59  ;;  %v1268_v9 = vpop.f32.mrb[16].mxu0  ;;  %v1383_v11 = vadd.f32 %v7956_v41, %v1354_v7  ;;  %v1531_v59 = vld [vmem:[#allocation22 + $0x2d8] sm:$0xff]  ;;  %v8006_v7 = vmax.f32 %v1095_v55, 0.0  ;;  %v1557_v55 = vld [vmem:[#allocation22 + $0x3a8] sm:$0xff] }
 0x4d7   :  { %v7976_v34 = vadd.f32 %v7916_v12, %v1268_v9  ;;  %1766 = vmatprep.mubr.f32.mxu0 %v7965_v19  ;;  %1879 = vmatprep.mubr.f32.mxu1 %v7965_v19  ;;  %v1270_v33 = vpop.f32.mrb[17].mxu0  ;;  %v6280_v12 = vpack.c.bf16 %v1525_v28, %v1521_v27  ;;  %v8004_v2 = vmax.f32 %v1382_v48, 0.0  ;;  %v6348_v6 = vpack.c.bf16 %v1535_v60, %v1531_v59  ;;  %v1543_v9 = vld [vmem:[#allocation22 + $0x338] sm:$0xff]  ;;  %v1542_v27 = vld [vmem:[#allocation22 + $0x330] sm:$0xff]  ;;  %v1544_v48 = vld [vmem:[#allocation22 + $0x340] sm:$0xff] }
 0x4d8   :  { %v1360_v43 = vadd.f32 %v7918_v13, %v1270_v33  ;;  %1767 = vmatmul.mubr.f32.gmra.mrb[22].mxu0 %v7970_v25  ;;  %1880 = vmatmul.mubr.f32.gmra.mrb[14].mxu1 %v7970_v25  ;;  %v6282_v13 = vpack.c.bf16 %v1524_v42, %v1520_v40  ;;  %v7990_v56 = vmax.f32 %v1383_v11, 0.0  ;;  %v6288_v11 = vpack.c.bf16 %v1541_v16, %v1537_v47  ;;  %v1565_v47 = vld [vmem:[#allocation22 + $0x3e8] sm:$0xff]  ;;  %v1563_v16 = vld [vmem:[#allocation22 + $0x3d8] sm:$0xff] }
 0x4d9   :  { %1772 = vmatprep.mubr.f32.mxu0 %v7972_v30  ;;  %1885 = vmatprep.mubr.f32.mxu1 %v7972_v30  ;;  %v1384_v29 = vadd.f32 %v7953_v37, %v7976_v34  ;;  %v6352_v33 = vpack.c.bf16 %v1543_v9, %v1539_v24  ;;  %v1097_v40 = vadd.f32 %v7928_v18, %v7950_v3  ;;  %v1548_v34 = vld [vmem:[#allocation22 + $0x360] sm:$0xff] }
 0x4da   :  { %6277 = vmatprep.subr.bf16.mxu0 %v6276_v23  ;;  %6341 = vmatprep.subr.bf16.mxu1 %v6340_v39  ;;  %v1274_v50 = vpop.f32.mrb[18].mxu0  ;;  %v1385_v20 = vadd.f32 %v7956_v41, %v1360_v43  ;;  %v6350_v23 = vpack.c.bf16 %v1534_v1, %v1530_v63  ;;  %v1536_v39 = vld [vmem:[#allocation22 + $0x300] sm:$0xff]  ;;  %v1096_v18 = vadd.f32 %v7925_v17, %v7948_v62  ;;  %v1554_v63 = vld [vmem:[#allocation22 + $0x390] sm:$0xff] }
 0x4db   :  { %6279 = vmatpush1.bf16.msra.mxu0 %v6278_v26  ;;  %6343 = vmatpush1.bf16.msra.mxu1 %v6342_v35  ;;  %v7993_v57 = vadd.f32 %v7920_v14, %v1274_v50  ;;  %v1276_v58 = vpop.f32.mrb[19].mxu0  ;;  %v1094_v14 = vadd.f32 %v7925_v17, %v7944_v49  ;;  %v1540_v49 = vld [vmem:[#allocation22 + $0x320] sm:$0xff]  ;;  %v1538_v26 = vld [vmem:[#allocation22 + $0x310] sm:$0xff]  ;;  %v1545_v35 = vld [vmem:[#allocation22 + $0x348] sm:$0xff]  ;;  %v8027_v3 = vmax.f32 %v1384_v29, 0.0  ;;  %v6294_v59 = vpack.c.bf16 %v1548_v34, %v1544_v48 }
 0x4dc   :  { %v7996_v61 = vadd.f32 %v7922_v15, %v1276_v58  ;;  %1773 = vmatmul.mubr.f32.gmra.mrb[24].mxu0 %v7985_v46  ;;  %1886 = vmatmul.mubr.f32.gmra.mrb[16].mxu1 %v7985_v46  ;;  %v6284_v15 = vpack.c.bf16 %v1533_v21, %v1529_v52  ;;  %v8019_v42 = vmax.f32 %v1385_v20, 0.0  ;;  %v6290_v43 = vpack.c.bf16 %v1540_v49, %v1536_v39  ;;  %v1546_v50 = vld [vmem:[#allocation22 + $0x350] sm:$0xff]  ;;  %v1553_v21 = vld [vmem:[#allocation22 + $0x388] sm:$0xff]  ;;  %v1552_v17 = vld [vmem:[#allocation22 + $0x380] sm:$0xff] }
 0x4dd   :  { %1778 = vmatprep.mubr.f32.mxu0 %v7990_v56  ;;  %1891 = vmatprep.mubr.f32.mxu1 %v7990_v56  ;;  %v8013_v28 = vmax.f32 %v1094_v14, 0.0  ;;  %v6354_v44 = vpack.c.bf16 %v1542_v27, %v1538_v26  ;;  %v8029_v58 = vmax.f32 %v1097_v40, 0.0  ;;  %v1556_v62 = vld [vmem:[#allocation22 + $0x3a0] sm:$0xff]  ;;  %v1558_v1 = vld [vmem:[#allocation22 + $0x3b0] sm:$0xff]  ;;  %v1561_v14 = vld [vmem:[#allocation22 + $0x3c8] sm:$0xff] }
 0x4de   :  { %6281 = vmatprep.subr.bf16.mxu0 %v6280_v12  ;;  %6345 = vmatprep.subr.bf16.mxu1 %v6344_v51  ;;  %v1551_v12 = vld [vmem:[#allocation22 + $0x378] sm:$0xff]  ;;  %v1550_v51 = vld [vmem:[#allocation22 + $0x370] sm:$0xff]  ;;  %v6362_v24 = vpack.c.bf16 %v1558_v1, %v1554_v63  ;;  %v1560_v9 = vld [vmem:[#allocation22 + $0x3c0] sm:$0xff]  ;;  %v6300_v26 = vpack.c.bf16 %v1565_v47, %v1561_v14 }
 0x4df   :  { %6283 = vmatpush1.bf16.msra.mxu0 %v6282_v13  ;;  %6347 = vmatpush1.bf16.msra.mxu1 %v6346_v32  ;;  %v6292_v13 = vpack.c.bf16 %v1549_v36, %v1545_v35  ;;  %v6356_v52 = vpack.c.bf16 %v1551_v12, %v1547_v45  ;;  %v1387_v32 = vadd.f32 %v7956_v41, %v7996_v61  ;;  %v8037_v41 = vmax.f32 %v1096_v18, 0.0  ;;  %v1567_v20 = vld [vmem:[#allocation22 + $0x3f8] sm:$0xff]  ;;  %v1564_v39 = vld [vmem:[#allocation22 + $0x3e0] sm:$0xff]  ;;  %v2435_v49 = vld [vmem:[#allocation23 + $0x408] sm:$0xff] }
 0x4e0   :  { %1779 = vmatmul.mubr.f32.gmra.mrb[26].mxu0 %v8004_v2  ;;  %1892 = vmatmul.mubr.f32.gmra.mrb[18].mxu1 %v8004_v2  ;;  %v6358_v60 = vpack.c.bf16 %v1550_v51, %v1546_v50  ;;  %v1386_v61 = vadd.f32 %v7953_v37, %v7993_v57  ;;  %v1562_v37 = vld [vmem:[#allocation22 + $0x3d0] sm:$0xff]  ;;  %v6364_v27 = vpack.c.bf16 %v1567_v20, %v1563_v16  ;;  %v2439_v29 = vld [vmem:[#allocation23 + $0x428] sm:$0xff]  ;;  %v2434_v45 = vld [vmem:[#allocation23 + $0x400] sm:$0xff] }
 0x4e1   :  { %1784 = vmatprep.mubr.f32.mxu0 %v8006_v7  ;;  %1897 = vmatprep.mubr.f32.mxu1 %v8006_v7  ;;  %v1566_v57 = vld [vmem:[#allocation22 + $0x3f0] sm:$0xff]  ;;  %v6302_v36 = vpack.c.bf16 %v1564_v39, %v1560_v9  ;;  %v2438_v12 = vld [vmem:[#allocation23 + $0x420] sm:$0xff]  ;;  %v2443_v50 = vld [vmem:[#allocation23 + $0x448] sm:$0xff] }
 0x4e2   :  { %6285 = vmatprep.subr.bf16.mxu0 %v6284_v15  ;;  %6349 = vmatprep.subr.bf16.mxu1 %v6348_v6  ;;  %v6296_v15 = vpack.c.bf16 %v1557_v55, %v1553_v21  ;;  %v6360_v6 = vpack.c.bf16 %v1559_v53, %v1555_v5  ;;  %v8047_v35 = vmax.f32 %v1386_v61, 0.0  ;;  %v6366_v40 = vpack.c.bf16 %v1566_v57, %v1562_v37  ;;  %v2436_v48 = vld [vmem:[#allocation23 + $0x410] sm:$0xff]  ;;  %v2447_v51 = vld [vmem:[#allocation23 + $0x468] sm:$0xff]  ;;  %v2445_v18 = vld [vmem:[#allocation23 + $0x458] sm:$0xff] }
 0x4e3   :  { %6287 = vmatpush1.bf16.msra.mxu0 %v6286_v22  ;;  %6351 = vmatpush1.bf16.msra.mxu1 %v6350_v23  ;;  %v8041_v22 = vmax.f32 %v1387_v32, 0.0  ;;  %v6298_v23 = vpack.c.bf16 %v1556_v62, %v1552_v17  ;;  %v2440_v34 = vld [vmem:[#allocation23 + $0x430] sm:$0xff]  ;;  %v2442_v55 = vld [vmem:[#allocation23 + $0x440] sm:$0xff]  ;;  %v2451_v17 = vld [vmem:[#allocation23 + $0x488] sm:$0xff] }
 0x4e4   :  { %1785 = vmatmul.mubr.f32.gmra.mrb[28].mxu0 %v8013_v28  ;;  %1898 = vmatmul.mubr.f32.gmra.mrb[20].mxu1 %v8013_v28  ;;  %v6434_v21 = vpack.c.bf16 %v2440_v34, %v2436_v48  ;;  %v2446_v32 = vld [vmem:[#allocation23 + $0x460] sm:$0xff]  ;;  %v2444_v5 = vld [vmem:[#allocation23 + $0x450] sm:$0xff]  ;;  %v2455_v62 = vld [vmem:[#allocation23 + $0x4a8] sm:$0xff] }
 0x4e5   :  { %1790 = vmatprep.mubr.f32.mxu0 %v8019_v42  ;;  %1903 = vmatprep.mubr.f32.mxu1 %v8019_v42  ;;  %v2448_v53 = vld [vmem:[#allocation23 + $0x470] sm:$0xff]  ;;  %v2453_v63 = vld [vmem:[#allocation23 + $0x498] sm:$0xff]  ;;  %v6374_v14 = vpack.c.bf16 %v2446_v32, %v2442_v55  ;;  %v6376_v47 = vpack.c.bf16 %v2455_v62, %v2451_v17  ;;  %v2463_v9 = vld [vmem:[#allocation23 + $0x4e8] sm:$0xff] }
 0x4e6   :  { %6289 = vmatprep.subr.bf16.mxu0 %v6288_v11  ;;  %6353 = vmatprep.subr.bf16.mxu1 %v6352_v33  ;;  %v2437_v11 = vld [vmem:[#allocation23 + $0x418] sm:$0xff]  ;;  %v6438_v61 = vpack.c.bf16 %v2448_v53, %v2444_v5  ;;  %v2452_v20 = vld [vmem:[#allocation23 + $0x490] sm:$0xff]  ;;  %v2466_v34 = vld [vmem:[#allocation23 + $0x500] sm:$0xff] }
 0x4e7   :  { %6291 = vmatpush1.bf16.msra.mxu0 %v6290_v43  ;;  %6355 = vmatpush1.bf16.msra.mxu1 %v6354_v44  ;;  %v2441_v33 = vld [vmem:[#allocation23 + $0x438] sm:$0xff]  ;;  %v6368_v43 = vpack.c.bf16 %v2439_v29, %v2435_v49  ;;  %v2479_v55 = vld [vmem:[#allocation23 + $0x568] sm:$0xff]  ;;  %v2474_v53 = vld [vmem:[#allocation23 + $0x540] sm:$0xff] }
 0x4e8   :  { %1791 = vmatmul.mubr.f32.gmra.mrb[30].mxu0 %v8027_v3  ;;  %1904 = vmatmul.mubr.f32.gmra.mrb[22].mxu1 %v8027_v3  ;;  %v6432_v44 = vpack.c.bf16 %v2441_v33, %v2437_v11  ;;  %v2457_v1 = vld [vmem:[#allocation23 + $0x4b8] sm:$0xff]  ;;  %v2460_v33 = vld [vmem:[#allocation23 + $0x4d0] sm:$0xff]  ;;  %v2478_v17 = vld [vmem:[#allocation23 + $0x560] sm:$0xff] }
 0x4e9   :  { %1796 = vmatprep.mubr.f32.mxu0 %v8029_v58  ;;  %1909 = vmatprep.mubr.f32.mxu1 %v8029_v58  ;;  %v6440_v16 = vpack.c.bf16 %v2457_v1, %v2453_v63  ;;  %v2461_v39 = vld [vmem:[#allocation23 + $0x4d8] sm:$0xff]  ;;  %v2476_v1 = vld [vmem:[#allocation23 + $0x550] sm:$0xff] }
 0x4ea   :  { %6293 = vmatprep.subr.bf16.mxu0 %v6292_v13  ;;  %6357 = vmatprep.subr.bf16.mxu1 %v6356_v52  ;;  %v2449_v13 = vld [vmem:[#allocation23 + $0x478] sm:$0xff]  ;;  %v6370_v52 = vpack.c.bf16 %v2438_v12, %v2434_v45 }
 0x4eb   :  { %6295 = vmatpush1.bf16.msra.mxu0 %v6294_v59  ;;  %6359 = vmatpush1.bf16.msra.mxu1 %v6358_v60  ;;  %v6372_v59 = vpack.c.bf16 %v2447_v51, %v2443_v50  ;;  %v6436_v60 = vpack.c.bf16 %v2449_v13, %v2445_v18  ;;  %v2465_v37 = vld [vmem:[#allocation23 + $0x4f8] sm:$0xff]  ;;  %v2470_v50 = vld [vmem:[#allocation23 + $0x520] sm:$0xff]  ;;  %v2468_v13 = vld [vmem:[#allocation23 + $0x510] sm:$0xff] }
 0x4ec   :  { %1797 = vmatmul.mubr.f32.gmra.mrb[32].mxu0 %v8037_v41  ;;  %1910 = vmatmul.mubr.f32.gmra.mrb[24].mxu1 %v8037_v41  ;;  %v6444_v11 = vpack.c.bf16 %v2465_v37, %v2461_v39  ;;  %v2473_v45 = vld [vmem:[#allocation23 + $0x538] sm:$0xff]  ;;  %v2484_v37 = vld [vmem:[#allocation23 + $0x590] sm:$0xff] }
 0x4ed   :  { %1802 = vmatprep.mubr.f32.mxu0 %v8041_v22  ;;  %1915 = vmatprep.mubr.f32.mxu1 %v8041_v22  ;;  %v2477_v32 = vld [vmem:[#allocation23 + $0x558] sm:$0xff] }
 0x4ee   :  { %6297 = vmatprep.subr.bf16.mxu0 %v6296_v15  ;;  %6361 = vmatprep.subr.bf16.mxu1 %v6360_v6  ;;  %v2450_v15 = vld [vmem:[#allocation23 + $0x480] sm:$0xff] }
 0x4ef   :  { %6299 = vmatpush1.bf16.msra.mxu0 %v6298_v23  ;;  %6363 = vmatpush1.bf16.msra.mxu1 %v6362_v24  ;;  %v2454_v6 = vld [vmem:[#allocation23 + $0x4a0] sm:$0xff]  ;;  %v2456_v23 = vld [vmem:[#allocation23 + $0x4b0] sm:$0xff]  ;;  %v2459_v24 = vld [vmem:[#allocation23 + $0x4c8] sm:$0xff] }
 0x4f0   :  { %1803 = vmatmul.mubr.f32.gmra.mrb[34].mxu0 %v8047_v35  ;;  %1916 = vmatmul.mubr.f32.gmra.mrb[26].mxu1 %v8047_v35  ;;  %v6378_v57 = vpack.c.bf16 %v2454_v6, %v2450_v15  ;;  %v6442_v49 = vpack.c.bf16 %v2456_v23, %v2452_v20  ;;  %v6380_v29 = vpack.c.bf16 %v2463_v9, %v2459_v24  ;;  %v2487_v15 = vld [vmem:[#allocation23 + $0x5a8] sm:$0xff]  ;;  %v2485_v6 = vld [vmem:[#allocation23 + $0x598] sm:$0xff]  ;;  %v2482_v23 = vld [vmem:[#allocation23 + $0x580] sm:$0xff] }
 0x4f1   :  { %6301 = vmatprep.subr.bf16.mxu0 %v6300_v26  ;;  %6365 = vmatprep.subr.bf16.mxu1 %v6364_v27  ;;  %v2458_v26 = vld [vmem:[#allocation23 + $0x4c0] sm:$0xff] }
 0x4f2   :  { %1986 = vmatprep.mubr.f32.mxu0 %v8925_v0  ;;  %2099 = vmatprep.mubr.f32.mxu1 %v8925_v0  ;;  %v2462_v27 = vld [vmem:[#allocation23 + $0x4e0] sm:$0xff] }
 0x4f3   :  { %6303 = vmatpush1.bf16.msra.mxu0 %v6302_v36  ;;  %6367 = vmatpush1.bf16.msra.mxu1 %v6366_v40  ;;  %v2464_v36 = vld [vmem:[#allocation23 + $0x4f0] sm:$0xff]  ;;  %v2467_v40 = vld [vmem:[#allocation23 + $0x508] sm:$0xff]  ;;  %v6382_v12 = vpack.c.bf16 %v2462_v27, %v2458_v26  ;;  %v2486_v24 = vld [vmem:[#allocation23 + $0x5a0] sm:$0xff] }
 0x4f4   :  { %6369 = vmatprep.subr.bf16.mxu0 %v6368_v43  ;;  %6433 = vmatprep.subr.bf16.mxu1 %v6432_v44  ;;  %v2471_v43 = vld [vmem:[#allocation23 + $0x528] sm:$0xff]  ;;  %v2469_v44 = vld [vmem:[#allocation23 + $0x518] sm:$0xff]  ;;  %v6446_v48 = vpack.c.bf16 %v2464_v36, %v2460_v33  ;;  %v2490_v36 = vld [vmem:[#allocation23 + $0x5c0] sm:$0xff] }
 0x4f5   :  { %v6384_v51 = vpack.c.bf16 %v2471_v43, %v2467_v40  ;;  %v6448_v18 = vpack.c.bf16 %v2473_v45, %v2469_v44  ;;  %v2495_v26 = vld [vmem:[#allocation23 + $0x5e8] sm:$0xff]  ;;  %v2493_v27 = vld [vmem:[#allocation23 + $0x5d8] sm:$0xff]  ;;  %v2494_v40 = vld [vmem:[#allocation23 + $0x5e0] sm:$0xff] }
 0x4f6   :  { %1987 = vmatmul.mubr.f32.vlgmr.msra.gmra.mrb[20].mxu0 %v8925_v0  ;;  %2100 = vmatmul.mubr.f32.vlgmr.msra.gmra.mrb[12].mxu1 %v8925_v0  ;;  %v2492_v45 = vld [vmem:[#allocation23 + $0x5d0] sm:$0xff] }
 0x4f7   :  { %1992 = vmatprep.mubr.f32.mxu0 %v7932_v31  ;;  %2105 = vmatprep.mubr.f32.mxu1 %v7932_v31 }
 0x4f8   :  { %6371 = vmatpush1.bf16.msra.mxu0 %v6370_v52  ;;  %6435 = vmatpush1.bf16.msra.mxu1 %v6434_v21  ;;  %v2472_v52 = vld [vmem:[#allocation23 + $0x530] sm:$0xff]  ;;  %v2475_v21 = vld [vmem:[#allocation23 + $0x548] sm:$0xff] }
 0x4f9   :  { %6373 = vmatprep.subr.bf16.mxu0 %v6372_v59  ;;  %6437 = vmatprep.subr.bf16.mxu1 %v6436_v60  ;;  %v2481_v59 = vld [vmem:[#allocation23 + $0x578] sm:$0xff]  ;;  %v6386_v60 = vpack.c.bf16 %v2470_v50, %v2466_v34  ;;  %v6450_v5 = vpack.c.bf16 %v2472_v52, %v2468_v13  ;;  %v6388_v62 = vpack.c.bf16 %v2479_v55, %v2475_v21  ;;  %v2503_v34 = vld [vmem:[#allocation23 + $0x628] sm:$0xff]  ;;  %v2498_v52 = vld [vmem:[#allocation23 + $0x600] sm:$0xff] }
 0x4fa   :  { %1993 = vmatmul.mubr.f32.gmra.mrb[22].mxu0 %v7936_v38  ;;  %2106 = vmatmul.mubr.f32.gmra.mrb[14].mxu1 %v7936_v38  ;;  %v6452_v63 = vpack.c.bf16 %v2481_v59, %v2477_v32  ;;  %v2501_v50 = vld [vmem:[#allocation23 + $0x618] sm:$0xff]  ;;  %v2502_v21 = vld [vmem:[#allocation23 + $0x620] sm:$0xff]  ;;  %v2500_v59 = vld [vmem:[#allocation23 + $0x610] sm:$0xff] }
 0x4fb   :  { %1998 = vmatprep.mubr.f32.mxu0 %v7965_v19  ;;  %2111 = vmatprep.mubr.f32.mxu1 %v7965_v19 }
 0x4fc   :  { %6375 = vmatpush1.bf16.msra.mxu0 %v6374_v14  ;;  %6439 = vmatpush1.bf16.msra.mxu1 %v6438_v61  ;;  %v2480_v14 = vld [vmem:[#allocation23 + $0x570] sm:$0xff]  ;;  %v2483_v61 = vld [vmem:[#allocation23 + $0x588] sm:$0xff] }
 0x4fd   :  { %6377 = vmatprep.subr.bf16.mxu0 %v6376_v47  ;;  %6441 = vmatprep.subr.bf16.mxu1 %v6440_v16  ;;  %v2489_v47 = vld [vmem:[#allocation23 + $0x5b8] sm:$0xff]  ;;  %v6390_v16 = vpack.c.bf16 %v2478_v17, %v2474_v53  ;;  %v6454_v20 = vpack.c.bf16 %v2480_v14, %v2476_v1  ;;  %v6392_v9 = vpack.c.bf16 %v2487_v15, %v2483_v61  ;;  %v2511_v53 = vld [vmem:[#allocation23 + $0x668] sm:$0xff]  ;;  %v2506_v14 = vld [vmem:[#allocation23 + $0x640] sm:$0xff] }
 0x4fe   :  { %1999 = vmatmul.mubr.f32.gmra.mrb[24].mxu0 %v7970_v25  ;;  %2112 = vmatmul.mubr.f32.gmra.mrb[16].mxu1 %v7970_v25  ;;  %v6456_v39 = vpack.c.bf16 %v2489_v47, %v2485_v6  ;;  %v2509_v17 = vld [vmem:[#allocation23 + $0x658] sm:$0xff]  ;;  %v2510_v61 = vld [vmem:[#allocation23 + $0x660] sm:$0xff]  ;;  %v2508_v47 = vld [vmem:[#allocation23 + $0x650] sm:$0xff] }
 0x4ff   :  { %2004 = vmatprep.mubr.f32.mxu0 %v7972_v30  ;;  %2117 = vmatprep.mubr.f32.mxu1 %v7972_v30 }
 0x500   :  { %6379 = vmatpush1.bf16.msra.mxu0 %v6378_v57  ;;  %6443 = vmatpush1.bf16.msra.mxu1 %v6442_v49  ;;  %v2488_v57 = vld [vmem:[#allocation23 + $0x5b0] sm:$0xff]  ;;  %v2491_v49 = vld [vmem:[#allocation23 + $0x5c8] sm:$0xff] }
 0x501   :  { %6381 = vmatprep.subr.bf16.mxu0 %v6380_v29  ;;  %6445 = vmatprep.subr.bf16.mxu1 %v6444_v11  ;;  %v2497_v29 = vld [vmem:[#allocation23 + $0x5f8] sm:$0xff]  ;;  %v6394_v11 = vpack.c.bf16 %v2486_v24, %v2482_v23  ;;  %v6458_v33 = vpack.c.bf16 %v2488_v57, %v2484_v37  ;;  %v6396_v43 = vpack.c.bf16 %v2495_v26, %v2491_v49  ;;  %v2519_v23 = vld [vmem:[#allocation23 + $0x6a8] sm:$0xff]  ;;  %v2514_v57 = vld [vmem:[#allocation23 + $0x680] sm:$0xff] }
 0x502   :  { %2005 = vmatmul.mubr.f32.gmra.mrb[26].mxu0 %v7985_v46  ;;  %2118 = vmatmul.mubr.f32.gmra.mrb[18].mxu1 %v7985_v46  ;;  %v6460_v44 = vpack.c.bf16 %v2497_v29, %v2493_v27  ;;  %v2517_v24 = vld [vmem:[#allocation23 + $0x698] sm:$0xff]  ;;  %v2518_v49 = vld [vmem:[#allocation23 + $0x6a0] sm:$0xff]  ;;  %v2516_v29 = vld [vmem:[#allocation23 + $0x690] sm:$0xff] }
 0x503   :  { %2010 = vmatprep.mubr.f32.mxu0 %v7990_v56  ;;  %2123 = vmatprep.mubr.f32.mxu1 %v7990_v56 }
 0x504   :  { %6383 = vmatpush1.bf16.msra.mxu0 %v6382_v12  ;;  %6447 = vmatpush1.bf16.msra.mxu1 %v6446_v48  ;;  %v2496_v12 = vld [vmem:[#allocation23 + $0x5f0] sm:$0xff]  ;;  %v2499_v48 = vld [vmem:[#allocation23 + $0x608] sm:$0xff] }
 0x505   :  { %6385 = vmatprep.subr.bf16.mxu0 %v6384_v51  ;;  %6449 = vmatprep.subr.bf16.mxu1 %v6448_v18  ;;  %v2505_v51 = vld [vmem:[#allocation23 + $0x638] sm:$0xff]  ;;  %v6398_v18 = vpack.c.bf16 %v2494_v40, %v2490_v36  ;;  %v6462_v13 = vpack.c.bf16 %v2496_v12, %v2492_v45  ;;  %v6400_v55 = vpack.c.bf16 %v2503_v34, %v2499_v48  ;;  %v2527_v36 = vld [vmem:[#allocation23 + $0x6e8] sm:$0xff]  ;;  %v2522_v12 = vld [vmem:[#allocation23 + $0x6c0] sm:$0xff] }
 0x506   :  { %2011 = vmatmul.mubr.f32.gmra.mrb[28].mxu0 %v8004_v2  ;;  %2124 = vmatmul.mubr.f32.gmra.mrb[20].mxu1 %v8004_v2  ;;  %v6464_v32 = vpack.c.bf16 %v2505_v51, %v2501_v50  ;;  %v2525_v40 = vld [vmem:[#allocation23 + $0x6d8] sm:$0xff]  ;;  %v2526_v48 = vld [vmem:[#allocation23 + $0x6e0] sm:$0xff]  ;;  %v2524_v51 = vld [vmem:[#allocation23 + $0x6d0] sm:$0xff] }
 0x507   :  { %2016 = vmatprep.mubr.f32.mxu0 %v8006_v7  ;;  %2129 = vmatprep.mubr.f32.mxu1 %v8006_v7 }
 0x508   :  { %6387 = vmatpush1.bf16.msra.mxu0 %v6386_v60  ;;  %6451 = vmatpush1.bf16.msra.mxu1 %v6450_v5  ;;  %v2504_v60 = vld [vmem:[#allocation23 + $0x630] sm:$0xff]  ;;  %v2507_v5 = vld [vmem:[#allocation23 + $0x648] sm:$0xff] }
 0x509   :  { %6389 = vmatprep.subr.bf16.mxu0 %v6388_v62  ;;  %6453 = vmatprep.subr.bf16.mxu1 %v6452_v63  ;;  %v2513_v62 = vld [vmem:[#allocation23 + $0x678] sm:$0xff]  ;;  %v6402_v63 = vpack.c.bf16 %v2502_v21, %v2498_v52  ;;  %v6466_v1 = vpack.c.bf16 %v2504_v60, %v2500_v59  ;;  %v6404_v15 = vpack.c.bf16 %v2511_v53, %v2507_v5  ;;  %v2535_v52 = vld [vmem:[#allocation23 + $0x728] sm:$0xff]  ;;  %v2530_v60 = vld [vmem:[#allocation23 + $0x700] sm:$0xff] }
 0x50a   :  { %2017 = vmatmul.mubr.f32.gmra.mrb[30].mxu0 %v8013_v28  ;;  %2130 = vmatmul.mubr.f32.gmra.mrb[22].mxu1 %v8013_v28  ;;  %v6468_v6 = vpack.c.bf16 %v2513_v62, %v2509_v17  ;;  %v2533_v21 = vld [vmem:[#allocation23 + $0x718] sm:$0xff]  ;;  %v2534_v5 = vld [vmem:[#allocation23 + $0x720] sm:$0xff]  ;;  %v2532_v62 = vld [vmem:[#allocation23 + $0x710] sm:$0xff] }
 0x50b   :  { %2022 = vmatprep.mubr.f32.mxu0 %v8019_v42  ;;  %2135 = vmatprep.mubr.f32.mxu1 %v8019_v42 }
 0x50c   :  { %6391 = vmatpush1.bf16.msra.mxu0 %v6390_v16  ;;  %6455 = vmatpush1.bf16.msra.mxu1 %v6454_v20  ;;  %v2512_v16 = vld [vmem:[#allocation23 + $0x670] sm:$0xff]  ;;  %v2515_v20 = vld [vmem:[#allocation23 + $0x688] sm:$0xff] }
 0x50d   :  { %6393 = vmatprep.subr.bf16.mxu0 %v6392_v9  ;;  %6457 = vmatprep.subr.bf16.mxu1 %v6456_v39  ;;  %v2521_v9 = vld [vmem:[#allocation23 + $0x6b8] sm:$0xff]  ;;  %v6406_v39 = vpack.c.bf16 %v2510_v61, %v2506_v14  ;;  %v6470_v37 = vpack.c.bf16 %v2512_v16, %v2508_v47  ;;  %v6408_v26 = vpack.c.bf16 %v2519_v23, %v2515_v20  ;;  %v2543_v14 = vld [vmem:[#allocation23 + $0x768] sm:$0xff]  ;;  %v2538_v16 = vld [vmem:[#allocation23 + $0x740] sm:$0xff] }
 0x50e   :  { %2023 = vmatmul.mubr.f32.gmra.mrb[32].mxu0 %v8027_v3  ;;  %2136 = vmatmul.mubr.f32.gmra.mrb[24].mxu1 %v8027_v3  ;;  %v6472_v27 = vpack.c.bf16 %v2521_v9, %v2517_v24  ;;  %v2541_v61 = vld [vmem:[#allocation23 + $0x758] sm:$0xff]  ;;  %v2542_v20 = vld [vmem:[#allocation23 + $0x760] sm:$0xff]  ;;  %v2540_v9 = vld [vmem:[#allocation23 + $0x750] sm:$0xff] }
 0x50f   :  { %2028 = vmatprep.mubr.f32.mxu0 %v8029_v58  ;;  %2141 = vmatprep.mubr.f32.mxu1 %v8029_v58 }
 0x510   :  { %6395 = vmatpush1.bf16.msra.mxu0 %v6394_v11  ;;  %6459 = vmatpush1.bf16.msra.mxu1 %v6458_v33  ;;  %v2520_v11 = vld [vmem:[#allocation23 + $0x6b0] sm:$0xff]  ;;  %v2523_v33 = vld [vmem:[#allocation23 + $0x6c8] sm:$0xff] }
 0x511   :  { %6397 = vmatprep.subr.bf16.mxu0 %v6396_v43  ;;  %6461 = vmatprep.subr.bf16.mxu1 %v6460_v44  ;;  %v2529_v43 = vld [vmem:[#allocation23 + $0x6f8] sm:$0xff]  ;;  %v6410_v44 = vpack.c.bf16 %v2518_v49, %v2514_v57  ;;  %v6474_v45 = vpack.c.bf16 %v2520_v11, %v2516_v29  ;;  %v6412_v34 = vpack.c.bf16 %v2527_v36, %v2523_v33  ;;  %v2551_v57 = vld [vmem:[#allocation23 + $0x7a8] sm:$0xff]  ;;  %v2546_v11 = vld [vmem:[#allocation23 + $0x780] sm:$0xff] }
 0x512   :  { %2029 = vmatmul.mubr.f32.gmra.mrb[34].mxu0 %v8037_v41  ;;  %2142 = vmatmul.mubr.f32.gmra.mrb[26].mxu1 %v8037_v41  ;;  %v6476_v50 = vpack.c.bf16 %v2529_v43, %v2525_v40  ;;  %v2549_v49 = vld [vmem:[#allocation23 + $0x798] sm:$0xff]  ;;  %v2550_v33 = vld [vmem:[#allocation23 + $0x7a0] sm:$0xff]  ;;  %v2548_v43 = vld [vmem:[#allocation23 + $0x790] sm:$0xff] }
 0x513   :  { %2626 = vmatprep.mubr.f32.mxu0 %v7965_v19  ;;  %2739 = vmatprep.mubr.f32.mxu1 %v7965_v19 }
 0x514   :  { %6399 = vmatpush1.bf16.msra.mxu0 %v6398_v18  ;;  %6463 = vmatpush1.bf16.msra.mxu1 %v6462_v13  ;;  %v2528_v18 = vld [vmem:[#allocation23 + $0x6f0] sm:$0xff]  ;;  %v2531_v13 = vld [vmem:[#allocation23 + $0x708] sm:$0xff] }
 0x515   :  { %6401 = vmatprep.subr.bf16.mxu0 %v6400_v55  ;;  %6465 = vmatprep.subr.bf16.mxu1 %v6464_v32  ;;  %v2537_v55 = vld [vmem:[#allocation23 + $0x738] sm:$0xff]  ;;  %v6414_v32 = vpack.c.bf16 %v2526_v48, %v2522_v12  ;;  %v6478_v59 = vpack.c.bf16 %v2528_v18, %v2524_v51  ;;  %v6416_v53 = vpack.c.bf16 %v2535_v52, %v2531_v13  ;;  %v2559_v12 = vld [vmem:[#allocation23 + $0x7e8] sm:$0xff]  ;;  %v2554_v18 = vld [vmem:[#allocation23 + $0x7c0] sm:$0xff] }
 0x516   :  { %v6480_v17 = vpack.c.bf16 %v2537_v55, %v2533_v21  ;;  %v2557_v48 = vld [vmem:[#allocation23 + $0x7d8] sm:$0xff]  ;;  %v2558_v13 = vld [vmem:[#allocation23 + $0x7e0] sm:$0xff]  ;;  %v2556_v55 = vld [vmem:[#allocation23 + $0x7d0] sm:$0xff] }
 0x518   :  { %6403 = vmatpush1.bf16.msra.mxu0 %v6402_v63  ;;  %6467 = vmatpush1.bf16.msra.mxu1 %v6466_v1  ;;  %v2536_v63 = vld [vmem:[#allocation23 + $0x730] sm:$0xff]  ;;  %v2539_v1 = vld [vmem:[#allocation23 + $0x748] sm:$0xff] }
 0x519   :  { %6405 = vmatprep.subr.bf16.mxu0 %v6404_v15  ;;  %6469 = vmatprep.subr.bf16.mxu1 %v6468_v6  ;;  %v2545_v15 = vld [vmem:[#allocation23 + $0x778] sm:$0xff]  ;;  %v6418_v6 = vpack.c.bf16 %v2534_v5, %v2530_v60  ;;  %v6482_v47 = vpack.c.bf16 %v2536_v63, %v2532_v62  ;;  %v6420_v23 = vpack.c.bf16 %v2543_v14, %v2539_v1  ;;  %v2311_v60 = vld [vmem:[#allocation23 + $0x28] sm:$0xff]  ;;  %v2306_v14 = vld [vmem:[#allocation23] sm:$0xff] }
 0x51a   :  { %v6484_v24 = vpack.c.bf16 %v2545_v15, %v2541_v61  ;;  %v2309_v5 = vld [vmem:[#allocation23 + $0x18] sm:$0xff]  ;;  %v2310_v61 = vld [vmem:[#allocation23 + $0x20] sm:$0xff]  ;;  %v2308_v15 = vld [vmem:[#allocation23 + $0x10] sm:$0xff] }
 0x51c   :  { %6407 = vmatpush1.bf16.msra.mxu0 %v6406_v39  ;;  %6471 = vmatpush1.bf16.msra.mxu1 %v6470_v37  ;;  %v2544_v39 = vld [vmem:[#allocation23 + $0x770] sm:$0xff]  ;;  %v2547_v37 = vld [vmem:[#allocation23 + $0x788] sm:$0xff] }
 0x51d   :  { %6409 = vmatprep.subr.bf16.mxu0 %v6408_v26  ;;  %6473 = vmatprep.subr.bf16.mxu1 %v6472_v27  ;;  %v2553_v26 = vld [vmem:[#allocation23 + $0x7b8] sm:$0xff]  ;;  %v6422_v27 = vpack.c.bf16 %v2542_v20, %v2538_v16  ;;  %v6486_v29 = vpack.c.bf16 %v2544_v39, %v2540_v9  ;;  %v6424_v36 = vpack.c.bf16 %v2551_v57, %v2547_v37  ;;  %v2319_v16 = vld [vmem:[#allocation23 + $0x68] sm:$0xff]  ;;  %v2314_v39 = vld [vmem:[#allocation23 + $0x40] sm:$0xff] }
 0x51e   :  { %v6488_v40 = vpack.c.bf16 %v2553_v26, %v2549_v49  ;;  %v2317_v20 = vld [vmem:[#allocation23 + $0x58] sm:$0xff]  ;;  %v2318_v37 = vld [vmem:[#allocation23 + $0x60] sm:$0xff]  ;;  %v2316_v26 = vld [vmem:[#allocation23 + $0x50] sm:$0xff] }
 0x520   :  { %6411 = vmatpush1.bf16.msra.mxu0 %v6410_v44  ;;  %6475 = vmatpush1.bf16.msra.mxu1 %v6474_v45  ;;  %v2552_v44 = vld [vmem:[#allocation23 + $0x7b0] sm:$0xff]  ;;  %v2555_v45 = vld [vmem:[#allocation23 + $0x7c8] sm:$0xff] }
 0x521   :  { %6413 = vmatprep.subr.bf16.mxu0 %v6412_v34  ;;  %6477 = vmatprep.subr.bf16.mxu1 %v6476_v50  ;;  %v2561_v34 = vld [vmem:[#allocation23 + $0x7f8] sm:$0xff]  ;;  %v6426_v50 = vpack.c.bf16 %v2550_v33, %v2546_v11  ;;  %v6490_v51 = vpack.c.bf16 %v2552_v44, %v2548_v43  ;;  %v6428_v52 = vpack.c.bf16 %v2559_v12, %v2555_v45  ;;  %v2327_v11 = vld [vmem:[#allocation23 + $0xa8] sm:$0xff]  ;;  %v2322_v44 = vld [vmem:[#allocation23 + $0x80] sm:$0xff] }
 0x522   :  { %v6492_v21 = vpack.c.bf16 %v2561_v34, %v2557_v48  ;;  %v2325_v33 = vld [vmem:[#allocation23 + $0x98] sm:$0xff]  ;;  %v2326_v45 = vld [vmem:[#allocation23 + $0xa0] sm:$0xff]  ;;  %v2324_v34 = vld [vmem:[#allocation23 + $0x90] sm:$0xff] }
 0x524   :  { %6415 = vmatpush1.bf16.msra.mxu0 %v6414_v32  ;;  %6479 = vmatpush1.bf16.msra.mxu1 %v6478_v59  ;;  %v2560_v32 = vld [vmem:[#allocation23 + $0x7f0] sm:$0xff]  ;;  %v2307_v59 = vld [vmem:[#allocation23 + $0x8] sm:$0xff] }
 0x525   :  { %6417 = vmatprep.subr.bf16.mxu0 %v6416_v53  ;;  %6481 = vmatprep.subr.bf16.mxu1 %v6480_v17  ;;  %v2313_v53 = vld [vmem:[#allocation23 + $0x38] sm:$0xff]  ;;  %v6430_v17 = vpack.c.bf16 %v2558_v13, %v2554_v18  ;;  %v6494_v62 = vpack.c.bf16 %v2560_v32, %v2556_v55  ;;  %v6496_v63 = vpack.c.bf16 %v2311_v60, %v2307_v59  ;;  %v2335_v18 = vld [vmem:[#allocation23 + $0xe8] sm:$0xff]  ;;  %v2330_v32 = vld [vmem:[#allocation23 + $0xc0] sm:$0xff] }
 0x526   :  { %v6560_v1 = vpack.c.bf16 %v2313_v53, %v2309_v5  ;;  %v2333_v13 = vld [vmem:[#allocation23 + $0xd8] sm:$0xff]  ;;  %v2334_v59 = vld [vmem:[#allocation23 + $0xe0] sm:$0xff]  ;;  %v2332_v53 = vld [vmem:[#allocation23 + $0xd0] sm:$0xff] }
 0x528   :  { %6419 = vmatpush1.bf16.msra.mxu0 %v6418_v6  ;;  %6483 = vmatpush1.bf16.msra.mxu1 %v6482_v47  ;;  %v2312_v6 = vld [vmem:[#allocation23 + $0x30] sm:$0xff]  ;;  %v2315_v47 = vld [vmem:[#allocation23 + $0x48] sm:$0xff] }
 0x529   :  { %6421 = vmatprep.subr.bf16.mxu0 %v6420_v23  ;;  %6485 = vmatprep.subr.bf16.mxu1 %v6484_v24  ;;  %v2321_v23 = vld [vmem:[#allocation23 + $0x78] sm:$0xff]  ;;  %v6498_v24 = vpack.c.bf16 %v2310_v61, %v2306_v14  ;;  %v6562_v9 = vpack.c.bf16 %v2312_v6, %v2308_v15  ;;  %v6500_v57 = vpack.c.bf16 %v2319_v16, %v2315_v47  ;;  %v2338_v6 = vld [vmem:[#allocation23 + $0x100] sm:$0xff] }
 0x52a   :  { %v6564_v49 = vpack.c.bf16 %v2321_v23, %v2317_v20  ;;  %v2345_v14 = vld [vmem:[#allocation23 + $0x138] sm:$0xff]  ;;  %v6510_v61 = vpack.c.bf16 %v2334_v59, %v2330_v32  ;;  %v2342_v47 = vld [vmem:[#allocation23 + $0x120] sm:$0xff]  ;;  %v2340_v23 = vld [vmem:[#allocation23 + $0x110] sm:$0xff] }
 0x52b   :  { %v2367_v32 = vld [vmem:[#allocation23 + $0x1e8] sm:$0xff]  ;;  %v2365_v59 = vld [vmem:[#allocation23 + $0x1d8] sm:$0xff] }
 0x52c   :  { %6423 = vmatpush1.bf16.msra.mxu0 %v6422_v27  ;;  %6487 = vmatpush1.bf16.msra.mxu1 %v6486_v29  ;;  %v2320_v27 = vld [vmem:[#allocation23 + $0x70] sm:$0xff]  ;;  %v2323_v29 = vld [vmem:[#allocation23 + $0x88] sm:$0xff] }
 0x52d   :  { %6425 = vmatprep.subr.bf16.mxu0 %v6424_v36  ;;  %6489 = vmatprep.subr.bf16.mxu1 %v6488_v40  ;;  %v2329_v36 = vld [vmem:[#allocation23 + $0xb8] sm:$0xff]  ;;  %v6502_v40 = vpack.c.bf16 %v2318_v37, %v2314_v39  ;;  %v6566_v43 = vpack.c.bf16 %v2320_v27, %v2316_v26  ;;  %v6504_v12 = vpack.c.bf16 %v2327_v11, %v2323_v29  ;;  %v2351_v39 = vld [vmem:[#allocation23 + $0x168] sm:$0xff]  ;;  %v2346_v27 = vld [vmem:[#allocation23 + $0x140] sm:$0xff] }
 0x52e   :  { %v6568_v48 = vpack.c.bf16 %v2329_v36, %v2325_v33  ;;  %v2349_v37 = vld [vmem:[#allocation23 + $0x158] sm:$0xff]  ;;  %v2350_v29 = vld [vmem:[#allocation23 + $0x160] sm:$0xff]  ;;  %v2348_v36 = vld [vmem:[#allocation23 + $0x150] sm:$0xff] }
 0x530   :  { %6427 = vmatpush1.bf16.msra.mxu0 %v6426_v50  ;;  %6491 = vmatpush1.bf16.msra.mxu1 %v6490_v51  ;;  %v2328_v50 = vld [vmem:[#allocation23 + $0xb0] sm:$0xff]  ;;  %v2331_v51 = vld [vmem:[#allocation23 + $0xc8] sm:$0xff] }
 0x531   :  { %6429 = vmatprep.subr.bf16.mxu0 %v6428_v52  ;;  %6493 = vmatprep.subr.bf16.mxu1 %v6492_v21  ;;  %v2337_v52 = vld [vmem:[#allocation23 + $0xf8] sm:$0xff]  ;;  %v6506_v21 = vpack.c.bf16 %v2326_v45, %v2322_v44  ;;  %v6570_v55 = vpack.c.bf16 %v2328_v50, %v2324_v34  ;;  %v6508_v60 = vpack.c.bf16 %v2335_v18, %v2331_v51  ;;  %v2359_v44 = vld [vmem:[#allocation23 + $0x1a8] sm:$0xff]  ;;  %v2354_v50 = vld [vmem:[#allocation23 + $0x180] sm:$0xff] }
 0x532   :  { %v6572_v5 = vpack.c.bf16 %v2337_v52, %v2333_v13  ;;  %v2357_v45 = vld [vmem:[#allocation23 + $0x198] sm:$0xff]  ;;  %v2358_v51 = vld [vmem:[#allocation23 + $0x1a0] sm:$0xff]  ;;  %v2356_v52 = vld [vmem:[#allocation23 + $0x190] sm:$0xff] }
 0x534   :  { %6431 = vmatpush1.bf16.msra.mxu0 %v6430_v17  ;;  %6495 = vmatpush1.bf16.msra.mxu1 %v6494_v62  ;;  %v2336_v17 = vld [vmem:[#allocation23 + $0xf0] sm:$0xff]  ;;  %v2339_v62 = vld [vmem:[#allocation23 + $0x108] sm:$0xff] }
 0x535   :  { %6497 = vmatprep.subr.bf16.mxu0 %v6496_v63  ;;  %6561 = vmatprep.subr.bf16.mxu1 %v6560_v1  ;;  %v2343_v63 = vld [vmem:[#allocation23 + $0x128] sm:$0xff]  ;;  %v2341_v1 = vld [vmem:[#allocation23 + $0x118] sm:$0xff]  ;;  %v6574_v15 = vpack.c.bf16 %v2336_v17, %v2332_v53  ;;  %v2362_v17 = vld [vmem:[#allocation23 + $0x1c0] sm:$0xff] }
 0x536   :  { %v6512_v16 = vpack.c.bf16 %v2343_v63, %v2339_v62  ;;  %v6576_v20 = vpack.c.bf16 %v2345_v14, %v2341_v1  ;;  %v2366_v62 = vld [vmem:[#allocation23 + $0x1e0] sm:$0xff]  ;;  %v2364_v14 = vld [vmem:[#allocation23 + $0x1d0] sm:$0xff] }
 0x537   :  { %2627 = vmatmul.mubr.f32.vlgmr.msra.gmra.mrb[36].mxu0 %v7970_v25  ;;  %2740 = vmatmul.mubr.f32.vlgmr.msra.gmra.mrb[28].mxu1 %v7970_v25 }
 0x538   :  { %2632 = vmatprep.mubr.f32.mxu0 %v7972_v30  ;;  %2745 = vmatprep.mubr.f32.mxu1 %v7972_v30 }
 0x539   :  { %6499 = vmatpush1.bf16.msra.mxu0 %v6498_v24  ;;  %6563 = vmatpush1.bf16.msra.mxu1 %v6562_v9  ;;  %v2344_v24 = vld [vmem:[#allocation23 + $0x130] sm:$0xff]  ;;  %v2347_v9 = vld [vmem:[#allocation23 + $0x148] sm:$0xff] }
 0x53a   :  { %6501 = vmatprep.subr.bf16.mxu0 %v6500_v57  ;;  %6565 = vmatprep.subr.bf16.mxu1 %v6564_v49  ;;  %v2353_v57 = vld [vmem:[#allocation23 + $0x178] sm:$0xff]  ;;  %v6514_v49 = vpack.c.bf16 %v2342_v47, %v2338_v6  ;;  %v6578_v26 = vpack.c.bf16 %v2344_v24, %v2340_v23  ;;  %v6516_v11 = vpack.c.bf16 %v2351_v39, %v2347_v9  ;;  %v2375_v6 = vld [vmem:[#allocation23 + $0x228] sm:$0xff]  ;;  %v2370_v24 = vld [vmem:[#allocation23 + $0x200] sm:$0xff] }
 0x53b   :  { %2633 = vmatmul.mubr.f32.gmra.mrb[38].mxu0 %v7985_v46  ;;  %2746 = vmatmul.mubr.f32.gmra.mrb[30].mxu1 %v7985_v46  ;;  %v6580_v33 = vpack.c.bf16 %v2353_v57, %v2349_v37  ;;  %v2373_v47 = vld [vmem:[#allocation23 + $0x218] sm:$0xff]  ;;  %v2374_v9 = vld [vmem:[#allocation23 + $0x220] sm:$0xff]  ;;  %v2372_v57 = vld [vmem:[#allocation23 + $0x210] sm:$0xff] }
 0x53c   :  { %2638 = vmatprep.mubr.f32.mxu0 %v7990_v56  ;;  %2751 = vmatprep.mubr.f32.mxu1 %v7990_v56 }
 0x53d   :  { %6503 = vmatpush1.bf16.msra.mxu0 %v6502_v40  ;;  %6567 = vmatpush1.bf16.msra.mxu1 %v6566_v43  ;;  %v2352_v40 = vld [vmem:[#allocation23 + $0x170] sm:$0xff]  ;;  %v2355_v43 = vld [vmem:[#allocation23 + $0x188] sm:$0xff] }
 0x53e   :  { %6505 = vmatprep.subr.bf16.mxu0 %v6504_v12  ;;  %6569 = vmatprep.subr.bf16.mxu1 %v6568_v48  ;;  %v2361_v12 = vld [vmem:[#allocation23 + $0x1b8] sm:$0xff]  ;;  %v6518_v48 = vpack.c.bf16 %v2350_v29, %v2346_v27  ;;  %v6582_v34 = vpack.c.bf16 %v2352_v40, %v2348_v36  ;;  %v6520_v18 = vpack.c.bf16 %v2359_v44, %v2355_v43  ;;  %v2383_v27 = vld [vmem:[#allocation23 + $0x268] sm:$0xff]  ;;  %v2378_v40 = vld [vmem:[#allocation23 + $0x240] sm:$0xff] }
 0x53f   :  { %2639 = vmatmul.mubr.f32.gmra.mrb[40].mxu0 %v8004_v2  ;;  %2752 = vmatmul.mubr.f32.gmra.mrb[32].mxu1 %v8004_v2  ;;  %v6584_v13 = vpack.c.bf16 %v2361_v12, %v2357_v45  ;;  %v2381_v29 = vld [vmem:[#allocation23 + $0x258] sm:$0xff]  ;;  %v2382_v43 = vld [vmem:[#allocation23 + $0x260] sm:$0xff]  ;;  %v2380_v12 = vld [vmem:[#allocation23 + $0x250] sm:$0xff] }
 0x540   :  { %2644 = vmatprep.mubr.f32.mxu0 %v8006_v7  ;;  %2757 = vmatprep.mubr.f32.mxu1 %v8006_v7 }
 0x541   :  { %6507 = vmatpush1.bf16.msra.mxu0 %v6506_v21  ;;  %6571 = vmatpush1.bf16.msra.mxu1 %v6570_v55  ;;  %v2360_v21 = vld [vmem:[#allocation23 + $0x1b0] sm:$0xff]  ;;  %v2363_v55 = vld [vmem:[#allocation23 + $0x1c8] sm:$0xff] }
 0x542   :  { %6509 = vmatprep.subr.bf16.mxu0 %v6508_v60  ;;  %6573 = vmatprep.subr.bf16.mxu1 %v6572_v5  ;;  %v2369_v60 = vld [vmem:[#allocation23 + $0x1f8] sm:$0xff]  ;;  %v6522_v5 = vpack.c.bf16 %v2358_v51, %v2354_v50  ;;  %v6586_v53 = vpack.c.bf16 %v2360_v21, %v2356_v52  ;;  %v6524_v63 = vpack.c.bf16 %v2367_v32, %v2363_v55  ;;  %v2391_v50 = vld [vmem:[#allocation23 + $0x2a8] sm:$0xff]  ;;  %v2386_v52 = vld [vmem:[#allocation23 + $0x280] sm:$0xff] }
 0x543   :  { %2645 = vmatmul.mubr.f32.gmra.mrb[42].mxu0 %v8013_v28  ;;  %2758 = vmatmul.mubr.f32.gmra.mrb[34].mxu1 %v8013_v28  ;;  %v6588_v1 = vpack.c.bf16 %v2369_v60, %v2365_v59  ;;  %v2389_v51 = vld [vmem:[#allocation23 + $0x298] sm:$0xff]  ;;  %v2390_v21 = vld [vmem:[#allocation23 + $0x2a0] sm:$0xff]  ;;  %v2388_v59 = vld [vmem:[#allocation23 + $0x290] sm:$0xff] }
 0x544   :  { %2650 = vmatprep.mubr.f32.mxu0 %v8019_v42  ;;  %2763 = vmatprep.mubr.f32.mxu1 %v8019_v42  ;;  %v2392_v60 = vld [vmem:[#allocation23 + $0x2b0] sm:$0xff] }
 0x545   :  { %6511 = vmatpush1.bf16.msra.mxu0 %v6510_v61  ;;  %6575 = vmatpush1.bf16.msra.mxu1 %v6574_v15  ;;  %v2368_v61 = vld [vmem:[#allocation23 + $0x1f0] sm:$0xff]  ;;  %v2371_v15 = vld [vmem:[#allocation23 + $0x208] sm:$0xff] }
 0x546   :  { %6513 = vmatprep.subr.bf16.mxu0 %v6512_v16  ;;  %6577 = vmatprep.subr.bf16.mxu1 %v6576_v20  ;;  %v2377_v16 = vld [vmem:[#allocation23 + $0x238] sm:$0xff]  ;;  %v6526_v20 = vpack.c.bf16 %v2366_v62, %v2362_v17  ;;  %v6590_v23 = vpack.c.bf16 %v2368_v61, %v2364_v14  ;;  %v6528_v39 = vpack.c.bf16 %v2375_v6, %v2371_v15  ;;  %v2394_v14 = vld [vmem:[#allocation23 + $0x2c0] sm:$0xff] }
 0x547   :  { %2651 = vmatmul.mubr.f32.gmra.mrb[44].mxu0 %v8027_v3  ;;  %2764 = vmatmul.mubr.f32.gmra.mrb[36].mxu1 %v8027_v3  ;;  %v6592_v37 = vpack.c.bf16 %v2377_v16, %v2373_v47  ;;  %v2397_v17 = vld [vmem:[#allocation23 + $0x2d8] sm:$0xff]  ;;  %v2398_v61 = vld [vmem:[#allocation23 + $0x2e0] sm:$0xff]  ;;  %v2396_v47 = vld [vmem:[#allocation23 + $0x2d0] sm:$0xff] }
 0x548   :  { %2656 = vmatprep.mubr.f32.mxu0 %v8029_v58  ;;  %2769 = vmatprep.mubr.f32.mxu1 %v8029_v58  ;;  %v2401_v62 = vld [vmem:[#allocation23 + $0x2f8] sm:$0xff]  ;;  %v2400_v16 = vld [vmem:[#allocation23 + $0x2f0] sm:$0xff] }
 0x549   :  { %6515 = vmatpush1.bf16.msra.mxu0 %v6514_v49  ;;  %6579 = vmatpush1.bf16.msra.mxu1 %v6578_v26  ;;  %v2376_v49 = vld [vmem:[#allocation23 + $0x230] sm:$0xff]  ;;  %v2379_v26 = vld [vmem:[#allocation23 + $0x248] sm:$0xff]  ;;  %v6604_v6 = vpack.c.bf16 %v2401_v62, %v2397_v17 }
 0x54a   :  { %6517 = vmatprep.subr.bf16.mxu0 %v6516_v11  ;;  %6581 = vmatprep.subr.bf16.mxu1 %v6580_v33  ;;  %v2385_v11 = vld [vmem:[#allocation23 + $0x278] sm:$0xff]  ;;  %v6530_v33 = vpack.c.bf16 %v2374_v9, %v2370_v24  ;;  %v6594_v36 = vpack.c.bf16 %v2376_v49, %v2372_v57  ;;  %v6532_v44 = vpack.c.bf16 %v2383_v27, %v2379_v26  ;;  %v2402_v57 = vld [vmem:[#allocation23 + $0x300] sm:$0xff]  ;;  %v2420_v17 = vld [vmem:[#allocation23 + $0x390] sm:$0xff] }
 0x54b   :  { %2657 = vmatmul.mubr.f32.gmra.mrb[46].mxu0 %v8037_v41  ;;  %2770 = vmatmul.mubr.f32.gmra.mrb[38].mxu1 %v8037_v41  ;;  %v6596_v45 = vpack.c.bf16 %v2385_v11, %v2381_v29  ;;  %v2405_v24 = vld [vmem:[#allocation23 + $0x318] sm:$0xff]  ;;  %v2406_v49 = vld [vmem:[#allocation23 + $0x320] sm:$0xff]  ;;  %v2404_v29 = vld [vmem:[#allocation23 + $0x310] sm:$0xff] }
 0x54c   :  { %2662 = vmatprep.mubr.f32.mxu0 %v8041_v22  ;;  %2775 = vmatprep.mubr.f32.mxu1 %v8041_v22  ;;  %v2409_v9 = vld [vmem:[#allocation23 + $0x338] sm:$0xff]  ;;  %v2408_v11 = vld [vmem:[#allocation23 + $0x330] sm:$0xff] }
 0x54d   :  { %6519 = vmatpush1.bf16.msra.mxu0 %v6518_v48  ;;  %6583 = vmatpush1.bf16.msra.mxu1 %v6582_v34  ;;  %v2384_v48 = vld [vmem:[#allocation23 + $0x270] sm:$0xff]  ;;  %v2387_v34 = vld [vmem:[#allocation23 + $0x288] sm:$0xff]  ;;  %v6608_v27 = vpack.c.bf16 %v2409_v9, %v2405_v24 }
 0x54e   :  { %6521 = vmatprep.subr.bf16.mxu0 %v6520_v18  ;;  %6585 = vmatprep.subr.bf16.mxu1 %v6584_v13  ;;  %v2393_v18 = vld [vmem:[#allocation23 + $0x2b8] sm:$0xff]  ;;  %v6534_v13 = vpack.c.bf16 %v2382_v43, %v2378_v40  ;;  %v6536_v55 = vpack.c.bf16 %v2391_v50, %v2387_v34  ;;  %v2424_v62 = vld [vmem:[#allocation23 + $0x3b0] sm:$0xff] }
 0x54f   :  { %2663 = vmatmul.mubr.f32.gmra.mrb[48].mxu0 %v8047_v35  ;;  %2776 = vmatmul.mubr.f32.gmra.mrb[40].mxu1 %v8047_v35  ;;  %v6600_v32 = vpack.c.bf16 %v2393_v18, %v2389_v51  ;;  %v2413_v40 = vld [vmem:[#allocation23 + $0x358] sm:$0xff]  ;;  %v2412_v51 = vld [vmem:[#allocation23 + $0x350] sm:$0xff] }
 0x550   :  { %2668 = vmatprep.mubr.f32.mxu0 %v8925_v0  ;;  %2781 = vmatprep.mubr.f32.mxu1 %v8925_v0  ;;  %v2417_v43 = vld [vmem:[#allocation23 + $0x378] sm:$0xff]  ;;  %v2416_v18 = vld [vmem:[#allocation23 + $0x370] sm:$0xff] }
 0x551   :  { %6523 = vmatpush1.bf16.msra.mxu0 %v6522_v5  ;;  %6587 = vmatpush1.bf16.msra.mxu1 %v6586_v53  ;;  %v2395_v5 = vld [vmem:[#allocation23 + $0x2c8] sm:$0xff]  ;;  %v6612_v50 = vpack.c.bf16 %v2417_v43, %v2413_v40  ;;  %v2428_v24 = vld [vmem:[#allocation23 + $0x3d0] sm:$0xff] }
 0x552   :  { %6525 = vmatprep.subr.bf16.mxu0 %v6524_v63  ;;  %6589 = vmatprep.subr.bf16.mxu1 %v6588_v1  ;;  %v2399_v53 = vld [vmem:[#allocation23 + $0x2e8] sm:$0xff]  ;;  %v6538_v63 = vpack.c.bf16 %v2390_v21, %v2386_v52  ;;  %v6602_v1 = vpack.c.bf16 %v2392_v60, %v2388_v59  ;;  %v2421_v52 = vld [vmem:[#allocation23 + $0x398] sm:$0xff]  ;;  %v2418_v59 = vld [vmem:[#allocation23 + $0x380] sm:$0xff] }
 0x553   :  { %2669 = vmatmul.mubr.f32.gmra.mrb[50].mxu0 %v8925_v0  ;;  %2782 = vmatmul.mubr.f32.gmra.mrb[42].mxu1 %v8925_v0  ;;  %v6540_v15 = vpack.c.bf16 %v2399_v53, %v2395_v5  ;;  %v2425_v21 = vld [vmem:[#allocation23 + $0x3b8] sm:$0xff]  ;;  %v2422_v60 = vld [vmem:[#allocation23 + $0x3a0] sm:$0xff]  ;;  %v2432_v9 = vld [vmem:[#allocation23 + $0x3f0] sm:$0xff] }
 0x554   :  { %2852 = vmatprep.mubr.f32.mxu0 %v7932_v31  ;;  %2965 = vmatprep.mubr.f32.mxu1 %v7932_v31  ;;  %v6598_v31 = vpack.c.bf16 %v2384_v48, %v2380_v12  ;;  %v2410_v12 = vld [vmem:[#allocation23 + $0x340] sm:$0xff]  ;;  %v6616_v53 = vpack.c.bf16 %v2425_v21, %v2421_v52  ;;  %v3365_v43 = vld [vmem:[#allocation26 + $0x308] sm:$0xff]  ;;  %v3366_v52 = vld [vmem:[#allocation26 + $0x310] sm:$0xff] }
 0x555   :  { %6527 = vmatpush1.bf16.msra.mxu0 %v6526_v20  ;;  %6591 = vmatpush1.bf16.msra.mxu1 %v6590_v23  ;;  %v2403_v20 = vld [vmem:[#allocation23 + $0x308] sm:$0xff]  ;;  %v2414_v48 = vld [vmem:[#allocation23 + $0x360] sm:$0xff] }
 0x556   :  { %6529 = vmatprep.subr.bf16.mxu0 %v6528_v39  ;;  %6593 = vmatprep.subr.bf16.mxu1 %v6592_v37  ;;  %v2407_v23 = vld [vmem:[#allocation23 + $0x328] sm:$0xff]  ;;  %v6542_v39 = vpack.c.bf16 %v2398_v61, %v2394_v14  ;;  %v6606_v37 = vpack.c.bf16 %v2400_v16, %v2396_v47  ;;  %v2429_v14 = vld [vmem:[#allocation23 + $0x3d8] sm:$0xff]  ;;  %v2426_v47 = vld [vmem:[#allocation23 + $0x3c0] sm:$0xff] }
 0x557   :  { %v6544_v26 = vpack.c.bf16 %v2407_v23, %v2403_v20  ;;  %v2433_v61 = vld [vmem:[#allocation23 + $0x3f8] sm:$0xff]  ;;  %v2430_v16 = vld [vmem:[#allocation23 + $0x3e0] sm:$0xff] }
 0x558   :  { %v6620_v23 = vpack.c.bf16 %v2433_v61, %v2429_v14  ;;  %v3364_v40 = vld [vmem:[#allocation26 + $0x300] sm:$0xff]  ;;  %v3367_v21 = vld [vmem:[#allocation26 + $0x318] sm:$0xff]  ;;  %v3369_v61 = vld [vmem:[#allocation26 + $0x328] sm:$0xff] }
 0x559   :  { %6531 = vmatpush1.bf16.msra.mxu0 %v6530_v33  ;;  %6595 = vmatpush1.bf16.msra.mxu1 %v6594_v36  ;;  %v2411_v33 = vld [vmem:[#allocation23 + $0x348] sm:$0xff] }
 0x55a   :  { %6533 = vmatprep.subr.bf16.mxu0 %v6532_v44  ;;  %6597 = vmatprep.subr.bf16.mxu1 %v6596_v45  ;;  %v2415_v36 = vld [vmem:[#allocation23 + $0x368] sm:$0xff]  ;;  %v6546_v44 = vpack.c.bf16 %v2406_v49, %v2402_v57  ;;  %v6610_v45 = vpack.c.bf16 %v2408_v11, %v2404_v29 }
 0x55b   :  { %v6548_v34 = vpack.c.bf16 %v2415_v36, %v2411_v33  ;;  %v3380_v57 = vld [vmem:[#allocation26 + $0x380] sm:$0xff]  ;;  %v3381_v49 = vld [vmem:[#allocation26 + $0x388] sm:$0xff] }
 0x55c   :  { %v6656_v11 = vpack.c.bf16 %v3381_v49, %v3380_v57  ;;  %v3332_v33 = vld [vmem:[#allocation26 + $0x200] sm:$0xff]  ;;  %v3333_v36 = vld [vmem:[#allocation26 + $0x208] sm:$0xff] }
 0x55d   :  { %6535 = vmatpush1.bf16.msra.mxu0 %v6534_v13  ;;  %6599 = vmatpush1.bf16.msra.mxu1 %v6598_v31  ;;  %v2419_v13 = vld [vmem:[#allocation23 + $0x388] sm:$0xff] }
 0x55e   :  { %6537 = vmatprep.subr.bf16.mxu0 %v6536_v55  ;;  %6601 = vmatprep.subr.bf16.mxu1 %v6600_v32  ;;  %v2423_v31 = vld [vmem:[#allocation23 + $0x3a8] sm:$0xff]  ;;  %v6550_v55 = vpack.c.bf16 %v2414_v48, %v2410_v12  ;;  %v6614_v32 = vpack.c.bf16 %v2416_v18, %v2412_v51  ;;  %v3382_v12 = vld [vmem:[#allocation26 + $0x390] sm:$0xff]  ;;  %v3383_v48 = vld [vmem:[#allocation26 + $0x398] sm:$0xff] }
 0x55f   :  { %v6552_v5 = vpack.c.bf16 %v2423_v31, %v2419_v13  ;;  %v3334_v51 = vld [vmem:[#allocation26 + $0x210] sm:$0xff]  ;;  %v3335_v18 = vld [vmem:[#allocation26 + $0x218] sm:$0xff]  ;;  %v6660_v31 = vpack.c.bf16 %v3383_v48, %v3382_v12  ;;  %v3368_v14 = vld [vmem:[#allocation26 + $0x320] sm:$0xff] }
 0x560   :  { %v3357_v57 = vld [vmem:[#allocation26 + $0x2c8] sm:$0xff]  ;;  %v3388_v49 = vld [vmem:[#allocation26 + $0x3c0] sm:$0xff] }
 0x561   :  { %6539 = vmatpush1.bf16.msra.mxu0 %v6538_v63  ;;  %6603 = vmatpush1.bf16.msra.mxu1 %v6602_v1  ;;  %v2427_v63 = vld [vmem:[#allocation23 + $0x3c8] sm:$0xff] }
 0x562   :  { %6541 = vmatprep.subr.bf16.mxu0 %v6540_v15  ;;  %6605 = vmatprep.subr.bf16.mxu1 %v6604_v6  ;;  %v2431_v1 = vld [vmem:[#allocation23 + $0x3e8] sm:$0xff]  ;;  %v6554_v15 = vpack.c.bf16 %v2422_v60, %v2418_v59  ;;  %v6618_v6 = vpack.c.bf16 %v2424_v62, %v2420_v17 }
 0x563   :  { %v6556_v20 = vpack.c.bf16 %v2431_v1, %v2427_v63  ;;  %v3384_v59 = vld [vmem:[#allocation26 + $0x3a0] sm:$0xff]  ;;  %v3385_v60 = vld [vmem:[#allocation26 + $0x3a8] sm:$0xff] }
 0x564   :  { %v3336_v17 = vld [vmem:[#allocation26 + $0x220] sm:$0xff]  ;;  %v3337_v62 = vld [vmem:[#allocation26 + $0x228] sm:$0xff]  ;;  %v6664_v1 = vpack.c.bf16 %v3385_v60, %v3384_v59 }
 0x565   :  { %6543 = vmatpush1.bf16.msra.mxu0 %v6542_v39  ;;  %6607 = vmatpush1.bf16.msra.mxu1 %v6606_v37  ;;  %v3348_v39 = vld [vmem:[#allocation26 + $0x280] sm:$0xff]  ;;  %v3349_v37 = vld [vmem:[#allocation26 + $0x288] sm:$0xff] }
 0x566   :  { %6545 = vmatprep.subr.bf16.mxu0 %v6544_v26  ;;  %6609 = vmatprep.subr.bf16.mxu1 %v6608_v27  ;;  %v6558_v26 = vpack.c.bf16 %v2430_v16, %v2426_v47  ;;  %v6622_v27 = vpack.c.bf16 %v2432_v9, %v2428_v24  ;;  %v6624_v29 = vpack.c.bf16 %v3349_v37, %v3348_v39  ;;  %v3370_v39 = vld [vmem:[#allocation26 + $0x330] sm:$0xff]  ;;  %v3371_v37 = vld [vmem:[#allocation26 + $0x338] sm:$0xff]  ;;  %v3344_v59 = vld [vmem:[#allocation26 + $0x260] sm:$0xff] }
 0x567   :  { %v6634_v47 = vpack.c.bf16 %v3337_v62, %v3336_v17  ;;  %v6666_v16 = vpack.c.bf16 %v3369_v61, %v3368_v14  ;;  %v3345_v60 = vld [vmem:[#allocation26 + $0x268] sm:$0xff]  ;;  %v3376_v17 = vld [vmem:[#allocation26 + $0x360] sm:$0xff] }
 0x568   :  { %v3377_v62 = vld [vmem:[#allocation26 + $0x368] sm:$0xff]  ;;  %v6650_v14 = vpack.c.bf16 %v3345_v60, %v3344_v59 }
 0x569   :  { %6547 = vmatpush1.bf16.msra.mxu0 %v6546_v44  ;;  %6611 = vmatpush1.bf16.msra.mxu1 %v6610_v45  ;;  %v3350_v44 = vld [vmem:[#allocation26 + $0x290] sm:$0xff]  ;;  %v3351_v45 = vld [vmem:[#allocation26 + $0x298] sm:$0xff]  ;;  %v6682_v61 = vpack.c.bf16 %v3377_v62, %v3376_v17  ;;  %v3301_v17 = vld [vmem:[#allocation26 + $0x108] sm:$0xff] }
 0x56a   :  { %6549 = vmatprep.subr.bf16.mxu0 %v6548_v34  ;;  %6613 = vmatprep.subr.bf16.mxu1 %v6612_v50  ;;  %v6626_v34 = vpack.c.bf16 %v3333_v36, %v3332_v33  ;;  %v6658_v50 = vpack.c.bf16 %v3365_v43, %v3364_v40  ;;  %v6628_v13 = vpack.c.bf16 %v3351_v45, %v3350_v44  ;;  %v3372_v40 = vld [vmem:[#allocation26 + $0x340] sm:$0xff]  ;;  %v3373_v43 = vld [vmem:[#allocation26 + $0x348] sm:$0xff]  ;;  %v3359_v44 = vld [vmem:[#allocation26 + $0x2d8] sm:$0xff] }
 0x56b   :  { %v3390_v45 = vld [vmem:[#allocation26 + $0x3d0] sm:$0xff]  ;;  %v6674_v48 = vpack.c.bf16 %v3373_v43, %v3372_v40 }
 0x56d   :  { %6551 = vmatpush1.bf16.msra.mxu0 %v6550_v55  ;;  %6615 = vmatpush1.bf16.msra.mxu1 %v6614_v32  ;;  %v3352_v55 = vld [vmem:[#allocation26 + $0x2a0] sm:$0xff]  ;;  %v3353_v32 = vld [vmem:[#allocation26 + $0x2a8] sm:$0xff] }
 0x56e   :  { %6553 = vmatprep.subr.bf16.mxu0 %v6552_v5  ;;  %6617 = vmatprep.subr.bf16.mxu1 %v6616_v53  ;;  %v6630_v5 = vpack.c.bf16 %v3335_v18, %v3334_v51  ;;  %v6662_v53 = vpack.c.bf16 %v3367_v21, %v3366_v52  ;;  %v6632_v63 = vpack.c.bf16 %v3353_v32, %v3352_v55  ;;  %v3361_v52 = vld [vmem:[#allocation26 + $0x2e8] sm:$0xff]  ;;  %v3392_v21 = vld [vmem:[#allocation26 + $0x3e0] sm:$0xff] }
 0x571   :  { %6555 = vmatpush1.bf16.msra.mxu0 %v6554_v15  ;;  %6619 = vmatpush1.bf16.msra.mxu1 %v6618_v6  ;;  %v3355_v15 = vld [vmem:[#allocation26 + $0x2b8] sm:$0xff]  ;;  %v3386_v6 = vld [vmem:[#allocation26 + $0x3b0] sm:$0xff] }
 0x572   :  { %6557 = vmatprep.subr.bf16.mxu0 %v6556_v20  ;;  %6621 = vmatprep.subr.bf16.mxu1 %v6620_v23  ;;  %v3338_v20 = vld [vmem:[#allocation26 + $0x230] sm:$0xff]  ;;  %v3339_v23 = vld [vmem:[#allocation26 + $0x238] sm:$0xff] }
 0x575   :  { %6559 = vmatpush1.bf16.msra.mxu0 %v6558_v26  ;;  %6623 = vmatpush1.bf16.msra.mxu1 %v6622_v27  ;;  %v6638_v26 = vpack.c.bf16 %v3339_v23, %v3338_v20  ;;  %v6670_v27 = vpack.c.bf16 %v3371_v37, %v3370_v39  ;;  %v2148_v20 = vld [vmem:[#allocation25] sm:$0xf] }
 0x576   :  { %6625 = vmatprep.subr.bf16.mxu0 %v6624_v29  ;;  %6657 = vmatprep.subr.bf16.mxu1 %v6656_v11  ;;  %v3340_v29 = vld [vmem:[#allocation26 + $0x240] sm:$0xff]  ;;  %v3341_v11 = vld [vmem:[#allocation26 + $0x248] sm:$0xff]  ;;  %v8148_v23 = vrot.slane %v2148_v20, %v7849_v8 }
 0x577   :  { %v6642_v12 = vpack.c.bf16 %v3341_v11, %v3340_v29 }
 0x578   :  { %2853 = vmatmul.mubr.f32.vlgmr.msra.gmra.mrb[36].mxu0 %v7936_v38  ;;  %2966 = vmatmul.mubr.f32.vlgmr.msra.gmra.mrb[28].mxu1 %v7936_v38  ;;  %v3354_v38 = vld [vmem:[#allocation26 + $0x2b0] sm:$0xff] }
 0x579   :  { %2858 = vmatprep.mubr.f32.mxu0 %v7965_v19  ;;  %2971 = vmatprep.mubr.f32.mxu1 %v7965_v19  ;;  %v3387_v19 = vld [vmem:[#allocation26 + $0x3b8] sm:$0xff]  ;;  %v6636_v24 = vpack.c.bf16 %v3355_v15, %v3354_v38  ;;  %v3346_v38 = vld [vmem:[#allocation26 + $0x270] sm:$0xff] }
 0x57a   :  { %6627 = vmatpush3.bf16.msra.mxu0 %v6626_v34  ;;  %6659 = vmatpush3.bf16.msra.mxu1 %v6658_v50  ;;  %v6668_v9 = vpack.c.bf16 %v3387_v19, %v3386_v6  ;;  %v3342_v34 = vld [vmem:[#allocation26 + $0x250] sm:$0xff]  ;;  %v3343_v50 = vld [vmem:[#allocation26 + $0x258] sm:$0xff] }
 0x57b   :  { %6629 = vmatprep.subr.bf16.mxu0 %v6628_v13  ;;  %6661 = vmatprep.subr.bf16.mxu1 %v6660_v31  ;;  %v3374_v13 = vld [vmem:[#allocation26 + $0x350] sm:$0xff]  ;;  %v3375_v31 = vld [vmem:[#allocation26 + $0x358] sm:$0xff]  ;;  %v6646_v55 = vpack.c.bf16 %v3343_v50, %v3342_v34  ;;  %v3268_v34 = vld [vmem:[#allocation26] sm:$0xff] }
 0x57c   :  { %2859 = vmatmul.mubr.f32.gmra.mrb[38].mxu0 %v7970_v25  ;;  %2972 = vmatmul.mubr.f32.gmra.mrb[30].mxu1 %v7970_v25  ;;  %v3356_v25 = vld [vmem:[#allocation26 + $0x2c0] sm:$0xff]  ;;  %v6678_v32 = vpack.c.bf16 %v3375_v31, %v3374_v13  ;;  %v3347_v19 = vld [vmem:[#allocation26 + $0x278] sm:$0xff] }
 0x57d   :  { %2864 = vmatprep.mubr.f32.mxu0 %v7972_v30  ;;  %2977 = vmatprep.mubr.f32.mxu1 %v7972_v30  ;;  %v3389_v30 = vld [vmem:[#allocation26 + $0x3c8] sm:$0xff]  ;;  %v6640_v33 = vpack.c.bf16 %v3357_v57, %v3356_v25 }
 0x57e   :  { %6631 = vmatpush3.bf16.msra.mxu0 %v6630_v5  ;;  %6663 = vmatpush3.bf16.msra.mxu1 %v6662_v53  ;;  %v6672_v36 = vpack.c.bf16 %v3389_v30, %v3388_v49 }
 0x57f   :  { %6633 = vmatprep.subr.bf16.mxu0 %v6632_v63  ;;  %6665 = vmatprep.subr.bf16.mxu1 %v6664_v1  ;;  %v3363_v63 = vld [vmem:[#allocation26 + $0x2f8] sm:$0xff]  ;;  %v3394_v1 = vld [vmem:[#allocation26 + $0x3f0] sm:$0xff] }
 0x580   :  { %2865 = vmatmul.mubr.f32.gmra.mrb[40].mxu0 %v7985_v46  ;;  %2978 = vmatmul.mubr.f32.gmra.mrb[32].mxu1 %v7985_v46  ;;  %v3358_v46 = vld [vmem:[#allocation26 + $0x2d0] sm:$0xff] }
 0x581   :  { %2870 = vmatprep.mubr.f32.mxu0 %v7990_v56  ;;  %2983 = vmatprep.mubr.f32.mxu1 %v7990_v56  ;;  %v3391_v56 = vld [vmem:[#allocation26 + $0x3d8] sm:$0xff]  ;;  %v6644_v51 = vpack.c.bf16 %v3359_v44, %v3358_v46 }
 0x582   :  { %6635 = vmatpush3.bf16.msra.mxu0 %v6634_v47  ;;  %6667 = vmatpush3.bf16.msra.mxu1 %v6666_v16  ;;  %v6676_v18 = vpack.c.bf16 %v3391_v56, %v3390_v45  ;;  %v3378_v47 = vld [vmem:[#allocation26 + $0x370] sm:$0xff]  ;;  %v3379_v16 = vld [vmem:[#allocation26 + $0x378] sm:$0xff] }
 0x583   :  { %6637 = vmatprep.subr.bf16.mxu0 %v6636_v24  ;;  %6669 = vmatprep.subr.bf16.mxu1 %v6668_v9  ;;  %v8157_v24 = vrot.slane %v2148_v20, %v7866_v4 }
 0x584   :  { %2871 = vmatmul.mubr.f32.gmra.mrb[42].mxu0 %v8004_v2  ;;  %2984 = vmatmul.mubr.f32.gmra.mrb[34].mxu1 %v8004_v2  ;;  %v3360_v2 = vld [vmem:[#allocation26 + $0x2e0] sm:$0xff] }
 0x585   :  { %2876 = vmatprep.mubr.f32.mxu0 %v8006_v7  ;;  %2989 = vmatprep.mubr.f32.mxu1 %v8006_v7  ;;  %v3393_v7 = vld [vmem:[#allocation26 + $0x3e8] sm:$0xff]  ;;  %v6648_v5 = vpack.c.bf16 %v3361_v52, %v3360_v2 }
 0x586   :  { %6639 = vmatpush3.bf16.msra.mxu0 %v6638_v26  ;;  %6671 = vmatpush3.bf16.msra.mxu1 %v6670_v27  ;;  %v6680_v53 = vpack.c.bf16 %v3393_v7, %v3392_v21 }
 0x587   :  { %6641 = vmatprep.subr.bf16.mxu0 %v6640_v33  ;;  %6673 = vmatprep.subr.bf16.mxu1 %v6672_v36 }
 0x588   :  { %2877 = vmatmul.mubr.f32.gmra.mrb[44].mxu0 %v8013_v28  ;;  %2990 = vmatmul.mubr.f32.gmra.mrb[36].mxu1 %v8013_v28  ;;  %v3362_v28 = vld [vmem:[#allocation26 + $0x2f0] sm:$0xff] }
 0x589   :  { %2882 = vmatprep.mubr.f32.mxu0 %v8019_v42  ;;  %2995 = vmatprep.mubr.f32.mxu1 %v8019_v42  ;;  %v3395_v42 = vld [vmem:[#allocation26 + $0x3f8] sm:$0xff]  ;;  %v6652_v15 = vpack.c.bf16 %v3363_v63, %v3362_v28 }
 0x58a   :  { %6643 = vmatpush3.bf16.msra.mxu0 %v6642_v12  ;;  %6675 = vmatpush3.bf16.msra.mxu1 %v6674_v48  ;;  %v6684_v6 = vpack.c.bf16 %v3395_v42, %v3394_v1  ;;  %v3284_v12 = vld [vmem:[#allocation26 + $0x80] sm:$0xff]  ;;  %v3285_v48 = vld [vmem:[#allocation26 + $0x88] sm:$0xff] }
 0x58b   :  { %6645 = vmatprep.subr.bf16.mxu0 %v6644_v51  ;;  %6677 = vmatprep.subr.bf16.mxu1 %v6676_v18  ;;  %v6688_v50 = vpack.c.bf16 %v3285_v48, %v3284_v12  ;;  %v3269_v51 = vld [vmem:[#allocation26 + $0x8] sm:$0xff] }
 0x58c   :  { %2883 = vmatmul.mubr.f32.gmra.mrb[46].mxu0 %v8027_v3  ;;  %2996 = vmatmul.mubr.f32.gmra.mrb[38].mxu1 %v8027_v3  ;;  %v6654_v3 = vpack.c.bf16 %v3347_v19, %v3346_v38  ;;  %v6690_v31 = vpack.c.bf16 %v3269_v51, %v3268_v34  ;;  %v3287_v19 = vld [vmem:[#allocation26 + $0x98] sm:$0xff] }
 0x58d   :  { %2888 = vmatprep.mubr.f32.mxu0 %v8029_v58  ;;  %3001 = vmatprep.mubr.f32.mxu1 %v8029_v58  ;;  %v6686_v58 = vpack.c.bf16 %v3379_v16, %v3378_v47  ;;  %v3270_v47 = vld [vmem:[#allocation26 + $0x10] sm:$0xff] }
 0x58e   :  { %6647 = vmatpush3.bf16.msra.mxu0 %v6646_v55  ;;  %6679 = vmatpush3.bf16.msra.mxu1 %v6678_v32  ;;  %v3316_v55 = vld [vmem:[#allocation26 + $0x180] sm:$0xff]  ;;  %v3317_v32 = vld [vmem:[#allocation26 + $0x188] sm:$0xff] }
 0x58f   :  { %6649 = vmatprep.subr.bf16.mxu0 %v6648_v5  ;;  %6681 = vmatprep.subr.bf16.mxu1 %v6680_v53  ;;  %v6720_v5 = vpack.c.bf16 %v3317_v32, %v3316_v55  ;;  %v3300_v53 = vld [vmem:[#allocation26 + $0x100] sm:$0xff]  ;;  %v3289_v55 = vld [vmem:[#allocation26 + $0xa8] sm:$0xff] }
 0x590   :  { %2889 = vmatmul.mubr.f32.gmra.mrb[48].mxu0 %v8037_v41  ;;  %3002 = vmatmul.mubr.f32.gmra.mrb[40].mxu1 %v8037_v41  ;;  %v8151_v41 = vrot.slane %v2148_v20, %v7862_v54  ;;  %v6722_v62 = vpack.c.bf16 %v3301_v17, %v3300_v53  ;;  %v3272_v32 = vld [vmem:[#allocation26 + $0x20] sm:$0xff]  ;;  %v3273_v53 = vld [vmem:[#allocation26 + $0x28] sm:$0xff] }
 0x591   :  { %2894 = vmatprep.mubr.f32.mxu0 %v8041_v22  ;;  %3007 = vmatprep.mubr.f32.mxu1 %v8041_v22  ;;  %v8154_v22 = vrot.slane %v2148_v20, %v7852_v10 }
 0x592   :  { %6651 = vmatpush3.bf16.msra.mxu0 %v6650_v14  ;;  %6683 = vmatpush3.bf16.msra.mxu1 %v6682_v61 }
 0x593   :  { %6653 = vmatprep.subr.bf16.mxu0 %v6652_v15  ;;  %6685 = vmatprep.subr.bf16.mxu1 %v6684_v6  ;;  %v3286_v6 = vld [vmem:[#allocation26 + $0x90] sm:$0xff] }
 0x594   :  { %2895 = vmatmul.mubr.f32.gmra.mrb[50].mxu0 %v8047_v35  ;;  %3008 = vmatmul.mubr.f32.gmra.mrb[42].mxu1 %v8047_v35  ;;  %v6692_v16 = vpack.c.bf16 %v3287_v19, %v3286_v6  ;;  %v3320_v19 = vld [vmem:[#allocation26 + $0x1a0] sm:$0xff] }
 0x596   :  { %6655 = vmatpush3.bf16.msra.mxu0 %v6654_v3  ;;  %6687 = vmatpush3.bf16.msra.mxu1 %v6686_v58  ;;  %v3271_v3 = vld [vmem:[#allocation26 + $0x18] sm:$0xff] }
 0x597   :  { %6689 = vmatprep.subr.bf16.mxu0 %v6688_v50  ;;  %6721 = vmatprep.subr.bf16.mxu1 %v6720_v5 }
 0x5c9   :  { %v1988_v9 = vpop.f32.mrb[20].mxu0  ;;  %v2101_v39 = vpop.f32.mrb[12].mxu1 }
 0x5ca   :  { %v2170_v37 = vadd.f32 %v8148_v23, %v1988_v9  ;;  %v2172_v35 = vadd.f32 %v8151_v41, %v2101_v39  ;;  %v1990_v25 = vpop.f32.mrb[21].mxu0  ;;  %v2103_v57 = vpop.f32.mrb[13].mxu1  ;;  %v6694_v9 = vpack.c.bf16 %v3271_v3, %v3270_v47  ;;  %v3321_v47 = vld [vmem:[#allocation26 + $0x1a8] sm:$0xff] }
 0x5cb   :  { %v2171_v49 = vadd.f32 %v8154_v22, %v1990_v25  ;;  %v2173_v30 = vadd.f32 %v8157_v24, %v2103_v57  ;;  %v3318_v57 = vld [vmem:[#allocation26 + $0x190] sm:$0xff] }
 0x5cc   :  { %v8167_v33 = vmax.f32 %v2170_v37, 0.0  ;;  %v8169_v36 = vmax.f32 %v2172_v35, 0.0 }
 0x5cd   :  { %v8163_v26 = vmax.f32 %v2171_v49, 0.0  ;;  %v8165_v27 = vmax.f32 %v2173_v30, 0.0  ;;  %v1994_v29 = vpop.f32.mrb[22].mxu0  ;;  %v2107_v11 = vpop.f32.mrb[14].mxu1  ;;  %v3319_v49 = vld [vmem:[#allocation26 + $0x198] sm:$0xff] }
 0x5ce   :  { %8997 = vst [vmem:[#allocation44_spill] sm:$0xff] %v8167_v33  ;;  %8998 = vst [vmem:[#allocation45_spill] sm:$0xff] %v8169_v36  ;;  %v8172_v40 = vadd.f32 %v8148_v23, %v1994_v29  ;;  %v8175_v43 = vadd.f32 %v8151_v41, %v2107_v11  ;;  %v1996_v46 = vpop.f32.mrb[23].mxu0  ;;  %v2109_v44 = vpop.f32.mrb[15].mxu1  ;;  %v6724_v11 = vpack.c.bf16 %v3319_v49, %v3318_v57 }
 0x5cf   :  { %8995 = vst [vmem:[#allocation42_spill] sm:$0xff] %v8163_v26  ;;  %8996 = vst [vmem:[#allocation43_spill] sm:$0xff] %v8165_v27  ;;  %v8178_v45 = vadd.f32 %v8154_v22, %v1996_v46  ;;  %v8181_v56 = vadd.f32 %v8157_v24, %v2109_v44  ;;  %3460 = vmatprep.mubr.f32.mxu0 %v8163_v26  ;;  %3605 = vmatprep.mubr.f32.mxu1 %v8165_v27  ;;  %v3302_v46 = vld [vmem:[#allocation26 + $0x110] sm:$0xff]  ;;  %v3303_v44 = vld [vmem:[#allocation26 + $0x118] sm:$0xff] }
 0x5d0   :  { %3461 = vmatmul.mubr.f32.vlgmr.msra.gmra.mrb[52].mxu0 %v8167_v33  ;;  %3606 = vmatmul.mubr.f32.vlgmr.msra.gmra.mrb[44].mxu1 %v8169_v36  ;;  %v6726_v12 = vpack.c.bf16 %v3303_v44, %v3302_v46 }
 0x5d1   :  { %v2000_v18 = vpop.f32.mrb[24].mxu0  ;;  %v2113_v13 = vpop.f32.mrb[16].mxu1  ;;  %6691 = vmatpush3.bf16.msra.mxu0 %v6690_v31  ;;  %6723 = vmatpush3.bf16.msra.mxu1 %v6722_v62 }
 0x5d2   :  { %v8188_v2 = vadd.f32 %v8148_v23, %v2000_v18  ;;  %v8191_v52 = vadd.f32 %v8151_v41, %v2113_v13  ;;  %v2002_v21 = vpop.f32.mrb[25].mxu0  ;;  %v2115_v7 = vpop.f32.mrb[17].mxu1  ;;  %6693 = vmatprep.subr.bf16.mxu0 %v6692_v16  ;;  %6725 = vmatprep.subr.bf16.mxu1 %v6724_v11 }
 0x5d3   :  { %v8194_v59 = vadd.f32 %v8154_v22, %v2002_v21  ;;  %v8197_v60 = vadd.f32 %v8157_v24, %v2115_v7  ;;  %v3288_v7 = vld [vmem:[#allocation26 + $0xa0] sm:$0xff] }
 0x5d4   :  { %v6696_v5 = vpack.c.bf16 %v3289_v55, %v3288_v7  ;;  %v3275_v55 = vld [vmem:[#allocation26 + $0x38] sm:$0xff] }
 0x5d5   :  { %v2006_v28 = vpop.f32.mrb[26].mxu0  ;;  %v2119_v63 = vpop.f32.mrb[18].mxu1  ;;  %6695 = vmatpush3.bf16.msra.mxu0 %v6694_v9  ;;  %6727 = vmatpush3.bf16.msra.mxu1 %v6726_v12  ;;  %v3305_v9 = vld [vmem:[#allocation26 + $0x128] sm:$0xff] }
 0x5d6   :  { %v8200_v1 = vadd.f32 %v8148_v23, %v2006_v28  ;;  %v8203_v42 = vadd.f32 %v8151_v41, %v2119_v63  ;;  %v2008_v14 = vpop.f32.mrb[27].mxu0  ;;  %v2121_v61 = vpop.f32.mrb[19].mxu1  ;;  %v6698_v28 = vpack.c.bf16 %v3273_v53, %v3272_v32  ;;  %6697 = vmatprep.subr.bf16.mxu0 %v6696_v5  ;;  %v3323_v5 = vld [vmem:[#allocation26 + $0x1b8] sm:$0xff]  ;;  %v3306_v53 = vld [vmem:[#allocation26 + $0x130] sm:$0xff] }
 0x5d7   :  { %v8206_v38 = vadd.f32 %v8154_v22, %v2008_v14  ;;  %v8209_v15 = vadd.f32 %v8157_v24, %v2121_v61 }
 0x5d9   :  { %v2012_v58 = vpop.f32.mrb[28].mxu0  ;;  %v2125_v20 = vpop.f32.mrb[20].mxu1  ;;  %6699 = vmatpush3.bf16.msra.mxu0 %v6698_v28  ;;  %v8363_v0 = vmax.f32 %v8206_v38, 0.0  ;;  %v8377_v38 = vmax.f32 %v8200_v1, 0.0 }
 0x5da   :  { %v8212_v39 = vadd.f32 %v8148_v23, %v2012_v58  ;;  %v8215_v37 = vadd.f32 %v8151_v41, %v2125_v20  ;;  %v2014_v35 = vpop.f32.mrb[29].mxu0  ;;  %v2127_v25 = vpop.f32.mrb[21].mxu1  ;;  %v6728_v58 = vpack.c.bf16 %v3321_v47, %v3320_v19  ;;  %v3304_v20 = vld [vmem:[#allocation26 + $0x120] sm:$0xff] }
 0x5db   :  { %v8218_v30 = vadd.f32 %v8154_v22, %v2014_v35  ;;  %v8221_v29 = vadd.f32 %v8157_v24, %v2127_v25  ;;  %v6730_v35 = vpack.c.bf16 %v3305_v9, %v3304_v20  ;;  %v3324_v47 = vld [vmem:[#allocation26 + $0x1c0] sm:$0xff]  ;;  %9015 = vst [vmem:[#allocation62_spill] sm:$0xff] %v8363_v0  ;;  %9017 = vst [vmem:[#allocation64_spill] sm:$0xff] %v8377_v38 }
 0x5dc   :  { %6729 = vmatprep.subr.bf16.mxu1 %v6728_v58  ;;  %v3325_v58 = vld [vmem:[#allocation26 + $0x1c8] sm:$0xff]  ;;  %v3308_v20 = vld [vmem:[#allocation26 + $0x140] sm:$0xff] }
 0x5dd   :  { %v2018_v48 = vpop.f32.mrb[30].mxu0  ;;  %v2131_v34 = vpop.f32.mrb[22].mxu1  ;;  %6731 = vmatpush3.bf16.msra.mxu1 %v6730_v35  ;;  %v6736_v9 = vpack.c.bf16 %v3325_v58, %v3324_v47  ;;  %v3309_v35 = vld [vmem:[#allocation26 + $0x148] sm:$0xff] }
 0x5de   :  { %v8224_v50 = vadd.f32 %v8148_v23, %v2018_v48  ;;  %v8227_v51 = vadd.f32 %v8151_v41, %v2131_v34  ;;  %v2020_v18 = vpop.f32.mrb[31].mxu0  ;;  %v2133_v13 = vpop.f32.mrb[23].mxu1  ;;  %v3290_v34 = vld [vmem:[#allocation26 + $0xb0] sm:$0xff]  ;;  %v3313_v58 = vld [vmem:[#allocation26 + $0x168] sm:$0xff] }
 0x5df   :  { %v8230_v31 = vadd.f32 %v8154_v22, %v2020_v18  ;;  %v8233_v21 = vadd.f32 %v8157_v24, %v2133_v13  ;;  %v3291_v18 = vld [vmem:[#allocation26 + $0xb8] sm:$0xff]  ;;  %v3274_v13 = vld [vmem:[#allocation26 + $0x30] sm:$0xff] }
 0x5e0   :  { %v6700_v7 = vpack.c.bf16 %v3291_v18, %v3290_v34  ;;  %v6702_v32 = vpack.c.bf16 %v3275_v55, %v3274_v13  ;;  %v3278_v34 = vld [vmem:[#allocation26 + $0x50] sm:$0xff]  ;;  %v3279_v18 = vld [vmem:[#allocation26 + $0x58] sm:$0xff] }
 0x5e1   :  { %v2024_v17 = vpop.f32.mrb[32].mxu0  ;;  %v2137_v62 = vpop.f32.mrb[24].mxu1  ;;  %v6710_v13 = vpack.c.bf16 %v3279_v18, %v3278_v34  ;;  %v3327_v55 = vld [vmem:[#allocation26 + $0x1d8] sm:$0xff]  ;;  %v3330_v34 = vld [vmem:[#allocation26 + $0x1f0] sm:$0xff] }
 0x5e2   :  { %v8236_v63 = vadd.f32 %v8148_v23, %v2024_v17  ;;  %v8239_v14 = vadd.f32 %v8151_v41, %v2137_v62  ;;  %v2026_v61 = vpop.f32.mrb[33].mxu0  ;;  %v2139_v6 = vpop.f32.mrb[25].mxu1  ;;  %6701 = vmatprep.subr.bf16.mxu0 %v6700_v7  ;;  %v3307_v17 = vld [vmem:[#allocation26 + $0x138] sm:$0xff]  ;;  %v3292_v62 = vld [vmem:[#allocation26 + $0xc0] sm:$0xff]  ;;  %v3326_v7 = vld [vmem:[#allocation26 + $0x1d0] sm:$0xff] }
 0x5e3   :  { %v8242_v16 = vadd.f32 %v8154_v22, %v2026_v61  ;;  %v8245_v3 = vadd.f32 %v8157_v24, %v2139_v6  ;;  %6703 = vmatpush3.bf16.msra.mxu0 %v6702_v32  ;;  %v6734_v28 = vpack.c.bf16 %v3307_v17, %v3306_v53  ;;  %v3277_v6 = vld [vmem:[#allocation26 + $0x48] sm:$0xff]  ;;  %v3310_v32 = vld [vmem:[#allocation26 + $0x150] sm:$0xff]  ;;  %v3296_v53 = vld [vmem:[#allocation26 + $0xe0] sm:$0xff] }
 0x5e4   :  { %v3297_v17 = vld [vmem:[#allocation26 + $0xe8] sm:$0xff]  ;;  %v3331_v18 = vld [vmem:[#allocation26 + $0x1f8] sm:$0xff] }
 0x5e5   :  { %v2030_v25 = vpop.f32.mrb[34].mxu0  ;;  %v2143_v57 = vpop.f32.mrb[26].mxu1 }
 0x5e6   :  { %v8248_v49 = vadd.f32 %v8148_v23, %v2030_v25  ;;  %v8251_v11 = vadd.f32 %v8151_v41, %v2143_v57  ;;  %v2032_v46 = vpop.f32.mrb[35].mxu0  ;;  %v2145_v44 = vpop.f32.mrb[27].mxu1  ;;  %v3322_v23 = vld [vmem:[#allocation26 + $0x1b0] sm:$0xff]  ;;  %v6738_v25 = vpack.c.bf16 %v3309_v35, %v3308_v20  ;;  %v3299_v35 = vld [vmem:[#allocation26 + $0xf8] sm:$0xff] }
 0x5e7   :  { %v8254_v12 = vadd.f32 %v8154_v22, %v2032_v46  ;;  %v8257_v48 = vadd.f32 %v8157_v24, %v2145_v44  ;;  %v6732_v41 = vpack.c.bf16 %v3323_v5, %v3322_v23  ;;  %v3293_v22 = vld [vmem:[#allocation26 + $0xc8] sm:$0xff]  ;;  %v3276_v24 = vld [vmem:[#allocation26 + $0x40] sm:$0xff]  ;;  %v3294_v57 = vld [vmem:[#allocation26 + $0xd0] sm:$0xff]  ;;  %v6740_v23 = vpack.c.bf16 %v3327_v55, %v3326_v7 }
 0x5e8   :  { %v6704_v61 = vpack.c.bf16 %v3293_v22, %v3292_v62  ;;  %v6706_v19 = vpack.c.bf16 %v3277_v6, %v3276_v24  ;;  %v3295_v46 = vld [vmem:[#allocation26 + $0xd8] sm:$0xff]  ;;  %v6712_v62 = vpack.c.bf16 %v3297_v17, %v3296_v53  ;;  %v3281_v22 = vld [vmem:[#allocation26 + $0x68] sm:$0xff]  ;;  %v3328_v24 = vld [vmem:[#allocation26 + $0x1e0] sm:$0xff]  ;;  %v6748_v7 = vpack.c.bf16 %v3331_v18, %v3330_v34 }
 0x5e9   :  { %6733 = vmatprep.subr.bf16.mxu1 %v6732_v41  ;;  %v6708_v44 = vpack.c.bf16 %v3295_v46, %v3294_v57  ;;  %v3311_v5 = vld [vmem:[#allocation26 + $0x158] sm:$0xff]  ;;  %v3329_v6 = vld [vmem:[#allocation26 + $0x1e8] sm:$0xff]  ;;  %v3282_v57 = vld [vmem:[#allocation26 + $0x70] sm:$0xff] }
 0x5ea   :  { %6735 = vmatpush3.bf16.msra.mxu1 %v6734_v28  ;;  %6705 = vmatprep.subr.bf16.mxu0 %v6704_v61  ;;  %v6742_v41 = vpack.c.bf16 %v3311_v5, %v3310_v32  ;;  %v3280_v28 = vld [vmem:[#allocation26 + $0x60] sm:$0xff]  ;;  %v6744_v47 = vpack.c.bf16 %v3329_v6, %v3328_v24  ;;  %v3283_v46 = vld [vmem:[#allocation26 + $0x78] sm:$0xff]  ;;  %v4321_v5 = vld [vmem:[#allocation28 + $0x288] sm:$0xff] }
 0x5eb   :  { %6707 = vmatpush3.bf16.msra.mxu0 %v6706_v19  ;;  %6737 = vmatprep.subr.bf16.mxu1 %v6736_v9  ;;  %v6714_v61 = vpack.c.bf16 %v3281_v22, %v3280_v28  ;;  %v3312_v19 = vld [vmem:[#allocation26 + $0x160] sm:$0xff]  ;;  %v3298_v9 = vld [vmem:[#allocation26 + $0xf0] sm:$0xff]  ;;  %v3315_v55 = vld [vmem:[#allocation26 + $0x178] sm:$0xff] }
 0x5ec   :  { %6709 = vmatprep.subr.bf16.mxu0 %v6708_v44  ;;  %v6746_v20 = vpack.c.bf16 %v3313_v58, %v3312_v19  ;;  %v6718_v44 = vpack.c.bf16 %v3283_v46, %v3282_v57  ;;  %v4352_v53 = vld [vmem:[#allocation28 + $0x380] sm:$0xff]  ;;  %v4353_v17 = vld [vmem:[#allocation28 + $0x388] sm:$0xff]  ;;  %v3014_v28 = vld [vmem:[#allocation25] sm:$0xf] }
 0x5ed   :  { %v8260_v22 = vrot.slane %v3014_v28, %v7849_v8  ;;  %v8266_v24 = vrot.slane %v3014_v28, %v7852_v10  ;;  %v8269_v6 = vrot.slane %v3014_v28, %v7866_v4 }
 0x5ee   :  { %6739 = vmatpush3.bf16.msra.mxu1 %v6738_v25  ;;  %v6716_v25 = vpack.c.bf16 %v3299_v35, %v3298_v9 }
 0x5ef   :  { %6711 = vmatpush3.bf16.msra.mxu0 %v6710_v13  ;;  %6741 = vmatprep.subr.bf16.mxu1 %v6740_v23  ;;  %v3314_v13 = vld [vmem:[#allocation26 + $0x170] sm:$0xff]  ;;  %v4320_v23 = vld [vmem:[#allocation28 + $0x280] sm:$0xff] }
 0x5f0   :  { %6713 = vmatprep.subr.bf16.mxu0 %v6712_v62  ;;  %v6750_v32 = vpack.c.bf16 %v3315_v55, %v3314_v13  ;;  %v6784_v62 = vpack.c.bf16 %v4353_v17, %v4352_v53  ;;  %v8288_v55 = vmax.f32 %v8181_v56, 0.0  ;;  %v8302_v56 = vmax.f32 %v8175_v43, 0.0 }
 0x5f2   :  { %6743 = vmatpush3.bf16.msra.mxu1 %v6742_v41  ;;  %v6752_v41 = vpack.c.bf16 %v4321_v5, %v4320_v23  ;;  %9002 = vst [vmem:[#allocation49_spill] sm:$0xff] %v8302_v56 }
 0x5f3   :  { %6715 = vmatpush3.bf16.msra.mxu0 %v6714_v61  ;;  %6745 = vmatprep.subr.bf16.mxu1 %v6744_v47  ;;  %v8263_v61 = vrot.slane %v3014_v28, %v7862_v54 }
 0x5f4   :  { %6717 = vmatprep.subr.bf16.mxu0 %v6716_v25 }
 0x5f6   :  { %6747 = vmatpush3.bf16.msra.mxu1 %v6746_v20 }
 0x5f7   :  { %6719 = vmatpush3.bf16.msra.mxu0 %v6718_v44  ;;  %6749 = vmatprep.subr.bf16.mxu1 %v6748_v7  ;;  %v8285_v7 = vmax.f32 %v8178_v45, 0.0  ;;  %v8299_v45 = vmax.f32 %v8172_v40, 0.0 }
 0x5f8   :  { %6753 = vmatprep.subr.bf16.mxu0 %v6752_v41 }
 0x5f9   :  { %9001 = vst [vmem:[#allocation48_spill] sm:$0xff] %v8285_v7 }
 0x5fa   :  { %6751 = vmatpush3.bf16.msra.mxu1 %v6750_v32 }
 0x5fb   :  { %6785 = vmatprep.subr.bf16.mxu1 %v6784_v62 }
 0x64b   :  { %v2854_v19 = vpop.f32.mrb[36].mxu0  ;;  %v2967_v47 = vpop.f32.mrb[28].mxu1 }
 0x64c   :  { %v3036_v58 = vadd.f32 %v8260_v22, %v2854_v19  ;;  %v3038_v20 = vadd.f32 %v8263_v61, %v2967_v47  ;;  %v2856_v9 = vpop.f32.mrb[37].mxu0  ;;  %v2969_v35 = vpop.f32.mrb[29].mxu1 }
 0x64d   :  { %v3037_v8 = vadd.f32 %v8266_v24, %v2856_v9  ;;  %v3039_v25 = vadd.f32 %v8269_v6, %v2969_v35 }
 0x64e   :  { %v8279_v4 = vmax.f32 %v3036_v58, 0.0  ;;  %v8281_v44 = vmax.f32 %v3038_v20, 0.0 }
 0x64f   :  { %v8275_v54 = vmax.f32 %v3037_v8, 0.0  ;;  %v8277_v57 = vmax.f32 %v3039_v25, 0.0  ;;  %v2860_v10 = vpop.f32.mrb[38].mxu0  ;;  %v2973_v46 = vpop.f32.mrb[30].mxu1 }
 0x650   :  { %8999 = vst [vmem:[#allocation46_spill] sm:$0xff] %v8279_v4  ;;  %9000 = vst [vmem:[#allocation47_spill] sm:$0xff] %v8281_v44  ;;  %v3042_v34 = vadd.f32 %v8263_v61, %v2973_v46  ;;  %v2862_v18 = vpop.f32.mrb[39].mxu0  ;;  %v2975_v13 = vpop.f32.mrb[31].mxu1  ;;  %v3040_v53 = vadd.f32 %v8260_v22, %v2860_v10  ;;  %v8321_v10 = vmax.f32 %v8194_v59, 0.0  ;;  %v8324_v46 = vmax.f32 %v8197_v60, 0.0 }
 0x651   :  { %v3041_v32 = vadd.f32 %v8266_v24, %v2862_v18  ;;  %v3043_v23 = vadd.f32 %v8269_v6, %v2975_v13  ;;  %3465 = vmatprep.mubr.f32.mxu0 %v8275_v54  ;;  %3610 = vmatprep.mubr.f32.mxu1 %v8277_v57  ;;  %v8335_v59 = vmax.f32 %v8188_v2, 0.0  ;;  %v8338_v60 = vmax.f32 %v8191_v52, 0.0 }
 0x652   :  { %3466 = vmatmul.mubr.f32.gmra.mrb[54].mxu0 %v8279_v4  ;;  %3611 = vmatmul.mubr.f32.gmra.mrb[46].mxu1 %v8281_v44  ;;  %v8315_v43 = vmax.f32 %v3040_v53, 0.0  ;;  %v8317_v9 = vmax.f32 %v3042_v34, 0.0  ;;  %9007 = vst [vmem:[#allocation54_spill] sm:$0xff] %v8321_v10  ;;  %9008 = vst [vmem:[#allocation55_spill] sm:$0xff] %v8324_v46 }
 0x653   :  { %v2866_v5 = vpop.f32.mrb[40].mxu0  ;;  %v2979_v41 = vpop.f32.mrb[32].mxu1  ;;  %3470 = vmatprep.mubr.f32.mxu0 %v8285_v7  ;;  %3615 = vmatprep.mubr.f32.mxu1 %v8288_v55  ;;  %v8306_v19 = vmax.f32 %v3041_v32, 0.0  ;;  %v8308_v47 = vmax.f32 %v3043_v23, 0.0  ;;  %9009 = vst [vmem:[#allocation56_spill] sm:$0xff] %v8335_v59  ;;  %9010 = vst [vmem:[#allocation57_spill] sm:$0xff] %v8338_v60 }
 0x654   :  { %v3046_v17 = vadd.f32 %v8263_v61, %v2979_v41  ;;  %v2868_v62 = vpop.f32.mrb[41].mxu0  ;;  %v2981_v28 = vpop.f32.mrb[33].mxu1  ;;  %9005 = vst [vmem:[#allocation52_spill] sm:$0xff] %v8315_v43  ;;  %9006 = vst [vmem:[#allocation53_spill] sm:$0xff] %v8317_v9  ;;  %v3044_v23 = vadd.f32 %v8260_v22, %v2866_v5 }
 0x655   :  { %9003 = vst [vmem:[#allocation50_spill] sm:$0xff] %v8306_v19  ;;  %9004 = vst [vmem:[#allocation51_spill] sm:$0xff] %v8308_v47  ;;  %v3047_v58 = vadd.f32 %v8269_v6, %v2981_v28  ;;  %v3045_v18 = vadd.f32 %v8266_v24, %v2868_v62 }
 0x656   :  { %3471 = vmatmul.mubr.f32.gmra.mrb[56].mxu0 %v8299_v45  ;;  %3616 = vmatmul.mubr.f32.gmra.mrb[48].mxu1 %v8302_v56  ;;  %v8355_v5 = vmax.f32 %v3044_v23, 0.0 }
 0x657   :  { %v2872_v40 = vpop.f32.mrb[42].mxu0  ;;  %v2985_v20 = vpop.f32.mrb[34].mxu1  ;;  %3475 = vmatprep.mubr.f32.mxu0 %v8306_v19  ;;  %3620 = vmatprep.mubr.f32.mxu1 %v8308_v47  ;;  %v8344_v28 = vmax.f32 %v3045_v18, 0.0 }
 0x658   :  { %v3050_v35 = vadd.f32 %v8263_v61, %v2985_v20  ;;  %v2874_v8 = vpop.f32.mrb[43].mxu0  ;;  %v2987_v25 = vpop.f32.mrb[35].mxu1  ;;  %v8346_v20 = vmax.f32 %v3047_v58, 0.0  ;;  %9013 = vst [vmem:[#allocation60_spill] sm:$0xff] %v8355_v5 }
 0x659   :  { %v3051_v13 = vadd.f32 %v8269_v6, %v2987_v25  ;;  %9011 = vst [vmem:[#allocation58_spill] sm:$0xff] %v8344_v28 }
 0x65a   :  { %3476 = vmatmul.mubr.f32.gmra.mrb[58].mxu0 %v8315_v43  ;;  %3621 = vmatmul.mubr.f32.gmra.mrb[50].mxu1 %v8317_v9  ;;  %9012 = vst [vmem:[#allocation59_spill] sm:$0xff] %v8346_v20 }
 0x65b   :  { %v8330_v34 = vpop.f32.mrb[44].mxu0  ;;  %v2991_v32 = vpop.f32.mrb[36].mxu1  ;;  %3480 = vmatprep.mubr.f32.mxu0 %v8321_v10  ;;  %3625 = vmatprep.mubr.f32.mxu1 %v8324_v46 }
 0x65c   :  { %v8342_v41 = vadd.f32 %v8263_v61, %v2991_v32  ;;  %v2880_v53 = vpop.f32.mrb[45].mxu0  ;;  %v2993_v62 = vpop.f32.mrb[37].mxu1  ;;  %v8357_v32 = vmax.f32 %v3046_v17, 0.0 }
 0x65d   :  { %v3055_v25 = vadd.f32 %v8269_v6, %v2993_v62 }
 0x65e   :  { %3481 = vmatmul.mubr.f32.gmra.mrb[60].mxu0 %v8335_v59  ;;  %3626 = vmatmul.mubr.f32.gmra.mrb[52].mxu1 %v8338_v60  ;;  %9014 = vst [vmem:[#allocation61_spill] sm:$0xff] %v8357_v32  ;;  %v8366_v60 = vmax.f32 %v8209_v15, 0.0  ;;  %v3049_v59 = vadd.f32 %v8266_v24, %v2874_v8  ;;  %v8380_v15 = vmax.f32 %v8203_v42, 0.0  ;;  %v3048_v8 = vadd.f32 %v8260_v22, %v2872_v40 }
 0x65f   :  { %v8351_v2 = vpop.f32.mrb[46].mxu0  ;;  %v2997_v52 = vpop.f32.mrb[38].mxu1  ;;  %3485 = vmatprep.mubr.f32.mxu0 %v8344_v28  ;;  %3630 = vmatprep.mubr.f32.mxu1 %v8346_v20  ;;  %v8388_v20 = vmax.f32 %v3051_v13, 0.0 }
 0x660   :  { %v8360_v58 = vadd.f32 %v8263_v61, %v2997_v52  ;;  %v2886_v18 = vpop.f32.mrb[47].mxu0  ;;  %v2999_v62 = vpop.f32.mrb[39].mxu1  ;;  %9016 = vst [vmem:[#allocation63_spill] sm:$0xff] %v8366_v60  ;;  %9018 = vst [vmem:[#allocation65_spill] sm:$0xff] %v8380_v15  ;;  %v8397_v40 = vmax.f32 %v3048_v8, 0.0  ;;  %v8470_v8 = vmax.f32 %v8242_v16, 0.0 }
 0x661   :  { %v3059_v28 = vadd.f32 %v8269_v6, %v2999_v62 }
 0x662   :  { %3486 = vmatmul.mubr.f32.gmra.mrb[62].mxu0 %v8355_v5  ;;  %3631 = vmatmul.mubr.f32.gmra.mrb[54].mxu1 %v8357_v32  ;;  %v8386_v5 = vmax.f32 %v3049_v59, 0.0 }
 0x663   :  { %v8372_v17 = vpop.f32.mrb[48].mxu0  ;;  %v3003_v23 = vpop.f32.mrb[40].mxu1  ;;  %3490 = vmatprep.mubr.f32.mxu0 %v8363_v0  ;;  %3635 = vmatprep.mubr.f32.mxu1 %v8366_v60  ;;  %v3053_v60 = vadd.f32 %v8266_v24, %v2880_v53  ;;  %v8438_v53 = vmax.f32 %v8230_v31, 0.0  ;;  %v3056_v31 = vadd.f32 %v8260_v22, %v8351_v2  ;;  %v8473_v2 = vmax.f32 %v8245_v3, 0.0 }
 0x664   :  { %v8384_v52 = vadd.f32 %v8263_v61, %v3003_v23  ;;  %v2892_v62 = vpop.f32.mrb[49].mxu0  ;;  %v3005_v32 = vpop.f32.mrb[41].mxu1  ;;  %9019 = vst [vmem:[#allocation66_spill] sm:$0xff] %v8386_v5  ;;  %v8399_v23 = vmax.f32 %v3050_v35, 0.0  ;;  %v3060_v16 = vadd.f32 %v8260_v22, %v8372_v17  ;;  %v8505_v17 = vmax.f32 %v8257_v48, 0.0 }
 0x665   :  { %v3063_v0 = vadd.f32 %v8269_v6, %v3005_v32  ;;  %v8424_v35 = vmax.f32 %v3053_v60, 0.0  ;;  %v3057_v60 = vadd.f32 %v8266_v24, %v2886_v18  ;;  %v8458_v18 = vmax.f32 %v3059_v28, 0.0 }
 0x666   :  { %3491 = vmatmul.mubr.f32.gmra.mrb[64].mxu0 %v8377_v38  ;;  %3636 = vmatmul.mubr.f32.gmra.mrb[56].mxu1 %v8380_v15  ;;  %v8405_v38 = vmax.f32 %v8218_v30, 0.0  ;;  %v8408_v15 = vmax.f32 %v8221_v29, 0.0  ;;  %v8420_v30 = vmax.f32 %v8215_v37, 0.0  ;;  %v3052_v29 = vadd.f32 %v8260_v22, %v8330_v34  ;;  %9024 = vst [vmem:[#allocation71_spill] sm:$0xff] %v8505_v17 }
 0x667   :  { %v8393_v1 = vpop.f32.mrb[50].mxu0  ;;  %v3009_v42 = vpop.f32.mrb[42].mxu1  ;;  %3495 = vmatprep.mubr.f32.mxu0 %v8386_v5  ;;  %3640 = vmatprep.mubr.f32.mxu1 %v8388_v20  ;;  %v8435_v37 = vmax.f32 %v8342_v41, 0.0  ;;  %v8441_v34 = vmax.f32 %v8233_v21, 0.0  ;;  %v8452_v41 = vmax.f32 %v8227_v51, 0.0  ;;  %v8456_v21 = vmax.f32 %v3057_v60, 0.0 }
 0x668   :  { %v8402_v13 = vadd.f32 %v8263_v61, %v3009_v42  ;;  %v2898_v59 = vpop.f32.mrb[51].mxu0  ;;  %v3011_v32 = vpop.f32.mrb[43].mxu1  ;;  %v8417_v61 = vmax.f32 %v8212_v39, 0.0  ;;  %v8432_v39 = vmax.f32 %v3052_v29, 0.0  ;;  %v8467_v51 = vmax.f32 %v8360_v58, 0.0  ;;  %v4305_v60 = vld [vmem:[#allocation28 + $0x208] sm:$0xff] }
 0x669   :  { %v3067_v5 = vadd.f32 %v8269_v6, %v3011_v32  ;;  %v8426_v6 = vmax.f32 %v3055_v25, 0.0  ;;  %v8449_v25 = vmax.f32 %v8224_v50, 0.0  ;;  %v8464_v50 = vmax.f32 %v3056_v31, 0.0  ;;  %v4322_v31 = vld [vmem:[#allocation28 + $0x290] sm:$0xff] }
 0x66a   :  { %3496 = vmatmul.mubr.f32.gmra.mrb[66].mxu0 %v8397_v40  ;;  %3641 = vmatmul.mubr.f32.gmra.mrb[58].mxu1 %v8399_v23  ;;  %v3061_v28 = vadd.f32 %v8266_v24, %v2892_v62  ;;  %v8481_v42 = vmax.f32 %v8236_v63, 0.0  ;;  %v8484_v58 = vmax.f32 %v8239_v14, 0.0  ;;  %v8490_v62 = vmax.f32 %v3063_v0, 0.0 }
 0x66b   :  { %3500 = vmatprep.mubr.f32.mxu0 %v8405_v38  ;;  %3645 = vmatprep.mubr.f32.mxu1 %v8408_v15  ;;  %v8496_v63 = vmax.f32 %v3060_v16, 0.0  ;;  %v8499_v14 = vmax.f32 %v8384_v52, 0.0  ;;  %v8502_v32 = vmax.f32 %v8254_v12, 0.0  ;;  %v3065_v0 = vadd.f32 %v8266_v24, %v2898_v59  ;;  %v4304_v59 = vld [vmem:[#allocation28 + $0x200] sm:$0xff]  ;;  %v4355_v16 = vld [vmem:[#allocation28 + $0x398] sm:$0xff] }
 0x66c   :  { %v8488_v3 = vmax.f32 %v3061_v28, 0.0  ;;  %9020 = vst [vmem:[#allocation67_spill] sm:$0xff] %v8490_v62  ;;  %v8513_v29 = vmax.f32 %v8248_v49, 0.0  ;;  %v8516_v52 = vmax.f32 %v8251_v11, 0.0  ;;  %v3064_v12 = vadd.f32 %v8260_v22, %v8393_v1  ;;  %v4336_v22 = vld [vmem:[#allocation28 + $0x300] sm:$0xff]  ;;  %v4337_v1 = vld [vmem:[#allocation28 + $0x308] sm:$0xff] }
 0x66d   :  { %9021 = vst [vmem:[#allocation68_spill] sm:$0xff] %v8496_v63  ;;  %9022 = vst [vmem:[#allocation69_spill] sm:$0xff] %v8499_v14  ;;  %v8520_v48 = vmax.f32 %v3065_v0, 0.0  ;;  %v8522_v24 = vmax.f32 %v3067_v5, 0.0  ;;  %v8531_v11 = vmax.f32 %v8402_v13, 0.0  ;;  %v4323_v5 = vld [vmem:[#allocation28 + $0x298] sm:$0xff] }
 0x66e   :  { %3501 = vmatmul.mubr.f32.gmra.mrb[68].mxu0 %v8417_v61  ;;  %3646 = vmatmul.mubr.f32.gmra.mrb[60].mxu1 %v8420_v30  ;;  %9023 = vst [vmem:[#allocation70_spill] sm:$0xff] %v8502_v32  ;;  %9025 = vst [vmem:[#allocation72_spill] sm:$0xff] %v8513_v29  ;;  %v8528_v49 = vmax.f32 %v3064_v12, 0.0  ;;  %v4354_v28 = vld [vmem:[#allocation28 + $0x390] sm:$0xff]  ;;  %v9031_v0 = vmov 0.0   ;;  %v6754_v12 = vpack.c.bf16 %v4305_v60, %v4304_v59 }
 0x66f   :  { %3505 = vmatprep.mubr.f32.mxu0 %v8424_v35  ;;  %3650 = vmatprep.mubr.f32.mxu1 %v8426_v6  ;;  %9026 = vst [vmem:[#allocation73_spill] sm:$0xff] %v8516_v52  ;;  %9027 = vst [vmem:[#allocation74_spill] sm:$0xff] %v8520_v48  ;;  %v4306_v13 = vld [vmem:[#allocation28 + $0x210] sm:$0xff] }
 0x670   :  { %9028 = vst [vmem:[#allocation75_spill] sm:$0xff] %v8522_v24  ;;  %9029 = vst [vmem:[#allocation76_spill] sm:$0xff] %v8528_v49 }
 0x671   :  { %9030 = vst [vmem:[#allocation77_spill] sm:$0xff] %v8531_v11 }
 0x672   :  { %3506 = vmatmul.mubr.f32.gmra.mrb[70].mxu0 %v8432_v39  ;;  %3651 = vmatmul.mubr.f32.gmra.mrb[62].mxu1 %v8435_v37 }
 0x673   :  { %3510 = vmatprep.mubr.f32.mxu0 %v8438_v53  ;;  %3655 = vmatprep.mubr.f32.mxu1 %v8441_v34 }
 0x676   :  { %3511 = vmatmul.mubr.f32.gmra.mrb[72].mxu0 %v8449_v25  ;;  %3656 = vmatmul.mubr.f32.gmra.mrb[64].mxu1 %v8452_v41 }
 0x677   :  { %3515 = vmatprep.mubr.f32.mxu0 %v8456_v21  ;;  %3660 = vmatprep.mubr.f32.mxu1 %v8458_v18 }
 0x67a   :  { %3516 = vmatmul.mubr.f32.gmra.mrb[74].mxu0 %v8464_v50  ;;  %3661 = vmatmul.mubr.f32.gmra.mrb[66].mxu1 %v8467_v51 }
 0x67b   :  { %3520 = vmatprep.mubr.f32.mxu0 %v8470_v8  ;;  %3665 = vmatprep.mubr.f32.mxu1 %v8473_v2 }
 0x67e   :  { %3521 = vmatmul.mubr.f32.gmra.mrb[76].mxu0 %v8481_v42  ;;  %3666 = vmatmul.mubr.f32.gmra.mrb[68].mxu1 %v8484_v58 }
 0x67f   :  { %3525 = vmatprep.mubr.f32.mxu0 %v8488_v3  ;;  %3670 = vmatprep.mubr.f32.mxu1 %v8490_v62  ;;  %v4359_v62 = vld [vmem:[#allocation28 + $0x3b8] sm:$0xff] }
 0x682   :  { %3526 = vmatmul.mubr.f32.gmra.mrb[78].mxu0 %v8496_v63  ;;  %3671 = vmatmul.mubr.f32.gmra.mrb[70].mxu1 %v8499_v14  ;;  %v4324_v14 = vld [vmem:[#allocation28 + $0x2a0] sm:$0xff]  ;;  %v4357_v63 = vld [vmem:[#allocation28 + $0x3a8] sm:$0xff] }
 0x683   :  { %3530 = vmatprep.mubr.f32.mxu0 %v8502_v32  ;;  %3675 = vmatprep.mubr.f32.mxu1 %v8505_v17  ;;  %v4338_v17 = vld [vmem:[#allocation28 + $0x310] sm:$0xff]  ;;  %v4339_v32 = vld [vmem:[#allocation28 + $0x318] sm:$0xff] }
 0x684   :  { %v6790_v60 = vpack.c.bf16 %v4339_v32, %v4338_v17 }
 0x686   :  { %3531 = vmatmul.mubr.f32.gmra.mrb[80].mxu0 %v8513_v29  ;;  %3676 = vmatmul.mubr.f32.gmra.mrb[72].mxu1 %v8516_v52  ;;  %v6756_v52 = vpack.c.bf16 %v4323_v5, %v4322_v31  ;;  %v6788_v29 = vpack.c.bf16 %v4355_v16, %v4354_v28  ;;  %v4340_v28 = vld [vmem:[#allocation28 + $0x320] sm:$0xff]  ;;  %v4341_v16 = vld [vmem:[#allocation28 + $0x328] sm:$0xff] }
 0x687   :  { %3535 = vmatprep.mubr.f32.mxu0 %v8520_v48  ;;  %3680 = vmatprep.mubr.f32.mxu1 %v8522_v24  ;;  %v6786_v24 = vpack.c.bf16 %v4337_v1, %v4336_v22  ;;  %v4307_v48 = vld [vmem:[#allocation28 + $0x218] sm:$0xff]  ;;  %v4308_v22 = vld [vmem:[#allocation28 + $0x220] sm:$0xff]  ;;  %v4309_v1 = vld [vmem:[#allocation28 + $0x228] sm:$0xff]  ;;  %v6794_v17 = vpack.c.bf16 %v4341_v16, %v4340_v28 }
 0x688   :  { %v6758_v59 = vpack.c.bf16 %v4307_v48, %v4306_v13  ;;  %v6762_v32 = vpack.c.bf16 %v4309_v1, %v4308_v22  ;;  %v4342_v48 = vld [vmem:[#allocation28 + $0x330] sm:$0xff]  ;;  %v4360_v13 = vld [vmem:[#allocation28 + $0x3c0] sm:$0xff]  ;;  %v4331_v28 = vld [vmem:[#allocation28 + $0x2d8] sm:$0xff] }
 0x689   :  { %v4344_v1 = vld [vmem:[#allocation28 + $0x340] sm:$0xff]  ;;  %v4362_v16 = vld [vmem:[#allocation28 + $0x3d0] sm:$0xff] }
 0x68a   :  { %3536 = vmatmul.mubr.f32.gmra.mrb[82].mxu0 %v8528_v49  ;;  %3681 = vmatmul.mubr.f32.gmra.mrb[74].mxu1 %v8531_v11  ;;  %v4325_v11 = vld [vmem:[#allocation28 + $0x2a8] sm:$0xff]  ;;  %v4356_v49 = vld [vmem:[#allocation28 + $0x3a0] sm:$0xff] }
 0x68b   :  { %3750 = vmatprep.mubr.f32.mxu0 %v9031_v0  ;;  %3895 = vmatprep.mubr.f32.mxu1 %v9031_v0  ;;  %v6760_v31 = vpack.c.bf16 %v4325_v11, %v4324_v14  ;;  %v6792_v5 = vpack.c.bf16 %v4357_v63, %v4356_v49  ;;  %v4310_v14 = vld [vmem:[#allocation28 + $0x230] sm:$0xff]  ;;  %v4311_v63 = vld [vmem:[#allocation28 + $0x238] sm:$0xff]  ;;  %v4328_v49 = vld [vmem:[#allocation28 + $0x2c0] sm:$0xff] }
 0x68c   :  { %v4329_v11 = vld [vmem:[#allocation28 + $0x2c8] sm:$0xff] }
 0x68e   :  { %3751 = vmatmul.mubr.f32.vlgmr.msra.gmra.mrb[84].mxu0 %v9031_v0  ;;  %3896 = vmatmul.mubr.f32.vlgmr.msra.gmra.mrb[76].mxu1 %v9031_v0  ;;  %v4326_v0 = vld [vmem:[#allocation28 + $0x2b0] sm:$0xff] }
 0x68f   :  { %6755 = vmatpush3.bf16.msra.mxu0 %v6754_v12  ;;  %3755 = vmatprep.mubr.f32.mxu0 %v8163_v26  ;;  %v4327_v12 = vld [vmem:[#allocation28 + $0x2b8] sm:$0xff]  ;;  %v4358_v26 = vld [vmem:[#allocation28 + $0x3b0] sm:$0xff] }
 0x690   :  { %3900 = vmatprep.mubr.f32.mxu1 %v8165_v27  ;;  %6787 = vmatpush3.bf16.msra.mxu1 %v6786_v24  ;;  %v4343_v24 = vld [vmem:[#allocation28 + $0x338] sm:$0xff] }
 0x691   :  { %6757 = vmatprep.subr.bf16.mxu0 %v6756_v52  ;;  %6789 = vmatprep.subr.bf16.mxu1 %v6788_v29  ;;  %v6764_v29 = vpack.c.bf16 %v4327_v12, %v4326_v0  ;;  %v6796_v52 = vpack.c.bf16 %v4359_v62, %v4358_v26  ;;  %v4312_v0 = vld [vmem:[#allocation28 + $0x240] sm:$0xff]  ;;  %v4313_v26 = vld [vmem:[#allocation28 + $0x248] sm:$0xff]  ;;  %v6768_v62 = vpack.c.bf16 %v4329_v11, %v4328_v49  ;;  %v4363_v12 = vld [vmem:[#allocation28 + $0x3d8] sm:$0xff] }
 0x692   :  { %3756 = vmatmul.mubr.f32.gmra.mrb[86].mxu0 %v8167_v33  ;;  %3901 = vmatmul.mubr.f32.gmra.mrb[78].mxu1 %v8169_v36  ;;  %v4361_v36 = vld [vmem:[#allocation28 + $0x3c8] sm:$0xff]  ;;  %v4364_v11 = vld [vmem:[#allocation28 + $0x3e0] sm:$0xff]  ;;  %v4366_v33 = vld [vmem:[#allocation28 + $0x3f0] sm:$0xff] }
 0x693   :  { %3760 = vmatprep.mubr.f32.mxu0 %v8275_v54  ;;  %3905 = vmatprep.mubr.f32.mxu1 %v8277_v57  ;;  %v6800_v22 = vpack.c.bf16 %v4361_v36, %v4360_v13  ;;  %v4315_v36 = vld [vmem:[#allocation28 + $0x258] sm:$0xff]  ;;  %v4333_v49 = vld [vmem:[#allocation28 + $0x2e8] sm:$0xff] }
 0x694   :  { %6759 = vmatpush3.bf16.msra.mxu0 %v6758_v59  ;;  %6791 = vmatpush3.bf16.msra.mxu1 %v6790_v60  ;;  %v6766_v59 = vpack.c.bf16 %v4311_v63, %v4310_v14  ;;  %v6798_v60 = vpack.c.bf16 %v4343_v24, %v4342_v48  ;;  %v4314_v14 = vld [vmem:[#allocation28 + $0x250] sm:$0xff]  ;;  %v4347_v48 = vld [vmem:[#allocation28 + $0x358] sm:$0xff]  ;;  %v4332_v24 = vld [vmem:[#allocation28 + $0x2e0] sm:$0xff] }
 0x695   :  { %6761 = vmatprep.subr.bf16.mxu0 %v6760_v31  ;;  %6793 = vmatprep.subr.bf16.mxu1 %v6792_v5  ;;  %v4345_v31 = vld [vmem:[#allocation28 + $0x348] sm:$0xff]  ;;  %v4330_v5 = vld [vmem:[#allocation28 + $0x2d0] sm:$0xff]  ;;  %v4367_v27 = vld [vmem:[#allocation28 + $0x3f8] sm:$0xff] }
 0x696   :  { %3761 = vmatmul.mubr.f32.gmra.mrb[88].mxu0 %v8279_v4  ;;  %3906 = vmatmul.mubr.f32.gmra.mrb[80].mxu1 %v8281_v44  ;;  %v6772_v63 = vpack.c.bf16 %v4331_v28, %v4330_v5  ;;  %v4365_v13 = vld [vmem:[#allocation28 + $0x3e8] sm:$0xff]  ;;  %v4334_v5 = vld [vmem:[#allocation28 + $0x2f0] sm:$0xff]  ;;  %v4335_v28 = vld [vmem:[#allocation28 + $0x2f8] sm:$0xff] }
 0x697   :  { %3765 = vmatprep.mubr.f32.mxu0 %v8285_v7  ;;  %3910 = vmatprep.mubr.f32.mxu1 %v8288_v55 }
 0x698   :  { %6763 = vmatpush3.bf16.msra.mxu0 %v6762_v32  ;;  %6795 = vmatpush3.bf16.msra.mxu1 %v6794_v17  ;;  %v6770_v32 = vpack.c.bf16 %v4313_v26, %v4312_v0  ;;  %v6802_v17 = vpack.c.bf16 %v4345_v31, %v4344_v1  ;;  %v4316_v0 = vld [vmem:[#allocation28 + $0x260] sm:$0xff]  ;;  %v4317_v26 = vld [vmem:[#allocation28 + $0x268] sm:$0xff]  ;;  %v6808_v1 = vpack.c.bf16 %v4365_v13, %v4364_v11  ;;  %v4319_v11 = vld [vmem:[#allocation28 + $0x278] sm:$0xff] }
 0x699   :  { %6765 = vmatprep.subr.bf16.mxu0 %v6764_v29  ;;  %6797 = vmatprep.subr.bf16.mxu1 %v6796_v52  ;;  %v6804_v29 = vpack.c.bf16 %v4363_v12, %v4362_v16  ;;  %v4346_v52 = vld [vmem:[#allocation28 + $0x350] sm:$0xff]  ;;  %v4349_v31 = vld [vmem:[#allocation28 + $0x368] sm:$0xff]  ;;  %v9033_v12 = vld [vmem:[#allocation57_spill] sm:$0xff] }
 0x69a   :  { %3766 = vmatmul.mubr.f32.gmra.mrb[90].mxu0 %v8299_v45  ;;  %3911 = vmatmul.mubr.f32.gmra.mrb[82].mxu1 %v8302_v56  ;;  %v9032_v16 = vld [vmem:[#allocation56_spill] sm:$0xff] }
 0x69b   :  { %3770 = vmatprep.mubr.f32.mxu0 %v8306_v19  ;;  %3915 = vmatprep.mubr.f32.mxu1 %v8308_v47 }
 0x69c   :  { %6767 = vmatpush3.bf16.msra.mxu0 %v6766_v59  ;;  %6799 = vmatpush3.bf16.msra.mxu1 %v6798_v60  ;;  %v6774_v59 = vpack.c.bf16 %v4315_v36, %v4314_v14  ;;  %v6806_v60 = vpack.c.bf16 %v4347_v48, %v4346_v52 }
 0x69d   :  { %6769 = vmatprep.subr.bf16.mxu0 %v6768_v62  ;;  %6801 = vmatprep.subr.bf16.mxu1 %v6800_v22  ;;  %v4348_v62 = vld [vmem:[#allocation28 + $0x360] sm:$0xff]  ;;  %v6776_v22 = vpack.c.bf16 %v4333_v49, %v4332_v24  ;;  %v6780_v24 = vpack.c.bf16 %v4335_v28, %v4334_v5  ;;  %v4318_v49 = vld [vmem:[#allocation28 + $0x270] sm:$0xff] }
 0x69e   :  { %3771 = vmatmul.mubr.f32.gmra.mrb[92].mxu0 %v8315_v43  ;;  %3916 = vmatmul.mubr.f32.gmra.mrb[84].mxu1 %v8317_v9  ;;  %v6810_v48 = vpack.c.bf16 %v4349_v31, %v4348_v62  ;;  %v9037_v9 = vld [vmem:[#allocation61_spill] sm:$0xff]  ;;  %v4257_v43 = vld [vmem:[#allocation28 + $0x88] sm:$0xff]  ;;  %v9041_v31 = vld [vmem:[#allocation64_spill] sm:$0xff] }
 0x69f   :  { %3775 = vmatprep.mubr.f32.mxu0 %v8321_v10  ;;  %3920 = vmatprep.mubr.f32.mxu1 %v8324_v46  ;;  %v4350_v46 = vld [vmem:[#allocation28 + $0x370] sm:$0xff]  ;;  %v4256_v10 = vld [vmem:[#allocation28 + $0x80] sm:$0xff] }
 0x6a0   :  { %6771 = vmatpush3.bf16.msra.mxu0 %v6770_v32  ;;  %6803 = vmatpush3.bf16.msra.mxu1 %v6802_v17  ;;  %v9034_v32 = vld [vmem:[#allocation58_spill] sm:$0xff]  ;;  %v9035_v17 = vld [vmem:[#allocation59_spill] sm:$0xff]  ;;  %v9042_v5 = vld [vmem:[#allocation65_spill] sm:$0xff] }
 0x6a1   :  { %6773 = vmatprep.subr.bf16.mxu0 %v6772_v63  ;;  %6805 = vmatprep.subr.bf16.mxu1 %v6804_v29  ;;  %v6778_v29 = vpack.c.bf16 %v4317_v26, %v4316_v0  ;;  %v9039_v26 = vld [vmem:[#allocation62_spill] sm:$0xff]  ;;  %v9040_v62 = vld [vmem:[#allocation63_spill] sm:$0xff] }
 0x6a2   :  { %3776 = vmatmul.mubr.f32.gmra.mrb[94].mxu0 %v9032_v16  ;;  %3921 = vmatmul.mubr.f32.gmra.mrb[86].mxu1 %v9033_v12  ;;  %v6812_v12 = vpack.c.bf16 %v4367_v27, %v4366_v33  ;;  %v6816_v33 = vpack.c.bf16 %v4257_v43, %v4256_v10  ;;  %v9043_v28 = vld [vmem:[#allocation66_spill] sm:$0xff]  ;;  %v9044_v43 = vld [vmem:[#allocation67_spill] sm:$0xff]  ;;  %v9045_v10 = vld [vmem:[#allocation68_spill] sm:$0xff] }
 0x6a3   :  { %3780 = vmatprep.mubr.f32.mxu0 %v9034_v32  ;;  %3925 = vmatprep.mubr.f32.mxu1 %v9035_v17  ;;  %v5178_v14 = vpop.f32.mrb[52].mxu0  ;;  %v5258_v36 = vpop.f32.mrb[44].mxu1  ;;  %v4351_v32 = vld [vmem:[#allocation28 + $0x378] sm:$0xff] }
 0x6a4   :  { %v5179_v52 = vpop.f32.mrb[53].mxu0  ;;  %v5259_v63 = vpop.f32.mrb[45].mxu1  ;;  %6775 = vmatpush3.bf16.msra.mxu0 %v6774_v59  ;;  %6807 = vmatpush3.bf16.msra.mxu1 %v6806_v60  ;;  %v9036_v17 = vld [vmem:[#allocation60_spill] sm:$0xff]  ;;  %v4288_v59 = vld [vmem:[#allocation28 + $0x180] sm:$0xff]  ;;  %v4289_v60 = vld [vmem:[#allocation28 + $0x188] sm:$0xff]  ;;  %v6814_v27 = vpack.c.bf16 %v4351_v32, %v4350_v46 }
 0x6a5   :  { %v5180_v13 = vadd.f32 %v5179_v52, %v5178_v14  ;;  %v5260_v16 = vadd.f32 %v5259_v63, %v5258_v36  ;;  %6777 = vmatprep.subr.bf16.mxu0 %v6776_v22  ;;  %6809 = vmatprep.subr.bf16.mxu1 %v6808_v1  ;;  %v6782_v22 = vpack.c.bf16 %v4319_v11, %v4318_v49  ;;  %v9046_v46 = vld [vmem:[#allocation69_spill] sm:$0xff]  ;;  %v4241_v14 = vld [vmem:[#allocation28 + $0x8] sm:$0xff]  ;;  %v4258_v63 = vld [vmem:[#allocation28 + $0x90] sm:$0xff] }
 0x6a6   :  { %3781 = vmatmul.mubr.f32.gmra.mrb[96].mxu0 %v9036_v17  ;;  %3926 = vmatmul.mubr.f32.gmra.mrb[88].mxu1 %v9037_v9  ;;  %v6848_v1 = vpack.c.bf16 %v4289_v60, %v4288_v59  ;;  %v4240_v32 = vld [vmem:[#allocation28] sm:$0xff]  ;;  %v4273_v52 = vld [vmem:[#allocation28 + $0x108] sm:$0xff]  ;;  %v4290_v49 = vld [vmem:[#allocation28 + $0x190] sm:$0xff] }
 0x6a7   :  { %v8563_v0 = vadd.f32 %v5260_v16, %v5180_v13  ;;  %3785 = vmatprep.mubr.f32.mxu0 %v9039_v26  ;;  %3930 = vmatprep.mubr.f32.mxu1 %v9040_v62  ;;  %v9047_v16 = vld [vmem:[#allocation70_spill] sm:$0xff]  ;;  %v4291_v11 = vld [vmem:[#allocation28 + $0x198] sm:$0xff]  ;;  %v6818_v13 = vpack.c.bf16 %v4241_v14, %v4240_v32  ;;  %v4242_v60 = vld [vmem:[#allocation28 + $0x10] sm:$0xff] }
 0x6a8   :  { %6779 = vmatpush3.bf16.msra.mxu0 %v6778_v29  ;;  %6811 = vmatpush3.bf16.msra.mxu1 %v6810_v48  ;;  %v4272_v36 = vld [vmem:[#allocation28 + $0x100] sm:$0xff]  ;;  %v9049_v29 = vld [vmem:[#allocation72_spill] sm:$0xff] }
 0x6a9   :  { %9038 = vst [vmem:[#allocation60_spill] sm:$0xff] %v8563_v0  ;;  %6781 = vmatprep.subr.bf16.mxu0 %v6780_v24  ;;  %6813 = vmatprep.subr.bf16.mxu1 %v6812_v12  ;;  %v9048_v12 = vld [vmem:[#allocation71_spill] sm:$0xff]  ;;  %v9050_v48 = vld [vmem:[#allocation73_spill] sm:$0xff]  ;;  %v6850_v59 = vpack.c.bf16 %v4273_v52, %v4272_v36 }
 0x6aa   :  { %3786 = vmatmul.mubr.f32.gmra.mrb[98].mxu0 %v9041_v31  ;;  %3931 = vmatmul.mubr.f32.gmra.mrb[90].mxu1 %v9042_v5  ;;  %v4259_v24 = vld [vmem:[#allocation28 + $0x98] sm:$0xff]  ;;  %v4244_v36 = vld [vmem:[#allocation28 + $0x20] sm:$0xff]  ;;  %v4245_v52 = vld [vmem:[#allocation28 + $0x28] sm:$0xff] }
 0x6ab   :  { %3790 = vmatprep.mubr.f32.mxu0 %v9043_v28  ;;  %3935 = vmatprep.mubr.f32.mxu1 %v8388_v20  ;;  %v4275_v0 = vld [vmem:[#allocation28 + $0x118] sm:$0xff] }
 0x6ac   :  { %6783 = vmatpush3.bf16.msra.mxu0 %v6782_v22  ;;  %6815 = vmatpush3.bf16.msra.mxu1 %v6814_v27  ;;  %v4243_v22 = vld [vmem:[#allocation28 + $0x18] sm:$0xff]  ;;  %v6820_v27 = vpack.c.bf16 %v4259_v24, %v4258_v63 }
 0x6ad   :  { %6817 = vmatprep.subr.bf16.mxu0 %v6816_v33  ;;  %6849 = vmatprep.subr.bf16.mxu1 %v6848_v1  ;;  %v6852_v33 = vpack.c.bf16 %v4291_v11, %v4290_v49  ;;  %v4274_v1 = vld [vmem:[#allocation28 + $0x110] sm:$0xff]  ;;  %v6822_v32 = vpack.c.bf16 %v4243_v22, %v4242_v60  ;;  %v4276_v49 = vld [vmem:[#allocation28 + $0x120] sm:$0xff]  ;;  %v4277_v11 = vld [vmem:[#allocation28 + $0x128] sm:$0xff] }
 0x6ae   :  { %3791 = vmatmul.mubr.f32.gmra.mrb[100].mxu0 %v8397_v40  ;;  %3936 = vmatmul.mubr.f32.gmra.mrb[92].mxu1 %v8399_v23  ;;  %v6854_v14 = vpack.c.bf16 %v4275_v0, %v4274_v1  ;;  %v6826_v0 = vpack.c.bf16 %v4245_v52, %v4244_v36  ;;  %v4278_v60 = vld [vmem:[#allocation28 + $0x130] sm:$0xff]  ;;  %v4279_v22 = vld [vmem:[#allocation28 + $0x138] sm:$0xff] }
 0x6af   :  { %3795 = vmatprep.mubr.f32.mxu0 %v8405_v38  ;;  %3940 = vmatprep.mubr.f32.mxu1 %v8408_v15  ;;  %v9052_v1 = vld [vmem:[#allocation53_spill] sm:$0xff]  ;;  %v6862_v52 = vpack.c.bf16 %v4279_v22, %v4278_v60 }
 0x6b0   :  { %v4283_v60 = vld [vmem:[#allocation28 + $0x158] sm:$0xff]  ;;  %v4268_v22 = vld [vmem:[#allocation28 + $0xe0] sm:$0xff] }
 0x6b2   :  { %3796 = vmatmul.mubr.f32.gmra.mrb[102].mxu0 %v8417_v61  ;;  %3941 = vmatmul.mubr.f32.gmra.mrb[94].mxu1 %v8420_v30 }
 0x6b3   :  { %3800 = vmatprep.mubr.f32.mxu0 %v8424_v35  ;;  %3945 = vmatprep.mubr.f32.mxu1 %v8426_v6 }
 0x6b6   :  { %3801 = vmatmul.mubr.f32.gmra.mrb[104].mxu0 %v8432_v39  ;;  %3946 = vmatmul.mubr.f32.gmra.mrb[96].mxu1 %v8435_v37 }
 0x6b7   :  { %3805 = vmatprep.mubr.f32.mxu0 %v8438_v53  ;;  %3950 = vmatprep.mubr.f32.mxu1 %v8441_v34 }
 0x6ba   :  { %3806 = vmatmul.mubr.f32.gmra.mrb[106].mxu0 %v8449_v25  ;;  %3951 = vmatmul.mubr.f32.gmra.mrb[98].mxu1 %v8452_v41 }
 0x6bb   :  { %3810 = vmatprep.mubr.f32.mxu0 %v8456_v21  ;;  %3955 = vmatprep.mubr.f32.mxu1 %v8458_v18 }
 0x6be   :  { %3811 = vmatmul.mubr.f32.gmra.mrb[108].mxu0 %v8464_v50  ;;  %3956 = vmatmul.mubr.f32.gmra.mrb[100].mxu1 %v8467_v51 }
 0x6bf   :  { %3815 = vmatprep.mubr.f32.mxu0 %v8470_v8  ;;  %3960 = vmatprep.mubr.f32.mxu1 %v8473_v2 }
 0x6c2   :  { %3816 = vmatmul.mubr.f32.gmra.mrb[110].mxu0 %v8481_v42  ;;  %3961 = vmatmul.mubr.f32.gmra.mrb[102].mxu1 %v8484_v58 }
 0x6c3   :  { %3820 = vmatprep.mubr.f32.mxu0 %v8488_v3  ;;  %3965 = vmatprep.mubr.f32.mxu1 %v9044_v43 }
 0x6c6   :  { %3821 = vmatmul.mubr.f32.gmra.mrb[112].mxu0 %v9045_v10  ;;  %3966 = vmatmul.mubr.f32.gmra.mrb[104].mxu1 %v9046_v46 }
 0x6c7   :  { %3825 = vmatprep.mubr.f32.mxu0 %v9047_v16  ;;  %3970 = vmatprep.mubr.f32.mxu1 %v9048_v12  ;;  %v4260_v12 = vld [vmem:[#allocation28 + $0xa0] sm:$0xff]  ;;  %v4293_v16 = vld [vmem:[#allocation28 + $0x1a8] sm:$0xff] }
 0x6ca   :  { %3826 = vmatmul.mubr.f32.gmra.mrb[114].mxu0 %v9049_v29  ;;  %3971 = vmatmul.mubr.f32.gmra.mrb[106].mxu1 %v9050_v48  ;;  %v4261_v48 = vld [vmem:[#allocation28 + $0xa8] sm:$0xff]  ;;  %v4292_v29 = vld [vmem:[#allocation28 + $0x1a0] sm:$0xff] }
 0x6cb   :  { %4432 = vmatprep.mubr.f32.mxu0 %v8275_v54  ;;  %4577 = vmatprep.mubr.f32.mxu1 %v8277_v57  ;;  %v6824_v63 = vpack.c.bf16 %v4261_v48, %v4260_v12  ;;  %v6856_v24 = vpack.c.bf16 %v4293_v16, %v4292_v29  ;;  %v4246_v12 = vld [vmem:[#allocation28 + $0x30] sm:$0xff]  ;;  %v4247_v16 = vld [vmem:[#allocation28 + $0x38] sm:$0xff] }
 0x6cc   :  { %v6830_v36 = vpack.c.bf16 %v4247_v16, %v4246_v12 }
 0x6ce   :  { %4433 = vmatmul.mubr.f32.vlgmr.msra.gmra.mrb[116].mxu0 %v8279_v4  ;;  %4578 = vmatmul.mubr.f32.vlgmr.msra.gmra.mrb[108].mxu1 %v8281_v44  ;;  %v4262_v44 = vld [vmem:[#allocation28 + $0xb0] sm:$0xff]  ;;  %v4295_v4 = vld [vmem:[#allocation28 + $0x1b8] sm:$0xff] }
 0x6cf   :  { %6819 = vmatpush3.bf16.msra.mxu0 %v6818_v13  ;;  %4437 = vmatprep.mubr.f32.mxu0 %v8285_v7  ;;  %v4263_v13 = vld [vmem:[#allocation28 + $0xb8] sm:$0xff]  ;;  %v4294_v7 = vld [vmem:[#allocation28 + $0x1b0] sm:$0xff] }
 0x6d0   :  { %4582 = vmatprep.mubr.f32.mxu1 %v8288_v55  ;;  %6851 = vmatpush3.bf16.msra.mxu1 %v6850_v59  ;;  %v6858_v59 = vpack.c.bf16 %v4277_v11, %v4276_v49  ;;  %v6828_v29 = vpack.c.bf16 %v4263_v13, %v4262_v44  ;;  %v6860_v48 = vpack.c.bf16 %v4295_v4, %v4294_v7  ;;  %v4248_v44 = vld [vmem:[#allocation28 + $0x40] sm:$0xff]  ;;  %v4249_v4 = vld [vmem:[#allocation28 + $0x48] sm:$0xff]  ;;  %v4266_v11 = vld [vmem:[#allocation28 + $0xd0] sm:$0xff] }
 0x6d1   :  { %6821 = vmatprep.subr.bf16.mxu0 %v6820_v27  ;;  %6853 = vmatprep.subr.bf16.mxu1 %v6852_v33  ;;  %v4264_v27 = vld [vmem:[#allocation28 + $0xc0] sm:$0xff]  ;;  %v9051_v33 = vld [vmem:[#allocation52_spill] sm:$0xff]  ;;  %v4281_v49 = vld [vmem:[#allocation28 + $0x148] sm:$0xff]  ;;  %v6834_v12 = vpack.c.bf16 %v4249_v4, %v4248_v44 }
 0x6d2   :  { %4438 = vmatmul.mubr.f32.gmra.mrb[118].mxu0 %v8299_v45  ;;  %4583 = vmatmul.mubr.f32.gmra.mrb[110].mxu1 %v8302_v56  ;;  %v4296_v56 = vld [vmem:[#allocation28 + $0x1c0] sm:$0xff]  ;;  %v9055_v13 = vld [vmem:[#allocation56_spill] sm:$0xff] }
 0x6d3   :  { %4442 = vmatprep.mubr.f32.mxu0 %v8306_v19  ;;  %4587 = vmatprep.mubr.f32.mxu1 %v8308_v47  ;;  %v4265_v19 = vld [vmem:[#allocation28 + $0xc8] sm:$0xff]  ;;  %v4284_v4 = vld [vmem:[#allocation28 + $0x160] sm:$0xff] }
 0x6d4   :  { %6823 = vmatpush3.bf16.msra.mxu0 %v6822_v32  ;;  %6855 = vmatpush3.bf16.msra.mxu1 %v6854_v14  ;;  %v4297_v47 = vld [vmem:[#allocation28 + $0x1c8] sm:$0xff]  ;;  %v6832_v7 = vpack.c.bf16 %v4265_v19, %v4264_v27  ;;  %v4250_v19 = vld [vmem:[#allocation28 + $0x50] sm:$0xff] }
 0x6d5   :  { %6825 = vmatprep.subr.bf16.mxu0 %v6824_v63  ;;  %6857 = vmatprep.subr.bf16.mxu1 %v6856_v24  ;;  %v9053_v32 = vld [vmem:[#allocation54_spill] sm:$0xff]  ;;  %v9054_v14 = vld [vmem:[#allocation55_spill] sm:$0xff]  ;;  %v6864_v63 = vpack.c.bf16 %v4297_v47, %v4296_v56  ;;  %v4251_v56 = vld [vmem:[#allocation28 + $0x58] sm:$0xff] }
 0x6d6   :  { %4443 = vmatmul.mubr.f32.gmra.mrb[120].mxu0 %v9051_v33  ;;  %4588 = vmatmul.mubr.f32.gmra.mrb[112].mxu1 %v9052_v1  ;;  %v4280_v24 = vld [vmem:[#allocation28 + $0x140] sm:$0xff]  ;;  %v4298_v33 = vld [vmem:[#allocation28 + $0x1d0] sm:$0xff]  ;;  %v4269_v27 = vld [vmem:[#allocation28 + $0xe8] sm:$0xff] }
 0x6d7   :  { %4447 = vmatprep.mubr.f32.mxu0 %v9053_v32  ;;  %4592 = vmatprep.mubr.f32.mxu1 %v9054_v14  ;;  %v9056_v1 = vld [vmem:[#allocation57_spill] sm:$0xff]  ;;  %v6866_v16 = vpack.c.bf16 %v4281_v49, %v4280_v24  ;;  %v4302_v49 = vld [vmem:[#allocation28 + $0x1f0] sm:$0xff] }
 0x6d8   :  { %6827 = vmatpush3.bf16.msra.mxu0 %v6826_v0  ;;  %6859 = vmatpush3.bf16.msra.mxu1 %v6858_v59  ;;  %v4267_v32 = vld [vmem:[#allocation28 + $0xd8] sm:$0xff]  ;;  %v9057_v0 = vld [vmem:[#allocation58_spill] sm:$0xff]  ;;  %v9058_v59 = vld [vmem:[#allocation59_spill] sm:$0xff] }
 0x6d9   :  { %6829 = vmatprep.subr.bf16.mxu0 %v6828_v29  ;;  %6861 = vmatprep.subr.bf16.mxu1 %v6860_v48  ;;  %v4299_v14 = vld [vmem:[#allocation28 + $0x1d8] sm:$0xff]  ;;  %v6836_v47 = vpack.c.bf16 %v4267_v32, %v4266_v11  ;;  %v4282_v48 = vld [vmem:[#allocation28 + $0x150] sm:$0xff]  ;;  %v4252_v32 = vld [vmem:[#allocation28 + $0x60] sm:$0xff] }
 0x6da   :  { %4448 = vmatmul.mubr.f32.gmra.mrb[122].mxu0 %v9055_v13  ;;  %4593 = vmatmul.mubr.f32.gmra.mrb[114].mxu1 %v9056_v1  ;;  %v6868_v29 = vpack.c.bf16 %v4299_v14, %v4298_v33  ;;  %v4253_v33 = vld [vmem:[#allocation28 + $0x68] sm:$0xff]  ;;  %v6840_v14 = vpack.c.bf16 %v4269_v27, %v4268_v22  ;;  %v4271_v24 = vld [vmem:[#allocation28 + $0xf8] sm:$0xff] }
 0x6db   :  { %4452 = vmatprep.mubr.f32.mxu0 %v9057_v0  ;;  %4597 = vmatprep.mubr.f32.mxu1 %v9058_v59  ;;  %v4300_v0 = vld [vmem:[#allocation28 + $0x1e0] sm:$0xff]  ;;  %v4301_v59 = vld [vmem:[#allocation28 + $0x1e8] sm:$0xff]  ;;  %v4303_v11 = vld [vmem:[#allocation28 + $0x1f8] sm:$0xff] }
 0x6dc   :  { %6831 = vmatpush3.bf16.msra.mxu0 %v6830_v36  ;;  %6863 = vmatpush3.bf16.msra.mxu1 %v6862_v52  ;;  %v6838_v36 = vpack.c.bf16 %v4251_v56, %v4250_v19  ;;  %v6870_v52 = vpack.c.bf16 %v4283_v60, %v4282_v48  ;;  %v6872_v44 = vpack.c.bf16 %v4301_v59, %v4300_v0  ;;  %v4254_v19 = vld [vmem:[#allocation28 + $0x70] sm:$0xff]  ;;  %v4255_v59 = vld [vmem:[#allocation28 + $0x78] sm:$0xff]  ;;  %v9059_v22 = vld [vmem:[#allocation70_spill] sm:$0xff] }
 0x6dd   :  { %6833 = vmatprep.subr.bf16.mxu0 %v6832_v7  ;;  %6865 = vmatprep.subr.bf16.mxu1 %v6864_v63  ;;  %v4285_v7 = vld [vmem:[#allocation28 + $0x168] sm:$0xff]  ;;  %v4270_v63 = vld [vmem:[#allocation28 + $0xf0] sm:$0xff]  ;;  %v6876_v56 = vpack.c.bf16 %v4303_v11, %v4302_v49  ;;  %v6846_v48 = vpack.c.bf16 %v4255_v59, %v4254_v19  ;;  %v9071_v49 = vld [vmem:[#allocation45_spill] sm:$0xff] }
 0x6de   :  { %4453 = vmatmul.mubr.f32.gmra.mrb[124].mxu0 %v9036_v17  ;;  %4598 = vmatmul.mubr.f32.gmra.mrb[116].mxu1 %v9037_v9  ;;  %v6844_v0 = vpack.c.bf16 %v4271_v24, %v4270_v63  ;;  %v9060_v27 = vld [vmem:[#allocation71_spill] sm:$0xff]  ;;  %v9070_v24 = vld [vmem:[#allocation44_spill] sm:$0xff]  ;;  %v9072_v11 = vld [vmem:[#allocation46_spill] sm:$0xff] }
 0x6df   :  { %4457 = vmatprep.mubr.f32.mxu0 %v9039_v26  ;;  %4602 = vmatprep.mubr.f32.mxu1 %v9040_v62  ;;  %v9069_v63 = vld [vmem:[#allocation43_spill] sm:$0xff]  ;;  %v9075_v19 = vld [vmem:[#allocation49_spill] sm:$0xff] }
 0x6e0   :  { %6835 = vmatpush3.bf16.msra.mxu0 %v6834_v12  ;;  %6867 = vmatpush3.bf16.msra.mxu1 %v6866_v16  ;;  %v6842_v12 = vpack.c.bf16 %v4253_v33, %v4252_v32  ;;  %v6874_v16 = vpack.c.bf16 %v4285_v7, %v4284_v4  ;;  %v9063_v32 = vld [vmem:[#allocation74_spill] sm:$0xff]  ;;  %v9064_v33 = vld [vmem:[#allocation75_spill] sm:$0xff]  ;;  %v9067_v4 = vmov 0.0  }
 0x6e1   :  { %6837 = vmatprep.subr.bf16.mxu0 %v6836_v47  ;;  %6869 = vmatprep.subr.bf16.mxu1 %v6868_v29  ;;  %v4286_v47 = vld [vmem:[#allocation28 + $0x170] sm:$0xff]  ;;  %v4287_v29 = vld [vmem:[#allocation28 + $0x178] sm:$0xff]  ;;  %v9068_v7 = vld [vmem:[#allocation42_spill] sm:$0xff] }
 0x6e2   :  { %4458 = vmatmul.mubr.f32.gmra.mrb[126].mxu0 %v9041_v31  ;;  %4603 = vmatmul.mubr.f32.gmra.mrb[118].mxu1 %v9042_v5  ;;  %v6878_v60 = vpack.c.bf16 %v4287_v29, %v4286_v47  ;;  %v9077_v59 = vld [vmem:[#allocation51_spill] sm:$0xff] }
 0x6e3   :  { %4462 = vmatprep.mubr.f32.mxu0 %v9043_v28  ;;  %4607 = vmatprep.mubr.f32.mxu1 %v8388_v20  ;;  %v9081_v47 = vld [vmem:[#allocation55_spill] sm:$0xff] }
 0x6e4   :  { %6839 = vmatpush3.bf16.msra.mxu0 %v6838_v36  ;;  %6871 = vmatpush3.bf16.msra.mxu1 %v6870_v52  ;;  %v9061_v36 = vld [vmem:[#allocation72_spill] sm:$0xff]  ;;  %v9062_v52 = vld [vmem:[#allocation73_spill] sm:$0xff] }
 0x6e5   :  { %6841 = vmatprep.subr.bf16.mxu0 %v6840_v14  ;;  %6873 = vmatprep.subr.bf16.mxu1 %v6872_v44  ;;  %v9065_v14 = vld [vmem:[#allocation76_spill] sm:$0xff]  ;;  %v9066_v44 = vld [vmem:[#allocation77_spill] sm:$0xff] }
 0x6e6   :  { %4463 = vmatmul.mubr.f32.gmra.mrb[128].mxu0 %v8397_v40  ;;  %4608 = vmatmul.mubr.f32.gmra.mrb[120].mxu1 %v8399_v23 }
 0x6e7   :  { %4467 = vmatprep.mubr.f32.mxu0 %v8405_v38  ;;  %4612 = vmatprep.mubr.f32.mxu1 %v8408_v15 }
 0x6e8   :  { %6843 = vmatpush3.bf16.msra.mxu0 %v6842_v12  ;;  %6875 = vmatpush3.bf16.msra.mxu1 %v6874_v16  ;;  %v9073_v12 = vld [vmem:[#allocation47_spill] sm:$0xff]  ;;  %v9074_v16 = vld [vmem:[#allocation48_spill] sm:$0xff] }
 0x6e9   :  { %6845 = vmatprep.subr.bf16.mxu0 %v6844_v0  ;;  %6877 = vmatprep.subr.bf16.mxu1 %v6876_v56  ;;  %v9076_v0 = vld [vmem:[#allocation50_spill] sm:$0xff]  ;;  %v9078_v56 = vld [vmem:[#allocation52_spill] sm:$0xff] }
 0x6ea   :  { %4468 = vmatmul.mubr.f32.gmra.mrb[130].mxu0 %v8417_v61  ;;  %4613 = vmatmul.mubr.f32.gmra.mrb[122].mxu1 %v8420_v30 }
 0x6eb   :  { %4472 = vmatprep.mubr.f32.mxu0 %v8424_v35  ;;  %4617 = vmatprep.mubr.f32.mxu1 %v8426_v6 }
 0x6ec   :  { %6847 = vmatpush3.bf16.msra.mxu0 %v6846_v48  ;;  %6879 = vmatpush3.bf16.msra.mxu1 %v6878_v60 }
 0x6ee   :  { %4473 = vmatmul.mubr.f32.gmra.mrb[132].mxu0 %v8432_v39  ;;  %4618 = vmatmul.mubr.f32.gmra.mrb[124].mxu1 %v8435_v37 }
 0x6ef   :  { %4477 = vmatprep.mubr.f32.mxu0 %v8438_v53  ;;  %4622 = vmatprep.mubr.f32.mxu1 %v8441_v34 }
 0x6f2   :  { %4478 = vmatmul.mubr.f32.gmra.mrb[134].mxu0 %v8449_v25  ;;  %4623 = vmatmul.mubr.f32.gmra.mrb[126].mxu1 %v8452_v41 }
 0x6f3   :  { %4482 = vmatprep.mubr.f32.mxu0 %v8456_v21  ;;  %4627 = vmatprep.mubr.f32.mxu1 %v8458_v18 }
 0x6f6   :  { %4483 = vmatmul.mubr.f32.gmra.mrb[136].mxu0 %v8464_v50  ;;  %4628 = vmatmul.mubr.f32.gmra.mrb[128].mxu1 %v8467_v51 }
 0x6f7   :  { %4487 = vmatprep.mubr.f32.mxu0 %v8470_v8  ;;  %4632 = vmatprep.mubr.f32.mxu1 %v8473_v2 }
 0x6fa   :  { %4488 = vmatmul.mubr.f32.gmra.mrb[138].mxu0 %v8481_v42  ;;  %4633 = vmatmul.mubr.f32.gmra.mrb[130].mxu1 %v8484_v58 }
 0x6fb   :  { %4492 = vmatprep.mubr.f32.mxu0 %v8488_v3  ;;  %4637 = vmatprep.mubr.f32.mxu1 %v9044_v43 }
 0x6fe   :  { %4493 = vmatmul.mubr.f32.gmra.mrb[140].mxu0 %v9045_v10  ;;  %4638 = vmatmul.mubr.f32.gmra.mrb[132].mxu1 %v9046_v46 }
 0x6ff   :  { %4497 = vmatprep.mubr.f32.mxu0 %v9059_v22  ;;  %4642 = vmatprep.mubr.f32.mxu1 %v9060_v27 }
 0x702   :  { %4498 = vmatmul.mubr.f32.gmra.mrb[142].mxu0 %v9061_v36  ;;  %4643 = vmatmul.mubr.f32.gmra.mrb[134].mxu1 %v9062_v52 }
 0x703   :  { %4502 = vmatprep.mubr.f32.mxu0 %v9063_v32  ;;  %4647 = vmatprep.mubr.f32.mxu1 %v9064_v33 }
 0x706   :  { %4503 = vmatmul.mubr.f32.gmra.mrb[144].mxu0 %v9065_v14  ;;  %4648 = vmatmul.mubr.f32.gmra.mrb[136].mxu1 %v9066_v44 }
 0x707   :  { %4507 = vmatprep.mubr.f32.mxu0 %v9067_v4  ;;  %4652 = vmatprep.mubr.f32.mxu1 %v9067_v4 }
 0x70a   :  { %4508 = vmatmul.mubr.f32.gmra.mrb[146].mxu0 %v9067_v4  ;;  %4653 = vmatmul.mubr.f32.gmra.mrb[138].mxu1 %v9067_v4 }
 0x70b   :  { %4722 = vmatprep.mubr.f32.mxu0 %v9068_v7  ;;  %4867 = vmatprep.mubr.f32.mxu1 %v9069_v63 }
 0x70e   :  { %4723 = vmatmul.mubr.f32.vlgmr.msra.gmra.mrb[148].mxu0 %v9070_v24  ;;  %4868 = vmatmul.mubr.f32.vlgmr.msra.gmra.mrb[140].mxu1 %v9071_v49 }
 0x70f   :  { %4727 = vmatprep.mubr.f32.mxu0 %v8275_v54  ;;  %4872 = vmatprep.mubr.f32.mxu1 %v8277_v57  ;;  %v9079_v54 = vld [vmem:[#allocation53_spill] sm:$0xff]  ;;  %v9080_v57 = vld [vmem:[#allocation54_spill] sm:$0xff] }
 0x712   :  { %4728 = vmatmul.mubr.f32.gmra.mrb[150].mxu0 %v9072_v11  ;;  %4873 = vmatmul.mubr.f32.gmra.mrb[142].mxu1 %v9073_v12 }
 0x713   :  { %4732 = vmatprep.mubr.f32.mxu0 %v9074_v16  ;;  %4877 = vmatprep.mubr.f32.mxu1 %v8288_v55  ;;  %v9082_v55 = vld [vmem:[#allocation58_spill] sm:$0xff] }
 0x716   :  { %4733 = vmatmul.mubr.f32.gmra.mrb[152].mxu0 %v8299_v45  ;;  %4878 = vmatmul.mubr.f32.gmra.mrb[144].mxu1 %v9075_v19  ;;  %v9083_v45 = vld [vmem:[#allocation59_spill] sm:$0xff] }
 0x717   :  { %4737 = vmatprep.mubr.f32.mxu0 %v9076_v0  ;;  %4882 = vmatprep.mubr.f32.mxu1 %v9077_v59 }
 0x71a   :  { %4738 = vmatmul.mubr.f32.gmra.mrb[154].mxu0 %v9078_v56  ;;  %4883 = vmatmul.mubr.f32.gmra.mrb[146].mxu1 %v9079_v54 }
 0x71b   :  { %4742 = vmatprep.mubr.f32.mxu0 %v9080_v57  ;;  %4887 = vmatprep.mubr.f32.mxu1 %v9081_v47 }
 0x71e   :  { %4743 = vmatmul.mubr.f32.gmra.mrb[156].mxu0 %v9055_v13  ;;  %4888 = vmatmul.mubr.f32.gmra.mrb[148].mxu1 %v9056_v1 }
 0x71f   :  { %4747 = vmatprep.mubr.f32.mxu0 %v9082_v55  ;;  %4892 = vmatprep.mubr.f32.mxu1 %v9083_v45 }
 0x722   :  { %4748 = vmatmul.mubr.f32.gmra.mrb[158].mxu0 %v9036_v17  ;;  %4893 = vmatmul.mubr.f32.gmra.mrb[150].mxu1 %v9037_v9 }
 0x723   :  { %4752 = vmatprep.mubr.f32.mxu0 %v9039_v26  ;;  %4897 = vmatprep.mubr.f32.mxu1 %v9040_v62 }
 0x725   :  { %v5181_v29 = vpop.f32.mrb[54].mxu0  ;;  %v5261_v48 = vpop.f32.mrb[46].mxu1 }
 0x726   :  { %v5182_v60 = vpop.f32.mrb[55].mxu0  ;;  %v5262_v4 = vpop.f32.mrb[47].mxu1  ;;  %4753 = vmatmul.mubr.f32.gmra.mrb[160].mxu0 %v9041_v31  ;;  %4898 = vmatmul.mubr.f32.gmra.mrb[152].mxu1 %v9042_v5 }
 0x727   :  { %v5183_v1 = vadd.f32 %v5182_v60, %v5181_v29  ;;  %v5263_v13 = vadd.f32 %v5262_v4, %v5261_v48  ;;  %4757 = vmatprep.mubr.f32.mxu0 %v9043_v28  ;;  %4902 = vmatprep.mubr.f32.mxu1 %v8388_v20 }
 0x729   :  { %v8695_v17 = vadd.f32 %v5263_v13, %v5183_v1  ;;  %v5184_v9 = vpop.f32.mrb[56].mxu0  ;;  %v5264_v26 = vpop.f32.mrb[48].mxu1 }
 0x72a   :  { %v5185_v7 = vpop.f32.mrb[57].mxu0  ;;  %v5265_v62 = vpop.f32.mrb[49].mxu1  ;;  %4758 = vmatmul.mubr.f32.gmra.mrb[162].mxu0 %v8397_v40  ;;  %4903 = vmatmul.mubr.f32.gmra.mrb[154].mxu1 %v8399_v23 }
 0x72b   :  { %v5186_v63 = vadd.f32 %v5185_v7, %v5184_v9  ;;  %v5266_v31 = vadd.f32 %v5265_v62, %v5264_v26  ;;  %4762 = vmatprep.mubr.f32.mxu0 %v8405_v38  ;;  %4907 = vmatprep.mubr.f32.mxu1 %v8408_v15 }
 0x72d   :  { %v8701_v5 = vadd.f32 %v5266_v31, %v5186_v63  ;;  %v5187_v28 = vpop.f32.mrb[58].mxu0  ;;  %v5267_v20 = vpop.f32.mrb[50].mxu1 }
 0x72e   :  { %v5188_v24 = vpop.f32.mrb[59].mxu0  ;;  %v5268_v49 = vpop.f32.mrb[51].mxu1  ;;  %4763 = vmatmul.mubr.f32.gmra.mrb[164].mxu0 %v8417_v61  ;;  %4908 = vmatmul.mubr.f32.gmra.mrb[156].mxu1 %v8420_v30 }
 0x72f   :  { %v5189_v11 = vadd.f32 %v5188_v24, %v5187_v28  ;;  %v5269_v40 = vadd.f32 %v5268_v49, %v5267_v20  ;;  %4767 = vmatprep.mubr.f32.mxu0 %v8424_v35  ;;  %4912 = vmatprep.mubr.f32.mxu1 %v8426_v6 }
 0x731   :  { %v8707_v23 = vadd.f32 %v5269_v40, %v5189_v11  ;;  %v5190_v38 = vpop.f32.mrb[60].mxu0  ;;  %v5270_v15 = vpop.f32.mrb[52].mxu1 }
 0x732   :  { %v5191_v12 = vpop.f32.mrb[61].mxu0  ;;  %v5271_v16 = vpop.f32.mrb[53].mxu1  ;;  %4768 = vmatmul.mubr.f32.gmra.mrb[166].mxu0 %v8432_v39  ;;  %4913 = vmatmul.mubr.f32.gmra.mrb[158].mxu1 %v8435_v37 }
 0x733   :  { %v5192_v19 = vadd.f32 %v5191_v12, %v5190_v38  ;;  %v5272_v61 = vadd.f32 %v5271_v16, %v5270_v15  ;;  %4772 = vmatprep.mubr.f32.mxu0 %v8438_v53  ;;  %4917 = vmatprep.mubr.f32.mxu1 %v8441_v34 }
 0x735   :  { %v8713_v30 = vadd.f32 %v5272_v61, %v5192_v19  ;;  %v5193_v35 = vpop.f32.mrb[62].mxu0  ;;  %v5273_v6 = vpop.f32.mrb[54].mxu1 }
 0x736   :  { %v5194_v0 = vpop.f32.mrb[63].mxu0  ;;  %v5274_v59 = vpop.f32.mrb[55].mxu1  ;;  %4773 = vmatmul.mubr.f32.gmra.mrb[168].mxu0 %v8449_v25  ;;  %4918 = vmatmul.mubr.f32.gmra.mrb[160].mxu1 %v8452_v41 }
 0x737   :  { %v5195_v56 = vadd.f32 %v5194_v0, %v5193_v35  ;;  %v5275_v39 = vadd.f32 %v5274_v59, %v5273_v6  ;;  %4777 = vmatprep.mubr.f32.mxu0 %v8456_v21  ;;  %4922 = vmatprep.mubr.f32.mxu1 %v8458_v18 }
 0x739   :  { %v8719_v37 = vadd.f32 %v5275_v39, %v5195_v56  ;;  %v5196_v53 = vpop.f32.mrb[64].mxu0  ;;  %v5276_v34 = vpop.f32.mrb[56].mxu1 }
 0x73a   :  { %v5197_v54 = vpop.f32.mrb[65].mxu0  ;;  %v5277_v57 = vpop.f32.mrb[57].mxu1  ;;  %4778 = vmatmul.mubr.f32.gmra.mrb[170].mxu0 %v8464_v50  ;;  %4923 = vmatmul.mubr.f32.gmra.mrb[162].mxu1 %v8467_v51 }
 0x73b   :  { %v5198_v47 = vadd.f32 %v5197_v54, %v5196_v53  ;;  %v5278_v25 = vadd.f32 %v5277_v57, %v5276_v34  ;;  %4782 = vmatprep.mubr.f32.mxu0 %v8470_v8  ;;  %4927 = vmatprep.mubr.f32.mxu1 %v8473_v2 }
 0x73d   :  { %v8725_v41 = vadd.f32 %v5278_v25, %v5198_v47  ;;  %v5199_v21 = vpop.f32.mrb[66].mxu0  ;;  %v5279_v18 = vpop.f32.mrb[58].mxu1 }
 0x73e   :  { %v5200_v55 = vpop.f32.mrb[67].mxu0  ;;  %v5280_v45 = vpop.f32.mrb[59].mxu1  ;;  %4783 = vmatmul.mubr.f32.gmra.mrb[172].mxu0 %v8481_v42  ;;  %4928 = vmatmul.mubr.f32.gmra.mrb[164].mxu1 %v8484_v58 }
 0x73f   :  { %v5201_v29 = vadd.f32 %v5200_v55, %v5199_v21  ;;  %v5281_v50 = vadd.f32 %v5280_v45, %v5279_v18  ;;  %4787 = vmatprep.mubr.f32.mxu0 %v8488_v3  ;;  %4932 = vmatprep.mubr.f32.mxu1 %v9044_v43 }
 0x741   :  { %v8731_v51 = vadd.f32 %v5281_v50, %v5201_v29  ;;  %v5202_v8 = vpop.f32.mrb[68].mxu0  ;;  %v5282_v2 = vpop.f32.mrb[60].mxu1 }
 0x742   :  { %v5203_v48 = vpop.f32.mrb[69].mxu0  ;;  %v5283_v60 = vpop.f32.mrb[61].mxu1  ;;  %4788 = vmatmul.mubr.f32.gmra.mrb[174].mxu0 %v9045_v10  ;;  %4933 = vmatmul.mubr.f32.gmra.mrb[166].mxu1 %v9046_v46 }
 0x743   :  { %v5204_v4 = vadd.f32 %v5203_v48, %v5202_v8  ;;  %v5284_v42 = vadd.f32 %v5283_v60, %v5282_v2  ;;  %4792 = vmatprep.mubr.f32.mxu0 %v9059_v22  ;;  %4937 = vmatprep.mubr.f32.mxu1 %v9060_v27 }
 0x745   :  { %v8737_v58 = vadd.f32 %v5284_v42, %v5204_v4  ;;  %v5205_v3 = vpop.f32.mrb[70].mxu0  ;;  %v5285_v43 = vpop.f32.mrb[62].mxu1  ;;  %v9084_v42 = vld [vmem:[#allocation60_spill] sm:$0xff] }
 0x746   :  { %v5206_v1 = vpop.f32.mrb[71].mxu0  ;;  %v5286_v13 = vpop.f32.mrb[63].mxu1  ;;  %4793 = vmatmul.mubr.f32.gmra.mrb[176].mxu0 %v9061_v36  ;;  %4938 = vmatmul.mubr.f32.gmra.mrb[168].mxu1 %v9062_v52 }
 0x747   :  { %v5207_v9 = vadd.f32 %v5206_v1, %v5205_v3  ;;  %v5287_v10 = vadd.f32 %v5286_v13, %v5285_v43  ;;  %4797 = vmatprep.mubr.f32.mxu0 %v9063_v32  ;;  %4942 = vmatprep.mubr.f32.mxu1 %v9064_v33  ;;  %v8760_v13 = vld [vmem:[#allocation29] ss:$0 sm:$0xff] }
 0x749   :  { %v8743_v46 = vadd.f32 %v5287_v10, %v5207_v9  ;;  %v5208_v22 = vpop.f32.mrb[72].mxu0  ;;  %v5288_v27 = vpop.f32.mrb[64].mxu1 }
 0x74a   :  { %v5209_v26 = vpop.f32.mrb[73].mxu0  ;;  %v5289_v7 = vpop.f32.mrb[65].mxu1  ;;  %4798 = vmatmul.mubr.f32.gmra.mrb[178].mxu0 %v9065_v14  ;;  %4943 = vmatmul.mubr.f32.gmra.mrb[170].mxu1 %v9066_v44 }
 0x74b   :  { %v5210_v62 = vadd.f32 %v5209_v26, %v5208_v22  ;;  %v5290_v36 = vadd.f32 %v5289_v7, %v5288_v27 }
 0x74d   :  { %v8747_v63 = vadd.f32 %v5290_v36, %v5210_v62  ;;  %v5211_v52 = vpop.f32.mrb[74].mxu0  ;;  %v5291_v31 = vpop.f32.mrb[66].mxu1 }
 0x74e   :  { %v5212_v28 = vpop.f32.mrb[75].mxu0  ;;  %v5292_v32 = vpop.f32.mrb[67].mxu1 }
 0x74f   :  { %v5213_v20 = vadd.f32 %v5212_v28, %v5211_v52  ;;  %v5293_v33 = vadd.f32 %v5292_v32, %v5291_v31 }
 0x751   :  { %v8749_v24 = vadd.f32 %v5293_v33, %v5213_v20  ;;  %v5214_v49 = vpop.f32.mrb[76].mxu0  ;;  %v5294_v11 = vpop.f32.mrb[68].mxu1 }
 0x752   :  { %v5215_v40 = vpop.f32.mrb[77].mxu0  ;;  %v5295_v38 = vpop.f32.mrb[69].mxu1 }
 0x753   :  { %v5216_v15 = vadd.f32 %v5215_v40, %v5214_v49  ;;  %v5296_v14 = vadd.f32 %v5295_v38, %v5294_v11 }
 0x755   :  { %v8751_v12 = vadd.f32 %v5296_v14, %v5216_v15  ;;  %v5217_v44 = vpop.f32.mrb[78].mxu0  ;;  %v5297_v16 = vpop.f32.mrb[70].mxu1 }
 0x756   :  { %v5218_v19 = vpop.f32.mrb[79].mxu0  ;;  %v5298_v61 = vpop.f32.mrb[71].mxu1 }
 0x757   :  { %v5219_v35 = vadd.f32 %v5218_v19, %v5217_v44  ;;  %v5299_v6 = vadd.f32 %v5298_v61, %v5297_v16 }
 0x759   :  { %v8753_v0 = vadd.f32 %v5299_v6, %v5219_v35  ;;  %v5220_v59 = vpop.f32.mrb[80].mxu0  ;;  %v5300_v56 = vpop.f32.mrb[72].mxu1 }
 0x75a   :  { %v5221_v39 = vpop.f32.mrb[81].mxu0  ;;  %v5301_v53 = vpop.f32.mrb[73].mxu1 }
 0x75b   :  { %v5222_v34 = vadd.f32 %v5221_v39, %v5220_v59  ;;  %v5302_v54 = vadd.f32 %v5301_v53, %v5300_v56 }
 0x75d   :  { %v8755_v57 = vadd.f32 %v5302_v54, %v5222_v34  ;;  %v5223_v47 = vpop.f32.mrb[82].mxu0  ;;  %v5303_v25 = vpop.f32.mrb[74].mxu1 }
 0x75e   :  { %v5224_v21 = vpop.f32.mrb[83].mxu0  ;;  %v5304_v18 = vpop.f32.mrb[75].mxu1 }
 0x75f   :  { %v5225_v55 = vadd.f32 %v5224_v21, %v5223_v47  ;;  %v5305_v45 = vadd.f32 %v5304_v18, %v5303_v25 }
 0x761   :  { %v8757_v29 = vadd.f32 %v5305_v45, %v5225_v55  ;;  %v5338_v50 = vpop.f32.mrb[84].mxu0  ;;  %v5418_v8 = vpop.f32.mrb[76].mxu1 }
 0x762   :  { %v5339_v2 = vpop.f32.mrb[85].mxu0  ;;  %v5419_v48 = vpop.f32.mrb[77].mxu1 }
 0x763   :  { %v5340_v60 = vadd.f32 %v5339_v2, %v5338_v50  ;;  %v5420_v4 = vadd.f32 %v5419_v48, %v5418_v8 }
 0x765   :  { %v3753_v3 = vadd.f32 %v5340_v60, %v9084_v42  ;;  %v5341_v43 = vpop.f32.mrb[86].mxu0  ;;  %v5421_v1 = vpop.f32.mrb[78].mxu1 }
 0x766   :  { %v5342_v9 = vpop.f32.mrb[87].mxu0  ;;  %v5422_v10 = vpop.f32.mrb[79].mxu1 }
 0x767   :  { %v3898_v22 = vadd.f32 %v5420_v4, %v3753_v3  ;;  %v5343_v27 = vadd.f32 %v5342_v9, %v5341_v43  ;;  %v5423_v26 = vadd.f32 %v5422_v10, %v5421_v1 }
 0x769   :  { %v3983_v7 = vadd.f32 %v8760_v13, %v3898_v22  ;;  %v3758_v62 = vadd.f32 %v5343_v27, %v8695_v17  ;;  %v5344_v36 = vpop.f32.mrb[88].mxu0  ;;  %v5424_v52 = vpop.f32.mrb[80].mxu1 }
 0x76a   :  { %v5345_v31 = vpop.f32.mrb[89].mxu0  ;;  %v5425_v28 = vpop.f32.mrb[81].mxu1 }
 0x76b   :  { %v5113_v32 = vmul.f32 -1.442695, %v3983_v7  ;;  %v3903_v20 = vadd.f32 %v5423_v26, %v3758_v62  ;;  %v5346_v33 = vadd.f32 %v5345_v31, %v5344_v36  ;;  %v5426_v49 = vadd.f32 %v5425_v28, %v5424_v52 }
 0x76d   :  { %6985 = vpow2.f32 %v5113_v32  ;;  %v3984_v11 = vadd.f32 %v8760_v13, %v3903_v20  ;;  %v3763_v40 = vadd.f32 %v5346_v33, %v8701_v5  ;;  %v5347_v38 = vpop.f32.mrb[90].mxu0  ;;  %v5427_v15 = vpop.f32.mrb[82].mxu1 }
 0x76e   :  { %v5348_v14 = vpop.f32.mrb[91].mxu0  ;;  %v5428_v44 = vpop.f32.mrb[83].mxu1 }
 0x76f   :  { %v5114_v16 = vmul.f32 -1.442695, %v3984_v11  ;;  %v3908_v19 = vadd.f32 %v5426_v49, %v3763_v40  ;;  %v5349_v17 = vadd.f32 %v5348_v14, %v5347_v38  ;;  %v5429_v61 = vadd.f32 %v5428_v44, %v5427_v15 }
 0x771   :  { %6987 = vpow2.f32 %v5114_v16  ;;  %v3985_v35 = vadd.f32 %v8760_v13, %v3908_v19  ;;  %v3768_v6 = vadd.f32 %v5349_v17, %v8707_v23  ;;  %v5350_v59 = vpop.f32.mrb[92].mxu0  ;;  %v5430_v56 = vpop.f32.mrb[84].mxu1 }
 0x772   :  { %v5351_v39 = vpop.f32.mrb[93].mxu0  ;;  %v5431_v53 = vpop.f32.mrb[85].mxu1 }
 0x773   :  { %v5115_v34 = vmul.f32 -1.442695, %v3985_v35  ;;  %v3913_v54 = vadd.f32 %v5429_v61, %v3768_v6  ;;  %v5352_v5 = vadd.f32 %v5351_v39, %v5350_v59  ;;  %v5432_v47 = vadd.f32 %v5431_v53, %v5430_v56 }
 0x775   :  { %6989 = vpow2.f32 %v5115_v34  ;;  %v3986_v25 = vadd.f32 %v8760_v13, %v3913_v54  ;;  %v3773_v21 = vadd.f32 %v5352_v5, %v8713_v30  ;;  %v5353_v18 = vpop.f32.mrb[94].mxu0  ;;  %v5433_v55 = vpop.f32.mrb[86].mxu1 }
 0x776   :  { %v5354_v45 = vpop.f32.mrb[95].mxu0  ;;  %v5434_v50 = vpop.f32.mrb[87].mxu1 }
 0x777   :  { %v6986_v8 = vpop.eup %6985  ;;  %v5116_v2 = vmul.f32 -1.442695, %v3986_v25  ;;  %v3918_v23 = vadd.f32 %v5432_v47, %v3773_v21  ;;  %v5355_v48 = vadd.f32 %v5354_v45, %v5353_v18  ;;  %v5435_v60 = vadd.f32 %v5434_v50, %v5433_v55 }
 0x778   :  { %v4047_v4 = vadd.f32 1.0, %v6986_v8 }
 0x779   :  { %6991 = vpow2.f32 %v5116_v2  ;;  %v3987_v42 = vadd.f32 %v8760_v13, %v3918_v23  ;;  %v3778_v3 = vadd.f32 %v5355_v48, %v8719_v37  ;;  %v5356_v43 = vpop.f32.mrb[96].mxu0  ;;  %v5436_v1 = vpop.f32.mrb[88].mxu1 }
 0x77a   :  { %6993 = vrcp.f32 %v4047_v4  ;;  %v5357_v9 = vpop.f32.mrb[97].mxu0  ;;  %v5437_v30 = vpop.f32.mrb[89].mxu1 }
 0x77b   :  { %v6988_v10 = vpop.eup %6987  ;;  %v5117_v22 = vmul.f32 -1.442695, %v3987_v42  ;;  %v3923_v27 = vadd.f32 %v5435_v60, %v3778_v3  ;;  %v5358_v26 = vadd.f32 %v5357_v9, %v5356_v43  ;;  %v5438_v7 = vadd.f32 %v5437_v30, %v5436_v1 }
 0x77c   :  { %v4048_v62 = vadd.f32 1.0, %v6988_v10 }
 0x77d   :  { %6995 = vpow2.f32 %v5117_v22  ;;  %v3988_v36 = vadd.f32 %v8760_v13, %v3923_v27  ;;  %v3783_v52 = vadd.f32 %v5358_v26, %v8725_v41  ;;  %v5359_v31 = vpop.f32.mrb[98].mxu0  ;;  %v5439_v28 = vpop.f32.mrb[90].mxu1 }
 0x77e   :  { %6997 = vrcp.f32 %v4048_v62  ;;  %v5360_v37 = vpop.f32.mrb[99].mxu0  ;;  %v5440_v32 = vpop.f32.mrb[91].mxu1 }
 0x77f   :  { %v6990_v20 = vpop.eup %6989  ;;  %v5118_v33 = vmul.f32 -1.442695, %v3988_v36  ;;  %v3928_v49 = vadd.f32 %v5438_v7, %v3783_v52  ;;  %v5361_v11 = vadd.f32 %v5360_v37, %v5359_v31  ;;  %v5441_v40 = vadd.f32 %v5440_v32, %v5439_v28 }
 0x780   :  { %v4049_v38 = vadd.f32 1.0, %v6990_v20 }
 0x781   :  { %6999 = vpow2.f32 %v5118_v33  ;;  %v3989_v15 = vadd.f32 %v8760_v13, %v3928_v49  ;;  %v3788_v14 = vadd.f32 %v5361_v11, %v8731_v51  ;;  %v5362_v44 = vpop.f32.mrb[100].mxu0  ;;  %v5442_v16 = vpop.f32.mrb[92].mxu1 }
 0x782   :  { %7001 = vrcp.f32 %v4049_v38  ;;  %v5363_v41 = vpop.f32.mrb[101].mxu0  ;;  %v5443_v19 = vpop.f32.mrb[93].mxu1 }
 0x783   :  { %v6992_v17 = vpop.eup %6991  ;;  %v5119_v61 = vmul.f32 -1.442695, %v3989_v15  ;;  %v3933_v35 = vadd.f32 %v5441_v40, %v3788_v14  ;;  %v5364_v6 = vadd.f32 %v5363_v41, %v5362_v44  ;;  %v5444_v59 = vadd.f32 %v5443_v19, %v5442_v16 }
 0x784   :  { %v6994_v56 = vpop.eup %6993  ;;  %v4050_v39 = vadd.f32 1.0, %v6992_v17 }
 0x785   :  { %4096 = vst.msk [vmem:[#allocation31] sm:$0xff] %vm4095_vm4, %v6994_v56  ;;  %7003 = vpow2.f32 %v5119_v61  ;;  %v3990_v53 = vadd.f32 %v8760_v13, %v3933_v35  ;;  %v3793_v51 = vadd.f32 %v5364_v6, %v8737_v58  ;;  %v5365_v34 = vpop.f32.mrb[102].mxu0  ;;  %v5445_v54 = vpop.f32.mrb[94].mxu1 }
 0x786   :  { %7005 = vrcp.f32 %v4050_v39  ;;  %v5366_v5 = vpop.f32.mrb[103].mxu0  ;;  %v5446_v47 = vpop.f32.mrb[95].mxu1 }
 0x787   :  { %v6996_v25 = vpop.eup %6995  ;;  %v5120_v21 = vmul.f32 -1.442695, %v3990_v53  ;;  %v3938_v18 = vadd.f32 %v5444_v59, %v3793_v51  ;;  %v5367_v55 = vadd.f32 %v5366_v5, %v5365_v34  ;;  %v5447_v45 = vadd.f32 %v5446_v47, %v5445_v54 }
 0x788   :  { %v6998_v50 = vpop.eup %6997  ;;  %v4051_v8 = vadd.f32 1.0, %v6996_v25 }
 0x789   :  { %4097 = vst.msk [vmem:[#allocation31 + $0x8] sm:$0xff] %vm4095_vm4, %v6998_v50  ;;  %7007 = vpow2.f32 %v5120_v21  ;;  %v3991_v2 = vadd.f32 %v8760_v13, %v3938_v18  ;;  %v3798_v23 = vadd.f32 %v5367_v55, %v8743_v46  ;;  %v5368_v58 = vpop.f32.mrb[104].mxu0  ;;  %v5448_v48 = vpop.f32.mrb[96].mxu1 }
 0x78a   :  { %7009 = vrcp.f32 %v4051_v8  ;;  %v5369_v60 = vpop.f32.mrb[105].mxu0  ;;  %v5449_v4 = vpop.f32.mrb[97].mxu1 }
 0x78b   :  { %v7000_v42 = vpop.eup %6999  ;;  %v5121_v3 = vmul.f32 -1.442695, %v3991_v2  ;;  %v3943_v43 = vadd.f32 %v5447_v45, %v3798_v23  ;;  %v5370_v1 = vadd.f32 %v5369_v60, %v5368_v58  ;;  %v5450_v9 = vadd.f32 %v5449_v4, %v5448_v48 }
 0x78c   :  { %v7002_v30 = vpop.eup %7001  ;;  %v4052_v10 = vadd.f32 1.0, %v7000_v42 }
 0x78d   :  { %4098 = vst.msk [vmem:[#allocation31 + $0x10] sm:$0xff] %vm4095_vm4, %v7002_v30  ;;  %7011 = vpow2.f32 %v5121_v3  ;;  %v3992_v22 = vadd.f32 %v8760_v13, %v3943_v43  ;;  %v3803_v27 = vadd.f32 %v5370_v1, %v8747_v63  ;;  %v5371_v46 = vpop.f32.mrb[106].mxu0  ;;  %v5451_v26 = vpop.f32.mrb[98].mxu1 }
 0x78e   :  { %7013 = vrcp.f32 %v4052_v10  ;;  %v5372_v7 = vpop.f32.mrb[107].mxu0  ;;  %v5452_v62 = vpop.f32.mrb[99].mxu1 }
 0x78f   :  { %v7004_v36 = vpop.eup %7003  ;;  %v5122_v52 = vmul.f32 -1.442695, %v3992_v22  ;;  %v3948_v31 = vadd.f32 %v5450_v9, %v3803_v27  ;;  %v5373_v28 = vadd.f32 %v5372_v7, %v5371_v46  ;;  %v5453_v37 = vadd.f32 %v5452_v62, %v5451_v26 }
 0x790   :  { %v7006_v32 = vpop.eup %7005  ;;  %v4053_v20 = vadd.f32 1.0, %v7004_v36 }
 0x791   :  { %4099 = vst.msk [vmem:[#allocation31 + $0x18] sm:$0xff] %vm4095_vm4, %v7006_v32  ;;  %7015 = vpow2.f32 %v5122_v52  ;;  %v3993_v33 = vadd.f32 %v8760_v13, %v3948_v31  ;;  %v3808_v49 = vadd.f32 %v5373_v28, %v8749_v24  ;;  %v5374_v63 = vpop.f32.mrb[108].mxu0  ;;  %v5454_v11 = vpop.f32.mrb[100].mxu1 }
 0x792   :  { %7017 = vrcp.f32 %v4053_v20  ;;  %v5375_v40 = vpop.f32.mrb[109].mxu0  ;;  %v5455_v38 = vpop.f32.mrb[101].mxu1 }
 0x793   :  { %v7008_v15 = vpop.eup %7007  ;;  %v5123_v14 = vmul.f32 -1.442695, %v3993_v33  ;;  %v3953_v44 = vadd.f32 %v5453_v37, %v3808_v49  ;;  %v5376_v16 = vadd.f32 %v5375_v40, %v5374_v63  ;;  %v5456_v41 = vadd.f32 %v5455_v38, %v5454_v11 }
 0x794   :  { %v7010_v19 = vpop.eup %7009  ;;  %v4054_v17 = vadd.f32 1.0, %v7008_v15 }
 0x795   :  { %4100 = vst.msk [vmem:[#allocation31 + $0x20] sm:$0xff] %vm4095_vm4, %v7010_v19  ;;  %7019 = vpow2.f32 %v5123_v14  ;;  %v3994_v61 = vadd.f32 %v8760_v13, %v3953_v44  ;;  %v3813_v35 = vadd.f32 %v5376_v16, %v8751_v12  ;;  %v5377_v24 = vpop.f32.mrb[110].mxu0  ;;  %v5457_v6 = vpop.f32.mrb[102].mxu1 }
 0x796   :  { %7021 = vrcp.f32 %v4054_v17  ;;  %v5378_v59 = vpop.f32.mrb[111].mxu0  ;;  %v5458_v56 = vpop.f32.mrb[103].mxu1 }
 0x797   :  { %v7012_v39 = vpop.eup %7011  ;;  %v5124_v53 = vmul.f32 -1.442695, %v3994_v61  ;;  %v3958_v51 = vadd.f32 %v5456_v41, %v3813_v35  ;;  %v5379_v34 = vadd.f32 %v5378_v59, %v5377_v24  ;;  %v5459_v54 = vadd.f32 %v5458_v56, %v5457_v6 }
 0x798   :  { %v7014_v5 = vpop.eup %7013  ;;  %v4055_v47 = vadd.f32 1.0, %v7012_v39 }
 0x799   :  { %4101 = vst.msk [vmem:[#allocation31 + $0x28] sm:$0xff] %vm4095_vm4, %v7014_v5  ;;  %7023 = vpow2.f32 %v5124_v53  ;;  %v3995_v25 = vadd.f32 %v8760_v13, %v3958_v51  ;;  %v3818_v21 = vadd.f32 %v5379_v34, %v8753_v0  ;;  %v5380_v12 = vpop.f32.mrb[112].mxu0  ;;  %v5460_v18 = vpop.f32.mrb[104].mxu1 }
 0x79a   :  { %7025 = vrcp.f32 %v4055_v47  ;;  %v5381_v55 = vpop.f32.mrb[113].mxu0  ;;  %v5461_v45 = vpop.f32.mrb[105].mxu1 }
 0x79b   :  { %v7016_v50 = vpop.eup %7015  ;;  %v5125_v8 = vmul.f32 -1.442695, %v3995_v25  ;;  %v3963_v2 = vadd.f32 %v5459_v54, %v3818_v21  ;;  %v5382_v23 = vadd.f32 %v5381_v55, %v5380_v12  ;;  %v5462_v58 = vadd.f32 %v5461_v45, %v5460_v18 }
 0x79c   :  { %v7018_v48 = vpop.eup %7017  ;;  %v4056_v60 = vadd.f32 1.0, %v7016_v50 }
 0x79d   :  { %4102 = vst.msk [vmem:[#allocation31 + $0x30] sm:$0xff] %vm4095_vm4, %v7018_v48  ;;  %7027 = vpow2.f32 %v5125_v8  ;;  %v3996_v4 = vadd.f32 %v8760_v13, %v3963_v2  ;;  %v3823_v42 = vadd.f32 %v5382_v23, %v8755_v57  ;;  %v5383_v0 = vpop.f32.mrb[114].mxu0  ;;  %v5463_v3 = vpop.f32.mrb[106].mxu1 }
 0x79e   :  { %7029 = vrcp.f32 %v4056_v60  ;;  %v5384_v43 = vpop.f32.mrb[115].mxu0  ;;  %v5464_v1 = vpop.f32.mrb[107].mxu1 }
 0x79f   :  { %v7020_v9 = vpop.eup %7019  ;;  %v5126_v30 = vmul.f32 -1.442695, %v3996_v4  ;;  %v3968_v10 = vadd.f32 %v5462_v58, %v3823_v42  ;;  %v5385_v22 = vadd.f32 %v5384_v43, %v5383_v0  ;;  %v5465_v27 = vadd.f32 %v5464_v1, %v5463_v3 }
 0x7a0   :  { %v7022_v46 = vpop.eup %7021  ;;  %v4057_v26 = vadd.f32 1.0, %v7020_v9 }
 0x7a1   :  { %4103 = vst.msk [vmem:[#allocation31 + $0x38] sm:$0xff] %vm4095_vm4, %v7022_v46  ;;  %7031 = vpow2.f32 %v5126_v30  ;;  %v3997_v7 = vadd.f32 %v8760_v13, %v3968_v10  ;;  %v3828_v62 = vadd.f32 %v5385_v22, %v8757_v29  ;;  %v5498_v57 = vpop.f32.mrb[116].mxu0  ;;  %v5578_v36 = vpop.f32.mrb[108].mxu1 }
 0x7a2   :  { %7033 = vrcp.f32 %v4057_v26  ;;  %v5499_v52 = vpop.f32.mrb[117].mxu0  ;;  %v5579_v31 = vpop.f32.mrb[109].mxu1 }
 0x7a3   :  { %v7024_v28 = vpop.eup %7023  ;;  %v5127_v37 = vmul.f32 -1.442695, %v3997_v7  ;;  %v3973_v32 = vadd.f32 %v5465_v27, %v3828_v62  ;;  %v5500_v20 = vadd.f32 %v5499_v52, %v5498_v57  ;;  %v5580_v33 = vadd.f32 %v5579_v31, %v5578_v36 }
 0x7a4   :  { %v7026_v49 = vpop.eup %7025  ;;  %v4058_v63 = vadd.f32 1.0, %v7024_v28 }
 0x7a5   :  { %4104 = vst.msk [vmem:[#allocation31 + $0x40] sm:$0xff] %vm4095_vm4, %v7026_v49  ;;  %7035 = vpow2.f32 %v5127_v37  ;;  %v3998_v11 = vadd.f32 %v8760_v13, %v3973_v32  ;;  %v8802_v40 = vadd.f32 %v5580_v33, %v5500_v20  ;;  %v5501_v29 = vpop.f32.mrb[118].mxu0  ;;  %v5581_v38 = vpop.f32.mrb[110].mxu1 }
 0x7a6   :  { %7037 = vrcp.f32 %v4058_v63  ;;  %v5502_v15 = vpop.f32.mrb[119].mxu0  ;;  %v5582_v14 = vpop.f32.mrb[111].mxu1 }
 0x7a7   :  { %v7028_v44 = vpop.eup %7027  ;;  %v5128_v16 = vmul.f32 -1.442695, %v3998_v11  ;;  %v5503_v41 = vadd.f32 %v5502_v15, %v5501_v29  ;;  %v5583_v19 = vadd.f32 %v5582_v14, %v5581_v38 }
 0x7a8   :  { %v7030_v17 = vpop.eup %7029  ;;  %v4059_v61 = vadd.f32 1.0, %v7028_v44 }
 0x7a9   :  { %4105 = vst.msk [vmem:[#allocation31 + $0x48] sm:$0xff] %vm4095_vm4, %v7030_v17  ;;  %7039 = vpow2.f32 %v5128_v16  ;;  %v8805_v35 = vadd.f32 %v5583_v19, %v5503_v41  ;;  %v5504_v24 = vpop.f32.mrb[120].mxu0  ;;  %v5584_v6 = vpop.f32.mrb[112].mxu1 }
 0x7aa   :  { %7041 = vrcp.f32 %v4059_v61  ;;  %v5505_v59 = vpop.f32.mrb[121].mxu0  ;;  %v5585_v56 = vpop.f32.mrb[113].mxu1 }
 0x7ab   :  { %v7032_v39 = vpop.eup %7031  ;;  %v5506_v53 = vadd.f32 %v5505_v59, %v5504_v24  ;;  %v5586_v51 = vadd.f32 %v5585_v56, %v5584_v6 }
 0x7ac   :  { %v7034_v34 = vpop.eup %7033  ;;  %v4060_v54 = vadd.f32 1.0, %v7032_v39 }
 0x7ad   :  { %4106 = vst.msk [vmem:[#allocation31 + $0x50] sm:$0xff] %vm4095_vm4, %v7034_v34  ;;  %v8808_v5 = vadd.f32 %v5586_v51, %v5506_v53  ;;  %v5507_v47 = vpop.f32.mrb[122].mxu0  ;;  %v5587_v25 = vpop.f32.mrb[114].mxu1 }
 0x7ae   :  { %7043 = vrcp.f32 %v4060_v54  ;;  %v5508_v21 = vpop.f32.mrb[123].mxu0  ;;  %v5588_v12 = vpop.f32.mrb[115].mxu1 }
 0x7af   :  { %v7036_v18 = vpop.eup %7035  ;;  %v5509_v55 = vadd.f32 %v5508_v21, %v5507_v47  ;;  %v5589_v45 = vadd.f32 %v5588_v12, %v5587_v25 }
 0x7b0   :  { %v7038_v50 = vpop.eup %7037  ;;  %v4061_v8 = vadd.f32 1.0, %v7036_v18 }
 0x7b1   :  { %4107 = vst.msk [vmem:[#allocation31 + $0x58] sm:$0xff] %vm4095_vm4, %v7038_v50  ;;  %v8811_v2 = vadd.f32 %v5589_v45, %v5509_v55  ;;  %v5510_v23 = vpop.f32.mrb[124].mxu0  ;;  %v5590_v58 = vpop.f32.mrb[116].mxu1 }
 0x7b2   :  { %7045 = vrcp.f32 %v4061_v8  ;;  %v5511_v48 = vpop.f32.mrb[125].mxu0  ;;  %v5591_v60 = vpop.f32.mrb[117].mxu1 }
 0x7b3   :  { %v7040_v4 = vpop.eup %7039  ;;  %v5512_v42 = vadd.f32 %v5511_v48, %v5510_v23  ;;  %v5592_v0 = vadd.f32 %v5591_v60, %v5590_v58 }
 0x7b4   :  { %v7042_v3 = vpop.eup %7041  ;;  %v4062_v43 = vadd.f32 1.0, %v7040_v4 }
 0x7b5   :  { %4108 = vst.msk [vmem:[#allocation31 + $0x60] sm:$0xff] %vm4095_vm4, %v7042_v3  ;;  %v8814_v1 = vadd.f32 %v5592_v0, %v5512_v42  ;;  %v5513_v9 = vpop.f32.mrb[126].mxu0  ;;  %v5593_v30 = vpop.f32.mrb[118].mxu1 }
 0x7b6   :  { %7047 = vrcp.f32 %v4062_v43  ;;  %v5514_v10 = vpop.f32.mrb[127].mxu0  ;;  %v5594_v22 = vpop.f32.mrb[119].mxu1 }
 0x7b7   :  { %v5515_v27 = vadd.f32 %v5514_v10, %v5513_v9  ;;  %v5595_v46 = vadd.f32 %v5594_v22, %v5593_v30 }
 0x7b8   :  { %v7044_v26 = vpop.eup %7043 }
 0x7b9   :  { %4109 = vst.msk [vmem:[#allocation31 + $0x68] sm:$0xff] %vm4095_vm4, %v7044_v26  ;;  %v8817_v7 = vadd.f32 %v5595_v46, %v5515_v27  ;;  %v5516_v62 = vpop.f32.mrb[128].mxu0  ;;  %v5596_v57 = vpop.f32.mrb[120].mxu1 }
 0x7ba   :  { %v5517_v36 = vpop.f32.mrb[129].mxu0  ;;  %v5597_v52 = vpop.f32.mrb[121].mxu1 }
 0x7bb   :  { %v5518_v31 = vadd.f32 %v5517_v36, %v5516_v62  ;;  %v5598_v28 = vadd.f32 %v5597_v52, %v5596_v57 }
 0x7bc   :  { %v7046_v37 = vpop.eup %7045 }
 0x7bd   :  { %4110 = vst.msk [vmem:[#allocation31 + $0x70] sm:$0xff] %vm4095_vm4, %v7046_v37  ;;  %v8820_v32 = vadd.f32 %v5598_v28, %v5518_v31  ;;  %v5519_v20 = vpop.f32.mrb[130].mxu0  ;;  %v5599_v33 = vpop.f32.mrb[122].mxu1 }
 0x7be   :  { %v5520_v49 = vpop.f32.mrb[131].mxu0  ;;  %v5600_v63 = vpop.f32.mrb[123].mxu1 }
 0x7bf   :  { %v5521_v11 = vadd.f32 %v5520_v49, %v5519_v20  ;;  %v5601_v29 = vadd.f32 %v5600_v63, %v5599_v33 }
 0x7c0   :  { %v7048_v38 = vpop.eup %7047 }
 0x7c1   :  { %4111 = vst.msk [vmem:[#allocation31 + $0x78] sm:$0xff] %vm4095_vm4, %v7048_v38  ;;  %v8823_v15 = vadd.f32 %v5601_v29, %v5521_v11  ;;  %v5522_v14 = vpop.f32.mrb[132].mxu0  ;;  %v5602_v44 = vpop.f32.mrb[124].mxu1 }
 0x7c2   :  { %v5523_v16 = vpop.f32.mrb[133].mxu0  ;;  %v5603_v41 = vpop.f32.mrb[125].mxu1 }
 0x7c3   :  { %v5524_v19 = vadd.f32 %v5523_v16, %v5522_v14  ;;  %v5604_v17 = vadd.f32 %v5603_v41, %v5602_v44 }
 0x7c5   :  { %v8825_v61 = vadd.f32 %v5604_v17, %v5524_v19  ;;  %v5525_v24 = vpop.f32.mrb[134].mxu0  ;;  %v5605_v6 = vpop.f32.mrb[126].mxu1 }
 0x7c6   :  { %v5526_v59 = vpop.f32.mrb[135].mxu0  ;;  %v5606_v56 = vpop.f32.mrb[127].mxu1 }
 0x7c7   :  { %v5527_v39 = vadd.f32 %v5526_v59, %v5525_v24  ;;  %v5607_v53 = vadd.f32 %v5606_v56, %v5605_v6 }
 0x7c9   :  { %v8827_v51 = vadd.f32 %v5607_v53, %v5527_v39  ;;  %v5528_v34 = vpop.f32.mrb[136].mxu0  ;;  %v5608_v54 = vpop.f32.mrb[128].mxu1 }
 0x7ca   :  { %v5529_v47 = vpop.f32.mrb[137].mxu0  ;;  %v5609_v25 = vpop.f32.mrb[129].mxu1 }
 0x7cb   :  { %v5530_v21 = vadd.f32 %v5529_v47, %v5528_v34  ;;  %v5610_v12 = vadd.f32 %v5609_v25, %v5608_v54 }
 0x7cd   :  { %v8829_v18 = vadd.f32 %v5610_v12, %v5530_v21  ;;  %v5531_v55 = vpop.f32.mrb[138].mxu0  ;;  %v5611_v45 = vpop.f32.mrb[130].mxu1 }
 0x7ce   :  { %v5532_v50 = vpop.f32.mrb[139].mxu0  ;;  %v5612_v8 = vpop.f32.mrb[131].mxu1 }
 0x7cf   :  { %v5533_v23 = vadd.f32 %v5532_v50, %v5531_v55  ;;  %v5613_v58 = vadd.f32 %v5612_v8, %v5611_v45 }
 0x7d1   :  { %v8831_v48 = vadd.f32 %v5613_v58, %v5533_v23  ;;  %v5534_v60 = vpop.f32.mrb[140].mxu0  ;;  %v5614_v4 = vpop.f32.mrb[132].mxu1 }
 0x7d2   :  { %v5535_v42 = vpop.f32.mrb[141].mxu0  ;;  %v5615_v0 = vpop.f32.mrb[133].mxu1 }
 0x7d3   :  { %v5536_v3 = vadd.f32 %v5535_v42, %v5534_v60  ;;  %v5616_v43 = vadd.f32 %v5615_v0, %v5614_v4 }
 0x7d5   :  { %v8833_v9 = vadd.f32 %v5616_v43, %v5536_v3  ;;  %v5537_v30 = vpop.f32.mrb[142].mxu0  ;;  %v5617_v10 = vpop.f32.mrb[134].mxu1 }
 0x7d6   :  { %v5538_v22 = vpop.f32.mrb[143].mxu0  ;;  %v5618_v27 = vpop.f32.mrb[135].mxu1 }
 0x7d7   :  { %v5539_v46 = vadd.f32 %v5538_v22, %v5537_v30  ;;  %v5619_v26 = vadd.f32 %v5618_v27, %v5617_v10 }
 0x7d9   :  { %v8835_v62 = vadd.f32 %v5619_v26, %v5539_v46  ;;  %v5540_v57 = vpop.f32.mrb[144].mxu0  ;;  %v5620_v36 = vpop.f32.mrb[136].mxu1 }
 0x7da   :  { %v5541_v52 = vpop.f32.mrb[145].mxu0  ;;  %v5621_v31 = vpop.f32.mrb[137].mxu1 }
 0x7db   :  { %v5542_v28 = vadd.f32 %v5541_v52, %v5540_v57  ;;  %v5622_v37 = vadd.f32 %v5621_v31, %v5620_v36 }
 0x7dd   :  { %v8837_v20 = vadd.f32 %v5622_v37, %v5542_v28  ;;  %v5543_v33 = vpop.f32.mrb[146].mxu0  ;;  %v5623_v49 = vpop.f32.mrb[138].mxu1 }
 0x7de   :  { %v5544_v63 = vpop.f32.mrb[147].mxu0  ;;  %v5624_v11 = vpop.f32.mrb[139].mxu1 }
 0x7df   :  { %v5545_v29 = vadd.f32 %v5544_v63, %v5543_v33  ;;  %v5625_v38 = vadd.f32 %v5624_v11, %v5623_v49 }
 0x7e1   :  { %v8839_v14 = vadd.f32 %v5625_v38, %v5545_v29  ;;  %v5658_v44 = vpop.f32.mrb[148].mxu0  ;;  %v5738_v16 = vpop.f32.mrb[140].mxu1 }
 0x7e2   :  { %v5659_v41 = vpop.f32.mrb[149].mxu0  ;;  %v5739_v19 = vpop.f32.mrb[141].mxu1 }
 0x7e3   :  { %v5660_v17 = vadd.f32 %v5659_v41, %v5658_v44  ;;  %v5740_v24 = vadd.f32 %v5739_v19, %v5738_v16 }
 0x7e5   :  { %v4725_v6 = vadd.f32 %v5660_v17, %v8802_v40  ;;  %v5661_v59 = vpop.f32.mrb[150].mxu0  ;;  %v5741_v56 = vpop.f32.mrb[142].mxu1 }
 0x7e6   :  { %v5662_v39 = vpop.f32.mrb[151].mxu0  ;;  %v5742_v53 = vpop.f32.mrb[143].mxu1 }
 0x7e7   :  { %v4870_v34 = vadd.f32 %v5740_v24, %v4725_v6  ;;  %v5663_v54 = vadd.f32 %v5662_v39, %v5661_v59  ;;  %v5743_v47 = vadd.f32 %v5742_v53, %v5741_v56 }
 0x7e9   :  { %v4955_v25 = vadd.f32 %v8760_v13, %v4870_v34  ;;  %v4730_v21 = vadd.f32 %v5663_v54, %v8805_v35  ;;  %v5664_v12 = vpop.f32.mrb[152].mxu0  ;;  %v5744_v55 = vpop.f32.mrb[144].mxu1 }
 0x7ea   :  { %v5665_v45 = vpop.f32.mrb[153].mxu0  ;;  %v5745_v50 = vpop.f32.mrb[145].mxu1 }
 0x7eb   :  { %v5130_v8 = vmul.f32 -1.442695, %v4955_v25  ;;  %v4875_v23 = vadd.f32 %v5743_v47, %v4730_v21  ;;  %v5666_v58 = vadd.f32 %v5665_v45, %v5664_v12  ;;  %v5746_v60 = vadd.f32 %v5745_v50, %v5744_v55 }
 0x7ed   :  { %7049 = vpow2.f32 %v5130_v8  ;;  %v4956_v40 = vadd.f32 %v8760_v13, %v4875_v23  ;;  %v4735_v4 = vadd.f32 %v5666_v58, %v8808_v5  ;;  %v5667_v42 = vpop.f32.mrb[154].mxu0  ;;  %v5747_v0 = vpop.f32.mrb[146].mxu1 }
 0x7ee   :  { %v5668_v3 = vpop.f32.mrb[155].mxu0  ;;  %v5748_v43 = vpop.f32.mrb[147].mxu1 }
 0x7ef   :  { %v5131_v30 = vmul.f32 -1.442695, %v4956_v40  ;;  %v4880_v10 = vadd.f32 %v5746_v60, %v4735_v4  ;;  %v5669_v35 = vadd.f32 %v5668_v3, %v5667_v42  ;;  %v5749_v22 = vadd.f32 %v5748_v43, %v5747_v0 }
 0x7f1   :  { %7051 = vpow2.f32 %v5131_v30  ;;  %v4957_v27 = vadd.f32 %v8760_v13, %v4880_v10  ;;  %v4740_v46 = vadd.f32 %v5669_v35, %v8811_v2  ;;  %v5670_v26 = vpop.f32.mrb[156].mxu0  ;;  %v5750_v57 = vpop.f32.mrb[148].mxu1 }
 0x7f2   :  { %v5671_v36 = vpop.f32.mrb[157].mxu0  ;;  %v5751_v52 = vpop.f32.mrb[149].mxu1 }
 0x7f3   :  { %v5132_v31 = vmul.f32 -1.442695, %v4957_v27  ;;  %v4885_v28 = vadd.f32 %v5749_v22, %v4740_v46  ;;  %v5672_v5 = vadd.f32 %v5671_v36, %v5670_v26  ;;  %v5752_v37 = vadd.f32 %v5751_v52, %v5750_v57 }
 0x7f5   :  { %7053 = vpow2.f32 %v5132_v31  ;;  %v4958_v33 = vadd.f32 %v8760_v13, %v4885_v28  ;;  %v4745_v49 = vadd.f32 %v5672_v5, %v8814_v1  ;;  %v5673_v63 = vpop.f32.mrb[158].mxu0  ;;  %v5753_v11 = vpop.f32.mrb[150].mxu1 }
 0x7f6   :  { %v5674_v29 = vpop.f32.mrb[159].mxu0  ;;  %v5754_v38 = vpop.f32.mrb[151].mxu1 }
 0x7f7   :  { %v7050_v44 = vpop.eup %7049  ;;  %v5133_v16 = vmul.f32 -1.442695, %v4958_v33  ;;  %v4890_v2 = vadd.f32 %v5752_v37, %v4745_v49  ;;  %v5675_v41 = vadd.f32 %v5674_v29, %v5673_v63  ;;  %v5755_v19 = vadd.f32 %v5754_v38, %v5753_v11 }
 0x7f8   :  { %v5019_v17 = vadd.f32 1.0, %v7050_v44 }
 0x7f9   :  { %7055 = vpow2.f32 %v5133_v16  ;;  %v4959_v24 = vadd.f32 %v8760_v13, %v4890_v2  ;;  %v4750_v6 = vadd.f32 %v5675_v41, %v8817_v7  ;;  %v5676_v59 = vpop.f32.mrb[160].mxu0  ;;  %v5756_v56 = vpop.f32.mrb[152].mxu1 }
 0x7fa   :  { %7057 = vrcp.f32 %v5019_v17  ;;  %v5677_v39 = vpop.f32.mrb[161].mxu0  ;;  %v5757_v1 = vpop.f32.mrb[153].mxu1 }
 0x7fb   :  { %v7052_v53 = vpop.eup %7051  ;;  %v5134_v34 = vmul.f32 -1.442695, %v4959_v24  ;;  %v4895_v54 = vadd.f32 %v5755_v19, %v4750_v6  ;;  %v5678_v47 = vadd.f32 %v5677_v39, %v5676_v59  ;;  %v5758_v25 = vadd.f32 %v5757_v1, %v5756_v56 }
 0x7fc   :  { %v5020_v21 = vadd.f32 1.0, %v7052_v53 }
 0x7fd   :  { %7059 = vpow2.f32 %v5134_v34  ;;  %v4960_v12 = vadd.f32 %v8760_v13, %v4895_v54  ;;  %v4755_v55 = vadd.f32 %v5678_v47, %v8820_v32  ;;  %v5679_v45 = vpop.f32.mrb[162].mxu0  ;;  %v5759_v50 = vpop.f32.mrb[154].mxu1 }
 0x7fe   :  { %7061 = vrcp.f32 %v5020_v21  ;;  %v5680_v7 = vpop.f32.mrb[163].mxu0  ;;  %v5760_v8 = vpop.f32.mrb[155].mxu1 }
 0x7ff   :  { %v7054_v23 = vpop.eup %7053  ;;  %v5135_v58 = vmul.f32 -1.442695, %v4960_v12  ;;  %v4900_v60 = vadd.f32 %v5758_v25, %v4755_v55  ;;  %v5681_v40 = vadd.f32 %v5680_v7, %v5679_v45  ;;  %v5761_v4 = vadd.f32 %v5760_v8, %v5759_v50 }
 0x800   :  { %v5021_v42 = vadd.f32 1.0, %v7054_v23 }
 0x801   :  { %7063 = vpow2.f32 %v5135_v58  ;;  %v4961_v0 = vadd.f32 %v8760_v13, %v4900_v60  ;;  %v4760_v3 = vadd.f32 %v5681_v40, %v8823_v15  ;;  %v5682_v43 = vpop.f32.mrb[164].mxu0  ;;  %v5762_v30 = vpop.f32.mrb[156].mxu1  ;;  %v8866_v58 = vld [vmem:[#allocation29] ss:$0 sm:$0xff] }
 0x802   :  { %7065 = vrcp.f32 %v5021_v42  ;;  %v5683_v32 = vpop.f32.mrb[165].mxu0  ;;  %v5763_v10 = vpop.f32.mrb[157].mxu1 }
 0x803   :  { %v7056_v35 = vpop.eup %7055  ;;  %v5136_v22 = vmul.f32 -1.442695, %v4961_v0  ;;  %v4905_v27 = vadd.f32 %v5761_v4, %v4760_v3  ;;  %v5684_v46 = vadd.f32 %v5683_v32, %v5682_v43  ;;  %v5764_v26 = vadd.f32 %v5763_v10, %v5762_v30 }
 0x804   :  { %v7058_v57 = vpop.eup %7057  ;;  %v5022_v36 = vadd.f32 1.0, %v7056_v35 }
 0x805   :  { %5068 = vst.msk [vmem:[#allocation31 + $0x80] sm:$0xff] %vm4095_vm4, %v7058_v57  ;;  %7067 = vpow2.f32 %v5136_v22  ;;  %v4962_v52 = vadd.f32 %v8760_v13, %v4905_v27  ;;  %v4765_v31 = vadd.f32 %v5684_v46, %v8825_v61  ;;  %v5685_v15 = vpop.f32.mrb[166].mxu0  ;;  %v5765_v28 = vpop.f32.mrb[158].mxu1 }
 0x806   :  { %7069 = vrcp.f32 %v5022_v36  ;;  %v5686_v5 = vpop.f32.mrb[167].mxu0  ;;  %v5766_v37 = vpop.f32.mrb[159].mxu1 }
 0x807   :  { %v7060_v33 = vpop.eup %7059  ;;  %v5137_v49 = vmul.f32 -1.442695, %v4962_v52  ;;  %v4910_v63 = vadd.f32 %v5764_v26, %v4765_v31  ;;  %v5687_v11 = vadd.f32 %v5686_v5, %v5685_v15  ;;  %v5767_v29 = vadd.f32 %v5766_v37, %v5765_v28 }
 0x808   :  { %v7062_v38 = vpop.eup %7061  ;;  %v5023_v44 = vadd.f32 1.0, %v7060_v33 }
 0x809   :  { %5069 = vst.msk [vmem:[#allocation31 + $0x88] sm:$0xff] %vm4095_vm4, %v7062_v38  ;;  %7071 = vpow2.f32 %v5137_v49  ;;  %v4963_v16 = vadd.f32 %v8760_v13, %v4910_v63  ;;  %v4770_v2 = vadd.f32 %v5687_v11, %v8827_v51  ;;  %v5688_v61 = vpop.f32.mrb[168].mxu0  ;;  %v5768_v41 = vpop.f32.mrb[160].mxu1 }
 0x80a   :  { %7073 = vrcp.f32 %v5023_v44  ;;  %v5689_v19 = vpop.f32.mrb[169].mxu0  ;;  %v5769_v17 = vpop.f32.mrb[161].mxu1 }
 0x80b   :  { %v7064_v24 = vpop.eup %7063  ;;  %v5138_v6 = vmul.f32 -1.442695, %v4963_v16  ;;  %v4915_v59 = vadd.f32 %v5767_v29, %v4770_v2  ;;  %v5690_v56 = vadd.f32 %v5689_v19, %v5688_v61  ;;  %v5770_v39 = vadd.f32 %v5769_v17, %v5768_v41 }
 0x80c   :  { %v7066_v1 = vpop.eup %7065  ;;  %v5024_v53 = vadd.f32 1.0, %v7064_v24 }
 0x80d   :  { %5070 = vst.msk [vmem:[#allocation31 + $0x90] sm:$0xff] %vm4095_vm4, %v7066_v1  ;;  %7075 = vpow2.f32 %v5138_v6  ;;  %v4964_v34 = vadd.f32 %v8760_v13, %v4915_v59  ;;  %v4775_v54 = vadd.f32 %v5690_v56, %v8829_v18  ;;  %v5691_v51 = vpop.f32.mrb[170].mxu0  ;;  %v5771_v47 = vpop.f32.mrb[162].mxu1 }
 0x80e   :  { %7077 = vrcp.f32 %v5024_v53  ;;  %v5692_v25 = vpop.f32.mrb[171].mxu0  ;;  %v5772_v21 = vpop.f32.mrb[163].mxu1 }
 0x80f   :  { %v7068_v12 = vpop.eup %7067  ;;  %v5139_v55 = vmul.f32 -1.442695, %v4964_v34  ;;  %v4920_v45 = vadd.f32 %v5770_v39, %v4775_v54  ;;  %v5693_v50 = vadd.f32 %v5692_v25, %v5691_v51  ;;  %v5773_v7 = vadd.f32 %v5772_v21, %v5771_v47 }
 0x810   :  { %v7070_v8 = vpop.eup %7069  ;;  %v5025_v23 = vadd.f32 1.0, %v7068_v12 }
 0x811   :  { %5071 = vst.msk [vmem:[#allocation31 + $0x98] sm:$0xff] %vm4095_vm4, %v7070_v8  ;;  %7079 = vpow2.f32 %v5139_v55  ;;  %v4965_v13 = vadd.f32 %v8866_v58, %v4920_v45  ;;  %v4780_v18 = vadd.f32 %v5693_v50, %v8831_v48  ;;  %v5694_v60 = vpop.f32.mrb[172].mxu0  ;;  %v5774_v40 = vpop.f32.mrb[164].mxu1 }
 0x812   :  { %7081 = vrcp.f32 %v5025_v23  ;;  %v5695_v4 = vpop.f32.mrb[173].mxu0  ;;  %v5775_v42 = vpop.f32.mrb[165].mxu1 }
 0x813   :  { %v7072_v0 = vpop.eup %7071  ;;  %v5140_v3 = vmul.f32 -1.442695, %v4965_v13  ;;  %v4925_v43 = vadd.f32 %v5773_v7, %v4780_v18  ;;  %v5696_v30 = vadd.f32 %v5695_v4, %v5694_v60  ;;  %v5776_v32 = vadd.f32 %v5775_v42, %v5774_v40 }
 0x814   :  { %v7074_v10 = vpop.eup %7073  ;;  %v5026_v35 = vadd.f32 1.0, %v7072_v0 }
 0x815   :  { %5072 = vst.msk [vmem:[#allocation31 + $0xa0] sm:$0xff] %vm4095_vm4, %v7074_v10  ;;  %7083 = vpow2.f32 %v5140_v3  ;;  %v4966_v22 = vadd.f32 %v8866_v58, %v4925_v43  ;;  %v4785_v27 = vadd.f32 %v5696_v30, %v8833_v9  ;;  %v5697_v48 = vpop.f32.mrb[174].mxu0  ;;  %v5777_v46 = vpop.f32.mrb[166].mxu1 }
 0x816   :  { %7085 = vrcp.f32 %v5026_v35  ;;  %v5698_v26 = vpop.f32.mrb[175].mxu0  ;;  %v5778_v57 = vpop.f32.mrb[167].mxu1 }
 0x817   :  { %v7076_v36 = vpop.eup %7075  ;;  %v5141_v52 = vmul.f32 -1.442695, %v4966_v22  ;;  %v4930_v31 = vadd.f32 %v5776_v32, %v4785_v27  ;;  %v5699_v15 = vadd.f32 %v5698_v26, %v5697_v48  ;;  %v5779_v28 = vadd.f32 %v5778_v57, %v5777_v46 }
 0x818   :  { %v7078_v5 = vpop.eup %7077  ;;  %v5027_v37 = vadd.f32 1.0, %v7076_v36 }
 0x819   :  { %5073 = vst.msk [vmem:[#allocation31 + $0xa8] sm:$0xff] %vm4095_vm4, %v7078_v5  ;;  %7087 = vpow2.f32 %v5141_v52  ;;  %v4967_v33 = vadd.f32 %v8866_v58, %v4930_v31  ;;  %v4790_v49 = vadd.f32 %v5699_v15, %v8835_v62  ;;  %v5700_v9 = vpop.f32.mrb[176].mxu0  ;;  %v5780_v63 = vpop.f32.mrb[168].mxu1 }
 0x81a   :  { %7089 = vrcp.f32 %v5027_v37  ;;  %v5701_v11 = vpop.f32.mrb[177].mxu0  ;;  %v5781_v29 = vpop.f32.mrb[169].mxu1 }
 0x81b   :  { %v7080_v38 = vpop.eup %7079  ;;  %v5142_v44 = vmul.f32 -1.442695, %v4967_v33  ;;  %v4935_v16 = vadd.f32 %v5779_v28, %v4790_v49  ;;  %v5702_v2 = vadd.f32 %v5701_v11, %v5700_v9  ;;  %v5782_v61 = vadd.f32 %v5781_v29, %v5780_v63 }
 0x81c   :  { %v7082_v41 = vpop.eup %7081  ;;  %v5028_v19 = vadd.f32 1.0, %v7080_v38 }
 0x81d   :  { %5074 = vst.msk [vmem:[#allocation31 + $0xb0] sm:$0xff] %vm4095_vm4, %v7082_v41  ;;  %7091 = vpow2.f32 %v5142_v44  ;;  %v4968_v17 = vadd.f32 %v8866_v58, %v4935_v16  ;;  %v4795_v24 = vadd.f32 %v5702_v2, %v8837_v20  ;;  %v5703_v62 = vpop.f32.mrb[178].mxu0  ;;  %v5783_v6 = vpop.f32.mrb[170].mxu1 }
 0x81e   :  { %7093 = vrcp.f32 %v5028_v19  ;;  %v5704_v59 = vpop.f32.mrb[179].mxu0  ;;  %v5784_v56 = vpop.f32.mrb[171].mxu1 }
 0x81f   :  { %v7084_v39 = vpop.eup %7083  ;;  %v5143_v1 = vmul.f32 -1.442695, %v4968_v17  ;;  %v4940_v53 = vadd.f32 %v5782_v61, %v4795_v24  ;;  %v5705_v34 = vadd.f32 %v5704_v59, %v5703_v62  ;;  %v5785_v54 = vadd.f32 %v5784_v56, %v5783_v6 }
 0x820   :  { %v7086_v51 = vpop.eup %7085  ;;  %v5029_v47 = vadd.f32 1.0, %v7084_v39 }
 0x821   :  { %5075 = vst.msk [vmem:[#allocation31 + $0xb8] sm:$0xff] %vm4095_vm4, %v7086_v51  ;;  %7095 = vpow2.f32 %v5143_v1  ;;  %v4969_v25 = vadd.f32 %v8866_v58, %v4940_v53  ;;  %v4800_v21 = vadd.f32 %v5705_v34, %v8839_v14 }
 0x822   :  { %7097 = vrcp.f32 %v5029_v47 }
 0x823   :  { %v7088_v20 = vpop.eup %7087  ;;  %v5144_v12 = vmul.f32 -1.442695, %v4969_v25  ;;  %v4945_v55 = vadd.f32 %v5785_v54, %v4800_v21 }
 0x824   :  { %v7090_v45 = vpop.eup %7089  ;;  %v5030_v50 = vadd.f32 1.0, %v7088_v20 }
 0x825   :  { %5076 = vst.msk [vmem:[#allocation31 + $0xc0] sm:$0xff] %vm4095_vm4, %v7090_v45  ;;  %7099 = vpow2.f32 %v5144_v12  ;;  %v4970_v7 = vadd.f32 %v8866_v58, %v4945_v55 }
 0x826   :  { %7101 = vrcp.f32 %v5030_v50 }
 0x827   :  { %v7092_v8 = vpop.eup %7091  ;;  %v5145_v23 = vmul.f32 -1.442695, %v4970_v7 }
 0x828   :  { %v7094_v13 = vpop.eup %7093  ;;  %v5031_v18 = vadd.f32 1.0, %v7092_v8 }
 0x829   :  { %5077 = vst.msk [vmem:[#allocation31 + $0xc8] sm:$0xff] %vm4095_vm4, %v7094_v13  ;;  %7103 = vpow2.f32 %v5145_v23 }
 0x82a   :  { %7105 = vrcp.f32 %v5031_v18 }
 0x82b   :  { %v7096_v14 = vpop.eup %7095 }
 0x82c   :  { %v7098_v60 = vpop.eup %7097  ;;  %v5032_v40 = vadd.f32 1.0, %v7096_v14 }
 0x82d   :  { %5078 = vst.msk [vmem:[#allocation31 + $0xd0] sm:$0xff] %vm4095_vm4, %v7098_v60 }
 0x82e   :  { %7107 = vrcp.f32 %v5032_v40 }
 0x82f   :  { %v7100_v4 = vpop.eup %7099 }
 0x830   :  { %v7102_v42 = vpop.eup %7101  ;;  %v5033_v0 = vadd.f32 1.0, %v7100_v4 }
 0x831   :  { %5079 = vst.msk [vmem:[#allocation31 + $0xd8] sm:$0xff] %vm4095_vm4, %v7102_v42 }
 0x832   :  { %7109 = vrcp.f32 %v5033_v0 }
 0x833   :  { %v7104_v58 = vpop.eup %7103 }
 0x834   :  { %v7106_v3 = vpop.eup %7105  ;;  %v5034_v43 = vadd.f32 1.0, %v7104_v58 }
 0x835   :  { %5080 = vst.msk [vmem:[#allocation31 + $0xe0] sm:$0xff] %vm4095_vm4, %v7106_v3 }
 0x836   :  { %7111 = vrcp.f32 %v5034_v43 }
 0x838   :  { %v7108_v30 = vpop.eup %7107 }
 0x839   :  { %5081 = vst.msk [vmem:[#allocation31 + $0xe8] sm:$0xff] %vm4095_vm4, %v7108_v30 }
 0x83c   :  { %v7110_v32 = vpop.eup %7109 }
 0x83d   :  { %5082 = vst.msk [vmem:[#allocation31 + $0xf0] sm:$0xff] %vm4095_vm4, %v7110_v32 }
 0x840   :  { %v7112_v10 = vpop.eup %7111 }
 0x841   :  { %5083 = vst.msk [vmem:[#allocation31 + $0xf8] sm:$0xff] %vm4095_vm4, %v7112_v10 }
 0x842   :  { %7477 = shalt.err (!%p7474_p6)
}
 0x843   :  { %s9085_s21 = sld [smem:[#allocation79_spill]] }
 0x849   :  { %s7478_s9 = scalar_lea.hbm %s9085_s21, 4096 }
 0x84a   :  { %p7479_p7 = scmp.ne.s32.totalorder %s9085_s21, %s7478_s9  ;;  %p7482_p8 = scmp.lt.u32.totalorder %s7478_s9, %s9085_s21 }
 0x84c   :  { %p7484_p9 = pnand %p7482_p8, %p7479_p7 }
 0x84e   :  { %7487 = shalt.err (!%p7484_p9)
}
 0x84f   :  { %5095 = dma.vmem_to_hbm [thread:$0]  %s5090_s6, 4096, %s9085_s21, [#allocation7], %s7519_s11, %s7519_s11, %s7520_s28  }
 0x850   :  { %7506 = dma.done.wait [#allocation7], 4096  }
 0x851   :  { %7507 = vsyncadd [#allocation7], 4294963200 }
 0x852   :  { %5099 = vsyncpa [#allocation6], 1 }
 0x853   :  { %5100 = vsyncpa [#allocation9], 1 }
 0x854   :  { %5101 = vsyncpa [#allocation12], 1 }
 0x855   :  { %5102 = vsyncpa [#allocation15], 1 }
 0x856   :  { %5103 = vsyncpa [#allocation18], 1 }
 0x857   :  { %5104 = vsyncpa [#allocation21], 1 }
 0x858   :  { %5105 = vsyncpa [#allocation24], 1 }
 0x859   :  { %5106 = vsyncpa [#allocation27], 1 }
 0x85a   :  { %5107 = vsyncpa [#allocation30], 1 }
 0x85b   :  { %5108 = vsyncpa [#allocation7], 1 }

</bundles_post_ra>
